<compile_context>
chip_gen: v7x
topology: tpu7x:2x2x1
jax: 0.10.0
libtpu: 0.0.40
codegen_flags: <defaults>
</compile_context>

<pallas_src>
import jax
import jax.numpy as jnp
import numpy as np
from jax import lax
from jax.experimental import pallas as pl
from jax.experimental.pallas import tpu as pltpu

IMG = 16
BATCH = 2
NT = 2                        # two twins (forward_once twice) fused per call
NTB = NT * BATCH
EPS = 1e-5                    # nn.BatchNorm2d default eps

H1 = IMG - 3 + 1              # 14  after Conv2d(1, 4, kernel_size=3)
H2 = H1 - 5 + 1               # 10  after Conv2d(4, 8, kernel_size=5)
H3 = H2 - 3 + 1               # 8   after Conv2d(8, 8, kernel_size=3)
C1, C2, C3 = 4, 8, 8
F0 = IMG * IMG                # 256  (Cin=1, so (h,w) flatten == (h,w,c) flatten)
F1 = H1 * H1 * C1             # 784
F2 = H2 * H2 * C2             # 800
F3 = H3 * H3 * C3             # 512
FLAT = F3                     # torch.flatten(out, 1) width (original: 8*120*120)
FC_HID = 512                  # Linear width 500 zero-padded to a multiple of 128
OUT = 128


# ------------------------------- kernel body ----------------------------------
def _conv_bn_relu(x, tw_ref, cbias_ref, sel_ref, selT_ref, gamma_ref, beta_ref):
    """One cnn1 stage: Conv2d (single Toeplitz MXU matmul, bf16 operands, f32
    accumulation) -> training-mode BatchNorm2d (per-twin batch stats, two-pass
    variance) -> ReLU.  Activations keep the lane-dense (h, w, c) flatten
    layout throughout; per-channel reduce/broadcast uses tiny 0/1 selector
    matmuls instead of lane-strided reshapes / tiles (XLU relief).

    x:         (NTB, Hin*Win*Cin) f32
    tw_ref:    (Hin*Win*Cin, Ho*Wo*Cout) bf16 Toeplitz conv weight
    cbias_ref: (1, Ho*Wo*Cout) conv bias tiled c-minor
    sel_ref:   (Ho*Wo*Cout, Cout) 0/1 channel-reduce selector
    selT_ref:  (Cout, Ho*Wo*Cout) its transpose (channel broadcast)
    gamma_ref: (1, Cout) BN weight
    beta_ref:  (1, Ho*Wo*Cout) BN bias tiled c-minor
    returns    (NTB, Ho*Wo*Cout) f32
    """
    y = jnp.dot(x.astype(jnp.bfloat16), tw_ref[...],
                preferred_element_type=jnp.float32) + cbias_ref[...]
    f = y.shape[-1]
    cout = sel_ref.shape[1]
    cnt = BATCH * (f // cout)                      # N*H*W per twin, per channel
    y3 = y.reshape(NT, BATCH, f)                   # twin-major rows

    # per-twin, per-channel mean (batch reduce on sublanes, channel via MXU)
    s1 = jnp.sum(y3, axis=1)                                               # (NT, F)
    mean_c = jnp.dot(s1, sel_ref[...], preferred_element_type=jnp.float32) / cnt
    mean_f = jnp.dot(mean_c, selT_ref[...], preferred_element_type=jnp.float32)
    cen = y3 - mean_f[:, None, :]

    # two-pass (centered) biased variance
    s2 = jnp.sum(cen * cen, axis=1)                                        # (NT, F)
    var_c = jnp.dot(s2, sel_ref[...], preferred_element_type=jnp.float32) / cnt
    scale_c = lax.rsqrt(var_c + EPS) * gamma_ref[...]                      # (NT, C)
    scale_f = jnp.dot(scale_c, selT_ref[...], preferred_element_type=jnp.float32)

    out = jnp.maximum(cen * scale_f[:, None, :] + beta_ref[...][None, :, :], 0.0)
    return out.reshape(NTB, f)
    # TODO(synk): running_mean/running_var buffer updates (a training-mode side
    # effect, not part of the returned tensors) are not materialized.


def siamese_kernel(x_ref,
                   tw1_ref, cb1_ref, sel1_ref, selT1_ref, g1_ref, b1_ref,
                   tw2_ref, cb2_ref, sel2_ref, selT2_ref, g2_ref, b2_ref,
                   tw3_ref, cb3_ref, sel3_ref, selT3_ref, g3_ref, b3_ref,
                   fw1_ref, fb1_ref, fw2_ref, fb2_ref, fw3_ref, fb3_ref,
                   out_ref):
    # torch.unsqueeze(x, dim=1): Cin = 1, so the (h, w) flatten of the input is
    # already the (h, w, c) flatten the Toeplitz weights expect.
    h = x_ref[...]                                                  # (NTB, 256)

    h = _conv_bn_relu(h, tw1_ref, cb1_ref, sel1_ref, selT1_ref, g1_ref, b1_ref)
    h = _conv_bn_relu(h, tw2_ref, cb2_ref, sel2_ref, selT2_ref, g2_ref, b2_ref)
    h = _conv_bn_relu(h, tw3_ref, cb3_ref, sel3_ref, selT3_ref, g3_ref, b3_ref)

    # torch.flatten(out, 1): h is already (h, w, c)-flattened; fc1's weight
    # rows were permuted wrapper-side to the same order.  FC stack: bf16
    # operands, f32 accumulation; hidden width zero-padded 500 -> 512.
    h = jnp.maximum(
        jnp.dot(h.astype(jnp.bfloat16), fw1_ref[...],
                preferred_element_type=jnp.float32) + fb1_ref[...], 0.0)
    h = jnp.maximum(
        jnp.dot(h.astype(jnp.bfloat16), fw2_ref[...],
                preferred_element_type=jnp.float32) + fb2_ref[...], 0.0)
    h = jnp.dot(h.astype(jnp.bfloat16), fw3_ref[...],
                preferred_element_type=jnp.float32) + fb3_ref[...]

    out_ref[...] = h.astype(out_ref.dtype)                          # (NTB, 128)


# ------------------------------ glue / wrapper ---------------------------------
def init_torch_params(key):
    """Deterministic parameters in PyTorch layout (OIHW conv, (out,in) linear)."""
    ks = jax.random.split(key, 18)

    def conv(kw_, kb_, cout, cin, k):
        fan = cin * k * k
        w = jax.random.normal(kw_, (cout, cin, k, k), jnp.float32) / jnp.sqrt(fan)
        b = 0.05 * jax.random.normal(kb_, (cout,), jnp.float32)
        return w, b

    def lin(kw_, kb_, cout, cin):
        w = jax.random.normal(kw_, (cout, cin), jnp.float32) / jnp.sqrt(cin)
        b = 0.05 * jax.random.normal(kb_, (cout,), jnp.float32)
        return w, b

    def bn(kg_, kb_, c):                     # slightly perturbed to exercise affine
        g = 1.0 + 0.1 * jax.random.normal(kg_, (c,), jnp.float32)
        b = 0.1 * jax.random.normal(kb_, (c,), jnp.float32)
        return g, b

    cw1, cb1 = conv(ks[0], ks[1], C1, 1, 3)
    cw2, cb2 = conv(ks[2], ks[3], C2, C1, 5)
    cw3, cb3 = conv(ks[4], ks[5], C3, C2, 3)
    fw1, fb1 = lin(ks[6], ks[7], 500, FLAT)
    fw2, fb2 = lin(ks[8], ks[9], 500, 500)
    fw3, fb3 = lin(ks[10], ks[11], OUT, 500)
    g1, be1 = bn(ks[12], ks[13], C1)
    g2, be2 = bn(ks[14], ks[15], C2)
    g3, be3 = bn(ks[16], ks[17], C3)
    return dict(cw1=cw1, cb1=cb1, g1=g1, be1=be1,
                cw2=cw2, cb2=cb2, g2=g2, be2=be2,
                cw3=cw3, cb3=cb3, g3=g3, be3=be3,
                fw1=fw1, fb1=fb1, fw2=fw2, fb2=fb2, fw3=fw3, fb3=fb3)


def _toeplitz(w_oihw, hin, win):
    """OIHW conv weight -> full Toeplitz matmul weight (bf16).

    T[((oh+ih)*Win + (ow+iw))*Cin + ci, (oh*Wo + ow)*Cout + co] = W[co, ci, ih, iw]
    so that out_flat = in_flat @ T is a valid stride-1 cross-correlation with
    (h, w, c) flatten order on both sides.
    """
    w = np.asarray(w_oihw, np.float32)
    cout, cin, kh, kw = w.shape
    ho, wo = hin - kh + 1, win - kw + 1
    t = np.zeros((hin * win * cin, ho * wo * cout), np.float32)
    for ih in range(kh):
        for iw in range(kw):
            blk = w[:, :, ih, iw].T                      # (cin, cout)
            for oh in range(ho):
                for ow in range(wo):
                    r = ((oh + ih) * win + (ow + iw)) * cin
                    c = (oh * wo + ow) * cout
                    t[r:r + cin, c:c + cout] = blk
    return jnp.asarray(t, jnp.bfloat16)


def _chan_selector(spatial, c):
    """0/1 selectors: (spatial*c, c) channel-reduce and (c, spatial*c) broadcast."""
    sel = np.tile(np.eye(c, dtype=np.float32), (spatial, 1))
    return jnp.asarray(sel), jnp.asarray(sel.T)


def _tile_row(v, spatial):
    """(C,) per-channel vector -> (1, spatial*C) row tiled c-minor."""
    return jnp.tile(jnp.asarray(v, jnp.float32).reshape(1, -1), (1, spatial))


def _pad_cols(a, n):
    return jnp.pad(a, ((0, 0), (0, n - a.shape[1])))


def _pad_rows(a, n):
    return jnp.pad(a, ((0, n - a.shape[0]), (0, 0)))


def to_kernel_layout(p):
    """PyTorch layout -> kernel layout: bf16 Toeplitz conv weights, c-minor
    bias/BN rows, selector matrices, bf16 + 512-padded FC weights."""
    tw1 = _toeplitz(p['cw1'], IMG, IMG)
    tw2 = _toeplitz(p['cw2'], H1, H1)
    tw3 = _toeplitz(p['cw3'], H2, H2)
    cb1, cb2, cb3 = (_tile_row(p['cb1'], H1 * H1),
                     _tile_row(p['cb2'], H2 * H2),
                     _tile_row(p['cb3'], H3 * H3))
    sel1, selT1 = _chan_selector(H1 * H1, C1)
    sel2, selT2 = _chan_selector(H2 * H2, C2)
    sel3, selT3 = _chan_selector(H3 * H3, C3)
    g1, g2, g3 = (jnp.asarray(p['g1']).reshape(1, -1),
                  jnp.asarray(p['g2']).reshape(1, -1),
                  jnp.asarray(p['g3']).reshape(1, -1))
    b1, b2, b3 = (_tile_row(p['be1'], H1 * H1),
                  _tile_row(p['be2'], H2 * H2),
                  _tile_row(p['be3'], H3 * H3))

    # fc1: rows of W^T are in NCHW-flatten order (c, y, x); reorder to the
    # kernel's (y, x, c) flatten order, pad 500 -> 512, cast to bf16.
    fw1t = p['fw1'].T.reshape(C3, H3, H3, 500).transpose(1, 2, 0, 3).reshape(FLAT, 500)
    fw1 = _pad_cols(fw1t, FC_HID).astype(jnp.bfloat16)                 # (FLAT, 512)
    fb1 = _pad_cols(p['fb1'].reshape(1, -1), FC_HID)                   # (1, 512)
    fw2 = _pad_cols(_pad_rows(p['fw2'].T, FC_HID), FC_HID).astype(jnp.bfloat16)
    fb2 = _pad_cols(p['fb2'].reshape(1, -1), FC_HID)
    fw3 = _pad_rows(p['fw3'].T, FC_HID).astype(jnp.bfloat16)           # (512, 128)
    fb3 = p['fb3'].reshape(1, -1)

    return (tw1, cb1, sel1, selT1, g1, b1,
            tw2, cb2, sel2, selT2, g2, b2,
            tw3, cb3, sel3, selT3, g3, b3,
            fw1, fb1, fw2, fb2, fw3, fb3)


def siamese_forward(x1, x2, torch_params):
    """forward(input1, input2) -> (output1, output2), each (BATCH, 128) f32."""
    kparams = to_kernel_layout(torch_params)
    # Stack both twins twin-major and flatten spatially (lane-dense rows).
    xs = jnp.concatenate([x1, x2], axis=0).reshape(NTB, F0)

    vmem = pltpu.MemorySpace.VMEM
    out = pl.pallas_call(
        siamese_kernel,
        out_shape=jax.ShapeDtypeStruct((NTB, OUT), jnp.float32),
        # Grid-less call: whole-array operands resident in VMEM (total ~5 MiB,
        # comfortably under every generation's scoped limit); no pipeline
        # prologue/epilogue, no per-core weight duplication.
        in_specs=[pl.BlockSpec(memory_space=vmem) for _ in range(1 + len(kparams))],
        out_specs=pl.BlockSpec(memory_space=vmem),
        compiler_params=pltpu.CompilerParams(vmem_limit_bytes=32 * 1024 * 1024),
    )(xs, *kparams)
    return out[:BATCH], out[BATCH:]


# ------------------------------ reference (JAX) --------------------------------
def ref_forward_once(x, p):
    x = x[:, None, :, :]                                  # NCHW

    def conv(x_, w, b):
        y = lax.conv_general_dilated(x_, w, (1, 1), 'VALID',
                                     dimension_numbers=('NCHW', 'OIHW', 'NCHW'))
        return y + b[None, :, None, None]

    def bn_relu(y, g, b):
        m = jnp.mean(y, axis=(0, 2, 3), keepdims=True)
        v = jnp.mean(jnp.square(y - m), axis=(0, 2, 3), keepdims=True)
        yn = (y - m) / jnp.sqrt(v + EPS)
        return jnp.maximum(yn * g[None, :, None, None] + b[None, :, None, None], 0.0)

    h = bn_relu(conv(x, p['cw1'], p['cb1']), p['g1'], p['be1'])
    h = bn_relu(conv(h, p['cw2'], p['cb2']), p['g2'], p['be2'])
    h = bn_relu(conv(h, p['cw3'], p['cb3']), p['g3'], p['be3'])
    h = h.reshape(x.shape[0], -1)                         # torch.flatten(out, 1)
    h = jnp.maximum(h @ p['fw1'].T + p['fb1'], 0.0)
    h = jnp.maximum(h @ p['fw2'].T + p['fb2'], 0.0)
    return h @ p['fw3'].T + p['fb3']


# ---------------------------------- main ---------------------------------------
if __name__ == "__main__":
    key = jax.random.PRNGKey(0)
    kx1, kx2, kp = jax.random.split(key, 3)
    x1 = jax.random.normal(kx1, (BATCH, IMG, IMG), jnp.float32)
    x2 = jax.random.normal(kx2, (BATCH, IMG, IMG), jnp.float32)
    params = init_torch_params(kp)

    o1, o2 = siamese_forward(x1, x2, params)
    jax.block_until_ready((o1, o2))

    assert o1.shape == (BATCH, OUT) and o2.shape == (BATCH, OUT)
    assert jnp.all(jnp.isfinite(o1)) and jnp.all(jnp.isfinite(o2))

    r1 = ref_forward_once(x1, params)
    r2 = ref_forward_once(x2, params)
    # bf16 MXU operands (conv Toeplitz + FC) with f32 accumulation bound the
    # error; padding/flatten-permutation are exact.
    assert jnp.allclose(o1, r1, atol=5e-2, rtol=5e-2)
    assert jnp.allclose(o2, r2, atol=5e-2, rtol=5e-2)
    print("KERNEL_OK")
</pallas_src>

<mosaic_0001>
module attributes {stable_mosaic.version = 11 : i64} {
  func.func @siamese_kernel(%arg0: memref<4x256xf32, #tpu.memory_space<vmem>>, %arg1: memref<256x784xbf16, #tpu.memory_space<vmem>>, %arg2: memref<1x784xf32, #tpu.memory_space<vmem>>, %arg3: memref<784x4xf32, #tpu.memory_space<vmem>>, %arg4: memref<4x784xf32, #tpu.memory_space<vmem>>, %arg5: memref<1x4xf32, #tpu.memory_space<vmem>>, %arg6: memref<1x784xf32, #tpu.memory_space<vmem>>, %arg7: memref<784x800xbf16, #tpu.memory_space<vmem>>, %arg8: memref<1x800xf32, #tpu.memory_space<vmem>>, %arg9: memref<800x8xf32, #tpu.memory_space<vmem>>, %arg10: memref<8x800xf32, #tpu.memory_space<vmem>>, %arg11: memref<1x8xf32, #tpu.memory_space<vmem>>, %arg12: memref<1x800xf32, #tpu.memory_space<vmem>>, %arg13: memref<800x512xbf16, #tpu.memory_space<vmem>>, %arg14: memref<1x512xf32, #tpu.memory_space<vmem>>, %arg15: memref<512x8xf32, #tpu.memory_space<vmem>>, %arg16: memref<8x512xf32, #tpu.memory_space<vmem>>, %arg17: memref<1x8xf32, #tpu.memory_space<vmem>>, %arg18: memref<1x512xf32, #tpu.memory_space<vmem>>, %arg19: memref<512x512xbf16, #tpu.memory_space<vmem>>, %arg20: memref<1x512xf32, #tpu.memory_space<vmem>>, %arg21: memref<512x512xbf16, #tpu.memory_space<vmem>>, %arg22: memref<1x512xf32, #tpu.memory_space<vmem>>, %arg23: memref<512x128xbf16, #tpu.memory_space<vmem>>, %arg24: memref<1x128xf32, #tpu.memory_space<vmem>>, %arg25: memref<4x128xf32, #tpu.memory_space<vmem>>) attributes {dimension_semantics = [], scalar_prefetch = 0 : i64, scratch_operands = 0 : i64, tpu.core_type = #tpu.core_type<tc>} {
    %c0 = arith.constant 0 : index
    %c0_0 = arith.constant 0 : index
    %0 = vector.load %arg0[%c0, %c0_0] : memref<4x256xf32, #tpu.memory_space<vmem>>, vector<4x256xf32>
    %1 = arith.truncf %0 : vector<4x256xf32> to vector<4x256xbf16>
    %c0_1 = arith.constant 0 : index
    %c0_2 = arith.constant 0 : index
    %2 = vector.load %arg1[%c0_1, %c0_2] : memref<256x784xbf16, #tpu.memory_space<vmem>>, vector<256x784xbf16>
    %cst = arith.constant dense<0.000000e+00> : vector<4x784xf32>
    %3 = tpu.matmul %1, %2, %cst {dimension_numbers = #tpu.dot_dimension_numbers<[1], [0], [0], [1], [0, 0, 1, 1], [], []>} : vector<4x256xbf16>, vector<256x784xbf16>, vector<4x784xf32> -> vector<4x784xf32>
    %c0_3 = arith.constant 0 : index
    %c0_4 = arith.constant 0 : index
    %4 = vector.load %arg2[%c0_3, %c0_4] : memref<1x784xf32, #tpu.memory_space<vmem>>, vector<1x784xf32>
    %5 = vector.broadcast %4 : vector<1x784xf32> to vector<4x784xf32>
    %6 = arith.addf %3, %5 : vector<4x784xf32>
    %7 = vector.shape_cast %6 : vector<4x784xf32> to vector<2x2x784xf32>
    %cst_5 = arith.constant dense<0.000000e+00> : vector<2x784xf32>
    %8 = vector.multi_reduction <add>, %7, %cst_5 [1] : vector<2x2x784xf32> to vector<2x784xf32>
    %c0_6 = arith.constant 0 : index
    %c0_7 = arith.constant 0 : index
    %9 = vector.load %arg3[%c0_6, %c0_7] : memref<784x4xf32, #tpu.memory_space<vmem>>, vector<784x4xf32>
    %cst_8 = arith.constant dense<0.000000e+00> : vector<2x4xf32>
    %10 = tpu.matmul %8, %9, %cst_8 {dimension_numbers = #tpu.dot_dimension_numbers<[1], [0], [0], [1], [0, 0, 1, 1], [], []>} : vector<2x784xf32>, vector<784x4xf32>, vector<2x4xf32> -> vector<2x4xf32>
    %cst_9 = arith.constant 3.920000e+02 : f32
    %11 = vector.broadcast %cst_9 : f32 to vector<2x4xf32>
    %12 = arith.divf %10, %11 : vector<2x4xf32>
    %c0_10 = arith.constant 0 : index
    %c0_11 = arith.constant 0 : index
    %13 = vector.load %arg4[%c0_10, %c0_11] : memref<4x784xf32, #tpu.memory_space<vmem>>, vector<4x784xf32>
    %cst_12 = arith.constant dense<0.000000e+00> : vector<2x784xf32>
    %14 = tpu.matmul %12, %13, %cst_12 {dimension_numbers = #tpu.dot_dimension_numbers<[1], [0], [0], [1], [0, 0, 1, 1], [], []>} : vector<2x4xf32>, vector<4x784xf32>, vector<2x784xf32> -> vector<2x784xf32>
    %15 = vector.shape_cast %14 : vector<2x784xf32> to vector<2x1x784xf32>
    %16 = vector.broadcast %15 : vector<2x1x784xf32> to vector<2x2x784xf32>
    %17 = arith.subf %7, %16 : vector<2x2x784xf32>
    %18 = arith.mulf %17, %17 : vector<2x2x784xf32>
    %cst_13 = arith.constant dense<0.000000e+00> : vector<2x784xf32>
    %19 = vector.multi_reduction <add>, %18, %cst_13 [1] : vector<2x2x784xf32> to vector<2x784xf32>
    %c0_14 = arith.constant 0 : index
    %c0_15 = arith.constant 0 : index
    %20 = vector.load %arg3[%c0_14, %c0_15] : memref<784x4xf32, #tpu.memory_space<vmem>>, vector<784x4xf32>
    %cst_16 = arith.constant dense<0.000000e+00> : vector<2x4xf32>
    %21 = tpu.matmul %19, %20, %cst_16 {dimension_numbers = #tpu.dot_dimension_numbers<[1], [0], [0], [1], [0, 0, 1, 1], [], []>} : vector<2x784xf32>, vector<784x4xf32>, vector<2x4xf32> -> vector<2x4xf32>
    %cst_17 = arith.constant 3.920000e+02 : f32
    %22 = vector.broadcast %cst_17 : f32 to vector<2x4xf32>
    %23 = arith.divf %21, %22 : vector<2x4xf32>
    %cst_18 = arith.constant 9.99999974E-6 : f32
    %24 = vector.broadcast %cst_18 : f32 to vector<2x4xf32>
    %25 = arith.addf %23, %24 : vector<2x4xf32>
    %26 = math.rsqrt %25 : vector<2x4xf32>
    %c0_19 = arith.constant 0 : index
    %c0_20 = arith.constant 0 : index
    %27 = vector.load %arg5[%c0_19, %c0_20] : memref<1x4xf32, #tpu.memory_space<vmem>>, vector<1x4xf32>
    %28 = vector.broadcast %27 : vector<1x4xf32> to vector<2x4xf32>
    %29 = arith.mulf %26, %28 : vector<2x4xf32>
    %c0_21 = arith.constant 0 : index
    %c0_22 = arith.constant 0 : index
    %30 = vector.load %arg4[%c0_21, %c0_22] : memref<4x784xf32, #tpu.memory_space<vmem>>, vector<4x784xf32>
    %cst_23 = arith.constant dense<0.000000e+00> : vector<2x784xf32>
    %31 = tpu.matmul %29, %30, %cst_23 {dimension_numbers = #tpu.dot_dimension_numbers<[1], [0], [0], [1], [0, 0, 1, 1], [], []>} : vector<2x4xf32>, vector<4x784xf32>, vector<2x784xf32> -> vector<2x784xf32>
    %32 = vector.shape_cast %31 : vector<2x784xf32> to vector<2x1x784xf32>
    %33 = vector.broadcast %32 : vector<2x1x784xf32> to vector<2x2x784xf32>
    %34 = arith.mulf %17, %33 : vector<2x2x784xf32>
    %c0_24 = arith.constant 0 : index
    %c0_25 = arith.constant 0 : index
    %35 = vector.load %arg6[%c0_24, %c0_25] : memref<1x784xf32, #tpu.memory_space<vmem>>, vector<1x784xf32>
    %36 = vector.shape_cast %35 : vector<1x784xf32> to vector<1x1x784xf32>
    %37 = vector.broadcast %36 : vector<1x1x784xf32> to vector<2x2x784xf32>
    %38 = arith.addf %34, %37 : vector<2x2x784xf32>
    %cst_26 = arith.constant 0.000000e+00 : f32
    %39 = vector.broadcast %cst_26 : f32 to vector<2x2x784xf32>
    %40 = arith.maximumf %38, %39 : vector<2x2x784xf32>
    %41 = vector.shape_cast %40 : vector<2x2x784xf32> to vector<4x784xf32>
    %42 = arith.truncf %41 : vector<4x784xf32> to vector<4x784xbf16>
    %c0_27 = arith.constant 0 : index
    %c0_28 = arith.constant 0 : index
    %43 = vector.load %arg7[%c0_27, %c0_28] : memref<784x800xbf16, #tpu.memory_space<vmem>>, vector<784x800xbf16>
    %cst_29 = arith.constant dense<0.000000e+00> : vector<4x800xf32>
    %44 = tpu.matmul %42, %43, %cst_29 {dimension_numbers = #tpu.dot_dimension_numbers<[1], [0], [0], [1], [0, 0, 1, 1], [], []>} : vector<4x784xbf16>, vector<784x800xbf16>, vector<4x800xf32> -> vector<4x800xf32>
    %c0_30 = arith.constant 0 : index
    %c0_31 = arith.constant 0 : index
    %45 = vector.load %arg8[%c0_30, %c0_31] : memref<1x800xf32, #tpu.memory_space<vmem>>, vector<1x800xf32>
    %46 = vector.broadcast %45 : vector<1x800xf32> to vector<4x800xf32>
    %47 = arith.addf %44, %46 : vector<4x800xf32>
    %48 = vector.shape_cast %47 : vector<4x800xf32> to vector<2x2x800xf32>
    %cst_32 = arith.constant dense<0.000000e+00> : vector<2x800xf32>
    %49 = vector.multi_reduction <add>, %48, %cst_32 [1] : vector<2x2x800xf32> to vector<2x800xf32>
    %c0_33 = arith.constant 0 : index
    %c0_34 = arith.constant 0 : index
    %50 = vector.load %arg9[%c0_33, %c0_34] : memref<800x8xf32, #tpu.memory_space<vmem>>, vector<800x8xf32>
    %cst_35 = arith.constant dense<0.000000e+00> : vector<2x8xf32>
    %51 = tpu.matmul %49, %50, %cst_35 {dimension_numbers = #tpu.dot_dimension_numbers<[1], [0], [0], [1], [0, 0, 1, 1], [], []>} : vector<2x800xf32>, vector<800x8xf32>, vector<2x8xf32> -> vector<2x8xf32>
    %cst_36 = arith.constant 2.000000e+02 : f32
    %52 = vector.broadcast %cst_36 : f32 to vector<2x8xf32>
    %53 = arith.divf %51, %52 : vector<2x8xf32>
    %c0_37 = arith.constant 0 : index
    %c0_38 = arith.constant 0 : index
    %54 = vector.load %arg10[%c0_37, %c0_38] : memref<8x800xf32, #tpu.memory_space<vmem>>, vector<8x800xf32>
    %cst_39 = arith.constant dense<0.000000e+00> : vector<2x800xf32>
    %55 = tpu.matmul %53, %54, %cst_39 {dimension_numbers = #tpu.dot_dimension_numbers<[1], [0], [0], [1], [0, 0, 1, 1], [], []>} : vector<2x8xf32>, vector<8x800xf32>, vector<2x800xf32> -> vector<2x800xf32>
    %56 = vector.shape_cast %55 : vector<2x800xf32> to vector<2x1x800xf32>
    %57 = vector.broadcast %56 : vector<2x1x800xf32> to vector<2x2x800xf32>
    %58 = arith.subf %48, %57 : vector<2x2x800xf32>
    %59 = arith.mulf %58, %58 : vector<2x2x800xf32>
    %cst_40 = arith.constant dense<0.000000e+00> : vector<2x800xf32>
    %60 = vector.multi_reduction <add>, %59, %cst_40 [1] : vector<2x2x800xf32> to vector<2x800xf32>
    %c0_41 = arith.constant 0 : index
    %c0_42 = arith.constant 0 : index
    %61 = vector.load %arg9[%c0_41, %c0_42] : memref<800x8xf32, #tpu.memory_space<vmem>>, vector<800x8xf32>
    %cst_43 = arith.constant dense<0.000000e+00> : vector<2x8xf32>
    %62 = tpu.matmul %60, %61, %cst_43 {dimension_numbers = #tpu.dot_dimension_numbers<[1], [0], [0], [1], [0, 0, 1, 1], [], []>} : vector<2x800xf32>, vector<800x8xf32>, vector<2x8xf32> -> vector<2x8xf32>
    %cst_44 = arith.constant 2.000000e+02 : f32
    %63 = vector.broadcast %cst_44 : f32 to vector<2x8xf32>
    %64 = arith.divf %62, %63 : vector<2x8xf32>
    %cst_45 = arith.constant 9.99999974E-6 : f32
    %65 = vector.broadcast %cst_45 : f32 to vector<2x8xf32>
    %66 = arith.addf %64, %65 : vector<2x8xf32>
    %67 = math.rsqrt %66 : vector<2x8xf32>
    %c0_46 = arith.constant 0 : index
    %c0_47 = arith.constant 0 : index
    %68 = vector.load %arg11[%c0_46, %c0_47] : memref<1x8xf32, #tpu.memory_space<vmem>>, vector<1x8xf32>
    %69 = vector.broadcast %68 : vector<1x8xf32> to vector<2x8xf32>
    %70 = arith.mulf %67, %69 : vector<2x8xf32>
    %c0_48 = arith.constant 0 : index
    %c0_49 = arith.constant 0 : index
    %71 = vector.load %arg10[%c0_48, %c0_49] : memref<8x800xf32, #tpu.memory_space<vmem>>, vector<8x800xf32>
    %cst_50 = arith.constant dense<0.000000e+00> : vector<2x800xf32>
    %72 = tpu.matmul %70, %71, %cst_50 {dimension_numbers = #tpu.dot_dimension_numbers<[1], [0], [0], [1], [0, 0, 1, 1], [], []>} : vector<2x8xf32>, vector<8x800xf32>, vector<2x800xf32> -> vector<2x800xf32>
    %73 = vector.shape_cast %72 : vector<2x800xf32> to vector<2x1x800xf32>
    %74 = vector.broadcast %73 : vector<2x1x800xf32> to vector<2x2x800xf32>
    %75 = arith.mulf %58, %74 : vector<2x2x800xf32>
    %c0_51 = arith.constant 0 : index
    %c0_52 = arith.constant 0 : index
    %76 = vector.load %arg12[%c0_51, %c0_52] : memref<1x800xf32, #tpu.memory_space<vmem>>, vector<1x800xf32>
    %77 = vector.shape_cast %76 : vector<1x800xf32> to vector<1x1x800xf32>
    %78 = vector.broadcast %77 : vector<1x1x800xf32> to vector<2x2x800xf32>
    %79 = arith.addf %75, %78 : vector<2x2x800xf32>
    %cst_53 = arith.constant 0.000000e+00 : f32
    %80 = vector.broadcast %cst_53 : f32 to vector<2x2x800xf32>
    %81 = arith.maximumf %79, %80 : vector<2x2x800xf32>
    %82 = vector.shape_cast %81 : vector<2x2x800xf32> to vector<4x800xf32>
    %83 = arith.truncf %82 : vector<4x800xf32> to vector<4x800xbf16>
    %c0_54 = arith.constant 0 : index
    %c0_55 = arith.constant 0 : index
    %84 = vector.load %arg13[%c0_54, %c0_55] : memref<800x512xbf16, #tpu.memory_space<vmem>>, vector<800x512xbf16>
    %cst_56 = arith.constant dense<0.000000e+00> : vector<4x512xf32>
    %85 = tpu.matmul %83, %84, %cst_56 {dimension_numbers = #tpu.dot_dimension_numbers<[1], [0], [0], [1], [0, 0, 1, 1], [], []>} : vector<4x800xbf16>, vector<800x512xbf16>, vector<4x512xf32> -> vector<4x512xf32>
    %c0_57 = arith.constant 0 : index
    %c0_58 = arith.constant 0 : index
    %86 = vector.load %arg14[%c0_57, %c0_58] : memref<1x512xf32, #tpu.memory_space<vmem>>, vector<1x512xf32>
    %87 = vector.broadcast %86 : vector<1x512xf32> to vector<4x512xf32>
    %88 = arith.addf %85, %87 : vector<4x512xf32>
    %89 = vector.shape_cast %88 : vector<4x512xf32> to vector<2x2x512xf32>
    %cst_59 = arith.constant dense<0.000000e+00> : vector<2x512xf32>
    %90 = vector.multi_reduction <add>, %89, %cst_59 [1] : vector<2x2x512xf32> to vector<2x512xf32>
    %c0_60 = arith.constant 0 : index
    %c0_61 = arith.constant 0 : index
    %91 = vector.load %arg15[%c0_60, %c0_61] : memref<512x8xf32, #tpu.memory_space<vmem>>, vector<512x8xf32>
    %cst_62 = arith.constant dense<0.000000e+00> : vector<2x8xf32>
    %92 = tpu.matmul %90, %91, %cst_62 {dimension_numbers = #tpu.dot_dimension_numbers<[1], [0], [0], [1], [0, 0, 1, 1], [], []>} : vector<2x512xf32>, vector<512x8xf32>, vector<2x8xf32> -> vector<2x8xf32>
    %cst_63 = arith.constant 1.280000e+02 : f32
    %93 = vector.broadcast %cst_63 : f32 to vector<2x8xf32>
    %94 = arith.divf %92, %93 : vector<2x8xf32>
    %c0_64 = arith.constant 0 : index
    %c0_65 = arith.constant 0 : index
    %95 = vector.load %arg16[%c0_64, %c0_65] : memref<8x512xf32, #tpu.memory_space<vmem>>, vector<8x512xf32>
    %cst_66 = arith.constant dense<0.000000e+00> : vector<2x512xf32>
    %96 = tpu.matmul %94, %95, %cst_66 {dimension_numbers = #tpu.dot_dimension_numbers<[1], [0], [0], [1], [0, 0, 1, 1], [], []>} : vector<2x8xf32>, vector<8x512xf32>, vector<2x512xf32> -> vector<2x512xf32>
    %97 = vector.shape_cast %96 : vector<2x512xf32> to vector<2x1x512xf32>
    %98 = vector.broadcast %97 : vector<2x1x512xf32> to vector<2x2x512xf32>
    %99 = arith.subf %89, %98 : vector<2x2x512xf32>
    %100 = arith.mulf %99, %99 : vector<2x2x512xf32>
    %cst_67 = arith.constant dense<0.000000e+00> : vector<2x512xf32>
    %101 = vector.multi_reduction <add>, %100, %cst_67 [1] : vector<2x2x512xf32> to vector<2x512xf32>
    %c0_68 = arith.constant 0 : index
    %c0_69 = arith.constant 0 : index
    %102 = vector.load %arg15[%c0_68, %c0_69] : memref<512x8xf32, #tpu.memory_space<vmem>>, vector<512x8xf32>
    %cst_70 = arith.constant dense<0.000000e+00> : vector<2x8xf32>
    %103 = tpu.matmul %101, %102, %cst_70 {dimension_numbers = #tpu.dot_dimension_numbers<[1], [0], [0], [1], [0, 0, 1, 1], [], []>} : vector<2x512xf32>, vector<512x8xf32>, vector<2x8xf32> -> vector<2x8xf32>
    %cst_71 = arith.constant 1.280000e+02 : f32
    %104 = vector.broadcast %cst_71 : f32 to vector<2x8xf32>
    %105 = arith.divf %103, %104 : vector<2x8xf32>
    %cst_72 = arith.constant 9.99999974E-6 : f32
    %106 = vector.broadcast %cst_72 : f32 to vector<2x8xf32>
    %107 = arith.addf %105, %106 : vector<2x8xf32>
    %108 = math.rsqrt %107 : vector<2x8xf32>
    %c0_73 = arith.constant 0 : index
    %c0_74 = arith.constant 0 : index
    %109 = vector.load %arg17[%c0_73, %c0_74] : memref<1x8xf32, #tpu.memory_space<vmem>>, vector<1x8xf32>
    %110 = vector.broadcast %109 : vector<1x8xf32> to vector<2x8xf32>
    %111 = arith.mulf %108, %110 : vector<2x8xf32>
    %c0_75 = arith.constant 0 : index
    %c0_76 = arith.constant 0 : index
    %112 = vector.load %arg16[%c0_75, %c0_76] : memref<8x512xf32, #tpu.memory_space<vmem>>, vector<8x512xf32>
    %cst_77 = arith.constant dense<0.000000e+00> : vector<2x512xf32>
    %113 = tpu.matmul %111, %112, %cst_77 {dimension_numbers = #tpu.dot_dimension_numbers<[1], [0], [0], [1], [0, 0, 1, 1], [], []>} : vector<2x8xf32>, vector<8x512xf32>, vector<2x512xf32> -> vector<2x512xf32>
    %114 = vector.shape_cast %113 : vector<2x512xf32> to vector<2x1x512xf32>
    %115 = vector.broadcast %114 : vector<2x1x512xf32> to vector<2x2x512xf32>
    %116 = arith.mulf %99, %115 : vector<2x2x512xf32>
    %c0_78 = arith.constant 0 : index
    %c0_79 = arith.constant 0 : index
    %117 = vector.load %arg18[%c0_78, %c0_79] : memref<1x512xf32, #tpu.memory_space<vmem>>, vector<1x512xf32>
    %118 = vector.shape_cast %117 : vector<1x512xf32> to vector<1x1x512xf32>
    %119 = vector.broadcast %118 : vector<1x1x512xf32> to vector<2x2x512xf32>
    %120 = arith.addf %116, %119 : vector<2x2x512xf32>
    %cst_80 = arith.constant 0.000000e+00 : f32
    %121 = vector.broadcast %cst_80 : f32 to vector<2x2x512xf32>
    %122 = arith.maximumf %120, %121 : vector<2x2x512xf32>
    %123 = vector.shape_cast %122 : vector<2x2x512xf32> to vector<4x512xf32>
    %124 = arith.truncf %123 : vector<4x512xf32> to vector<4x512xbf16>
    %c0_81 = arith.constant 0 : index
    %c0_82 = arith.constant 0 : index
    %125 = vector.load %arg19[%c0_81, %c0_82] : memref<512x512xbf16, #tpu.memory_space<vmem>>, vector<512x512xbf16>
    %cst_83 = arith.constant dense<0.000000e+00> : vector<4x512xf32>
    %126 = tpu.matmul %124, %125, %cst_83 {dimension_numbers = #tpu.dot_dimension_numbers<[1], [0], [0], [1], [0, 0, 1, 1], [], []>} : vector<4x512xbf16>, vector<512x512xbf16>, vector<4x512xf32> -> vector<4x512xf32>
    %c0_84 = arith.constant 0 : index
    %c0_85 = arith.constant 0 : index
    %127 = vector.load %arg20[%c0_84, %c0_85] : memref<1x512xf32, #tpu.memory_space<vmem>>, vector<1x512xf32>
    %128 = vector.broadcast %127 : vector<1x512xf32> to vector<4x512xf32>
    %129 = arith.addf %126, %128 : vector<4x512xf32>
    %cst_86 = arith.constant 0.000000e+00 : f32
    %130 = vector.broadcast %cst_86 : f32 to vector<4x512xf32>
    %131 = arith.maximumf %129, %130 : vector<4x512xf32>
    %132 = arith.truncf %131 : vector<4x512xf32> to vector<4x512xbf16>
    %c0_87 = arith.constant 0 : index
    %c0_88 = arith.constant 0 : index
    %133 = vector.load %arg21[%c0_87, %c0_88] : memref<512x512xbf16, #tpu.memory_space<vmem>>, vector<512x512xbf16>
    %cst_89 = arith.constant dense<0.000000e+00> : vector<4x512xf32>
    %134 = tpu.matmul %132, %133, %cst_89 {dimension_numbers = #tpu.dot_dimension_numbers<[1], [0], [0], [1], [0, 0, 1, 1], [], []>} : vector<4x512xbf16>, vector<512x512xbf16>, vector<4x512xf32> -> vector<4x512xf32>
    %c0_90 = arith.constant 0 : index
    %c0_91 = arith.constant 0 : index
    %135 = vector.load %arg22[%c0_90, %c0_91] : memref<1x512xf32, #tpu.memory_space<vmem>>, vector<1x512xf32>
    %136 = vector.broadcast %135 : vector<1x512xf32> to vector<4x512xf32>
    %137 = arith.addf %134, %136 : vector<4x512xf32>
    %cst_92 = arith.constant 0.000000e+00 : f32
    %138 = vector.broadcast %cst_92 : f32 to vector<4x512xf32>
    %139 = arith.maximumf %137, %138 : vector<4x512xf32>
    %140 = arith.truncf %139 : vector<4x512xf32> to vector<4x512xbf16>
    %c0_93 = arith.constant 0 : index
    %c0_94 = arith.constant 0 : index
    %141 = vector.load %arg23[%c0_93, %c0_94] : memref<512x128xbf16, #tpu.memory_space<vmem>>, vector<512x128xbf16>
    %cst_95 = arith.constant dense<0.000000e+00> : vector<4x128xf32>
    %142 = tpu.matmul %140, %141, %cst_95 {dimension_numbers = #tpu.dot_dimension_numbers<[1], [0], [0], [1], [0, 0, 1, 1], [], []>} : vector<4x512xbf16>, vector<512x128xbf16>, vector<4x128xf32> -> vector<4x128xf32>
    %c0_96 = arith.constant 0 : index
    %c0_97 = arith.constant 0 : index
    %143 = vector.load %arg24[%c0_96, %c0_97] : memref<1x128xf32, #tpu.memory_space<vmem>>, vector<1x128xf32>
    %144 = vector.broadcast %143 : vector<1x128xf32> to vector<4x128xf32>
    %145 = arith.addf %142, %144 : vector<4x128xf32>
    %c0_98 = arith.constant 0 : index
    %c0_99 = arith.constant 0 : index
    %146 = vector.load %arg25[%c0_98, %c0_99] : memref<4x128xf32, #tpu.memory_space<vmem>>, vector<4x128xf32>
    tpu.vector_store %arg25[%c0_98, %c0_99], %145 {strides = array<i32>} : memref<4x128xf32, #tpu.memory_space<vmem>>, vector<4x128xf32>,
    return
  }
}

</mosaic_0001>

<bundles_post_ra>
// kernel: tpu_custom_call.1
= control target key start
LH: loop header
LB: loop body
LE: loop exit
PB: predicated region body
PF: predicated region fallthrough
CT: control target
= control target key end

     0   :  { %s21496_s0 = inlined_call_operand.vmem [shape: f32[4,256], index: 0, kind: input, shape index: {}]   ;;  %s21497_s1 = inlined_call_operand.vmem [shape: bf16[256,784], index: 1, kind: input, shape index: {}]   ;;  %s21498_s2 = inlined_call_operand.vmem [shape: f32[1,784], index: 2, kind: input, shape index: {}]   ;;  %s21499_s3 = inlined_call_operand.vmem [shape: f32[784,4], index: 3, kind: input, shape index: {}]   ;;  %s21500_s4 = inlined_call_operand.vmem [shape: f32[4,784], index: 4, kind: input, shape index: {}]   ;;  %s21501_s5 = inlined_call_operand.vmem [shape: f32[1,4], index: 5, kind: input, shape index: {}]   ;;  %s21502_s6 = inlined_call_operand.vmem [shape: f32[1,784], index: 6, kind: input, shape index: {}]   ;;  %s21503_s7 = inlined_call_operand.vmem [shape: bf16[784,800], index: 7, kind: input, shape index: {}]   ;;  %s21504_s8 = inlined_call_operand.vmem [shape: f32[1,800], index: 8, kind: input, shape index: {}]   ;;  %s21505_s9 = inlined_call_operand.vmem [shape: f32[800,8], index: 9, kind: input, shape index: {}]   ;;  %s21506_s10 = inlined_call_operand.vmem [shape: f32[8,800], index: 10, kind: input, shape index: {}]   ;;  %s21507_s11 = inlined_call_operand.vmem [shape: f32[1,8], index: 11, kind: input, shape index: {}]   ;;  %s21508_s12 = inlined_call_operand.vmem [shape: f32[1,800], index: 12, kind: input, shape index: {}]   ;;  %s21509_s13 = inlined_call_operand.hbm [shape: bf16[800,512], index: 13, kind: input, shape index: {}]   ;;  %s21510_s14 = inlined_call_operand.vmem [shape: f32[1,512], index: 14, kind: input, shape index: {}]   ;;  %s21511_s15 = inlined_call_operand.vmem [shape: f32[512,8], index: 15, kind: input, shape index: {}]   ;;  %s21512_s16 = inlined_call_operand.vmem [shape: f32[8,512], index: 16, kind: input, shape index: {}]   ;;  %s21513_s17 = inlined_call_operand.vmem [shape: f32[1,8], index: 17, kind: input, shape index: {}]   ;;  %s21514_s18 = inlined_call_operand.vmem [shape: f32[1,512], index: 18, kind: input, shape index: {}]   ;;  %s21515_s19 = inlined_call_operand.vmem [shape: bf16[512,512], index: 19, kind: input, shape index: {}]   ;;  %s21516_s20 = inlined_call_operand.vmem [shape: f32[1,512], index: 20, kind: input, shape index: {}]   ;;  %s21517_s21 = inlined_call_operand.hbm [shape: bf16[512,512], index: 21, kind: input, shape index: {}]   ;;  %s21518_s22 = inlined_call_operand.vmem [shape: f32[1,512], index: 22, kind: input, shape index: {}]   ;;  %s21519_s23 = inlined_call_operand.hbm [shape: bf16[512,128], index: 23, kind: input, shape index: {}]   ;;  %s21520_s24 = inlined_call_operand.vmem [shape: f32[1,128], index: 24, kind: input, shape index: {}]   ;;  %s21521_s25 = inlined_call_operand.hbm [shape: f32[4,128], index: 25, kind: output, shape index: {}]  }
   0x1   :  { %21607 = sst [smem:[#allocation42_spill]] %s21496_s0 }
   0x2   :  { %21608 = sst [smem:[#allocation43_spill]] %s21497_s1 }
   0x3   :  { %21609 = sst [smem:[#allocation44_spill]] %s21498_s2 }
   0x4   :  { %21610 = sst [smem:[#allocation45_spill]] %s21499_s3 }
   0x5   :  { %21611 = sst [smem:[#allocation46_spill]] %s21500_s4 }
   0x6   :  { %21612 = sst [smem:[#allocation47_spill]] %s21501_s5 }
   0x7   :  { %21613 = sst [smem:[#allocation48_spill]] %s21502_s6 }
   0x8   :  { %21614 = sst [smem:[#allocation49_spill]] %s21503_s7 }
   0x9   :  { %21615 = sst [smem:[#allocation50_spill]] %s21504_s8 }
   0xa   :  { %21616 = sst [smem:[#allocation51_spill]] %s21505_s9 }
   0xb   :  { %30 = vsyncpa [#allocation3], 0 }
   0xc   :  { %31 = vsyncpa [#allocation6], 0 }
   0xd   :  { %32 = vsyncpa [#allocation4], 0  ;;  %s17319_s29 = smov [#allocation5]   ;;  %s17320_s6 = smov [#allocation2]  }
   0xe   :  { %s90_s2 = sshll.u32 %s17319_s29, 4  ;;  %s64_s30 = sshll.u32 %s17320_s6, 4  ;;  %s91_s2 = int_to_ptr.vmem [resolvable:$true] %s90_s2  ;;  %s17463_s30 = int_to_ptr.vmem [resolvable:$true] %s64_s30 }
   0xf   :  { %s17225_s26 = scalar_lea.hbm %s21517_s21, 16384 }
  0x10   :  { %p17226_p0 = scmp.ne.s32.totalorder %s21517_s21, %s17225_s26  ;;  %p17229_p1 = scmp.lt.u32.totalorder %s17225_s26, %s21517_s21 }
  0x12   :  { %p17231_p2 = pnand %p17229_p1, %p17226_p0 }
  0x14   :  { %17234 = shalt.err (!%p17231_p2)
}
  0x15   :  { %s17235_s28 = scalar_lea.vmem %s91_s2, 16384  ;;  %p17240_p4 = scmp.lt.s32.totalorder %s91_s2, %s91_s2 }
  0x16   :  { %p17236_p3 = scmp.ne.s32.totalorder %s91_s2, %s17235_s28  ;;  %p17241_p5 = scmp.lt.s32.totalorder %s17235_s28, %s17235_s28 }
  0x18   :  { %p17242_p6 = por %p17241_p5, %p17240_p4 }
  0x1a   :  { %p17243_p7 = pnand %p17242_p6, %p17236_p3 }
  0x1c   :  { %17246 = shalt.err (!%p17243_p7)
}
  0x1d   :  { %s17321_s9 = smov 256   ;;  %s17322_s5 = smov 16  }
  0x1e   :  { %96 = dma.hbm_to_vmem [thread:$0]  %s21517_s21, 16384, %s91_s2, [#allocation6], %s17321_s9, %s17321_s9, %s17322_s5  }
  0x1f   :  { %s17247_s3 = scalar_lea.hbm %s21509_s13, 25600 }
  0x20   :  { %p17248_p8 = scmp.ne.s32.totalorder %s21509_s13, %s17247_s3  ;;  %p17251_p9 = scmp.lt.u32.totalorder %s17247_s3, %s21509_s13 }
  0x22   :  { %p17253_p10 = pnand %p17251_p9, %p17248_p8 }
  0x24   :  { %17256 = shalt.err (!%p17253_p10)
}
  0x25   :  { %s17257_s4 = scalar_lea.vmem %s17463_s30, 25600  ;;  %p17262_p12 = scmp.lt.s32.totalorder %s17463_s30, %s17463_s30 }
  0x26   :  { %p17258_p11 = scmp.ne.s32.totalorder %s17463_s30, %s17257_s4  ;;  %p17263_p13 = scmp.lt.s32.totalorder %s17257_s4, %s17257_s4 }
  0x28   :  { %p17264_p0 = por %p17263_p13, %p17262_p12 }
  0x2a   :  { %p17265_p1 = pnand %p17264_p0, %p17258_p11 }
  0x2c   :  { %17268 = shalt.err (!%p17265_p1)
}
  0x2d   :  { %70 = dma.hbm_to_vmem [thread:$0]  %s21509_s13, 25600, %s17463_s30, [#allocation3], %s17321_s9, %s17321_s9, %s17322_s5  }
  0x2e   :  { %s17323_s28 = smov [#allocation7]   ;;  %s17269_s7 = scalar_lea.hbm %s21519_s23, 4096 }
  0x2f   :  { %s104_s0 = sshll.u32 %s17323_s28, 4  ;;  %p17270_p2 = scmp.ne.s32.totalorder %s21519_s23, %s17269_s7  ;;  %s105_s0 = int_to_ptr.vmem [resolvable:$true] %s104_s0 }
  0x30   :  { %p17273_p3 = scmp.lt.u32.totalorder %s17269_s7, %s21519_s23 }
  0x32   :  { %p17275_p4 = pnand %p17273_p3, %p17270_p2 }
  0x34   :  { %17278 = shalt.err (!%p17275_p4)
}
  0x35   :  { %s17279_s27 = scalar_lea.vmem %s105_s0, 4096  ;;  %p17284_p6 = scmp.lt.s32.totalorder %s105_s0, %s105_s0 }
  0x36   :  { %p17280_p5 = scmp.ne.s32.totalorder %s105_s0, %s17279_s27  ;;  %p17285_p7 = scmp.lt.s32.totalorder %s17279_s27, %s17279_s27 }
  0x38   :  { %p17286_p8 = por %p17285_p7, %p17284_p6 }
  0x3a   :  { %p17287_p9 = pnand %p17286_p8, %p17280_p5 }
  0x3c   :  { %17290 = shalt.err (!%p17287_p9)
}
  0x3d   :  { %s17324_s13 = smov 64   ;;  %s17325_s30 = smov 4  }
  0x3e   :  { %110 = dma.hbm_to_vmem [thread:$0]  %s21519_s23, 4096, %s105_s0, [#allocation6], %s17324_s13, %s17324_s13, %s17325_s30  }
  0x3f   :  { %17313 = dma.done.wait [#allocation3], 25600  }
  0x40   :  { %17314 = vsyncadd [#allocation3], 4294941696 }
  0x41   :  { %17315 = dma.done.wait [#allocation6], 20480  }
  0x42   :  { %17316 = vsyncadd [#allocation6], 4294946816  ;;  %s21617_s2 = sld [smem:[#allocation43_spill]]  ;;  %s21618_s0 = sld [smem:[#allocation42_spill]]  ;;  %vm1159_vm0 = vcmask 1041408   ;;  %vm1371_vm1 = vcmask 1041409  }
  0x43   :  { %s21619_s3 = sld [smem:[#allocation45_spill]]  ;;  %s21629_s23 = sld [smem:[#allocation44_spill]]  ;;  %vm17328_vm2 = vmmov 0   ;;  %vm1202_vm3 = vcmask 123904   ;;  %vm1385_vm4 = vcmask 130048   ;;  %vm1685_vm5 = vcmask 1043456  }
  0x44   :  { %s21650_s7 = sld [smem:[#allocation46_spill]]  ;;  %vm1681_vm6 = vcmask 31744   ;;  %s21679_s30 = sld [smem:[#allocation49_spill]]  ;;  %vm6321_vm7 = vcmask 254976   ;;  %vm6505_vm8 = vcmask 261120   ;;  %vm6797_vm9 = vcmask 64512  }
  0x45   :  { %s21680_s6 = sld [smem:[#allocation47_spill]]  ;;  %s21681_s13 = sld [smem:[#allocation48_spill]] }
  0x46   :  { %s21684_s8 = sld [smem:[#allocation51_spill]]  ;;  %s21687_s1 = sld [smem:[#allocation50_spill]] }
  0x48   :  { %v15849_v0 = vld [vmem:[%s21617_s2 + $0x4] ss:$28 sps:$4 sm:$0xff]   ;;  %v15851_v1 = vld [vmem:[%s21617_s2 + $0xc] ss:$28 sps:$4 sm:$0xff]   ;;  %v15855_v4 = vld [vmem:[%s21617_s2 + $0x3c] ss:$28 sps:$4 sm:$0xff]  }
  0x49   :  { %870 = vmatprep.subr.bf16.mxu0 %v15849_v0  ;;  %v15853_v2 = vld [vmem:[%s21617_s2] ss:$28 sps:$4 sm:$0xff]   ;;  %v15854_v3 = vld [vmem:[%s21617_s2 + $0x8] ss:$28 sps:$4 sm:$0xff]   ;;  %911 = vmatprep.subr.bf16.mxu1 %v15851_v1  ;;  %v15859_v6 = vld [vmem:[%s21617_s2 + $0x38] ss:$28 sps:$4 sm:$0xff]  }
  0x4a   :  { %871 = vmatpush1.bf16.msra.mxu0 %v15853_v2  ;;  %912 = vmatpush1.bf16.msra.mxu1 %v15854_v3  ;;  %v15857_v5 = vld [vmem:[%s21617_s2 + $0x44] ss:$28 sps:$4 sm:$0xff]   ;;  %v15861_v8 = vld [vmem:[%s21617_s2 + $0x74] ss:$28 sps:$4 sm:$0xff]   ;;  %v15863_v9 = vld [vmem:[%s21617_s2 + $0x7c] ss:$28 sps:$4 sm:$0xff]  }
  0x4b   :  { %872 = vmatprep.subr.bf16.mxu0 %v15855_v4  ;;  %v15860_v7 = vld [vmem:[%s21617_s2 + $0x40] ss:$28 sps:$4 sm:$0xff]   ;;  %913 = vmatprep.subr.bf16.mxu1 %v15857_v5  ;;  %v15865_v10 = vld [vmem:[%s21617_s2 + $0x70] ss:$28 sps:$4 sm:$0xff]   ;;  %v15866_v11 = vld [vmem:[%s21617_s2 + $0x78] ss:$28 sps:$4 sm:$0xff]  }
  0x4c   :  { %v15867_v12 = vld [vmem:[%s21617_s2 + $0xac] ss:$28 sps:$4 sm:$0xff]   ;;  %v15869_v13 = vld [vmem:[%s21617_s2 + $0xb4] ss:$28 sps:$4 sm:$0xff]   ;;  %v15873_v16 = vld [vmem:[%s21617_s2 + $0xe4] ss:$28 sps:$4 sm:$0xff]  }
  0x4d   :  { %v15871_v14 = vld [vmem:[%s21617_s2 + $0xa8] ss:$28 sps:$4 sm:$0xff]   ;;  %v15872_v15 = vld [vmem:[%s21617_s2 + $0xb0] ss:$28 sps:$4 sm:$0xff]   ;;  %v15877_v18 = vld [vmem:[%s21617_s2 + $0xe0] ss:$28 sps:$4 sm:$0xff]  }
  0x4e   :  { %873 = vmatpush1.bf16.msra.mxu0 %v15859_v6  ;;  %914 = vmatpush1.bf16.msra.mxu1 %v15860_v7  ;;  %v15875_v17 = vld [vmem:[%s21617_s2 + $0xec] ss:$28 sps:$4 sm:$0xff]   ;;  %v15879_v20 = vld [vmem:[%s21617_s2 + $0x11c] ss:$28 sps:$4 sm:$0xff]   ;;  %v15881_v21 = vld [vmem:[%s21617_s2 + $0x124] ss:$28 sps:$4 sm:$0xff]  }
  0x4f   :  { %874 = vmatprep.subr.bf16.mxu0 %v15861_v8  ;;  %915 = vmatprep.subr.bf16.mxu1 %v15863_v9  ;;  %v15878_v19 = vld [vmem:[%s21617_s2 + $0xe8] ss:$28 sps:$4 sm:$0xff]   ;;  %v15883_v22 = vld [vmem:[%s21617_s2 + $0x118] ss:$28 sps:$4 sm:$0xff]   ;;  %v15884_v23 = vld [vmem:[%s21617_s2 + $0x120] ss:$28 sps:$4 sm:$0xff]  }
  0x50   :  { %v15885_v24 = vld [vmem:[%s21617_s2 + $0x154] ss:$28 sps:$4 sm:$0xff]   ;;  %v15887_v25 = vld [vmem:[%s21617_s2 + $0x15c] ss:$28 sps:$4 sm:$0xff]   ;;  %v15891_v28 = vld [vmem:[%s21617_s2 + $0x18c] ss:$28 sps:$4 sm:$0xff]  }
  0x51   :  { %v15889_v26 = vld [vmem:[%s21617_s2 + $0x150] ss:$28 sps:$4 sm:$0xff]   ;;  %v15890_v27 = vld [vmem:[%s21617_s2 + $0x158] ss:$28 sps:$4 sm:$0xff]   ;;  %v15895_v30 = vld [vmem:[%s21617_s2 + $0x188] ss:$28 sps:$4 sm:$0xff]  }
  0x52   :  { %875 = vmatpush1.bf16.msra.mxu0 %v15865_v10  ;;  %916 = vmatpush1.bf16.msra.mxu1 %v15866_v11  ;;  %v15893_v29 = vld [vmem:[%s21617_s2 + $0x194] ss:$28 sps:$4 sm:$0xff]   ;;  %v15897_v32 = vld [vmem:[%s21617_s2 + $0x1c4] ss:$28 sps:$4 sm:$0xff]   ;;  %v15899_v33 = vld [vmem:[%s21617_s2 + $0x1cc] ss:$28 sps:$4 sm:$0xff]  }
  0x53   :  { %876 = vmatprep.subr.bf16.mxu0 %v15867_v12  ;;  %917 = vmatprep.subr.bf16.mxu1 %v15869_v13  ;;  %v15896_v31 = vld [vmem:[%s21617_s2 + $0x190] ss:$28 sps:$4 sm:$0xff]   ;;  %v15901_v34 = vld [vmem:[%s21617_s2 + $0x1c0] ss:$28 sps:$4 sm:$0xff]   ;;  %v15902_v35 = vld [vmem:[%s21617_s2 + $0x1c8] ss:$28 sps:$4 sm:$0xff]  }
  0x54   :  { %v15903_v36 = vld [vmem:[%s21617_s2 + $0x1fc] ss:$28 sps:$4 sm:$0xff]   ;;  %v15905_v37 = vld [vmem:[%s21617_s2 + $0x204] ss:$28 sps:$4 sm:$0xff]   ;;  %v15909_v40 = vld [vmem:[%s21617_s2 + $0x234] ss:$28 sps:$4 sm:$0xff]  }
  0x55   :  { %v15907_v38 = vld [vmem:[%s21617_s2 + $0x1f8] ss:$28 sps:$4 sm:$0xff]   ;;  %v15908_v39 = vld [vmem:[%s21617_s2 + $0x200] ss:$28 sps:$4 sm:$0xff]   ;;  %v15913_v42 = vld [vmem:[%s21617_s2 + $0x230] ss:$28 sps:$4 sm:$0xff]  }
  0x56   :  { %877 = vmatpush1.bf16.msra.mxu0 %v15871_v14  ;;  %918 = vmatpush1.bf16.msra.mxu1 %v15872_v15  ;;  %v15911_v41 = vld [vmem:[%s21617_s2 + $0x23c] ss:$28 sps:$4 sm:$0xff]   ;;  %v15915_v44 = vld [vmem:[%s21617_s2 + $0x26c] ss:$28 sps:$4 sm:$0xff]   ;;  %v15917_v45 = vld [vmem:[%s21617_s2 + $0x274] ss:$28 sps:$4 sm:$0xff]  }
  0x57   :  { %878 = vmatprep.subr.bf16.mxu0 %v15873_v16  ;;  %919 = vmatprep.subr.bf16.mxu1 %v15875_v17  ;;  %v15914_v43 = vld [vmem:[%s21617_s2 + $0x238] ss:$28 sps:$4 sm:$0xff]   ;;  %v123_v46 = vld [vmem:[%s21618_s0] sm:$0xff]  ;;  %v15920_v49 = vld [vmem:[%s21617_s2 + $0x270] ss:$28 sps:$4 sm:$0xff]  }
  0x58   :  { %v15919_v47 = vld [vmem:[%s21617_s2 + $0x268] ss:$28 sps:$4 sm:$0xff]   ;;  %v125_v48 = vcombine.high %v123_v46, %v123_v46  ;;  %v15925_v53 = vld [vmem:[%s21617_s2 + $0x2a0] ss:$28 sps:$4 sm:$0xff]   ;;  %v15931_v57 = vld [vmem:[%s21617_s2 + $0x2d8] ss:$28 sps:$4 sm:$0xff]   ;;  %v17707_v5 = vpack.c.bf16 %v123_v46, %v123_v46 }
  0x59   :  { %v15921_v50 = vld [vmem:[%s21617_s2 + $0x2a4] ss:$28 sps:$4 sm:$0xff]   ;;  %v15923_v51 = vld [vmem:[%s21617_s2 + $0x2ac] ss:$28 sps:$4 sm:$0xff]   ;;  %v15927_v55 = vld [vmem:[%s21617_s2 + $0x2dc] ss:$28 sps:$4 sm:$0xff]  }
  0x5a   :  { %879 = vmatpush1.bf16.msra.mxu0 %v15877_v18  ;;  %920 = vmatpush1.bf16.msra.mxu1 %v15878_v19  ;;  %v128_v52 = vpack.c.bf16 %v125_v48, %v125_v48  ;;  %v15926_v54 = vld [vmem:[%s21617_s2 + $0x2a8] ss:$28 sps:$4 sm:$0xff]   ;;  %v15932_v58 = vld [vmem:[%s21617_s2 + $0x2e0] ss:$28 sps:$4 sm:$0xff]   ;;  %v15933_v59 = vld [vmem:[%s21617_s2 + $0x314] ss:$28 sps:$4 sm:$0xff]  }
  0x5b   :  { %880 = vmatprep.subr.bf16.mxu0 %v15879_v20  ;;  %921 = vmatprep.subr.bf16.mxu1 %v15881_v21  ;;  %v15929_v56 = vld [vmem:[%s21617_s2 + $0x2e4] ss:$28 sps:$4 sm:$0xff]   ;;  %v15935_v60 = vld [vmem:[%s21617_s2 + $0x31c] ss:$28 sps:$4 sm:$0xff]   ;;  %v15937_v61 = vld [vmem:[%s21617_s2 + $0x310] ss:$28 sps:$4 sm:$0xff]  }
  0x5c   :  { %902 = vmatprep.mubr.bf16.mxu0 %v128_v52  ;;  %943 = vmatprep.mubr.bf16.mxu1 %v128_v52  ;;  %v15938_v62 = vld [vmem:[%s21617_s2 + $0x318] ss:$28 sps:$4 sm:$0xff]   ;;  %v15939_v63 = vld [vmem:[%s21617_s2 + $0x34c] ss:$28 sps:$4 sm:$0xff]   ;;  %v15954_v11 = vld [vmem:[%s21617_s2 + $0x84] ss:$28 sps:$4 sm:$0xff]  }
  0x5d   :  { %v15941_v0 = vld [vmem:[%s21617_s2 + $0x354] ss:$28 sps:$4 sm:$0xff]   ;;  %v15943_v1 = vld [vmem:[%s21617_s2 + $0x348] ss:$28 sps:$4 sm:$0xff]   ;;  %v15952_v14 = vld [vmem:[%s21617_s2 + $0x80] ss:$28 sps:$4 sm:$0xff]  }
  0x5e   :  { %881 = vmatpush1.bf16.msra.mxu0 %v15883_v22  ;;  %922 = vmatpush1.bf16.msra.mxu1 %v15884_v23  ;;  %v15944_v2 = vld [vmem:[%s21617_s2 + $0x350] ss:$28 sps:$4 sm:$0xff]   ;;  %v15967_v4 = vld [vmem:[%s21617_s2 + $0x1d8] ss:$28 sps:$4 sm:$0xff]   ;;  %v15949_v10 = vld [vmem:[%s21617_s2 + $0x48] ss:$28 sps:$4 sm:$0xff]  }
  0x5f   :  { %882 = vmatprep.subr.bf16.mxu0 %v15885_v24  ;;  %923 = vmatprep.subr.bf16.mxu1 %v15887_v25  ;;  %v15948_v3 = vld [vmem:[%s21617_s2 + $0x14] ss:$28 sps:$4 sm:$0xff]   ;;  %v15951_v8 = vld [vmem:[%s21617_s2 + $0x4c] ss:$28 sps:$4 sm:$0xff]   ;;  %v15957_v15 = vld [vmem:[%s21617_s2 + $0xbc] ss:$28 sps:$4 sm:$0xff]  }
  0x60   :  { %v15946_v6 = vld [vmem:[%s21617_s2 + $0x10] ss:$28 sps:$4 sm:$0xff]   ;;  %v15968_v7 = vld [vmem:[%s21617_s2 + $0x18] ss:$28 sps:$4 sm:$0xff]   ;;  %v15977_v13 = vld [vmem:[%s21617_s2 + $0x248] ss:$28 sps:$4 sm:$0xff]  }
  0x61   :  { %v15972_v9 = vld [vmem:[%s21617_s2 + $0x210] ss:$28 sps:$4 sm:$0xff]   ;;  %v15978_v16 = vld [vmem:[%s21617_s2 + $0x88] ss:$28 sps:$4 sm:$0xff]   ;;  %v15982_v17 = vld [vmem:[%s21617_s2 + $0x280] ss:$28 sps:$4 sm:$0xff]  }
  0x62   :  { %883 = vmatpush1.bf16.msra.mxu0 %v15889_v26  ;;  %924 = vmatpush1.bf16.msra.mxu1 %v15890_v27  ;;  %v15973_v12 = vld [vmem:[%s21617_s2 + $0x50] ss:$28 sps:$4 sm:$0xff]   ;;  %v15955_v18 = vld [vmem:[%s21617_s2 + $0xb8] ss:$28 sps:$4 sm:$0xff]   ;;  %v15983_v20 = vld [vmem:[%s21617_s2 + $0xc0] ss:$28 sps:$4 sm:$0xff]  }
  0x63   :  { %884 = vmatprep.subr.bf16.mxu0 %v15891_v28  ;;  %925 = vmatprep.subr.bf16.mxu1 %v15893_v29  ;;  %v15960_v19 = vld [vmem:[%s21617_s2 + $0xf4] ss:$28 sps:$4 sm:$0xff]   ;;  %v15963_v24 = vld [vmem:[%s21617_s2 + $0x12c] ss:$28 sps:$4 sm:$0xff]   ;;  %v15966_v28 = vld [vmem:[%s21617_s2 + $0x164] ss:$28 sps:$4 sm:$0xff]  }
  0x64   :  { %v15987_v21 = vld [vmem:[%s21617_s2 + $0x2b8] ss:$28 sps:$4 sm:$0xff]   ;;  %v15958_v22 = vld [vmem:[%s21617_s2 + $0xf0] ss:$28 sps:$4 sm:$0xff]   ;;  %v15961_v26 = vld [vmem:[%s21617_s2 + $0x128] ss:$28 sps:$4 sm:$0xff]  }
  0x65   :  { %v15988_v23 = vld [vmem:[%s21617_s2 + $0xf8] ss:$28 sps:$4 sm:$0xff]   ;;  %v15992_v25 = vld [vmem:[%s21617_s2 + $0x2f0] ss:$28 sps:$4 sm:$0xff]   ;;  %v15997_v29 = vld [vmem:[%s21617_s2 + $0x328] ss:$28 sps:$4 sm:$0xff]  }
  0x66   :  { %885 = vmatpush1.bf16.msra.mxu0 %v15895_v30  ;;  %926 = vmatpush1.bf16.msra.mxu1 %v15896_v31  ;;  %v15993_v27 = vld [vmem:[%s21617_s2 + $0x130] ss:$28 sps:$4 sm:$0xff]   ;;  %v15964_v30 = vld [vmem:[%s21617_s2 + $0x160] ss:$28 sps:$4 sm:$0xff]   ;;  %v15998_v31 = vld [vmem:[%s21617_s2 + $0x168] ss:$28 sps:$4 sm:$0xff]  }
  0x67   :  { %886 = vmatprep.subr.bf16.mxu0 %v15897_v32  ;;  %927 = vmatprep.subr.bf16.mxu1 %v15899_v33  ;;  %v15971_v32 = vld [vmem:[%s21617_s2 + $0x19c] ss:$28 sps:$4 sm:$0xff]   ;;  %v15986_v46 = vld [vmem:[%s21617_s2 + $0x244] ss:$28 sps:$4 sm:$0xff]  }
  0x68   :  { %v16002_v33 = vld [vmem:[%s21617_s2 + $0x360] ss:$28 sps:$4 sm:$0xff]  }
  0x69   :  { %v15991_v48 = vld [vmem:[%s21617_s2 + $0x27c] ss:$28 sps:$4 sm:$0xff]  }
  0x6a   :  { %887 = vmatpush1.bf16.msra.mxu0 %v15901_v34  ;;  %928 = vmatpush1.bf16.msra.mxu1 %v15902_v35  ;;  %v1275_v34 = vld [vmem:[%s21619_s3 + $0x80] sm:$0xff]  ;;  %v1276_v35 = vld [vmem:[%s21619_s3 + $0x88] sm:$0xff] }
  0x6b   :  { %888 = vmatprep.subr.bf16.mxu0 %v15903_v36  ;;  %929 = vmatprep.subr.bf16.mxu1 %v15905_v37  ;;  %v15969_v36 = vld [vmem:[%s21617_s2 + $0x198] ss:$28 sps:$4 sm:$0xff]   ;;  %v16003_v37 = vld [vmem:[%s21617_s2 + $0x1a0] ss:$28 sps:$4 sm:$0xff]  }
  0x6e   :  { %889 = vmatpush1.bf16.msra.mxu0 %v15907_v38  ;;  %930 = vmatpush1.bf16.msra.mxu1 %v15908_v39  ;;  %v15976_v38 = vld [vmem:[%s21617_s2 + $0x1d4] ss:$28 sps:$4 sm:$0xff]   ;;  %v1259_v39 = vld [vmem:[%s21619_s3] sm:$0xff] }
  0x6f   :  { %890 = vmatprep.subr.bf16.mxu0 %v15909_v40  ;;  %931 = vmatprep.subr.bf16.mxu1 %v15911_v41  ;;  %v1260_v40 = vld [vmem:[%s21619_s3 + $0x8] sm:$0xff]  ;;  %v17816_v41 = vpack.c.bf16 %v1276_v35, %v1275_v34  ;;  %v1298_v34 = vld [vmem:[%s21619_s3 + $0x138] sm:$0xff] }
  0x72   :  { %891 = vmatpush1.bf16.msra.mxu0 %v15913_v42  ;;  %932 = vmatpush1.bf16.msra.mxu1 %v15914_v43  ;;  %v15974_v42 = vld [vmem:[%s21617_s2 + $0x1d0] ss:$28 sps:$4 sm:$0xff]  }
  0x73   :  { %892 = vmatprep.subr.bf16.mxu0 %v15915_v44  ;;  %933 = vmatprep.subr.bf16.mxu1 %v15917_v45  ;;  %v15981_v43 = vld [vmem:[%s21617_s2 + $0x20c] ss:$28 sps:$4 sm:$0xff]   ;;  %v17824_v44 = vpack.c.bf16 %v1260_v40, %v1259_v39 }
  0x74   :  { %v15979_v45 = vld [vmem:[%s21617_s2 + $0x208] ss:$28 sps:$4 sm:$0xff]  }
  0x75   :  { %v1316_v40 = vld [vmem:[%s21619_s3 + $0x1c8] sm:$0xff] }
  0x76   :  { %893 = vmatpush1.bf16.msra.mxu0 %v15919_v47  ;;  %934 = vmatpush1.bf16.msra.mxu1 %v15920_v49  ;;  %v15984_v47 = vld [vmem:[%s21617_s2 + $0x240] ss:$28 sps:$4 sm:$0xff]   ;;  %v15989_v49 = vld [vmem:[%s21617_s2 + $0x278] ss:$28 sps:$4 sm:$0xff]  }
  0x77   :  { %894 = vmatprep.subr.bf16.mxu0 %v15921_v50  ;;  %935 = vmatprep.subr.bf16.mxu1 %v15923_v51  ;;  %v15996_v50 = vld [vmem:[%s21617_s2 + $0x2b4] ss:$28 sps:$4 sm:$0xff]  }
  0x78   :  { %v15994_v51 = vld [vmem:[%s21617_s2 + $0x2b0] ss:$28 sps:$4 sm:$0xff]  }
  0x7a   :  { %895 = vmatpush1.bf16.msra.mxu0 %v15925_v53  ;;  %936 = vmatpush1.bf16.msra.mxu1 %v15926_v54  ;;  %v15999_v53 = vld [vmem:[%s21617_s2 + $0x2e8] ss:$28 sps:$4 sm:$0xff]  }
  0x7b   :  { %896 = vmatprep.subr.bf16.mxu0 %v15927_v55  ;;  %937 = vmatprep.subr.bf16.mxu1 %v15929_v56  ;;  %v16006_v54 = vld [vmem:[%s21617_s2 + $0x324] ss:$28 sps:$4 sm:$0xff]   ;;  %v16009_v56 = vld [vmem:[%s21617_s2 + $0x35c] ss:$28 sps:$4 sm:$0xff]  }
  0x7c   :  { %v16004_v55 = vld [vmem:[%s21617_s2 + $0x320] ss:$28 sps:$4 sm:$0xff]  }
  0x7e   :  { %897 = vmatpush1.bf16.msra.mxu0 %v15931_v57  ;;  %938 = vmatpush1.bf16.msra.mxu1 %v15932_v58  ;;  %v1307_v57 = vld [vmem:[%s21619_s3 + $0x180] sm:$0xff]  ;;  %v1308_v58 = vld [vmem:[%s21619_s3 + $0x188] sm:$0xff] }
  0x7f   :  { %898 = vmatprep.subr.bf16.mxu0 %v15933_v59  ;;  %939 = vmatprep.subr.bf16.mxu1 %v15935_v60  ;;  %v16007_v59 = vld [vmem:[%s21617_s2 + $0x358] ss:$28 sps:$4 sm:$0xff]   ;;  %v1291_v60 = vld [vmem:[%s21619_s3 + $0x100] sm:$0xff] }
  0x82   :  { %899 = vmatpush1.bf16.msra.mxu0 %v15937_v61  ;;  %940 = vmatpush1.bf16.msra.mxu1 %v15938_v62  ;;  %v1292_v61 = vld [vmem:[%s21619_s3 + $0x108] sm:$0xff]  ;;  %v17880_v62 = vpack.c.bf16 %v1308_v58, %v1307_v57  ;;  %v1270_v57 = vld [vmem:[%s21619_s3 + $0x58] sm:$0xff]  ;;  %v1301_v58 = vld [vmem:[%s21619_s3 + $0x150] sm:$0xff] }
  0x83   :  { %900 = vmatprep.subr.bf16.mxu0 %v15939_v63  ;;  %941 = vmatprep.subr.bf16.mxu1 %v15941_v0  ;;  %v17882_v63 = vpack.c.bf16 %v1292_v61, %v1291_v60  ;;  %v1277_v0 = vld [vmem:[%s21619_s3 + $0x90] sm:$0xff]  ;;  %v1302_v60 = vld [vmem:[%s21619_s3 + $0x158] sm:$0xff]  ;;  %v1287_v61 = vld [vmem:[%s21619_s3 + $0xe0] sm:$0xff] }
  0x86   :  { %901 = vmatpush1.bf16.msra.mxu0 %v15943_v1  ;;  %942 = vmatpush1.bf16.msra.mxu1 %v15944_v2  ;;  %v1278_v1 = vld [vmem:[%s21619_s3 + $0x98] sm:$0xff]  ;;  %v1309_v2 = vld [vmem:[%s21619_s3 + $0x190] sm:$0xff] }
  0x87   :  { %952 = vmatprep.subr.bf16.mxu0 %v15948_v3  ;;  %14431 = vmatprep.subr.bf16.mxu1 %v15967_v4  ;;  %v17896_v3 = vpack.c.bf16 %v1278_v1, %v1277_v0  ;;  %v1310_v4 = vld [vmem:[%s21619_s3 + $0x198] sm:$0xff]  ;;  %v1288_v0 = vld [vmem:[%s21619_s3 + $0xe8] sm:$0xff]  ;;  %v18068_v1 = vpack.c.bf16 %v1302_v60, %v1301_v58 }
  0x89   :  { %903 = vmatmul.mubr.bf16.vlgmr.msra.gmra.mrb[0].mxu0 %v17707_v5  ;;  %944 = vmatmul.mubr.bf16.vlgmr.msra.gmra.mrb[0].mxu1 %v17707_v5 }
  0x8a   :  { %953 = vmatpush1.bf16.msra.mxu0 %v15946_v6  ;;  %14432 = vmatpush3.bf16.msra.mxu1 %v15968_v7  ;;  %v1262_v6 = vld [vmem:[%s21619_s3 + $0x18] sm:$0xff]  ;;  %v1293_v7 = vld [vmem:[%s21619_s3 + $0x110] sm:$0xff] }
  0x8b   :  { %954 = vmatprep.subr.bf16.mxu0 %v15951_v8  ;;  %14433 = vmatprep.subr.bf16.mxu1 %v15972_v9  ;;  %v1294_v8 = vld [vmem:[%s21619_s3 + $0x118] sm:$0xff]  ;;  %v17914_v9 = vpack.c.bf16 %v1310_v4, %v1309_v2  ;;  %v18070_v2 = vpack.c.bf16 %v1288_v0, %v1287_v61  ;;  %v1319_v4 = vld [vmem:[%s21619_s3 + $0x1e0] sm:$0xff] }
  0x8c   :  { %1025 = vmatprep.mubr.bf16.mxu1 %v128_v52  ;;  %984 = vmatprep.mubr.bf16.mxu0 %v128_v52  ;;  %v16001_v52 = vld [vmem:[%s21617_s2 + $0x2ec] ss:$28 sps:$4 sm:$0xff]  }
  0x8d   :  { %21620 = vst [vmem:[#allocation12_spill] sm:$0xff] %v18070_v2 }
  0x8e   :  { %955 = vmatpush1.bf16.msra.mxu0 %v15949_v10  ;;  %14434 = vmatpush3.bf16.msra.mxu1 %v15973_v12  ;;  %v1279_v12 = vld [vmem:[%s21619_s3 + $0xa0] sm:$0xff] }
  0x8f   :  { %956 = vmatprep.subr.bf16.mxu0 %v15954_v11  ;;  %14435 = vmatprep.subr.bf16.mxu1 %v15977_v13  ;;  %v17918_v11 = vpack.c.bf16 %v1294_v8, %v1293_v7  ;;  %v1280_v13 = vld [vmem:[%s21619_s3 + $0xa8] sm:$0xff] }
  0x90   :  { %v1272_v8 = vld [vmem:[%s21619_s3 + $0x68] sm:$0xff] }
  0x92   :  { %957 = vmatpush1.bf16.msra.mxu0 %v15952_v14  ;;  %14436 = vmatpush3.bf16.msra.mxu1 %v15978_v16  ;;  %v1311_v14 = vld [vmem:[%s21619_s3 + $0x1a0] sm:$0xff]  ;;  %v1312_v16 = vld [vmem:[%s21619_s3 + $0x1a8] sm:$0xff] }
  0x93   :  { %958 = vmatprep.subr.bf16.mxu0 %v15957_v15  ;;  %14437 = vmatprep.subr.bf16.mxu1 %v15982_v17  ;;  %v17931_v15 = vpack.c.bf16 %v1280_v13, %v1279_v12  ;;  %v1263_v17 = vld [vmem:[%s21619_s3 + $0x20] sm:$0xff]  ;;  %v1304_v13 = vld [vmem:[%s21619_s3 + $0x168] sm:$0xff] }
  0x94   :  { %v1303_v12 = vld [vmem:[%s21619_s3 + $0x160] sm:$0xff] }
  0x96   :  { %959 = vmatpush1.bf16.msra.mxu0 %v15955_v18  ;;  %14438 = vmatpush3.bf16.msra.mxu1 %v15983_v20  ;;  %v1264_v18 = vld [vmem:[%s21619_s3 + $0x28] sm:$0xff] }
  0x97   :  { %960 = vmatprep.subr.bf16.mxu0 %v15960_v19  ;;  %14439 = vmatprep.subr.bf16.mxu1 %v15987_v21  ;;  %v17943_v19 = vpack.c.bf16 %v1312_v16, %v1311_v14  ;;  %v17945_v20 = vpack.c.bf16 %v1264_v18, %v1263_v17  ;;  %v1295_v21 = vld [vmem:[%s21619_s3 + $0x120] sm:$0xff]  ;;  %v1289_v14 = vld [vmem:[%s21619_s3 + $0xf0] sm:$0xff]  ;;  %v1290_v16 = vld [vmem:[%s21619_s3 + $0xf8] sm:$0xff] }
  0x98   :  { %v1321_v17 = vld [vmem:[%s21619_s3 + $0x1f0] sm:$0xff] }
  0x9a   :  { %961 = vmatpush1.bf16.msra.mxu0 %v15958_v22  ;;  %14440 = vmatpush3.bf16.msra.mxu1 %v15988_v23  ;;  %v1296_v22 = vld [vmem:[%s21619_s3 + $0x128] sm:$0xff] }
  0x9b   :  { %962 = vmatprep.subr.bf16.mxu0 %v15963_v24  ;;  %14441 = vmatprep.subr.bf16.mxu1 %v15992_v25  ;;  %v17954_v23 = vpack.c.bf16 %v1296_v22, %v1295_v21  ;;  %v1281_v24 = vld [vmem:[%s21619_s3 + $0xb0] sm:$0xff]  ;;  %v1282_v25 = vld [vmem:[%s21619_s3 + $0xb8] sm:$0xff] }
  0x9c   :  { %v1322_v21 = vld [vmem:[%s21619_s3 + $0x1f8] sm:$0xff]  ;;  %v1273_v22 = vld [vmem:[%s21619_s3 + $0x70] sm:$0xff] }
  0x9e   :  { %963 = vmatpush1.bf16.msra.mxu0 %v15961_v26  ;;  %14442 = vmatpush3.bf16.msra.mxu1 %v15993_v27  ;;  %v1313_v26 = vld [vmem:[%s21619_s3 + $0x1b0] sm:$0xff]  ;;  %v17967_v27 = vpack.c.bf16 %v1282_v25, %v1281_v24  ;;  %v1274_v24 = vld [vmem:[%s21619_s3 + $0x78] sm:$0xff]  ;;  %v18116_v25 = vpack.c.bf16 %v1304_v13, %v1303_v12 }
  0x9f   :  { %964 = vmatprep.subr.bf16.mxu0 %v15966_v28  ;;  %14443 = vmatprep.subr.bf16.mxu1 %v15997_v29  ;;  %v1314_v28 = vld [vmem:[%s21619_s3 + $0x1b8] sm:$0xff]  ;;  %v1265_v29 = vld [vmem:[%s21619_s3 + $0x30] sm:$0xff] }
  0xa0   :  { %21623 = vst [vmem:[#allocation15_spill] sm:$0xff] %v18116_v25 }
  0xa2   :  { %965 = vmatpush1.bf16.msra.mxu0 %v15964_v30  ;;  %14444 = vmatpush3.bf16.msra.mxu1 %v15998_v31  ;;  %v1266_v30 = vld [vmem:[%s21619_s3 + $0x38] sm:$0xff]  ;;  %v17979_v31 = vpack.c.bf16 %v1314_v28, %v1313_v26  ;;  %v18118_v26 = vpack.c.bf16 %v1290_v16, %v1289_v14  ;;  %v1305_v28 = vld [vmem:[%s21619_s3 + $0x170] sm:$0xff] }
  0xa3   :  { %966 = vmatprep.subr.bf16.mxu0 %v15971_v32  ;;  %14445 = vmatprep.subr.bf16.mxu1 %v16002_v33  ;;  %v17981_v32 = vpack.c.bf16 %v1266_v30, %v1265_v29  ;;  %v1297_v33 = vld [vmem:[%s21619_s3 + $0x130] sm:$0xff]  ;;  %v1306_v29 = vld [vmem:[%s21619_s3 + $0x178] sm:$0xff]  ;;  %v18127_v30 = vpack.c.bf16 %v1322_v21, %v1321_v17 }
  0xa4   :  { %v17990_v35 = vpack.c.bf16 %v1298_v34, %v1297_v33  ;;  %21624 = vst [vmem:[#allocation16_spill] sm:$0xff] %v18118_v26  ;;  %v18130_v33 = vpack.c.bf16 %v1274_v24, %v1273_v22  ;;  %v18134_v34 = vpack.c.bf16 %v1306_v29, %v1305_v28 }
  0xa5   :  { %21625 = vst [vmem:[#allocation17_spill] sm:$0xff] %v18127_v30 }
  0xa6   :  { %967 = vmatpush1.bf16.msra.mxu0 %v15969_v36  ;;  %14446 = vmatpush3.bf16.msra.mxu1 %v16003_v37  ;;  %v1283_v36 = vld [vmem:[%s21619_s3 + $0xc0] sm:$0xff]  ;;  %v1284_v37 = vld [vmem:[%s21619_s3 + $0xc8] sm:$0xff]  ;;  %21626 = vst [vmem:[#allocation18_spill] sm:$0xff] %v18130_v33  ;;  %21627 = vst [vmem:[#allocation19_spill] sm:$0xff] %v18134_v34 }
  0xa7   :  { %968 = vmatprep.subr.bf16.mxu0 %v15976_v38  ;;  %15212 = vmatprep.subr.bf16.mxu1 %v17816_v41  ;;  %v1315_v38 = vld [vmem:[%s21619_s3 + $0x1c0] sm:$0xff]  ;;  %v18003_v39 = vpack.c.bf16 %v1284_v37, %v1283_v36  ;;  %v1340_v37 = vld [vmem:[%s21619_s3 + $0x288] sm:$0xff] }
  0xa8   :  { %v1339_v36 = vld [vmem:[%s21619_s3 + $0x280] sm:$0xff] }
  0xa9   :  { %1026 = vmatmul.mubr.bf16.vlgmr.msra.gmra.mrb[4].mxu1 %v17707_v5 }
  0xaa   :  { %969 = vmatpush1.bf16.msra.mxu0 %v15974_v42  ;;  %15214 = vmatpush3.bf16.msra.mxu1 %v17824_v44  ;;  %v1267_v42 = vld [vmem:[%s21619_s3 + $0x40] sm:$0xff] }
  0xab   :  { %970 = vmatprep.subr.bf16.mxu0 %v15981_v43  ;;  %15216 = vmatprep.subr.bf16.mxu1 %v17896_v3  ;;  %v1268_v43 = vld [vmem:[%s21619_s3 + $0x48] sm:$0xff] }
  0xae   :  { %971 = vmatpush1.bf16.msra.mxu0 %v15979_v45  ;;  %v18015_v45 = vpack.c.bf16 %v1316_v40, %v1315_v38  ;;  %v18145_v38 = vpack.c.bf16 %v1340_v37, %v1339_v36  ;;  %v21527_v40 = vmov 0.0|0.0  }
  0xaf   :  { %972 = vmatprep.subr.bf16.mxu0 %v15986_v46  ;;  %v18017_v46 = vpack.c.bf16 %v1268_v43, %v1267_v42  ;;  %v259_v42 = vlaneseq }
  0xb0   :  { %21628 = vst [vmem:[#allocation20_spill] sm:$0xff] %v18145_v38 }
  0xb1   :  { %v18149_v43 = vshrl.u32 %v259_v42, 7 }
  0xb2   :  { %973 = vmatpush1.bf16.msra.mxu0 %v15984_v47  ;;  %v1299_v47 = vld [vmem:[%s21619_s3 + $0x140] sm:$0xff] }
  0xb3   :  { %974 = vmatprep.subr.bf16.mxu0 %v15991_v48  ;;  %v1300_v48 = vld [vmem:[%s21619_s3 + $0x148] sm:$0xff] }
  0xb6   :  { %975 = vmatpush1.bf16.msra.mxu0 %v15989_v49  ;;  %v1285_v49 = vld [vmem:[%s21619_s3 + $0xd0] sm:$0xff] }
  0xb7   :  { %976 = vmatprep.subr.bf16.mxu0 %v15996_v50  ;;  %v18029_v50 = vpack.c.bf16 %v1300_v48, %v1299_v47  ;;  %v18154_v47 = vld [vmem:[%s21629_s23] sm:$0x7f]  ;;  %v18157_v48 = vsub.s32 0, %v18149_v43 }
  0xb9   :  { %21630 = vst [vmem:[#allocation21_spill] sm:$0xff] %v18157_v48 }
  0xba   :  { %977 = vmatpush1.bf16.msra.mxu0 %v15994_v51  ;;  %v1286_v51 = vld [vmem:[%s21619_s3 + $0xd8] sm:$0xff] }
  0xbb   :  { %978 = vmatprep.subr.bf16.mxu0 %v16001_v52  ;;  %v1317_v52 = vld [vmem:[%s21619_s3 + $0x1d0] sm:$0xff] }
  0xbe   :  { %979 = vmatpush1.bf16.msra.mxu0 %v15999_v53  ;;  %v1318_v53 = vld [vmem:[%s21619_s3 + $0x1d8] sm:$0xff] }
  0xbf   :  { %980 = vmatprep.subr.bf16.mxu0 %v16006_v54  ;;  %v18041_v54 = vpack.c.bf16 %v1286_v51, %v1285_v49  ;;  %v18160_v49 = vsub.s32 2, %v18149_v43  ;;  %v17327_v51 = vmov 1983009808  }
  0xc1   :  { %21631 = vst [vmem:[#allocation22_spill] sm:$0xff] %v18160_v49  ;;  %v270_v58 = vrot.slane %v18154_v47, %v18160_v49 }
  0xc2   :  { %981 = vmatpush1.bf16.msra.mxu0 %v16004_v55  ;;  %v18043_v55 = vpack.c.bf16 %v1318_v53, %v1317_v52  ;;  %v1043_v52 = vunpack.c.l.s4 %v17327_v51  ;;  %v18163_v53 = vsub.s32 1, %v18149_v43  ;;  %v1323_v51 = vld [vmem:[%s21619_s3 + $0x200] sm:$0xff] }
  0xc3   :  { %982 = vmatprep.subr.bf16.mxu0 %v16009_v56  ;;  %v1269_v56 = vld [vmem:[%s21619_s3 + $0x50] sm:$0xff] }
  0xc4   :  { %21632 = vst [vmem:[#allocation23_spill] sm:$0xff] %v18163_v53  ;;  %v1044_v60 = vunpack.c.0.s8 %v1043_v52  ;;  %v266_v61 = vrot.slane %v18154_v47, %v18163_v53  ;;  %v1324_v52 = vld [vmem:[%s21619_s3 + $0x208] sm:$0xff] }
  0xc6   :  { %983 = vmatpush1.bf16.msra.mxu0 %v16007_v59  ;;  %v18055_v59 = vpack.c.bf16 %v1270_v57, %v1269_v56  ;;  %v18166_v56 = vsub.s32 3, %v18149_v43  ;;  %v262_v57 = vrot.slane %v18154_v47, %v18157_v48  ;;  %v18177_v14 = vsub.s32 %v1044_v60, %v18149_v43 }
  0xc7   :  { %15244 = vmatprep.subr.bf16.mxu0 %v17880_v62 }
  0xc8   :  { %21633 = vst [vmem:[#allocation24_spill] sm:$0xff] %v18166_v56  ;;  %v274_v0 = vrot.slane %v18154_v47, %v18166_v56  ;;  %21634 = vst [vmem:[#allocation25_spill] sm:$0xff] %v18177_v14 }
  0xc9   :  { %985 = vmatmul.mubr.bf16.vlgmr.msra.gmra.mrb[4].mxu0 %v17707_v5  ;;  %v1261_v5 = vld [vmem:[%s21619_s3 + $0x10] sm:$0xff] }
  0xca   :  { %15246 = vmatpush3.bf16.msra.mxu0 %v17882_v63  ;;  %v17916_v10 = vpack.c.bf16 %v1262_v6, %v1261_v5  ;;  %v1320_v5 = vld [vmem:[%s21619_s3 + $0x1e8] sm:$0xff]  ;;  %v1271_v6 = vld [vmem:[%s21619_s3 + $0x60] sm:$0xff] }
  0xcb   :  { %15248 = vmatprep.subr.bf16.mxu0 %v17914_v9  ;;  %v18082_v7 = vpack.c.bf16 %v1320_v5, %v1319_v4  ;;  %v18103_v18 = vpack.c.bf16 %v1272_v8, %v1271_v6 }
  0xcc   :  { %15218 = vmatpush3.bf16.msra.mxu1 %v17916_v10 }
  0xcd   :  { %15220 = vmatprep.subr.bf16.mxu1 %v17931_v15  ;;  %21621 = vst [vmem:[#allocation13_spill] sm:$0xff] %v18082_v7  ;;  %21622 = vst [vmem:[#allocation14_spill] sm:$0xff] %v18103_v18 }
  0xce   :  { %15250 = vmatpush3.bf16.msra.mxu0 %v17918_v11 }
  0xcf   :  { %15252 = vmatprep.subr.bf16.mxu0 %v17943_v19 }
  0xd0   :  { %15222 = vmatpush3.bf16.msra.mxu1 %v17945_v20 }
  0xd1   :  { %15224 = vmatprep.subr.bf16.mxu1 %v17967_v27 }
  0xd2   :  { %15254 = vmatpush3.bf16.msra.mxu0 %v17954_v23 }
  0xd3   :  { %15256 = vmatprep.subr.bf16.mxu0 %v17979_v31 }
  0xd4   :  { %15226 = vmatpush3.bf16.msra.mxu1 %v17981_v32 }
  0xd5   :  { %15228 = vmatprep.subr.bf16.mxu1 %v18003_v39 }
  0xd6   :  { %15258 = vmatpush3.bf16.msra.mxu0 %v17990_v35 }
  0xd7   :  { %15260 = vmatprep.subr.bf16.mxu0 %v18015_v45 }
  0xd8   :  { %15230 = vmatpush3.bf16.msra.mxu1 %v18017_v46 }
  0xd9   :  { %15232 = vmatprep.subr.bf16.mxu1 %v18041_v54 }
  0xda   :  { %15262 = vmatpush3.bf16.msra.mxu0 %v18029_v50 }
  0xdb   :  { %15264 = vmatprep.subr.bf16.mxu0 %v18043_v55 }
  0xdc   :  { %15234 = vmatpush3.bf16.msra.mxu1 %v18055_v59 }
  0xdd   :  { %15236 = vmatprep.subr.bf16.mxu1 %v18070_v2 }
  0xde   :  { %15266 = vmatpush3.bf16.msra.mxu0 %v18068_v1 }
  0xdf   :  { %15268 = vmatprep.subr.bf16.mxu0 %v18082_v7 }
  0xe0   :  { %15238 = vmatpush3.bf16.msra.mxu1 %v18103_v18 }
  0xe1   :  { %15240 = vmatprep.subr.bf16.mxu1 %v18118_v26 }
  0xe2   :  { %15270 = vmatpush3.bf16.msra.mxu0 %v18116_v25 }
  0xe3   :  { %15272 = vmatprep.subr.bf16.mxu0 %v18127_v30 }
  0xe4   :  { %15242 = vmatpush3.bf16.msra.mxu1 %v18130_v33 }
  0xe5   :  { %15276 = vmatprep.subr.bf16.mxu1 %v18145_v38 }
  0xe6   :  { %15274 = vmatpush3.bf16.msra.mxu0 %v18134_v34 }
  0xe7   :  { %15307 = vmatprep.subr.bf16.mxu0 %v21527_v40 }
 0x15c   :  { %v904_v4 = vpop.f32.mrb[0].mxu0  ;;  %v945_v5 = vpop.f32.mrb[0].mxu1 }
 0x15d   :  { %v905_v6 = vadd.f32 %v904_v4, %v262_v57  ;;  %v946_v8 = vadd.f32 %v945_v5, %v270_v58  ;;  %v906_v12 = vpop.f32.mrb[1].mxu0  ;;  %v947_v13 = vpop.f32.mrb[1].mxu1  ;;  %v1355_v57 = vld [vmem:[%s21619_s3 + $0x300] sm:$0xff]  ;;  %v1356_v58 = vld [vmem:[%s21619_s3 + $0x308] sm:$0xff] }
 0x15e   :  { %v907_v16 = vadd.f32 %v906_v12, %v266_v61  ;;  %v948_v17 = vadd.f32 %v947_v13, %v274_v0  ;;  %v908_v21 = vpop.f32.mrb[2].mxu0  ;;  %v949_v22 = vpop.f32.mrb[2].mxu1  ;;  %v18203_v13 = vpack.c.bf16 %v1324_v52, %v1323_v51 }
 0x15f   :  { %v909_v24 = vpop.f32.mrb[3].mxu0  ;;  %v950_v28 = vpop.f32.mrb[3].mxu1 }
 0x160   :  { %v1040_v29 = vcombine.low %v905_v6, %v907_v16  ;;  %v1041_v36 = vcombine.low %v946_v8, %v948_v17  ;;  %v18205_v16 = vpack.c.bf16 %v1356_v58, %v1355_v57 }
 0x162   :  { %v1048_v37 = vrot.slane %v1040_v29, %v18177_v14  ;;  %v1055_v42 = vrot.slane %v1041_v36, %v18177_v14 }
 0x164   :  { %v18193_v60 = vcombine.low %v1048_v37, %v1055_v42  ;;  %v18195_v61 = vcombine.high %v1048_v37, %v1055_v42  ;;  %v13542_v0 = vcombine.low %v1055_v42, %v1055_v42  ;;  %v13544_v4 = vcombine.high %v1055_v42, %v1055_v42 }
 0x166   :  { %21635 = vst [vmem:[#allocation26_spill] sm:$0xff] %v18193_v60  ;;  %21636 = vst [vmem:[#allocation27_spill] sm:$0xff] %v18195_v61  ;;  %v1086_v5 = vrot.slane %v18193_v60, %v18177_v14  ;;  %v1093_v6 = vrot.slane %v13542_v0, %v18177_v14  ;;  %v1119_v8 = vrot.slane %v18195_v61, %v18177_v14 }
 0x167   :  { %v1126_v12 = vrot.slane %v13544_v4, %v18177_v14 }
 0x168   :  { %v1094_v17 = vcombine.high %v1086_v5, %v1086_v5  ;;  %v1127_v21 = vcombine.high %v1119_v8, %v1119_v8  ;;  %v1095_v22 = vcombine.high %v1093_v6, %v1093_v6  ;;  %v1160_v28 = vsel %vm1159_vm0, %v1086_v5, 0.0 }
 0x169   :  { %v1128_v24 = vcombine.high %v1126_v12, %v1126_v12  ;;  %v1210_v29 = vsel %vm1159_vm0, %v1119_v8, 0.0  ;;  %v1174_v36 = vsel %vm1159_vm0, %v1093_v6, 0.0  ;;  %v1224_v37 = vsel %vm1159_vm0, %v1126_v12, 0.0 }
 0x16a   :  { %v1167_v42 = vsel %vm1159_vm0, %v1094_v17, 0.0  ;;  %v1217_v0 = vsel %vm1159_vm0, %v1127_v21, 0.0  ;;  %v1181_v51 = vsel %vm1159_vm0, %v1095_v22, 0.0  ;;  %v1161_v61 = vrot.slane %v1160_v28, 4 }
 0x16b   :  { %v1231_v52 = vsel %vm1159_vm0, %v1128_v24, 0.0  ;;  %v1168_v57 = vrot.slane %v1167_v42, 4  ;;  %v1218_v58 = vrot.slane %v1217_v0, 4  ;;  %v1182_v4 = vrot.slane %v1181_v51, 4 }
 0x16c   :  { %v1232_v40 = vrot.slane %v1231_v52, 4  ;;  %v1211_v5 = vrot.slane %v1210_v29, 4  ;;  %v1175_v60 = vrot.slane %v1174_v36, 4  ;;  %v1225_v8 = vrot.slane %v1224_v37, 4 }
 0x16d   :  { %v1169_v56 = vadd.f32 %v1168_v57, %v1167_v42  ;;  %v1219_v6 = vadd.f32 %v1218_v58, %v1217_v0  ;;  %v1183_v12 = vadd.f32 %v1182_v4, %v1181_v51  ;;  %v1162_v17 = vadd.f32 %v1161_v61, %v1160_v28  ;;  %v1342_v61 = vld [vmem:[%s21619_s3 + $0x298] sm:$0xff] }
 0x16e   :  { %v1233_v49 = vadd.f32 %v1232_v40, %v1231_v52  ;;  %v1212_v53 = vadd.f32 %v1211_v5, %v1210_v29  ;;  %v1176_v21 = vadd.f32 %v1175_v60, %v1174_v36  ;;  %v1226_v48 = vadd.f32 %v1225_v8, %v1224_v37  ;;  %v1341_v60 = vld [vmem:[%s21619_s3 + $0x290] sm:$0xff]  ;;  %v1343_v8 = vld [vmem:[%s21619_s3 + $0x2a0] sm:$0xff] }
 0x16f   :  { %v1170_v22 = vrot.slane %v1169_v56, 2  ;;  %v1220_v38 = vrot.slane %v1219_v6, 2  ;;  %v1184_v24 = vrot.slane %v1183_v12, 2  ;;  %v1163_v33 = vrot.slane %v1162_v17, 2 }
 0x170   :  { %v1234_v34 = vrot.slane %v1233_v49, 2  ;;  %v1213_v30 = vrot.slane %v1212_v53, 2  ;;  %v1177_v26 = vrot.slane %v1176_v21, 2  ;;  %v1227_v25 = vrot.slane %v1226_v48, 2 }
 0x171   :  { %v1171_v18 = vadd.f32 %v1170_v22, %v1169_v56  ;;  %v1221_v7 = vadd.f32 %v1220_v38, %v1219_v6  ;;  %v1185_v2 = vadd.f32 %v1184_v24, %v1183_v12  ;;  %v1164_v0 = vadd.f32 %v1163_v33, %v1162_v17  ;;  %v1327_v22 = vld [vmem:[%s21619_s3 + $0x220] sm:$0xff]  ;;  %v1328_v24 = vld [vmem:[%s21619_s3 + $0x228] sm:$0xff] }
 0x172   :  { %v1235_v42 = vadd.f32 %v1234_v34, %v1233_v49  ;;  %v1214_v57 = vadd.f32 %v1213_v30, %v1212_v53  ;;  %v1178_v51 = vadd.f32 %v1177_v26, %v1176_v21  ;;  %v1228_v40 = vadd.f32 %v1227_v25, %v1226_v48  ;;  %v1325_v48 = vld [vmem:[%s21619_s3 + $0x210] sm:$0xff]  ;;  %v1326_v49 = vld [vmem:[%s21619_s3 + $0x218] sm:$0xff] }
 0x173   :  { %v1172_v28 = vrot.slane %v1171_v18, 1  ;;  %v1222_v29 = vrot.slane %v1221_v7, 1  ;;  %v1186_v36 = vrot.slane %v1185_v2, 1  ;;  %v1165_v56 = vrot.slane %v1164_v0, 1 }
 0x174   :  { %v1236_v37 = vrot.slane %v1235_v42, 1  ;;  %v1215_v38 = vrot.slane %v1214_v57, 1  ;;  %v1179_v52 = vrot.slane %v1178_v51, 1  ;;  %v1229_v34 = vrot.slane %v1228_v40, 1 }
 0x175   :  { %v1173_v33 = vadd.f32 %v1172_v28, %v1171_v18  ;;  %v1223_v30 = vadd.f32 %v1222_v29, %v1221_v7  ;;  %v1187_v26 = vadd.f32 %v1186_v36, %v1185_v2  ;;  %v1166_v53 = vadd.f32 %v1165_v56, %v1164_v0  ;;  %v1344_v2 = vld [vmem:[%s21619_s3 + $0x2a8] sm:$0xff]  ;;  %v1345_v0 = vld [vmem:[%s21619_s3 + $0x2b0] sm:$0xff]  ;;  %v1330_v36 = vld [vmem:[%s21619_s3 + $0x238] sm:$0xff] }
 0x176   :  { %v1237_v25 = vadd.f32 %v1236_v37, %v1235_v42  ;;  %v1216_v58 = vadd.f32 %v1215_v38, %v1214_v57  ;;  %v1180_v4 = vadd.f32 %v1179_v52, %v1178_v51  ;;  %v1230_v5 = vadd.f32 %v1229_v34, %v1228_v40  ;;  %v1346_v57 = vld [vmem:[%s21619_s3 + $0x2b8] sm:$0xff]  ;;  %v1329_v29 = vld [vmem:[%s21619_s3 + $0x230] sm:$0xff]  ;;  %v1347_v52 = vld [vmem:[%s21619_s3 + $0x2c0] sm:$0xff] }
 0x177   :  { %v1373_v7 = vsel %vm1371_vm1, %v1223_v30, %v1173_v33  ;;  %v18236_v6 = vsub.s32 6, %v18149_v43  ;;  %v18238_v12 = vpack.c.bf16 %v1342_v61, %v1341_v60  ;;  %v18249_v42 = vpack.c.bf16 %v1326_v49, %v1325_v48  ;;  %v1348_v34 = vld [vmem:[%s21619_s3 + $0x2c8] sm:$0xff] }
 0x178   :  { %v1375_v18 = vsel %vm1371_vm1, %v1237_v25, %v1187_v26  ;;  %1452 = vmatprep.mubr.f32.mxu1 %v1373_v7  ;;  %v1372_v17 = vsel %vm1371_vm1, %v1216_v58, %v1166_v53  ;;  %v1374_v21 = vsel %vm1371_vm1, %v1230_v5, %v1180_v4  ;;  %v18259_v51 = vpack.c.bf16 %v1344_v2, %v1343_v8  ;;  %v1331_v25 = vld [vmem:[%s21619_s3 + $0x240] sm:$0xff]  ;;  %v1332_v48 = vld [vmem:[%s21619_s3 + $0x248] sm:$0xff]  ;;  %v1349_v58 = vld [vmem:[%s21619_s3 + $0x2d0] sm:$0xff] }
 0x179   :  { %21637 = vst [vmem:[#allocation28_spill] sm:$0xff] %v18236_v6  ;;  %1522 = vmatprep.mubr.f32.mxu0 %v1375_v18  ;;  %1453 = vmatmul.mubr.f32.vlgmr.msra.gmra.mrb[8].mxu1 %v1372_v17  ;;  %v21548_v40 = vmov 0.0   ;;  %v286_v61 = vrot.slane %v18154_v47, %v18236_v6  ;;  %v18272_v38 = vpack.c.bf16 %v1328_v24, %v1327_v22  ;;  %v1350_v4 = vld [vmem:[%s21619_s3 + $0x2d8] sm:$0xff]  ;;  %v1333_v7 = vld [vmem:[%s21619_s3 + $0x250] sm:$0xff]  ;;  %v1351_v24 = vld [vmem:[%s21619_s3 + $0x2e0] sm:$0xff] }
 0x17a   :  { %1523 = vmatmul.mubr.f32.vlgmr.msra.gmra.mrb[8].mxu0 %v1374_v21  ;;  %15278 = vmatpush3.bf16.msra.mxu1 %v18203_v13  ;;  %v18281_v30 = vpack.c.bf16 %v1346_v57, %v1345_v0  ;;  %v18293_v53 = vpack.c.bf16 %v1330_v36, %v1329_v29  ;;  %v18302_v5 = vpack.c.bf16 %v1348_v34, %v1347_v52  ;;  %v1334_v18 = vld [vmem:[%s21619_s3 + $0x258] sm:$0xff]  ;;  %v1352_v0 = vld [vmem:[%s21619_s3 + $0x2e8] sm:$0xff]  ;;  %v1335_v36 = vld [vmem:[%s21619_s3 + $0x260] sm:$0xff] }
 0x17b   :  { %15309 = vmatpush3.bf16.msra.mxu0 %v18205_v16  ;;  %15280 = vmatprep.subr.bf16.mxu1 %v18238_v12  ;;  %v18317_v22 = vpack.c.bf16 %v1332_v48, %v1331_v25  ;;  %v18326_v57 = vpack.c.bf16 %v1350_v4, %v1349_v58  ;;  %v1353_v52 = vld [vmem:[%s21619_s3 + $0x2f0] sm:$0xff]  ;;  %v1354_v34 = vld [vmem:[%s21619_s3 + $0x2f8] sm:$0xff]  ;;  %v18346_v25 = vpack.c.bf16 %v1352_v0, %v1351_v24 }
 0x17c   :  { %15153 = vmatprep.mubr.msk.f32.mxu0 %vm17328_vm2, %v21548_v40  ;;  %v14447_v60 = vpop.f32.mrb[4].mxu1  ;;  %21638 = vst [vmem:[#allocation29_spill] sm:$0xff] %v18293_v53  ;;  %21639 = vst [vmem:[#allocation30_spill] sm:$0xff] %v18302_v5  ;;  %v1337_v4 = vld [vmem:[%s21619_s3 + $0x270] sm:$0xff] }
 0x17d   :  { %v14448_v28 = vpop.f32.mrb[5].mxu1  ;;  %21640 = vst [vmem:[#allocation31_spill] sm:$0xff] %v18317_v22  ;;  %21641 = vst [vmem:[#allocation32_spill] sm:$0xff] %v18326_v57 }
 0x17e   :  { %v14449_v37 = vadd.f32 %v14448_v28, %v14447_v60  ;;  %v14450_v56 = vpop.f32.mrb[6].mxu1  ;;  %15282 = vmatpush3.bf16.msra.mxu1 %v18249_v42  ;;  %21643 = vst [vmem:[#allocation34_spill] sm:$0xff] %v18346_v25 }
 0x17f   :  { %v14451_v33 = vpop.f32.mrb[7].mxu1  ;;  %15284 = vmatprep.subr.bf16.mxu1 %v18259_v51  ;;  %v18337_v56 = vpack.c.bf16 %v1334_v18, %v1333_v7 }
 0x180   :  { %v1028_v26 = vadd.f32 %v14449_v37, %v286_v61  ;;  %v1336_v37 = vld [vmem:[%s21619_s3 + $0x268] sm:$0xff] }
 0x181   :  { %21642 = vst [vmem:[#allocation33_spill] sm:$0xff] %v18337_v56 }
 0x182   :  { %v18290_v49 = vrot.slane %v1028_v26, %v18177_v14  ;;  %15286 = vmatpush3.bf16.msra.mxu1 %v18272_v38 }
 0x183   :  { %15288 = vmatprep.subr.bf16.mxu1 %v18281_v30 }
 0x184   :  { %v13543_v8 = vcombine.low %v18290_v49, %v18290_v49  ;;  %v13545_v2 = vcombine.high %v18290_v49, %v18290_v49 }
 0x186   :  { %v1110_v17 = vrot.slane %v13543_v8, %v18177_v14  ;;  %v1143_v21 = vrot.slane %v13545_v2, %v18177_v14  ;;  %15290 = vmatpush3.bf16.msra.mxu1 %v18293_v53  ;;  %v1338_v8 = vld [vmem:[%s21619_s3 + $0x278] sm:$0xff]  ;;  %v18355_v2 = vpack.c.bf16 %v1336_v37, %v1335_v36  ;;  %v18369_v36 = vsub.s32 5, %v18149_v43 }
 0x187   :  { %15292 = vmatprep.subr.bf16.mxu1 %v18302_v5  ;;  %v18361_v0 = vpack.c.bf16 %v1338_v8, %v1337_v4 }
 0x188   :  { %v1203_v60 = vsel %vm1202_vm3, %v1110_v17, 0.0  ;;  %v1252_v61 = vsel %vm1202_vm3, %v1143_v21, 0.0  ;;  %21644 = vst [vmem:[#allocation35_spill] sm:$0xff] %v18355_v2  ;;  %v18358_v17 = vpack.c.bf16 %v1354_v34, %v1353_v52  ;;  %21648 = vst [vmem:[#allocation39_spill] sm:$0xff] %v18369_v36  ;;  %v282_v52 = vrot.slane %v18154_v47, %v18369_v36 }
 0x189   :  { %v1204_v28 = vrot.slane %v1203_v60, 4  ;;  %v1253_v29 = vrot.slane %v1252_v61, 4  ;;  %21646 = vst [vmem:[#allocation37_spill] sm:$0xff] %v18361_v0 }
 0x18a   :  { %15294 = vmatpush3.bf16.msra.mxu1 %v18317_v22  ;;  %21645 = vst [vmem:[#allocation36_spill] sm:$0xff] %v18358_v17 }
 0x18b   :  { %15296 = vmatprep.subr.bf16.mxu1 %v18326_v57  ;;  %v1205_v33 = vadd.f32 %v1204_v28, %v1203_v60  ;;  %v1254_v26 = vadd.f32 %v1253_v29, %v1252_v61  ;;  %v18365_v28 = vsub.s32 4, %v18149_v43 }
 0x18d   :  { %v1206_v48 = vrot.slane %v1205_v33, 2  ;;  %v1255_v58 = vrot.slane %v1254_v26, 2  ;;  %21647 = vst [vmem:[#allocation38_spill] sm:$0xff] %v18365_v28  ;;  %v278_v37 = vrot.slane %v18154_v47, %v18365_v28 }
 0x18e   :  { %15298 = vmatpush3.bf16.msra.mxu1 %v18337_v56 }
 0x18f   :  { %v1207_v7 = vadd.f32 %v1206_v48, %v1205_v33  ;;  %v1256_v18 = vadd.f32 %v1255_v58, %v1254_v26  ;;  %15300 = vmatprep.subr.bf16.mxu1 %v18346_v25 }
 0x191   :  { %v1208_v21 = vrot.slane %v1207_v7, 1  ;;  %v1257_v24 = vrot.slane %v1256_v18, 1 }
 0x192   :  { %15302 = vmatpush3.bf16.msra.mxu1 %v18355_v2 }
 0x193   :  { %v1209_v60 = vadd.f32 %v1208_v21, %v1207_v7  ;;  %v1258_v61 = vadd.f32 %v1257_v24, %v1256_v18  ;;  %15304 = vmatprep.subr.bf16.mxu1 %v18358_v17 }
 0x195   :  { %v1378_v29 = vsel %vm1371_vm1, %v1258_v61, %v1209_v60 }
 0x196   :  { %15154 = vmatmul.mubr.msk.f32.vlgmr.msra.gmra.mrb[10].mxu0 %vm1385_vm4, %v1378_v29  ;;  %15306 = vmatpush3.bf16.msra.mxu1 %v18361_v0 }
 0x197   :  { %1835 = vmatprep.mubr.f32.mxu0 %v21548_v40 }
 0x19c   :  { %v986_v34 = vpop.f32.mrb[4].mxu0 }
 0x19d   :  { %v987_v33 = vadd.f32 %v986_v34, %v278_v37  ;;  %v988_v26 = vpop.f32.mrb[5].mxu0 }
 0x19e   :  { %v989_v48 = vadd.f32 %v988_v26, %v282_v52  ;;  %v990_v58 = vpop.f32.mrb[6].mxu0 }
 0x19f   :  { %v991_v4 = vpop.f32.mrb[7].mxu0 }
 0x1a0   :  { %v1058_v8 = vcombine.low %v987_v33, %v989_v48 }
 0x1a2   :  { %v1065_v7 = vrot.slane %v1058_v8, %v18177_v14 }
 0x1a4   :  { %v18380_v18 = vcombine.low %v1065_v7, %v18290_v49  ;;  %v18383_v21 = vcombine.high %v1065_v7, %v18290_v49 }
 0x1a6   :  { %v1103_v24 = vrot.slane %v18380_v18, %v18177_v14  ;;  %v1136_v47 = vrot.slane %v18383_v21, %v18177_v14 }
 0x1a8   :  { %v1111_v60 = vcombine.high %v1103_v24, %v1103_v24  ;;  %v1144_v61 = vcombine.high %v1136_v47, %v1136_v47  ;;  %v1188_v29 = vsel %vm1159_vm0, %v1103_v24, 0.0  ;;  %v1238_v37 = vsel %vm1159_vm0, %v1136_v47, 0.0 }
 0x1a9   :  { %v1189_v52 = vrot.slane %v1188_v29, 4  ;;  %v1239_v34 = vrot.slane %v1238_v37, 4 }
 0x1aa   :  { %v1195_v33 = vsel %vm1159_vm0, %v1111_v60, 0.0  ;;  %v1245_v26 = vsel %vm1159_vm0, %v1144_v61, 0.0 }
 0x1ab   :  { %v1190_v49 = vadd.f32 %v1189_v52, %v1188_v29  ;;  %v1240_v48 = vadd.f32 %v1239_v34, %v1238_v37  ;;  %v1196_v58 = vrot.slane %v1195_v33, 4  ;;  %v1246_v4 = vrot.slane %v1245_v26, 4 }
 0x1ad   :  { %v1197_v8 = vadd.f32 %v1196_v58, %v1195_v33  ;;  %v1247_v7 = vadd.f32 %v1246_v4, %v1245_v26  ;;  %v1191_v40 = vrot.slane %v1190_v49, 2  ;;  %v1241_v0 = vrot.slane %v1240_v48, 2 }
 0x1ae   :  { %v21649_v33 = vmov 0.0  }
 0x1af   :  { %v1198_v17 = vrot.slane %v1197_v8, 2  ;;  %v1248_v2 = vrot.slane %v1247_v7, 2  ;;  %v1192_v25 = vadd.f32 %v1191_v40, %v1190_v49  ;;  %v1242_v24 = vadd.f32 %v1241_v0, %v1240_v48  ;;  %v18399_v40 = vld [vmem:[%s21650_s7] sm:$0xff] }
 0x1b1   :  { %v1199_v56 = vadd.f32 %v1198_v17, %v1197_v8  ;;  %v1249_v47 = vadd.f32 %v1248_v2, %v1247_v7  ;;  %v1193_v57 = vrot.slane %v1192_v25, 1  ;;  %v1243_v22 = vrot.slane %v1242_v24, 1 }
 0x1b3   :  { %v1200_v5 = vrot.slane %v1199_v56, 1  ;;  %v1250_v60 = vrot.slane %v1249_v47, 1  ;;  %v1194_v53 = vadd.f32 %v1193_v57, %v1192_v25  ;;  %v1244_v61 = vadd.f32 %v1243_v22, %v1242_v24  ;;  %v18404_v22 = vld [vmem:[%s21650_s7 + $0x8] sm:$0xff]  ;;  %v18417_v57 = vld [vmem:[%s21650_s7 + $0x10] sm:$0xff] }
 0x1b5   :  { %v1201_v29 = vadd.f32 %v1200_v5, %v1199_v56  ;;  %v1251_v37 = vadd.f32 %v1250_v60, %v1249_v47  ;;  %v1376_v34 = vsel %vm1371_vm1, %v1244_v61, %v1194_v53  ;;  %v18408_v5 = vcombine.high %v18399_v40, %v18399_v40 }
 0x1b6   :  { %v18412_v53 = vcombine.high %v18404_v22, %v18404_v22  ;;  %v18425_v56 = vcombine.high %v18417_v57, %v18417_v57 }
 0x1b7   :  { %v1377_v52 = vsel %vm1371_vm1, %v1251_v37, %v1201_v29  ;;  %13547 = vmatprep.subr.msk.mxu1 %vm1685_vm5, %v18408_v5  ;;  %v18437_v29 = vld [vmem:[%s21650_s7 + $0x18] sm:$0xf] }
 0x1b8   :  { %1592 = vmatprep.mubr.f32.mxu1 %v1377_v52  ;;  %13550 = vmatprep.subr.msk.mxu0 %vm1685_vm5, %v18412_v53 }
 0x1b9   :  { %1593 = vmatmul.mubr.f32.vlgmr.msra.gmra.mrb[10].mxu1 %v1376_v34  ;;  %13551 = vmatpush1.msk.msra.mxu0 %vm1685_vm5, %v18404_v22 }
 0x1ba   :  { %1764 = vmatprep.mubr.f32.mxu1 %v21649_v33  ;;  %13548 = vmatpush1.msk.msra.mxu1 %vm1685_vm5, %v18399_v40 }
 0x1bb   :  { %13553 = vmatprep.subr.msk.mxu1 %vm1685_vm5, %v18425_v56  ;;  %15156 = vmatprep.subr.mxu0 %v21649_v33 }
 0x24c   :  { %v14485_v25 = vpop.f32.mrb[8].mxu1 }
 0x24d   :  { %v14520_v2 = vpop.f32.mrb[8].mxu0  ;;  %v14486_v17 = vpop.f32.mrb[9].mxu1 }
 0x24e   :  { %v14521_v0 = vpop.f32.mrb[9].mxu0  ;;  %v14487_v26 = vadd.f32 %v14486_v17, %v14485_v25 }
 0x24f   :  { %v14522_v49 = vadd.f32 %v14521_v0, %v14520_v2 }
 0x251   :  { %v1525_v48 = vadd.f32 %v14522_v49, %v14487_v26 }
 0x269   :  { %v1664_v58 = vpop.f32.mrb[10].mxu0 }
 0x26a   :  { %v15155_v4 = vpop.f32.mrb[11].mxu0 }
 0x28c   :  { %v14555_v8 = vpop.f32.mrb[10].mxu1 }
 0x28d   :  { %v14556_v7 = vpop.f32.mrb[11].mxu1 }
 0x28e   :  { %v14557_v24 = vadd.f32 %v14556_v7, %v14555_v8 }
 0x290   :  { %v1595_v47 = vadd.f32 %v14557_v24, %v1525_v48  ;;  %v21662_v24 = vld [vmem:[#allocation21_spill] sm:$0xff] }
 0x292   :  { %v1665_v60 = vadd.f32 %v1664_v58, %v1595_v47 }
 0x294   :  { %v1669_v61 = vmul.f32 0.0025510204, %v1665_v60  ;;  %v21663_v60 = vld [vmem:[#allocation23_spill] sm:$0xff] }
 0x296   :  { %13549 = vmatmul.mubr.msk.f32.vlgmr.msra.gmra.mrb[12].mxu1 %vm1681_vm6, %v1669_v61  ;;  %13552 = vmatmul.mubr.msk.f32.vlgmr.msra.gmra.mrb[12].mxu0 %vm1681_vm6, %v1669_v61 }
 0x297   :  { %13554 = vmatpush1.msk.msra.mxu1 %vm1685_vm5, %v18417_v57  ;;  %1906 = vmatprep.mubr.f32.mxu1 %v21649_v33 }
 0x298   :  { %15157 = vmatpush3.msk.msra.mxu0 %vm1685_vm5, %v18437_v29  ;;  %15158 = vmatprep.mubr.msk.f32.mxu0 %vm17328_vm2, %v21649_v33 }
 0x299   :  { %15311 = vmatprep.subr.bf16.mxu1 %v17816_v41  ;;  %15343 = vmatprep.subr.bf16.mxu0 %v17880_v62  ;;  %v21651_v41 = vld [vmem:[#allocation12_spill] sm:$0xff]  ;;  %v21653_v62 = vld [vmem:[#allocation14_spill] sm:$0xff] }
 0x29a   :  { %13555 = vmatmul.mubr.msk.f32.vlgmr.msra.gmra.mrb[14].mxu1 %vm1681_vm6, %v1669_v61  ;;  %15159 = vmatmul.mubr.msk.f32.vlgmr.msra.gmra.mrb[14].mxu0 %vm1681_vm6, %v1669_v61 }
 0x29b   :  { %15313 = vmatpush3.bf16.msra.mxu1 %v17824_v44  ;;  %15345 = vmatpush3.bf16.msra.mxu0 %v17882_v63  ;;  %v21652_v44 = vld [vmem:[#allocation13_spill] sm:$0xff]  ;;  %v21654_v63 = vld [vmem:[#allocation15_spill] sm:$0xff] }
 0x29c   :  { %15315 = vmatprep.subr.bf16.mxu1 %v17896_v3  ;;  %15347 = vmatprep.subr.bf16.mxu0 %v17914_v9  ;;  %v21655_v3 = vld [vmem:[#allocation16_spill] sm:$0xff]  ;;  %v21656_v9 = vld [vmem:[#allocation17_spill] sm:$0xff] }
 0x29f   :  { %15317 = vmatpush3.bf16.msra.mxu1 %v17916_v10  ;;  %15349 = vmatpush3.bf16.msra.mxu0 %v17918_v11  ;;  %v21657_v10 = vld [vmem:[#allocation18_spill] sm:$0xff]  ;;  %v21658_v11 = vld [vmem:[#allocation19_spill] sm:$0xff] }
 0x2a0   :  { %15319 = vmatprep.subr.bf16.mxu1 %v17931_v15  ;;  %15351 = vmatprep.subr.bf16.mxu0 %v17943_v19  ;;  %v21659_v15 = vld [vmem:[#allocation20_spill] sm:$0xff]  ;;  %v21660_v19 = vmov 0.0|0.0  }
 0x2a3   :  { %15321 = vmatpush3.bf16.msra.mxu1 %v17945_v20  ;;  %15353 = vmatpush3.bf16.msra.mxu0 %v17954_v23  ;;  %v17330_v20 = vmov 1966171168  }
 0x2a4   :  { %15323 = vmatprep.subr.bf16.mxu1 %v17967_v27  ;;  %15355 = vmatprep.subr.bf16.mxu0 %v17979_v31  ;;  %v1994_v23 = vunpack.c.l.s4 %v17330_v20 }
 0x2a6   :  { %v1995_v27 = vunpack.c.0.s8 %v1994_v23 }
 0x2a7   :  { %15325 = vmatpush3.bf16.msra.mxu1 %v17981_v32  ;;  %15357 = vmatpush3.bf16.msra.mxu0 %v17990_v35 }
 0x2a8   :  { %15327 = vmatprep.subr.bf16.mxu1 %v18003_v39  ;;  %15359 = vmatprep.subr.bf16.mxu0 %v18015_v45  ;;  %v18485_v31 = vsub.s32 %v1995_v27, %v18149_v43 }
 0x2aa   :  { %21661 = vst [vmem:[#allocation12_spill] sm:$0xff] %v18485_v31 }
 0x2ab   :  { %15329 = vmatpush3.bf16.msra.mxu1 %v18017_v46  ;;  %15361 = vmatpush3.bf16.msra.mxu0 %v18029_v50 }
 0x2ac   :  { %15331 = vmatprep.subr.bf16.mxu1 %v18041_v54  ;;  %15363 = vmatprep.subr.bf16.mxu0 %v18043_v55 }
 0x2af   :  { %15333 = vmatpush3.bf16.msra.mxu1 %v18055_v59  ;;  %15365 = vmatpush3.bf16.msra.mxu0 %v18068_v1 }
 0x2b0   :  { %15335 = vmatprep.subr.bf16.mxu1 %v21651_v41  ;;  %15367 = vmatprep.subr.bf16.mxu0 %v21652_v44  ;;  %v21664_v41 = vld [vmem:[#allocation22_spill] sm:$0xff] }
 0x2b3   :  { %15337 = vmatpush3.bf16.msra.mxu1 %v21653_v62  ;;  %15369 = vmatpush3.bf16.msra.mxu0 %v21654_v63  ;;  %v21665_v62 = vld [vmem:[#allocation24_spill] sm:$0xff] }
 0x2b4   :  { %15339 = vmatprep.subr.bf16.mxu1 %v21655_v3  ;;  %15371 = vmatprep.subr.bf16.mxu0 %v21656_v9 }
 0x2b7   :  { %15341 = vmatpush3.bf16.msra.mxu1 %v21657_v10  ;;  %15373 = vmatpush3.bf16.msra.mxu0 %v21658_v11 }
 0x2b8   :  { %15375 = vmatprep.subr.bf16.mxu1 %v21659_v15  ;;  %15406 = vmatprep.subr.bf16.mxu0 %v21660_v19 }
 0x369   :  { %v1766_v32 = vpop.f32.mrb[12].mxu1  ;;  %v1837_v35 = vpop.f32.mrb[12].mxu0 }
 0x36a   :  { %v1768_v39 = vpop.f32.mrb[13].mxu1  ;;  %v1839_v45 = vpop.f32.mrb[13].mxu0 }
 0x36b   :  { %v1990_v46 = vcombine.low %v1766_v32, %v1768_v39  ;;  %v1991_v50 = vcombine.low %v1837_v35, %v1839_v45 }
 0x36d   :  { %v1999_v54 = vrot.slane %v1990_v46, %v18485_v31  ;;  %v2006_v55 = vrot.slane %v1991_v50, %v18485_v31  ;;  %v1908_v59 = vpop.f32.mrb[14].mxu1  ;;  %v1979_v1 = vpop.f32.mrb[14].mxu0 }
 0x36e   :  { %v1910_v37 = vpop.f32.mrb[15].mxu1  ;;  %v15160_v52 = vpop.f32.mrb[15].mxu0  ;;  %v2020_v43 = vrot.slane %v1979_v1, %v18485_v31 }
 0x36f   :  { %v2021_v34 = vcombine.low %v1999_v54, %v2006_v55  ;;  %v2022_v25 = vcombine.high %v1999_v54, %v2006_v55  ;;  %v1992_v2 = vcombine.low %v1908_v59, %v1910_v37 }
 0x371   :  { %v2013_v17 = vrot.slane %v1992_v2, %v18485_v31  ;;  %v2031_v49 = vrot.slane %v2021_v34, %v18485_v31  ;;  %v2038_v48 = vrot.slane %v2022_v25, %v18485_v31 }
 0x373   :  { %v2023_v0 = vcombine.low %v2013_v17, %v2020_v43  ;;  %v2024_v26 = vcombine.high %v2013_v17, %v2020_v43  ;;  %v21666_v17 = vld [vmem:[#allocation26_spill] sm:$0xff] }
 0x375   :  { %v2045_v58 = vrot.slane %v2023_v0, %v18485_v31  ;;  %v2052_v4 = vrot.slane %v2024_v26, %v18485_v31 }
 0x377   :  { %v2053_v8 = vcombine.low %v2031_v49, %v2045_v58  ;;  %v2054_v7 = vcombine.low %v2038_v48, %v2052_v4  ;;  %v21667_v48 = vld [vmem:[#allocation27_spill] sm:$0xff] }
 0x379   :  { %v2058_v47 = vrot.slane %v2053_v8, %v21662_v24  ;;  %v2062_v61 = vrot.slane %v2053_v8, %v21663_v60  ;;  %v2066_v44 = vrot.slane %v2053_v8, %v21664_v41  ;;  %v2070_v63 = vrot.slane %v2053_v8, %v21665_v62 }
 0x37a   :  { %v2086_v3 = vrot.slane %v2054_v7, %v21662_v24  ;;  %v2090_v9 = vrot.slane %v2054_v7, %v21663_v60  ;;  %v2094_v10 = vrot.slane %v2054_v7, %v21664_v41  ;;  %v2098_v11 = vrot.slane %v2054_v7, %v21665_v62 }
 0x37b   :  { %v2111_v15 = vcombine.low %v2058_v47, %v2062_v61  ;;  %v2112_v20 = vcombine.low %v2066_v44, %v2070_v63  ;;  %v2074_v23 = vrot.slane %v2053_v8, %v18365_v28  ;;  %v2078_v27 = vrot.slane %v2053_v8, %v18369_v36 }
 0x37c   :  { %v2144_v32 = vcombine.low %v2086_v3, %v2090_v9  ;;  %v2145_v35 = vcombine.low %v2094_v10, %v2098_v11  ;;  %v2082_v39 = vrot.slane %v2053_v8, %v18236_v6  ;;  %v2102_v45 = vrot.slane %v2054_v7, %v18365_v28 }
 0x37d   :  { %v2119_v46 = vrot.slane %v2111_v15, %v18177_v14  ;;  %v2126_v50 = vrot.slane %v2112_v20, %v18177_v14  ;;  %v2106_v54 = vrot.slane %v2054_v7, %v18369_v36  ;;  %v2110_v55 = vrot.slane %v2054_v7, %v18236_v6 }
 0x37e   :  { %v2152_v59 = vrot.slane %v2144_v32, %v18177_v14  ;;  %v2159_v1 = vrot.slane %v2145_v35, %v18177_v14  ;;  %v2128_v37 = vcombine.low %v2074_v23, %v2078_v27  ;;  %v2142_v43 = vrot.slane %v2082_v39, %v18177_v14 }
 0x37f   :  { %v2127_v52 = vcombine.low %v2119_v46, %v2126_v50  ;;  %v2161_v34 = vcombine.low %v2102_v45, %v2106_v54  ;;  %v2175_v49 = vrot.slane %v2110_v55, %v18177_v14 }
 0x380   :  { %v2160_v25 = vcombine.low %v2152_v59, %v2159_v1  ;;  %v2135_v2 = vrot.slane %v2128_v37, %v18177_v14 }
 0x381   :  { %v18516_v0 = vsub.f32 %v21666_v17, %v2127_v52  ;;  %v2168_v26 = vrot.slane %v2161_v34, %v18177_v14 }
 0x382   :  { %v18521_v58 = vsub.f32 %v21667_v48, %v2160_v25  ;;  %v2143_v4 = vcombine.low %v2135_v2, %v2142_v43 }
 0x383   :  { %v2185_v8 = vmul.f32 %v18516_v0, %v18516_v0  ;;  %v2176_v7 = vcombine.low %v2168_v26, %v2175_v49 }
 0x384   :  { %v2187_v47 = vmul.f32 %v18521_v58, %v18521_v58  ;;  %v18528_v61 = vsub.f32 %v18380_v18, %v2143_v4 }
 0x385   :  { %v2200_v44 = vrot.slane %v2185_v8, %v18177_v14  ;;  %v2193_v63 = vcombine.high %v2185_v8, %v2185_v8  ;;  %v18532_v3 = vsub.f32 %v18383_v21, %v2176_v7 }
 0x386   :  { %21668 = vst [vmem:[#allocation13_spill] sm:$0xff] %v18528_v61  ;;  %v2233_v9 = vrot.slane %v2187_v47, %v18177_v14  ;;  %v2226_v10 = vcombine.high %v2187_v47, %v2187_v47  ;;  %v18537_v11 = vmul.f32 %v18528_v61, %v18528_v61 }
 0x387   :  { %21669 = vst [vmem:[#allocation14_spill] sm:$0xff] %v18532_v3  ;;  %v2208_v15 = vcombine.high %v2200_v44, %v2200_v44  ;;  %v2273_v20 = vsel %vm1159_vm0, %v2200_v44, 0.0  ;;  %v2207_v23 = vrot.slane %v2193_v63, %v18177_v14  ;;  %v18543_v18 = vmul.f32 %v18532_v3, %v18532_v3 }
 0x388   :  { %v2241_v27 = vcombine.high %v2233_v9, %v2233_v9  ;;  %v2274_v32 = vrot.slane %v2273_v20, 4  ;;  %v2322_v21 = vsel %vm1159_vm0, %v2233_v9, 0.0  ;;  %v2240_v35 = vrot.slane %v2226_v10, %v18177_v14 }
 0x389   :  { %v2280_v39 = vsel %vm1159_vm0, %v2208_v15, 0.0  ;;  %v2323_v45 = vrot.slane %v2322_v21, 4  ;;  %v2209_v46 = vcombine.high %v2207_v23, %v2207_v23  ;;  %v18550_v50 = vrot.slane %v18537_v11, %v18177_v14 }
 0x38a   :  { %v2281_v54 = vrot.slane %v2280_v39, 4  ;;  %v2329_v55 = vsel %vm1159_vm0, %v2241_v27, 0.0  ;;  %v2275_v59 = vadd.f32 %v2274_v32, %v2273_v20  ;;  %v2242_v1 = vcombine.high %v2240_v35, %v2240_v35 }
 0x38b   :  { %v2330_v37 = vrot.slane %v2329_v55, 4  ;;  %v2324_v52 = vadd.f32 %v2323_v45, %v2322_v21  ;;  %v2294_v34 = vsel %vm1159_vm0, %v2209_v46, 0.0  ;;  %v2225_v25 = vcombine.high %v18550_v50, %v18550_v50 }
 0x38c   :  { %v2282_v2 = vadd.f32 %v2281_v54, %v2280_v39  ;;  %v2276_v43 = vrot.slane %v2275_v59, 2  ;;  %v2295_v17 = vrot.slane %v2294_v34, 4  ;;  %v2343_v26 = vsel %vm1159_vm0, %v2242_v1, 0.0 }
 0x38d   :  { %v2331_v49 = vadd.f32 %v2330_v37, %v2329_v55  ;;  %v2325_v48 = vrot.slane %v2324_v52, 2  ;;  %v2344_v4 = vrot.slane %v2343_v26, 4  ;;  %v18559_v8 = vrot.slane %v18543_v18, %v18177_v14 }
 0x38e   :  { %v2283_v7 = vrot.slane %v2282_v2, 2  ;;  %v2277_v47 = vadd.f32 %v2276_v43, %v2275_v59  ;;  %v2296_v44 = vadd.f32 %v2295_v17, %v2294_v34  ;;  %v2308_v63 = vsel %vm1159_vm0, %v2225_v25, 0.0 }
 0x38f   :  { %v2332_v9 = vrot.slane %v2331_v49, 2  ;;  %v2326_v10 = vadd.f32 %v2325_v48, %v2324_v52  ;;  %v2345_v15 = vadd.f32 %v2344_v4, %v2343_v26  ;;  %v2258_v20 = vcombine.high %v18559_v8, %v18559_v8 }
 0x390   :  { %v2284_v27 = vadd.f32 %v2283_v7, %v2282_v2  ;;  %v2278_v32 = vrot.slane %v2277_v47, 1  ;;  %v2297_v21 = vrot.slane %v2296_v44, 2  ;;  %v2309_v39 = vrot.slane %v2308_v63, 4 }
 0x391   :  { %v2333_v45 = vadd.f32 %v2332_v9, %v2331_v49  ;;  %v2327_v46 = vrot.slane %v2326_v10, 1  ;;  %v2346_v54 = vrot.slane %v2345_v15, 2  ;;  %v2357_v55 = vsel %vm1159_vm0, %v2258_v20, 0.0 }
 0x392   :  { %v2285_v1 = vrot.slane %v2284_v27, 1  ;;  %v2279_v59 = vadd.f32 %v2278_v32, %v2277_v47  ;;  %v2298_v37 = vadd.f32 %v2297_v21, %v2296_v44  ;;  %v2310_v34 = vadd.f32 %v2309_v39, %v2308_v63 }
 0x393   :  { %v2334_v25 = vrot.slane %v2333_v45, 1  ;;  %v2328_v43 = vadd.f32 %v2327_v46, %v2326_v10  ;;  %v2347_v52 = vadd.f32 %v2346_v54, %v2345_v15  ;;  %v2358_v17 = vrot.slane %v2357_v55, 4 }
 0x394   :  { %v2286_v26 = vadd.f32 %v2285_v1, %v2284_v27  ;;  %v2299_v48 = vrot.slane %v2298_v37, 1  ;;  %v2311_v4 = vrot.slane %v2310_v34, 2  ;;  %v2287_v2 = vsel %vm1159_vm0, %v2207_v23, 0.0 }
 0x395   :  { %v2335_v7 = vadd.f32 %v2334_v25, %v2333_v45  ;;  %v2385_v49 = vsel %vm1371_vm1, %v2328_v43, %v2279_v59  ;;  %v2348_v9 = vrot.slane %v2347_v52, 1  ;;  %v2359_v19 = vadd.f32 %v2358_v17, %v2357_v55 }
 0x396   :  { %v2300_v3 = vadd.f32 %v2299_v48, %v2298_v37  ;;  %v2312_v20 = vadd.f32 %v2311_v4, %v2310_v34  ;;  %v2288_v61 = vrot.slane %v2287_v2, 4  ;;  %v2336_v47 = vsel %vm1159_vm0, %v2240_v35, 0.0 }
 0x397   :  { %v2386_v44 = vsel %vm1371_vm1, %v2335_v7, %v2286_v26  ;;  %v2349_v63 = vadd.f32 %v2348_v9, %v2347_v52  ;;  %v2360_v10 = vrot.slane %v2359_v19, 2  ;;  %v2337_v15 = vrot.slane %v2336_v47, 4 }
 0x398   :  { %2464 = vmatprep.mubr.f32.mxu1 %v2386_v44  ;;  %v2313_v27 = vrot.slane %v2312_v20, 1  ;;  %v2289_v32 = vadd.f32 %v2288_v61, %v2287_v2  ;;  %v2210_v23 = vcombine.high %v18537_v11, %v18537_v11  ;;  %v2243_v21 = vcombine.high %v18543_v18, %v18543_v18 }
 0x399   :  { %2465 = vmatmul.mubr.f32.vlgmr.msra.gmra.mrb[16].mxu1 %v2385_v49  ;;  %v2388_v39 = vsel %vm1371_vm1, %v2349_v63, %v2300_v3  ;;  %v2361_v45 = vadd.f32 %v2360_v10, %v2359_v19  ;;  %v2338_v46 = vadd.f32 %v2337_v15, %v2336_v47  ;;  %v2301_v11 = vsel %vm1159_vm0, %v18550_v50, 0.0  ;;  %v21670_v10 = vld [vmem:[#allocation29_spill] sm:$0xff] }
 0x39a   :  { %15377 = vmatpush3.bf16.msra.mxu1 %v18203_v13  ;;  %2534 = vmatprep.mubr.f32.mxu0 %v2388_v39  ;;  %v2290_v35 = vrot.slane %v2289_v32, 2  ;;  %v2224_v54 = vrot.slane %v2210_v23, %v18177_v14  ;;  %v2257_v55 = vrot.slane %v2243_v21, %v18177_v14  ;;  %v2314_v61 = vadd.f32 %v2313_v27, %v2312_v20  ;;  %v21671_v27 = vld [vmem:[#allocation30_spill] sm:$0xff]  ;;  %v21673_v21 = vld [vmem:[#allocation32_spill] sm:$0xff] }
 0x39b   :  { %v2362_v1 = vrot.slane %v2361_v45, 1  ;;  %v2339_v59 = vrot.slane %v2338_v46, 2  ;;  %15379 = vmatprep.subr.bf16.mxu1 %v18238_v12  ;;  %v2350_v13 = vsel %vm1159_vm0, %v18559_v8, 0.0  ;;  %v2302_v4 = vrot.slane %v2301_v11, 4 }
 0x39c   :  { %v2291_v18 = vadd.f32 %v2290_v35, %v2289_v32  ;;  %v2315_v19 = vsel %vm1202_vm3, %v2224_v54, 0.0  ;;  %v2364_v3 = vsel %vm1202_vm3, %v2257_v55, 0.0  ;;  %v2351_v2 = vrot.slane %v2350_v13, 4  ;;  %v21676_v55 = vld [vmem:[#allocation35_spill] sm:$0xff] }
 0x39d   :  { %v2363_v37 = vadd.f32 %v2362_v1, %v2361_v45  ;;  %v2340_v34 = vadd.f32 %v2339_v59, %v2338_v46  ;;  %v2316_v25 = vrot.slane %v2315_v19, 4  ;;  %v2365_v43 = vrot.slane %v2364_v3, 4  ;;  %v21675_v46 = vld [vmem:[#allocation34_spill] sm:$0xff] }
 0x39e   :  { %v2292_v52 = vrot.slane %v2291_v18, 1  ;;  %15381 = vmatpush3.bf16.msra.mxu1 %v18249_v42  ;;  %v2303_v47 = vadd.f32 %v2302_v4, %v2301_v11  ;;  %v2352_v44 = vadd.f32 %v2351_v2, %v2350_v13  ;;  %v16030_v13 = vld [vmem:[%s21679_s30 + $0x7c] ss:$28 sps:$4 sm:$0xff]  }
 0x39f   :  { %v2390_v12 = vsel %vm1371_vm1, %v2363_v37, %v2314_v61  ;;  %v2341_v17 = vrot.slane %v2340_v34, 1  ;;  %v2317_v26 = vadd.f32 %v2316_v25, %v2315_v19  ;;  %v2366_v50 = vadd.f32 %v2365_v43, %v2364_v3  ;;  %15383 = vmatprep.subr.bf16.mxu1 %v18259_v51  ;;  %v21677_v61 = vld [vmem:[#allocation36_spill] sm:$0xff]  ;;  %v16022_v3 = vld [vmem:[%s21679_s30 + $0x40] ss:$28 sps:$4 sm:$0xff]   ;;  %v16028_v37 = vld [vmem:[%s21679_s30 + $0x78] ss:$28 sps:$4 sm:$0xff]  }
 0x3a0   :  { %2604 = vmatprep.mubr.f32.mxu1 %v2390_v12  ;;  %v2293_v48 = vadd.f32 %v2292_v52, %v2291_v18  ;;  %v2353_v32 = vrot.slane %v2352_v44, 2  ;;  %v16018_v18 = vld [vmem:[%s21679_s30 + $0xc] ss:$28 sps:$4 sm:$0xff]   ;;  %v16024_v19 = vld [vmem:[%s21679_s30 + $0x44] ss:$28 sps:$4 sm:$0xff]  }
 0x3a1   :  { %v2342_v7 = vadd.f32 %v2341_v17, %v2340_v34  ;;  %v2318_v8 = vrot.slane %v2317_v26, 2  ;;  %v2367_v49 = vrot.slane %v2366_v50, 2  ;;  %v16036_v34 = vld [vmem:[%s21679_s30 + $0xb4] ss:$28 sps:$4 sm:$0xff]   ;;  %v16042_v43 = vld [vmem:[%s21679_s30 + $0xec] ss:$28 sps:$4 sm:$0xff]  }
 0x3a2   :  { %15385 = vmatpush3.bf16.msra.mxu1 %v18272_v38  ;;  %v2354_v45 = vadd.f32 %v2353_v32, %v2352_v44  ;;  %v16034_v25 = vld [vmem:[%s21679_s30 + $0xb0] ss:$28 sps:$4 sm:$0xff]   ;;  %v16040_v52 = vld [vmem:[%s21679_s30 + $0xe8] ss:$28 sps:$4 sm:$0xff]   ;;  %v16046_v17 = vld [vmem:[%s21679_s30 + $0x120] ss:$28 sps:$4 sm:$0xff]  }
 0x3a3   :  { %v2387_v9 = vsel %vm1371_vm1, %v2342_v7, %v2293_v48  ;;  %v2319_v20 = vadd.f32 %v2318_v8, %v2317_v26  ;;  %v2368_v42 = vadd.f32 %v2367_v49, %v2366_v50  ;;  %15387 = vmatprep.subr.bf16.mxu1 %v18281_v30  ;;  %v2304_v30 = vrot.slane %v2303_v47, 2  ;;  %v16048_v12 = vld [vmem:[%s21679_s30 + $0x124] ss:$28 sps:$4 sm:$0xff]   ;;  %v16025_v32 = vld [vmem:[%s21679_s30 + $0x70] ss:$28 sps:$4 sm:$0xff]  }
 0x3a4   :  { %2535 = vmatmul.mubr.f32.vlgmr.msra.gmra.mrb[16].mxu0 %v2387_v9  ;;  %v2355_v54 = vrot.slane %v2354_v45, 1 }
 0x3a5   :  { %15408 = vmatpush3.bf16.msra.mxu0 %v18205_v16  ;;  %15165 = vmatprep.mubr.msk.f32.mxu0 %vm17328_vm2, %v21649_v33  ;;  %v2320_v51 = vrot.slane %v2319_v20, 1  ;;  %v2369_v63 = vrot.slane %v2368_v42, 1  ;;  %v21672_v16 = vld [vmem:[#allocation31_spill] sm:$0xff]  ;;  %v2305_v39 = vadd.f32 %v2304_v30, %v2303_v47 }
 0x3a6   :  { %15389 = vmatpush3.bf16.msra.mxu1 %v21670_v10  ;;  %13560 = vmatprep.subr.msk.mxu0 %vm1685_vm5, %v18408_v5  ;;  %v21674_v5 = vld [vmem:[#allocation33_spill] sm:$0xff]  ;;  %v2356_v59 = vadd.f32 %v2355_v54, %v2354_v45  ;;  %v16015_v30 = vld [vmem:[%s21679_s30 + $0x4] ss:$28 sps:$4 sm:$0xff]   ;;  %v16045_v45 = vld [vmem:[%s21679_s30 + $0x11c] ss:$28 sps:$4 sm:$0xff]  }
 0x3a7   :  { %v2321_v38 = vadd.f32 %v2320_v51, %v2319_v20  ;;  %v2370_v15 = vadd.f32 %v2369_v63, %v2368_v42  ;;  %15391 = vmatprep.subr.bf16.mxu1 %v21671_v27  ;;  %v2306_v35 = vrot.slane %v2305_v39, 1  ;;  %v16052_v54 = vld [vmem:[%s21679_s30 + $0x158] ss:$28 sps:$4 sm:$0xff]  }
 0x3a9   :  { %v2391_v23 = vsel %vm1371_vm1, %v2370_v15, %v2321_v38  ;;  %v2307_v1 = vadd.f32 %v2306_v35, %v2305_v39  ;;  %v13559_v38 = vld [vmem:[%s21680_s6] ss:$0 sm:$0xff]  ;;  %v16051_v35 = vld [vmem:[%s21679_s30 + $0x154] ss:$28 sps:$4 sm:$0xff]  }
 0x3aa   :  { %15166 = vmatmul.mubr.msk.f32.vlgmr.msra.gmra.mrb[18].mxu0 %vm1385_vm4, %v2391_v23  ;;  %15393 = vmatpush3.bf16.msra.mxu1 %v21672_v16  ;;  %v16033_v23 = vld [vmem:[%s21679_s30 + $0xac] ss:$28 sps:$4 sm:$0xff]   ;;  %v16037_v39 = vld [vmem:[%s21679_s30 + $0xe0] ss:$28 sps:$4 sm:$0xff]  }
 0x3ab   :  { %15395 = vmatprep.subr.bf16.mxu1 %v21673_v21  ;;  %13561 = vmatpush1.msk.msra.mxu0 %vm1685_vm5, %v18399_v40  ;;  %v21678_v40 = vld [vmem:[#allocation37_spill] sm:$0xff]  ;;  %v2389_v11 = vsel %vm1371_vm1, %v2356_v59, %v2307_v1  ;;  %v16031_v16 = vld [vmem:[%s21679_s30 + $0xa8] ss:$28 sps:$4 sm:$0xff]  }
 0x3ac   :  { %2758 = vmatprep.mubr.f32.mxu0 %v21649_v33  ;;  %13563 = vmatprep.subr.msk.mxu0 %vm1685_vm5, %v18412_v53  ;;  %v16016_v53 = vld [vmem:[%s21679_s30 + $0x8] ss:$28 sps:$4 sm:$0xff]   ;;  %v16058_v59 = vld [vmem:[%s21679_s30 + $0x190] ss:$28 sps:$4 sm:$0xff]  }
 0x3ad   :  { %v16039_v21 = vld [vmem:[%s21679_s30 + $0xe4] ss:$28 sps:$4 sm:$0xff]   ;;  %v16057_v1 = vld [vmem:[%s21679_s30 + $0x18c] ss:$28 sps:$4 sm:$0xff]  }
 0x3ae   :  { %15397 = vmatpush3.bf16.msra.mxu1 %v21674_v5  ;;  %v16043_v5 = vld [vmem:[%s21679_s30 + $0x118] ss:$28 sps:$4 sm:$0xff]  }
 0x3af   :  { %15399 = vmatprep.subr.bf16.mxu1 %v21675_v46  ;;  %v16049_v46 = vld [vmem:[%s21679_s30 + $0x150] ss:$28 sps:$4 sm:$0xff]  }
 0x3b2   :  { %15401 = vmatpush3.bf16.msra.mxu1 %v21676_v55  ;;  %v16054_v55 = vld [vmem:[%s21679_s30 + $0x15c] ss:$28 sps:$4 sm:$0xff]  }
 0x3b3   :  { %15403 = vmatprep.subr.bf16.mxu1 %v21677_v61  ;;  %v16055_v61 = vld [vmem:[%s21679_s30 + $0x188] ss:$28 sps:$4 sm:$0xff]  }
 0x3b6   :  { %15405 = vmatpush3.bf16.msra.mxu1 %v21678_v40  ;;  %v16060_v40 = vld [vmem:[%s21679_s30 + $0x194] ss:$28 sps:$4 sm:$0xff]  }
 0x3b7   :  { %5665 = vmatprep.subr.bf16.mxu1 %v16018_v18  ;;  %v16061_v18 = vld [vmem:[%s21679_s30 + $0x1c0] ss:$28 sps:$4 sm:$0xff]  }
 0x3b9   :  { %2605 = vmatmul.mubr.f32.vlgmr.msra.gmra.mrb[18].mxu1 %v2389_v11  ;;  %v16063_v11 = vld [vmem:[%s21679_s30 + $0x1c4] ss:$28 sps:$4 sm:$0xff]  }
 0x3ba   :  { %5666 = vmatpush1.bf16.msra.mxu1 %v16016_v53  ;;  %v16066_v53 = vld [vmem:[%s21679_s30 + $0x1cc] ss:$28 sps:$4 sm:$0xff]  }
 0x3bb   :  { %5667 = vmatprep.subr.bf16.mxu1 %v16024_v19  ;;  %v16064_v19 = vld [vmem:[%s21679_s30 + $0x1c8] ss:$28 sps:$4 sm:$0xff]  }
 0x3be   :  { %5668 = vmatpush1.bf16.msra.mxu1 %v16022_v3  ;;  %v16067_v3 = vld [vmem:[%s21679_s30 + $0x1f8] ss:$28 sps:$4 sm:$0xff]  }
 0x3bf   :  { %5669 = vmatprep.subr.bf16.mxu1 %v16030_v13  ;;  %v16069_v13 = vld [vmem:[%s21679_s30 + $0x1fc] ss:$28 sps:$4 sm:$0xff]  }
 0x3c2   :  { %5670 = vmatpush1.bf16.msra.mxu1 %v16028_v37  ;;  %v16070_v37 = vld [vmem:[%s21679_s30 + $0x200] ss:$28 sps:$4 sm:$0xff]  }
 0x3c3   :  { %5671 = vmatprep.subr.bf16.mxu1 %v16036_v34  ;;  %v16072_v34 = vld [vmem:[%s21679_s30 + $0x204] ss:$28 sps:$4 sm:$0xff]  }
 0x3c6   :  { %5672 = vmatpush1.bf16.msra.mxu1 %v16034_v25  ;;  %v16075_v25 = vld [vmem:[%s21679_s30 + $0x234] ss:$28 sps:$4 sm:$0xff]  }
 0x3c7   :  { %5673 = vmatprep.subr.bf16.mxu1 %v16042_v43  ;;  %v16078_v43 = vld [vmem:[%s21679_s30 + $0x23c] ss:$28 sps:$4 sm:$0xff]  }
 0x3ca   :  { %5674 = vmatpush1.bf16.msra.mxu1 %v16040_v52  ;;  %v16073_v52 = vld [vmem:[%s21679_s30 + $0x230] ss:$28 sps:$4 sm:$0xff]  }
 0x3cb   :  { %5675 = vmatprep.subr.bf16.mxu1 %v16048_v12  ;;  %v16076_v12 = vld [vmem:[%s21679_s30 + $0x238] ss:$28 sps:$4 sm:$0xff]  }
 0x3ce   :  { %5676 = vmatpush1.bf16.msra.mxu1 %v16046_v17  ;;  %v16081_v17 = vld [vmem:[%s21679_s30 + $0x26c] ss:$28 sps:$4 sm:$0xff]  }
 0x3cf   :  { %5677 = vmatprep.subr.bf16.mxu1 %v16054_v55 }
 0x3d2   :  { %5678 = vmatpush1.bf16.msra.mxu1 %v16052_v54 }
 0x3d3   :  { %5679 = vmatprep.subr.bf16.mxu1 %v16060_v40 }
 0x3d6   :  { %5680 = vmatpush1.bf16.msra.mxu1 %v16058_v59 }
 0x3d7   :  { %5681 = vmatprep.subr.bf16.mxu1 %v16066_v53 }
 0x3da   :  { %5682 = vmatpush1.bf16.msra.mxu1 %v16064_v19 }
 0x3db   :  { %5683 = vmatprep.subr.bf16.mxu1 %v16072_v34 }
 0x3de   :  { %5684 = vmatpush1.bf16.msra.mxu1 %v16070_v37 }
 0x3df   :  { %5685 = vmatprep.subr.bf16.mxu1 %v16078_v43 }
 0x3e2   :  { %5686 = vmatpush1.bf16.msra.mxu1 %v16076_v12 }
 0x46c   :  { %v14595_v26 = vpop.f32.mrb[16].mxu1 }
 0x46d   :  { %v14596_v50 = vpop.f32.mrb[17].mxu1 }
 0x46e   :  { %v14597_v48 = vadd.f32 %v14596_v50, %v14595_v26  ;;  %v16084_v26 = vld [vmem:[%s21679_s30 + $0x274] ss:$28 sps:$4 sm:$0xff]   ;;  %v16079_v50 = vld [vmem:[%s21679_s30 + $0x268] ss:$28 sps:$4 sm:$0xff]  }
 0x46f   :  { %5687 = vmatprep.subr.bf16.mxu1 %v16084_v26 }
 0x477   :  { %v14630_v4 = vpop.f32.mrb[16].mxu0 }
 0x478   :  { %v14631_v2 = vpop.f32.mrb[17].mxu0 }
 0x479   :  { %v14632_v7 = vadd.f32 %v14631_v2, %v14630_v4  ;;  %v16087_v4 = vld [vmem:[%s21679_s30 + $0x2a4] ss:$28 sps:$4 sm:$0xff]   ;;  %v16090_v2 = vld [vmem:[%s21679_s30 + $0x2ac] ss:$28 sps:$4 sm:$0xff]  }
 0x47b   :  { %v2537_v8 = vadd.f32 %v14632_v7, %v14597_v48  ;;  %v16082_v48 = vld [vmem:[%s21679_s30 + $0x270] ss:$28 sps:$4 sm:$0xff]   ;;  %v16085_v7 = vld [vmem:[%s21679_s30 + $0x2a0] ss:$28 sps:$4 sm:$0xff]  }
 0x47c   :  { %5688 = vmatpush1.bf16.msra.mxu1 %v16082_v48 }
 0x47d   :  { %v2676_v49 = vpop.f32.mrb[18].mxu0  ;;  %5689 = vmatprep.subr.bf16.mxu1 %v16090_v2 }
 0x47e   :  { %v15167_v9 = vpop.f32.mrb[19].mxu0 }
 0x47f   :  { %v16096_v9 = vld [vmem:[%s21679_s30 + $0x2e4] ss:$28 sps:$4 sm:$0xff]  }
 0x48c   :  { %v14665_v20 = vpop.f32.mrb[18].mxu1 }
 0x48d   :  { %v14666_v42 = vpop.f32.mrb[19].mxu1 }
 0x48e   :  { %v14667_v47 = vadd.f32 %v14666_v42, %v14665_v20  ;;  %v16091_v20 = vld [vmem:[%s21679_s30 + $0x2d8] ss:$28 sps:$4 sm:$0xff]   ;;  %v16094_v42 = vld [vmem:[%s21679_s30 + $0x2e0] ss:$28 sps:$4 sm:$0xff]  }
 0x490   :  { %v2607_v44 = vadd.f32 %v14667_v47, %v2537_v8  ;;  %v16088_v8 = vld [vmem:[%s21679_s30 + $0x2a8] ss:$28 sps:$4 sm:$0xff]   ;;  %v16099_v47 = vld [vmem:[%s21679_s30 + $0x314] ss:$28 sps:$4 sm:$0xff]  }
 0x491   :  { %5690 = vmatpush1.bf16.msra.mxu1 %v16088_v8 }
 0x492   :  { %v2677_v51 = vadd.f32 %v2676_v49, %v2607_v44  ;;  %v16093_v49 = vld [vmem:[%s21679_s30 + $0x2dc] ss:$28 sps:$4 sm:$0xff]   ;;  %5691 = vmatprep.subr.bf16.mxu1 %v16096_v9 }
 0x493   :  { %v16102_v44 = vld [vmem:[%s21679_s30 + $0x31c] ss:$28 sps:$4 sm:$0xff]  }
 0x494   :  { %v2680_v63 = vmul.f32 0.0025510204, %v2677_v51  ;;  %v16097_v51 = vld [vmem:[%s21679_s30 + $0x310] ss:$28 sps:$4 sm:$0xff]  }
 0x495   :  { %5692 = vmatpush1.bf16.msra.mxu1 %v16094_v42 }
 0x496   :  { %v2681_v10 = vadd.f32 1e-05, %v2680_v63  ;;  %v16100_v63 = vld [vmem:[%s21679_s30 + $0x318] ss:$28 sps:$4 sm:$0xff]   ;;  %5693 = vmatprep.subr.bf16.mxu1 %v16102_v44 }
 0x498   :  { %17219 = vrsqrt.f32 %v2681_v10  ;;  %v16105_v10 = vld [vmem:[%s21679_s30 + $0x34c] ss:$28 sps:$4 sm:$0xff]  }
 0x499   :  { %5694 = vmatpush1.bf16.msra.mxu1 %v16100_v63 }
 0x4a2   :  { %v17220_v15 = vpop.eup %17219 }
 0x4a3   :  { %v2690_v27 = vmul.f32 %v17220_v15, %v13559_v38  ;;  %v16108_v38 = vld [vmem:[%s21679_s30 + $0x354] ss:$28 sps:$4 sm:$0xff]   ;;  %v16103_v15 = vld [vmem:[%s21679_s30 + $0x348] ss:$28 sps:$4 sm:$0xff]  }
 0x4a4   :  { %5695 = vmatprep.subr.bf16.mxu1 %v16108_v38 }
 0x4a5   :  { %13562 = vmatmul.mubr.msk.f32.vlgmr.msra.gmra.mrb[20].mxu0 %vm1681_vm6, %v2690_v27 }
 0x4a6   :  { %13564 = vmatpush1.msk.msra.mxu0 %vm1685_vm5, %v18404_v22  ;;  %2829 = vmatprep.mubr.f32.mxu0 %v21649_v33  ;;  %v16013_v22 = vld [vmem:[%s21679_s30] ss:$28 sps:$4 sm:$0xff]  }
 0x4a7   :  { %13566 = vmatprep.subr.msk.mxu0 %vm1685_vm5, %v18425_v56  ;;  %v16019_v56 = vld [vmem:[%s21679_s30 + $0x38] ss:$28 sps:$4 sm:$0xff]  }
 0x4a9   :  { %13565 = vmatmul.mubr.msk.f32.vlgmr.msra.gmra.mrb[22].mxu0 %vm1681_vm6, %v2690_v27 }
 0x4aa   :  { %13567 = vmatpush1.msk.msra.mxu0 %vm1685_vm5, %v18417_v57  ;;  %2900 = vmatprep.mubr.f32.mxu0 %v21649_v33  ;;  %v16021_v57 = vld [vmem:[%s21679_s30 + $0x3c] ss:$28 sps:$4 sm:$0xff]  }
 0x4ab   :  { %15168 = vmatprep.subr.mxu0 %v21649_v33 }
 0x4ad   :  { %13568 = vmatmul.mubr.msk.f32.vlgmr.msra.gmra.mrb[24].mxu0 %vm1681_vm6, %v2690_v27 }
 0x4ae   :  { %15169 = vmatpush3.msk.msra.mxu0 %vm1685_vm5, %v18437_v29  ;;  %15170 = vmatprep.mubr.msk.f32.mxu0 %vm17328_vm2, %v21649_v33  ;;  %v16027_v29 = vld [vmem:[%s21679_s30 + $0x74] ss:$28 sps:$4 sm:$0xff]  }
 0x4af   :  { %5501 = vmatprep.subr.bf16.mxu0 %v16015_v30  ;;  %v16111_v30 = vld [vmem:[%s21679_s30 + $0x384] ss:$28 sps:$4 sm:$0xff]  }
 0x4b1   :  { %15171 = vmatmul.mubr.msk.f32.vlgmr.msra.gmra.mrb[26].mxu0 %vm1681_vm6, %v2690_v27  ;;  %v16106_v27 = vld [vmem:[%s21679_s30 + $0x350] ss:$28 sps:$4 sm:$0xff]  }
 0x4b2   :  { %5502 = vmatpush1.bf16.msra.mxu0 %v16013_v22  ;;  %v16114_v22 = vld [vmem:[%s21679_s30 + $0x38c] ss:$28 sps:$4 sm:$0xff]   ;;  %5696 = vmatpush1.bf16.msra.mxu1 %v16106_v27 }
 0x4b3   :  { %5503 = vmatprep.subr.bf16.mxu0 %v16021_v57  ;;  %5706 = vmatprep.subr.bf16.mxu1 %v16114_v22 }
 0x4b6   :  { %5504 = vmatpush1.bf16.msra.mxu0 %v16019_v56 }
 0x4b7   :  { %5505 = vmatprep.subr.bf16.mxu0 %v16027_v29 }
 0x4ba   :  { %5506 = vmatpush1.bf16.msra.mxu0 %v16025_v32 }
 0x4bb   :  { %5507 = vmatprep.subr.bf16.mxu0 %v16033_v23 }
 0x4be   :  { %5508 = vmatpush1.bf16.msra.mxu0 %v16031_v16 }
 0x4bf   :  { %5509 = vmatprep.subr.bf16.mxu0 %v16039_v21 }
 0x4c2   :  { %5510 = vmatpush1.bf16.msra.mxu0 %v16037_v39 }
 0x4c3   :  { %5511 = vmatprep.subr.bf16.mxu0 %v16045_v45 }
 0x4c6   :  { %5512 = vmatpush1.bf16.msra.mxu0 %v16043_v5  ;;  %v3179_v5 = vld [vmem:[%s21681_s13] sm:$0x7f] }
 0x4c7   :  { %5513 = vmatprep.subr.bf16.mxu0 %v16051_v35  ;;  %v3192_v59 = vrot.slane %v3179_v5, %v21664_v41  ;;  %v3196_v53 = vrot.slane %v3179_v5, %v21665_v62  ;;  %v3204_v19 = vrot.slane %v3179_v5, %v18369_v36  ;;  %v3208_v8 = vrot.slane %v3179_v5, %v18236_v6 }
 0x4c9   :  { %v3210_v43 = vcombine.low %v3192_v59, %v3196_v53 }
 0x4ca   :  { %5514 = vmatpush1.bf16.msra.mxu0 %v16049_v46 }
 0x4cb   :  { %5515 = vmatprep.subr.bf16.mxu0 %v16057_v1  ;;  %v3188_v1 = vrot.slane %v3179_v5, %v21663_v60 }
 0x4ce   :  { %5516 = vmatpush1.bf16.msra.mxu0 %v16055_v61  ;;  %v3184_v61 = vrot.slane %v3179_v5, %v21662_v24 }
 0x4cf   :  { %5517 = vmatprep.subr.bf16.mxu0 %v16063_v11 }
 0x4d2   :  { %5518 = vmatpush1.bf16.msra.mxu0 %v16061_v18  ;;  %v3200_v18 = vrot.slane %v3179_v5, %v18365_v28 }
 0x4d3   :  { %5519 = vmatprep.subr.bf16.mxu0 %v16069_v13 }
 0x4d6   :  { %5520 = vmatpush1.bf16.msra.mxu0 %v16067_v3 }
 0x4d7   :  { %5521 = vmatprep.subr.bf16.mxu0 %v16075_v25  ;;  %v3209_v25 = vcombine.low %v3184_v61, %v3188_v1 }
 0x4d9   :  { %v3217_v2 = vrot.slane %v3209_v25, %v18177_v14  ;;  %v21682_v25 = vld [vmem:[#allocation13_spill] sm:$0xff] }
 0x4da   :  { %5522 = vmatpush1.bf16.msra.mxu0 %v16073_v52  ;;  %v3226_v52 = vcombine.low %v3200_v18, %v3204_v19 }
 0x4db   :  { %5523 = vmatprep.subr.bf16.mxu0 %v16081_v17 }
 0x4de   :  { %5524 = vmatpush1.bf16.msra.mxu0 %v16079_v50 }
 0x4df   :  { %5525 = vmatprep.subr.bf16.mxu0 %v16087_v4 }
 0x4e2   :  { %5526 = vmatpush1.bf16.msra.mxu0 %v16085_v7  ;;  %v3224_v7 = vrot.slane %v3210_v43, %v18177_v14 }
 0x4e3   :  { %5527 = vmatprep.subr.bf16.mxu0 %v16093_v49  ;;  %v3233_v49 = vrot.slane %v3226_v52, %v18177_v14 }
 0x4e6   :  { %5528 = vmatpush1.bf16.msra.mxu0 %v16091_v20 }
 0x4e7   :  { %5529 = vmatprep.subr.bf16.mxu0 %v16099_v47 }
 0x4ea   :  { %5530 = vmatpush1.bf16.msra.mxu0 %v16097_v51 }
 0x4eb   :  { %5531 = vmatprep.subr.bf16.mxu0 %v16105_v10 }
 0x4ee   :  { %5532 = vmatpush1.bf16.msra.mxu0 %v16103_v15 }
 0x4ef   :  { %5542 = vmatprep.subr.bf16.mxu0 %v16111_v30 }
 0x578   :  { %v2760_v57 = vpop.f32.mrb[20].mxu0 }
 0x579   :  { %v2762_v56 = vpop.f32.mrb[21].mxu0 }
 0x57a   :  { %v2984_v29 = vcombine.low %v2760_v57, %v2762_v56 }
 0x57c   :  { %v2831_v32 = vpop.f32.mrb[22].mxu0  ;;  %v2993_v21 = vrot.slane %v2984_v29, %v18485_v31 }
 0x57d   :  { %v2833_v23 = vpop.f32.mrb[23].mxu0 }
 0x57e   :  { %v2985_v16 = vcombine.low %v2831_v32, %v2833_v23 }
 0x580   :  { %v3000_v39 = vrot.slane %v2985_v16, %v18485_v31  ;;  %v2902_v45 = vpop.f32.mrb[24].mxu0 }
 0x581   :  { %v2904_v46 = vpop.f32.mrb[25].mxu0 }
 0x582   :  { %v3015_v35 = vcombine.low %v2993_v21, %v3000_v39  ;;  %v3016_v54 = vcombine.high %v2993_v21, %v3000_v39  ;;  %v2986_v55 = vcombine.low %v2902_v45, %v2904_v46  ;;  %v3240_v46 = vrot.slane %v3208_v8, %v18177_v14 }
 0x584   :  { %v3007_v40 = vrot.slane %v2986_v55, %v18485_v31  ;;  %v2973_v11 = vpop.f32.mrb[26].mxu0  ;;  %v3025_v12 = vrot.slane %v3015_v35, %v18485_v31  ;;  %v3032_v17 = vrot.slane %v3016_v54, %v18485_v31  ;;  %v3225_v54 = vcombine.low %v3217_v2, %v3224_v7 }
 0x585   :  { %v3014_v3 = vrot.slane %v2973_v11, %v18485_v31  ;;  %v15172_v13 = vpop.f32.mrb[27].mxu0 }
 0x587   :  { %v3017_v37 = vcombine.low %v3007_v40, %v3014_v3  ;;  %v3018_v34 = vcombine.high %v3007_v40, %v3014_v3  ;;  %v3241_v3 = vcombine.low %v3233_v49, %v3240_v46  ;;  %v16136_v46 = vld [vmem:[%s21679_s30 + $0x468] ss:$28 sps:$4 sm:$0xff]  }
 0x589   :  { %v3039_v26 = vrot.slane %v3017_v37, %v18485_v31  ;;  %v3046_v50 = vrot.slane %v3018_v34, %v18485_v31 }
 0x58b   :  { %v3047_v48 = vcombine.low %v3025_v12, %v3039_v26  ;;  %v3048_v4 = vcombine.low %v3032_v17, %v3046_v50  ;;  %v21683_v12 = vld [vmem:[#allocation14_spill] sm:$0xff] }
 0x58d   :  { %v3052_v9 = vrot.slane %v3047_v48, %v21662_v24  ;;  %v3056_v20 = vrot.slane %v3047_v48, %v21663_v60  ;;  %v3060_v42 = vrot.slane %v3047_v48, %v21664_v41  ;;  %v3064_v47 = vrot.slane %v3047_v48, %v21665_v62 }
 0x58e   :  { %v3080_v44 = vrot.slane %v3048_v4, %v21662_v24  ;;  %v3084_v51 = vrot.slane %v3048_v4, %v21663_v60  ;;  %v3088_v63 = vrot.slane %v3048_v4, %v21664_v41  ;;  %v3092_v10 = vrot.slane %v3048_v4, %v21665_v62 }
 0x58f   :  { %v3105_v38 = vcombine.low %v3052_v9, %v3056_v20  ;;  %v3106_v15 = vcombine.low %v3060_v42, %v3064_v47  ;;  %v3068_v27 = vrot.slane %v3047_v48, %v18365_v28  ;;  %v3072_v30 = vrot.slane %v3047_v48, %v18369_v36 }
 0x590   :  { %v3138_v22 = vcombine.low %v3080_v44, %v3084_v51  ;;  %v3139_v57 = vcombine.low %v3088_v63, %v3092_v10  ;;  %v3076_v56 = vrot.slane %v3047_v48, %v18236_v6  ;;  %v3096_v29 = vrot.slane %v3048_v4, %v18365_v28  ;;  %v16109_v44 = vld [vmem:[%s21679_s30 + $0x380] ss:$28 sps:$4 sm:$0xff]   ;;  %v16112_v51 = vld [vmem:[%s21679_s30 + $0x388] ss:$28 sps:$4 sm:$0xff]  }
 0x591   :  { %v3113_v32 = vrot.slane %v3105_v38, %v18177_v14  ;;  %v3120_v23 = vrot.slane %v3106_v15, %v18177_v14  ;;  %v3100_v16 = vrot.slane %v3048_v4, %v18369_v36  ;;  %v3104_v21 = vrot.slane %v3048_v4, %v18236_v6  ;;  %v16117_v10 = vld [vmem:[%s21679_s30 + $0x3bc] ss:$28 sps:$4 sm:$0xff]   ;;  %v16120_v38 = vld [vmem:[%s21679_s30 + $0x3c4] ss:$28 sps:$4 sm:$0xff]  }
 0x592   :  { %v3146_v39 = vrot.slane %v3138_v22, %v18177_v14  ;;  %v3153_v45 = vrot.slane %v3139_v57, %v18177_v14  ;;  %v3122_v5 = vcombine.low %v3068_v27, %v3072_v30  ;;  %v3136_v59 = vrot.slane %v3076_v56, %v18177_v14  ;;  %v16115_v27 = vld [vmem:[%s21679_s30 + $0x3b8] ss:$28 sps:$4 sm:$0xff]   ;;  %v16118_v30 = vld [vmem:[%s21679_s30 + $0x3c0] ss:$28 sps:$4 sm:$0xff]   ;;  %v16121_v56 = vld [vmem:[%s21679_s30 + $0x3f0] ss:$28 sps:$4 sm:$0xff]  }
 0x593   :  { %v3121_v35 = vcombine.low %v3113_v32, %v3120_v23  ;;  %v3155_v55 = vcombine.low %v3096_v29, %v3100_v16  ;;  %v3169_v53 = vrot.slane %v3104_v21, %v18177_v14  ;;  %v16123_v22 = vld [vmem:[%s21679_s30 + $0x3f4] ss:$28 sps:$4 sm:$0xff]   ;;  %v16126_v57 = vld [vmem:[%s21679_s30 + $0x3fc] ss:$28 sps:$4 sm:$0xff]   ;;  %v16129_v32 = vld [vmem:[%s21679_s30 + $0x42c] ss:$28 sps:$4 sm:$0xff]  }
 0x594   :  { %v3154_v61 = vcombine.low %v3146_v39, %v3153_v45  ;;  %v3129_v1 = vrot.slane %v3122_v5, %v18177_v14  ;;  %v16124_v29 = vld [vmem:[%s21679_s30 + $0x3f8] ss:$28 sps:$4 sm:$0xff]   ;;  %v16127_v16 = vld [vmem:[%s21679_s30 + $0x428] ss:$28 sps:$4 sm:$0xff]   ;;  %v16130_v21 = vld [vmem:[%s21679_s30 + $0x430] ss:$28 sps:$4 sm:$0xff]  }
 0x595   :  { %v3175_v40 = vmul.f32 %v3121_v35, %v18516_v0  ;;  %v3162_v11 = vrot.slane %v3155_v55, %v18177_v14  ;;  %v16132_v23 = vld [vmem:[%s21679_s30 + $0x434] ss:$28 sps:$4 sm:$0xff]   ;;  %v16135_v39 = vld [vmem:[%s21679_s30 + $0x464] ss:$28 sps:$4 sm:$0xff]   ;;  %v16138_v45 = vld [vmem:[%s21679_s30 + $0x46c] ss:$28 sps:$4 sm:$0xff]  }
 0x596   :  { %v3177_v18 = vmul.f32 %v3154_v61, %v18521_v58  ;;  %v3137_v19 = vcombine.low %v3129_v1, %v3136_v59  ;;  %v16133_v5 = vld [vmem:[%s21679_s30 + $0x460] ss:$28 sps:$4 sm:$0xff]   ;;  %v16139_v55 = vld [vmem:[%s21679_s30 + $0x498] ss:$28 sps:$4 sm:$0xff]  }
 0x597   :  { %v3244_v13 = vadd.f32 %v3225_v54, %v3175_v40  ;;  %v3170_v37 = vcombine.low %v3162_v11, %v3169_v53  ;;  %v16141_v35 = vld [vmem:[%s21679_s30 + $0x49c] ss:$28 sps:$4 sm:$0xff]   ;;  %v16147_v1 = vld [vmem:[%s21679_s30 + $0x4d4] ss:$28 sps:$4 sm:$0xff]   ;;  %v16153_v53 = vld [vmem:[%s21679_s30 + $0x50c] ss:$28 sps:$4 sm:$0xff]  }
 0x598   :  { %v3246_v34 = vadd.f32 %v3225_v54, %v3177_v18  ;;  %v3176_v43 = vmul.f32 %v3137_v19, %v21682_v25  ;;  %v16144_v54 = vld [vmem:[%s21679_s30 + $0x4a4] ss:$28 sps:$4 sm:$0xff]   ;;  %v16150_v59 = vld [vmem:[%s21679_s30 + $0x4dc] ss:$28 sps:$4 sm:$0xff]   ;;  %v16145_v40 = vld [vmem:[%s21679_s30 + $0x4d0] ss:$28 sps:$4 sm:$0xff]  }
 0x599   :  { %v3248_v52 = vmax.f32 %v3244_v13, 0.0  ;;  %v3178_v17 = vmul.f32 %v3170_v37, %v21683_v12  ;;  %v16142_v61 = vld [vmem:[%s21679_s30 + $0x4a0] ss:$28 sps:$4 sm:$0xff]   ;;  %v16148_v11 = vld [vmem:[%s21679_s30 + $0x4d8] ss:$28 sps:$4 sm:$0xff]  }
 0x59a   :  { %v3250_v26 = vmax.f32 %v3246_v34, 0.0  ;;  %v3245_v50 = vadd.f32 %v3241_v3, %v3176_v43  ;;  %v16156_v18 = vld [vmem:[%s21679_s30 + $0x514] ss:$28 sps:$4 sm:$0xff]   ;;  %v16151_v19 = vld [vmem:[%s21679_s30 + $0x508] ss:$28 sps:$4 sm:$0xff]  }
 0x59b   :  { %v3247_v48 = vadd.f32 %v3241_v3, %v3178_v17  ;;  %v16154_v3 = vld [vmem:[%s21679_s30 + $0x510] ss:$28 sps:$4 sm:$0xff]   ;;  %v16159_v13 = vld [vmem:[%s21679_s30 + $0x544] ss:$28 sps:$4 sm:$0xff]   ;;  %v16165_v43 = vld [vmem:[%s21679_s30 + $0x57c] ss:$28 sps:$4 sm:$0xff]  }
 0x59c   :  { %v3256_v0 = vcombine.low %v3248_v52, %v3250_v26  ;;  %v3257_v4 = vcombine.high %v3248_v52, %v3250_v26  ;;  %v3249_v2 = vmax.f32 %v3245_v50, 0.0  ;;  %v16162_v37 = vld [vmem:[%s21679_s30 + $0x54c] ss:$28 sps:$4 sm:$0xff]   ;;  %v16157_v34 = vld [vmem:[%s21679_s30 + $0x540] ss:$28 sps:$4 sm:$0xff]  }
 0x59d   :  { %v3251_v7 = vmax.f32 %v3247_v48, 0.0  ;;  %v16160_v25 = vld [vmem:[%s21679_s30 + $0x548] ss:$28 sps:$4 sm:$0xff]   ;;  %v16163_v12 = vld [vmem:[%s21679_s30 + $0x578] ss:$28 sps:$4 sm:$0xff]  }
 0x59e   :  { %v3264_v8 = vrot.slane %v3256_v0, %v18177_v14  ;;  %v18880_v58 = vrot.slane %v3257_v4, %v18177_v14  ;;  %v16168_v52 = vld [vmem:[%s21679_s30 + $0x584] ss:$28 sps:$4 sm:$0xff]   ;;  %v16171_v26 = vld [vmem:[%s21679_s30 + $0x5b4] ss:$28 sps:$4 sm:$0xff]   ;;  %v16174_v50 = vld [vmem:[%s21679_s30 + $0x5bc] ss:$28 sps:$4 sm:$0xff]  }
 0x59f   :  { %v18882_v49 = vcombine.low %v3249_v2, %v3251_v7  ;;  %v18884_v9 = vcombine.high %v3249_v2, %v3251_v7  ;;  %v16166_v17 = vld [vmem:[%s21679_s30 + $0x580] ss:$28 sps:$4 sm:$0xff]   ;;  %v16169_v48 = vld [vmem:[%s21679_s30 + $0x5b0] ss:$28 sps:$4 sm:$0xff]   ;;  %v16172_v0 = vld [vmem:[%s21679_s30 + $0x5b8] ss:$28 sps:$4 sm:$0xff]  }
 0x5a0   :  { %v3272_v20 = vcombine.high %v3264_v8, %v3264_v8  ;;  %v3273_v42 = vcombine.high %v18880_v58, %v18880_v58  ;;  %v18896_v63 = vpack.c.bf16 %v3264_v8, %v3264_v8  ;;  %v16177_v4 = vld [vmem:[%s21679_s30 + $0x5ec] ss:$28 sps:$4 sm:$0xff]   ;;  %v16180_v2 = vld [vmem:[%s21679_s30 + $0x5f4] ss:$28 sps:$4 sm:$0xff]  }
 0x5a1   :  { %v16175_v7 = vld [vmem:[%s21679_s30 + $0x5e8] ss:$28 sps:$4 sm:$0xff]   ;;  %v16178_v8 = vld [vmem:[%s21679_s30 + $0x5f0] ss:$28 sps:$4 sm:$0xff]  }
 0x5a2   :  { %v18888_v47 = vpack.c.bf16 %v3272_v20, %v3272_v20  ;;  %v18908_v15 = vpack.c.bf16 %v3273_v42, %v3273_v42  ;;  %v16183_v20 = vld [vmem:[%s21679_s30 + $0x624] ss:$28 sps:$4 sm:$0xff]   ;;  %v16186_v42 = vld [vmem:[%s21679_s30 + $0x62c] ss:$28 sps:$4 sm:$0xff]  }
 0x5a4   :  { %5533 = vmatprep.mubr.bf16.mxu0 %v18888_v47  ;;  %5697 = vmatprep.mubr.bf16.mxu1 %v18888_v47 }
 0x5a5   :  { %5534 = vmatmul.mubr.bf16.vlgmr.msra.gmra.mrb[28].mxu0 %v18896_v63  ;;  %5698 = vmatmul.mubr.bf16.vlgmr.msra.gmra.mrb[20].mxu1 %v18896_v63 }
 0x5a6   :  { %5543 = vmatpush1.bf16.msra.mxu0 %v16109_v44  ;;  %5707 = vmatpush1.bf16.msra.mxu1 %v16112_v51  ;;  %v16181_v44 = vld [vmem:[%s21679_s30 + $0x620] ss:$28 sps:$4 sm:$0xff]   ;;  %v16184_v51 = vld [vmem:[%s21679_s30 + $0x628] ss:$28 sps:$4 sm:$0xff]  }
 0x5a7   :  { %5574 = vmatprep.mubr.bf16.mxu0 %v18908_v15  ;;  %5738 = vmatprep.mubr.bf16.mxu1 %v18908_v15 }
 0x5a8   :  { %5544 = vmatprep.subr.bf16.mxu0 %v16117_v10  ;;  %5708 = vmatprep.subr.bf16.mxu1 %v16120_v38  ;;  %v16189_v10 = vld [vmem:[%s21679_s30 + $0x65c] ss:$28 sps:$4 sm:$0xff]   ;;  %v16192_v38 = vld [vmem:[%s21679_s30 + $0x664] ss:$28 sps:$4 sm:$0xff]  }
 0x5aa   :  { %5545 = vmatpush1.bf16.msra.mxu0 %v16115_v27  ;;  %5709 = vmatpush1.bf16.msra.mxu1 %v16118_v30  ;;  %v16187_v27 = vld [vmem:[%s21679_s30 + $0x658] ss:$28 sps:$4 sm:$0xff]   ;;  %v16190_v30 = vld [vmem:[%s21679_s30 + $0x660] ss:$28 sps:$4 sm:$0xff]  }
 0x5ab   :  { %5546 = vmatprep.subr.bf16.mxu0 %v16123_v22  ;;  %5710 = vmatprep.subr.bf16.mxu1 %v16126_v57  ;;  %v16195_v22 = vld [vmem:[%s21679_s30 + $0x694] ss:$28 sps:$4 sm:$0xff]   ;;  %v16198_v57 = vld [vmem:[%s21679_s30 + $0x69c] ss:$28 sps:$4 sm:$0xff]  }
 0x5ae   :  { %5547 = vmatpush1.bf16.msra.mxu0 %v16121_v56  ;;  %5711 = vmatpush1.bf16.msra.mxu1 %v16124_v29  ;;  %v16193_v56 = vld [vmem:[%s21679_s30 + $0x690] ss:$28 sps:$4 sm:$0xff]   ;;  %v16196_v29 = vld [vmem:[%s21679_s30 + $0x698] ss:$28 sps:$4 sm:$0xff]  }
 0x5af   :  { %5548 = vmatprep.subr.bf16.mxu0 %v16129_v32  ;;  %5712 = vmatprep.subr.bf16.mxu1 %v16132_v23  ;;  %v16201_v32 = vld [vmem:[%s21679_s30 + $0x6cc] ss:$28 sps:$4 sm:$0xff]   ;;  %v16204_v23 = vld [vmem:[%s21679_s30 + $0x6d4] ss:$28 sps:$4 sm:$0xff]  }
 0x5b2   :  { %5549 = vmatpush1.bf16.msra.mxu0 %v16127_v16  ;;  %5713 = vmatpush1.bf16.msra.mxu1 %v16130_v21  ;;  %v19082_v16 = vrot.slane %v18882_v49, %v18177_v14  ;;  %v16199_v21 = vld [vmem:[%s21679_s30 + $0x6c8] ss:$28 sps:$4 sm:$0xff]  }
 0x5b3   :  { %5550 = vmatprep.subr.bf16.mxu0 %v16135_v39  ;;  %5714 = vmatprep.subr.bf16.mxu1 %v16138_v45  ;;  %v16202_v39 = vld [vmem:[%s21679_s30 + $0x6d0] ss:$28 sps:$4 sm:$0xff]   ;;  %v16207_v45 = vld [vmem:[%s21679_s30 + $0x704] ss:$28 sps:$4 sm:$0xff]  }
 0x5b4   :  { %v16210_v49 = vld [vmem:[%s21679_s30 + $0x70c] ss:$28 sps:$4 sm:$0xff]  }
 0x5b6   :  { %5551 = vmatpush1.bf16.msra.mxu0 %v16133_v5  ;;  %5715 = vmatpush1.bf16.msra.mxu1 %v16136_v46  ;;  %v3290_v5 = vcombine.high %v19082_v16, %v19082_v16  ;;  %v16205_v46 = vld [vmem:[%s21679_s30 + $0x700] ss:$28 sps:$4 sm:$0xff]  }
 0x5b7   :  { %5552 = vmatprep.subr.bf16.mxu0 %v16141_v35  ;;  %5716 = vmatprep.subr.bf16.mxu1 %v16144_v54  ;;  %v19103_v35 = vpack.c.bf16 %v18880_v58, %v18880_v58  ;;  %v16208_v54 = vld [vmem:[%s21679_s30 + $0x708] ss:$28 sps:$4 sm:$0xff]   ;;  %v16211_v58 = vld [vmem:[%s21679_s30 + $0x738] ss:$28 sps:$4 sm:$0xff]  }
 0x5ba   :  { %5553 = vmatpush1.bf16.msra.mxu0 %v16139_v55  ;;  %5717 = vmatpush1.bf16.msra.mxu1 %v16142_v61  ;;  %v19108_v55 = vpack.c.bf16 %v3290_v5, %v3290_v5  ;;  %v16213_v61 = vld [vmem:[%s21679_s30 + $0x73c] ss:$28 sps:$4 sm:$0xff]   ;;  %v16279_v5 = vld [vmem:[%s21679_s30 + $0x9a4] ss:$28 sps:$4 sm:$0xff]  }
 0x5bb   :  { %5554 = vmatprep.subr.bf16.mxu0 %v16147_v1  ;;  %5718 = vmatprep.subr.bf16.mxu1 %v16150_v59  ;;  %v16216_v1 = vld [vmem:[%s21679_s30 + $0x744] ss:$28 sps:$4 sm:$0xff]  }
 0x5bc   :  { %v16214_v59 = vld [vmem:[%s21679_s30 + $0x740] ss:$28 sps:$4 sm:$0xff]  }
 0x5be   :  { %5555 = vmatpush1.bf16.msra.mxu0 %v16145_v40  ;;  %5719 = vmatpush1.bf16.msra.mxu1 %v16148_v11  ;;  %v16219_v40 = vld [vmem:[%s21679_s30 + $0x774] ss:$28 sps:$4 sm:$0xff]   ;;  %v16222_v11 = vld [vmem:[%s21679_s30 + $0x77c] ss:$28 sps:$4 sm:$0xff]  }
 0x5bf   :  { %5556 = vmatprep.subr.bf16.mxu0 %v16153_v53  ;;  %5720 = vmatprep.subr.bf16.mxu1 %v16156_v18  ;;  %v16217_v53 = vld [vmem:[%s21679_s30 + $0x770] ss:$28 sps:$4 sm:$0xff]   ;;  %v16220_v18 = vld [vmem:[%s21679_s30 + $0x778] ss:$28 sps:$4 sm:$0xff]  }
 0x5c2   :  { %5557 = vmatpush1.bf16.msra.mxu0 %v16151_v19  ;;  %5721 = vmatpush1.bf16.msra.mxu1 %v16154_v3  ;;  %v16225_v19 = vld [vmem:[%s21679_s30 + $0x7ac] ss:$28 sps:$4 sm:$0xff]   ;;  %v16228_v3 = vld [vmem:[%s21679_s30 + $0x7b4] ss:$28 sps:$4 sm:$0xff]  }
 0x5c3   :  { %5558 = vmatprep.subr.bf16.mxu0 %v16159_v13  ;;  %5722 = vmatprep.subr.bf16.mxu1 %v16162_v37  ;;  %v16223_v13 = vld [vmem:[%s21679_s30 + $0x7a8] ss:$28 sps:$4 sm:$0xff]   ;;  %v16226_v37 = vld [vmem:[%s21679_s30 + $0x7b0] ss:$28 sps:$4 sm:$0xff]  }
 0x5c6   :  { %5559 = vmatpush1.bf16.msra.mxu0 %v16157_v34  ;;  %5723 = vmatpush1.bf16.msra.mxu1 %v16160_v25  ;;  %v16231_v34 = vld [vmem:[%s21679_s30 + $0x7e4] ss:$28 sps:$4 sm:$0xff]   ;;  %v16234_v25 = vld [vmem:[%s21679_s30 + $0x7ec] ss:$28 sps:$4 sm:$0xff]  }
 0x5c7   :  { %5560 = vmatprep.subr.bf16.mxu0 %v16165_v43  ;;  %5724 = vmatprep.subr.bf16.mxu1 %v16168_v52  ;;  %v16229_v43 = vld [vmem:[%s21679_s30 + $0x7e0] ss:$28 sps:$4 sm:$0xff]   ;;  %v16232_v52 = vld [vmem:[%s21679_s30 + $0x7e8] ss:$28 sps:$4 sm:$0xff]  }
 0x5ca   :  { %5561 = vmatpush1.bf16.msra.mxu0 %v16163_v12  ;;  %5725 = vmatpush1.bf16.msra.mxu1 %v16166_v17  ;;  %v16237_v12 = vld [vmem:[%s21679_s30 + $0x81c] ss:$28 sps:$4 sm:$0xff]   ;;  %v16240_v17 = vld [vmem:[%s21679_s30 + $0x824] ss:$28 sps:$4 sm:$0xff]  }
 0x5cb   :  { %5562 = vmatprep.subr.bf16.mxu0 %v16171_v26  ;;  %5726 = vmatprep.subr.bf16.mxu1 %v16174_v50  ;;  %v16235_v26 = vld [vmem:[%s21679_s30 + $0x818] ss:$28 sps:$4 sm:$0xff]   ;;  %v16238_v50 = vld [vmem:[%s21679_s30 + $0x820] ss:$28 sps:$4 sm:$0xff]  }
 0x5ce   :  { %5563 = vmatpush1.bf16.msra.mxu0 %v16169_v48  ;;  %5727 = vmatpush1.bf16.msra.mxu1 %v16172_v0  ;;  %v16243_v48 = vld [vmem:[%s21679_s30 + $0x854] ss:$28 sps:$4 sm:$0xff]   ;;  %v16246_v0 = vld [vmem:[%s21679_s30 + $0x85c] ss:$28 sps:$4 sm:$0xff]  }
 0x5cf   :  { %5564 = vmatprep.subr.bf16.mxu0 %v16177_v4  ;;  %5728 = vmatprep.subr.bf16.mxu1 %v16180_v2  ;;  %v16241_v4 = vld [vmem:[%s21679_s30 + $0x850] ss:$28 sps:$4 sm:$0xff]   ;;  %v16244_v2 = vld [vmem:[%s21679_s30 + $0x858] ss:$28 sps:$4 sm:$0xff]  }
 0x5d2   :  { %5565 = vmatpush1.bf16.msra.mxu0 %v16175_v7  ;;  %5729 = vmatpush1.bf16.msra.mxu1 %v16178_v8  ;;  %v16249_v7 = vld [vmem:[%s21679_s30 + $0x88c] ss:$28 sps:$4 sm:$0xff]   ;;  %v16252_v8 = vld [vmem:[%s21679_s30 + $0x894] ss:$28 sps:$4 sm:$0xff]  }
 0x5d3   :  { %5566 = vmatprep.subr.bf16.mxu0 %v16183_v20  ;;  %5730 = vmatprep.subr.bf16.mxu1 %v16186_v42  ;;  %v16247_v20 = vld [vmem:[%s21679_s30 + $0x888] ss:$28 sps:$4 sm:$0xff]   ;;  %v16250_v42 = vld [vmem:[%s21679_s30 + $0x890] ss:$28 sps:$4 sm:$0xff]  }
 0x5d6   :  { %5567 = vmatpush1.bf16.msra.mxu0 %v16181_v44  ;;  %5731 = vmatpush1.bf16.msra.mxu1 %v16184_v51  ;;  %v16255_v44 = vld [vmem:[%s21679_s30 + $0x8c4] ss:$28 sps:$4 sm:$0xff]   ;;  %v16258_v51 = vld [vmem:[%s21679_s30 + $0x8cc] ss:$28 sps:$4 sm:$0xff]  }
 0x5d7   :  { %5568 = vmatprep.subr.bf16.mxu0 %v16189_v10  ;;  %5732 = vmatprep.subr.bf16.mxu1 %v16192_v38  ;;  %v16253_v10 = vld [vmem:[%s21679_s30 + $0x8c0] ss:$28 sps:$4 sm:$0xff]   ;;  %v16256_v38 = vld [vmem:[%s21679_s30 + $0x8c8] ss:$28 sps:$4 sm:$0xff]  }
 0x5da   :  { %5569 = vmatpush1.bf16.msra.mxu0 %v16187_v27  ;;  %5733 = vmatpush1.bf16.msra.mxu1 %v16190_v30  ;;  %v16261_v27 = vld [vmem:[%s21679_s30 + $0x8fc] ss:$28 sps:$4 sm:$0xff]   ;;  %v16264_v30 = vld [vmem:[%s21679_s30 + $0x904] ss:$28 sps:$4 sm:$0xff]  }
 0x5db   :  { %5570 = vmatprep.subr.bf16.mxu0 %v16195_v22  ;;  %5734 = vmatprep.subr.bf16.mxu1 %v16198_v57  ;;  %v16259_v22 = vld [vmem:[%s21679_s30 + $0x8f8] ss:$28 sps:$4 sm:$0xff]   ;;  %v16262_v57 = vld [vmem:[%s21679_s30 + $0x900] ss:$28 sps:$4 sm:$0xff]  }
 0x5de   :  { %5571 = vmatpush1.bf16.msra.mxu0 %v16193_v56  ;;  %5735 = vmatpush1.bf16.msra.mxu1 %v16196_v29  ;;  %v16267_v56 = vld [vmem:[%s21679_s30 + $0x934] ss:$28 sps:$4 sm:$0xff]   ;;  %v16270_v29 = vld [vmem:[%s21679_s30 + $0x93c] ss:$28 sps:$4 sm:$0xff]  }
 0x5df   :  { %5572 = vmatprep.subr.bf16.mxu0 %v16201_v32  ;;  %5736 = vmatprep.subr.bf16.mxu1 %v16204_v23  ;;  %v16265_v32 = vld [vmem:[%s21679_s30 + $0x930] ss:$28 sps:$4 sm:$0xff]   ;;  %v16268_v23 = vld [vmem:[%s21679_s30 + $0x938] ss:$28 sps:$4 sm:$0xff]  }
 0x5e2   :  { %5573 = vmatpush1.bf16.msra.mxu0 %v16199_v21  ;;  %5737 = vmatpush1.bf16.msra.mxu1 %v16202_v39  ;;  %v16273_v21 = vld [vmem:[%s21679_s30 + $0x96c] ss:$28 sps:$4 sm:$0xff]   ;;  %v16276_v39 = vld [vmem:[%s21679_s30 + $0x974] ss:$28 sps:$4 sm:$0xff]  }
 0x5e3   :  { %5583 = vmatprep.subr.bf16.mxu0 %v16207_v45  ;;  %5747 = vmatprep.subr.bf16.mxu1 %v16210_v49  ;;  %v16271_v45 = vld [vmem:[%s21679_s30 + $0x968] ss:$28 sps:$4 sm:$0xff]   ;;  %v16274_v49 = vld [vmem:[%s21679_s30 + $0x970] ss:$28 sps:$4 sm:$0xff]  }
 0x5e5   :  { %5575 = vmatmul.mubr.bf16.vlgmr.msra.gmra.mrb[28].mxu0 %v19103_v35  ;;  %5739 = vmatmul.mubr.bf16.vlgmr.msra.gmra.mrb[20].mxu1 %v19103_v35 }
 0x5e6   :  { %5584 = vmatpush1.bf16.msra.mxu0 %v16205_v46  ;;  %5615 = vmatprep.mubr.bf16.mxu0 %v19108_v55  ;;  %v16282_v46 = vld [vmem:[%s21679_s30 + $0x9ac] ss:$28 sps:$4 sm:$0xff]  }
 0x5e7   :  { %5748 = vmatpush1.bf16.msra.mxu1 %v16208_v54  ;;  %5779 = vmatprep.mubr.bf16.mxu1 %v19108_v55  ;;  %v16277_v54 = vld [vmem:[%s21679_s30 + $0x9a0] ss:$28 sps:$4 sm:$0xff]  }
 0x5e8   :  { %5585 = vmatprep.subr.bf16.mxu0 %v16213_v61  ;;  %5749 = vmatprep.subr.bf16.mxu1 %v16216_v1  ;;  %v16280_v61 = vld [vmem:[%s21679_s30 + $0x9a8] ss:$28 sps:$4 sm:$0xff]   ;;  %v16285_v1 = vld [vmem:[%s21679_s30 + $0x9dc] ss:$28 sps:$4 sm:$0xff]  }
 0x5ea   :  { %5586 = vmatpush1.bf16.msra.mxu0 %v16211_v58  ;;  %v16288_v58 = vld [vmem:[%s21679_s30 + $0x9e4] ss:$28 sps:$4 sm:$0xff]  }
 0x5eb   :  { %5750 = vmatpush1.bf16.msra.mxu1 %v16214_v59  ;;  %5587 = vmatprep.subr.bf16.mxu0 %v16219_v40  ;;  %v16283_v59 = vld [vmem:[%s21679_s30 + $0x9d8] ss:$28 sps:$4 sm:$0xff]   ;;  %v16286_v40 = vld [vmem:[%s21679_s30 + $0x9e0] ss:$28 sps:$4 sm:$0xff]  }
 0x5ec   :  { %5751 = vmatprep.subr.bf16.mxu1 %v16222_v11  ;;  %v16291_v11 = vld [vmem:[%s21679_s30 + $0xa14] ss:$28 sps:$4 sm:$0xff]  }
 0x5ee   :  { %5588 = vmatpush1.bf16.msra.mxu0 %v16217_v53  ;;  %v16294_v53 = vld [vmem:[%s21679_s30 + $0xa1c] ss:$28 sps:$4 sm:$0xff]  }
 0x5ef   :  { %5752 = vmatpush1.bf16.msra.mxu1 %v16220_v18  ;;  %5589 = vmatprep.subr.bf16.mxu0 %v16225_v19  ;;  %v16289_v18 = vld [vmem:[%s21679_s30 + $0xa10] ss:$28 sps:$4 sm:$0xff]   ;;  %v16292_v19 = vld [vmem:[%s21679_s30 + $0xa18] ss:$28 sps:$4 sm:$0xff]  }
 0x5f0   :  { %5753 = vmatprep.subr.bf16.mxu1 %v16228_v3  ;;  %v16297_v3 = vld [vmem:[%s21679_s30 + $0xa4c] ss:$28 sps:$4 sm:$0xff]  }
 0x5f2   :  { %5590 = vmatpush1.bf16.msra.mxu0 %v16223_v13  ;;  %v16300_v13 = vld [vmem:[%s21679_s30 + $0xa54] ss:$28 sps:$4 sm:$0xff]  }
 0x5f3   :  { %5754 = vmatpush1.bf16.msra.mxu1 %v16226_v37  ;;  %5591 = vmatprep.subr.bf16.mxu0 %v16231_v34  ;;  %v16295_v37 = vld [vmem:[%s21679_s30 + $0xa48] ss:$28 sps:$4 sm:$0xff]   ;;  %v16298_v34 = vld [vmem:[%s21679_s30 + $0xa50] ss:$28 sps:$4 sm:$0xff]  }
 0x5f4   :  { %5755 = vmatprep.subr.bf16.mxu1 %v16234_v25  ;;  %v16303_v25 = vld [vmem:[%s21679_s30 + $0xa84] ss:$28 sps:$4 sm:$0xff]  }
 0x5f6   :  { %5592 = vmatpush1.bf16.msra.mxu0 %v16229_v43  ;;  %v16306_v43 = vld [vmem:[%s21679_s30 + $0xa8c] ss:$28 sps:$4 sm:$0xff]  }
 0x5f7   :  { %5756 = vmatpush1.bf16.msra.mxu1 %v16232_v52  ;;  %5593 = vmatprep.subr.bf16.mxu0 %v16237_v12  ;;  %v16301_v52 = vld [vmem:[%s21679_s30 + $0xa80] ss:$28 sps:$4 sm:$0xff]   ;;  %v19305_v12 = vpack.c.bf16 %v19082_v16, %v19082_v16  ;;  %v21561_v16 = vmov 0  }
 0x5f8   :  { %5757 = vmatprep.subr.bf16.mxu1 %v16240_v17  ;;  %v16304_v17 = vld [vmem:[%s21679_s30 + $0xa88] ss:$28 sps:$4 sm:$0xff]  }
 0x5fa   :  { %5594 = vmatpush1.bf16.msra.mxu0 %v16235_v26  ;;  %v16309_v26 = vld [vmem:[%s21679_s30 + $0x14] ss:$28 sps:$4 sm:$0xff]  }
 0x5fb   :  { %5758 = vmatpush1.bf16.msra.mxu1 %v16238_v50  ;;  %5595 = vmatprep.subr.bf16.mxu0 %v16243_v48  ;;  %v16310_v50 = vld [vmem:[%s21679_s30 + $0x1d8] ss:$28 sps:$4 sm:$0xff]   ;;  %v3289_v48 = vrot.slane %v18884_v9, %v18177_v14  ;;  %v16315_v9 = vld [vmem:[%s21679_s30 + $0x210] ss:$28 sps:$4 sm:$0xff]  }
 0x5fc   :  { %5759 = vmatprep.subr.bf16.mxu1 %v16246_v0  ;;  %v16307_v0 = vld [vmem:[%s21679_s30 + $0x10] ss:$28 sps:$4 sm:$0xff]  }
 0x5fe   :  { %5596 = vmatpush1.bf16.msra.mxu0 %v16241_v4  ;;  %v19325_v4 = vpack.c.bf16 %v3289_v48, %v3289_v48  ;;  %v16369_v48 = vld [vmem:[%s21679_s30 + $0x2b4] ss:$28 sps:$4 sm:$0xff]  }
 0x5ff   :  { %5760 = vmatpush1.bf16.msra.mxu1 %v16244_v2  ;;  %5597 = vmatprep.subr.bf16.mxu0 %v16249_v7  ;;  %v16311_v2 = vld [vmem:[%s21679_s30 + $0x18] ss:$28 sps:$4 sm:$0xff]   ;;  %v16314_v7 = vld [vmem:[%s21679_s30 + $0x4c] ss:$28 sps:$4 sm:$0xff]  }
 0x600   :  { %5761 = vmatprep.subr.bf16.mxu1 %v16252_v8  ;;  %v16312_v8 = vld [vmem:[%s21679_s30 + $0x48] ss:$28 sps:$4 sm:$0xff]  }
 0x602   :  { %5598 = vmatpush1.bf16.msra.mxu0 %v16247_v20  ;;  %v16316_v20 = vld [vmem:[%s21679_s30 + $0x50] ss:$28 sps:$4 sm:$0xff]  }
 0x603   :  { %5762 = vmatpush1.bf16.msra.mxu1 %v16250_v42  ;;  %5599 = vmatprep.subr.bf16.mxu0 %v16255_v44  ;;  %v16319_v42 = vld [vmem:[%s21679_s30 + $0x84] ss:$28 sps:$4 sm:$0xff]  }
 0x604   :  { %5763 = vmatprep.subr.bf16.mxu1 %v16258_v51  ;;  %v16320_v44 = vld [vmem:[%s21679_s30 + $0x248] ss:$28 sps:$4 sm:$0xff]   ;;  %v16317_v51 = vld [vmem:[%s21679_s30 + $0x80] ss:$28 sps:$4 sm:$0xff]  }
 0x606   :  { %5600 = vmatpush1.bf16.msra.mxu0 %v16253_v10  ;;  %v16321_v10 = vld [vmem:[%s21679_s30 + $0x88] ss:$28 sps:$4 sm:$0xff]  }
 0x607   :  { %5764 = vmatpush1.bf16.msra.mxu1 %v16256_v38  ;;  %5601 = vmatprep.subr.bf16.mxu0 %v16261_v27  ;;  %v16325_v38 = vld [vmem:[%s21679_s30 + $0x280] ss:$28 sps:$4 sm:$0xff]   ;;  %v16322_v27 = vld [vmem:[%s21679_s30 + $0xb8] ss:$28 sps:$4 sm:$0xff]  }
 0x608   :  { %5765 = vmatprep.subr.bf16.mxu1 %v16264_v30  ;;  %v16326_v30 = vld [vmem:[%s21679_s30 + $0xc0] ss:$28 sps:$4 sm:$0xff]  }
 0x60a   :  { %5602 = vmatpush1.bf16.msra.mxu0 %v16259_v22  ;;  %v16329_v22 = vld [vmem:[%s21679_s30 + $0xf4] ss:$28 sps:$4 sm:$0xff]  }
 0x60b   :  { %5766 = vmatpush1.bf16.msra.mxu1 %v16262_v57  ;;  %5603 = vmatprep.subr.bf16.mxu0 %v16267_v56  ;;  %v16330_v57 = vld [vmem:[%s21679_s30 + $0x2b8] ss:$28 sps:$4 sm:$0xff]   ;;  %v16327_v56 = vld [vmem:[%s21679_s30 + $0xf0] ss:$28 sps:$4 sm:$0xff]  }
 0x60c   :  { %5767 = vmatprep.subr.bf16.mxu1 %v16270_v29  ;;  %v16331_v29 = vld [vmem:[%s21679_s30 + $0xf8] ss:$28 sps:$4 sm:$0xff]  }
 0x60e   :  { %5604 = vmatpush1.bf16.msra.mxu0 %v16265_v32  ;;  %v16334_v32 = vld [vmem:[%s21679_s30 + $0x12c] ss:$28 sps:$4 sm:$0xff]  }
 0x60f   :  { %5768 = vmatpush1.bf16.msra.mxu1 %v16268_v23  ;;  %5605 = vmatprep.subr.bf16.mxu0 %v16273_v21  ;;  %v16335_v23 = vld [vmem:[%s21679_s30 + $0x2f0] ss:$28 sps:$4 sm:$0xff]   ;;  %v16332_v21 = vld [vmem:[%s21679_s30 + $0x128] ss:$28 sps:$4 sm:$0xff]  }
 0x610   :  { %5769 = vmatprep.subr.bf16.mxu1 %v16276_v39  ;;  %v16336_v39 = vld [vmem:[%s21679_s30 + $0x130] ss:$28 sps:$4 sm:$0xff]  }
 0x612   :  { %5606 = vmatpush1.bf16.msra.mxu0 %v16271_v45  ;;  %v16339_v45 = vld [vmem:[%s21679_s30 + $0x164] ss:$28 sps:$4 sm:$0xff]  }
 0x613   :  { %5770 = vmatpush1.bf16.msra.mxu1 %v16274_v49  ;;  %5607 = vmatprep.subr.bf16.mxu0 %v16279_v5  ;;  %v16340_v49 = vld [vmem:[%s21679_s30 + $0x328] ss:$28 sps:$4 sm:$0xff]   ;;  %v16337_v5 = vld [vmem:[%s21679_s30 + $0x160] ss:$28 sps:$4 sm:$0xff]  }
 0x614   :  { %5771 = vmatprep.subr.bf16.mxu1 %v16282_v46  ;;  %v16341_v46 = vld [vmem:[%s21679_s30 + $0x168] ss:$28 sps:$4 sm:$0xff]  }
 0x616   :  { %5608 = vmatpush1.bf16.msra.mxu0 %v16277_v54  ;;  %v16344_v54 = vld [vmem:[%s21679_s30 + $0x19c] ss:$28 sps:$4 sm:$0xff]  }
 0x617   :  { %5772 = vmatpush1.bf16.msra.mxu1 %v16280_v61  ;;  %5609 = vmatprep.subr.bf16.mxu0 %v16285_v1  ;;  %v16345_v61 = vld [vmem:[%s21679_s30 + $0x360] ss:$28 sps:$4 sm:$0xff]   ;;  %v16342_v1 = vld [vmem:[%s21679_s30 + $0x198] ss:$28 sps:$4 sm:$0xff]  }
 0x618   :  { %5773 = vmatprep.subr.bf16.mxu1 %v16288_v58  ;;  %v16346_v58 = vld [vmem:[%s21679_s30 + $0x1a0] ss:$28 sps:$4 sm:$0xff]  }
 0x61a   :  { %5610 = vmatpush1.bf16.msra.mxu0 %v16283_v59  ;;  %v16349_v59 = vld [vmem:[%s21679_s30 + $0x1d4] ss:$28 sps:$4 sm:$0xff]  }
 0x61b   :  { %5774 = vmatpush1.bf16.msra.mxu1 %v16286_v40  ;;  %5611 = vmatprep.subr.bf16.mxu0 %v16291_v11  ;;  %v16350_v40 = vld [vmem:[%s21679_s30 + $0x558] ss:$28 sps:$4 sm:$0xff]   ;;  %v16347_v11 = vld [vmem:[%s21679_s30 + $0x1d0] ss:$28 sps:$4 sm:$0xff]  }
 0x61c   :  { %5775 = vmatprep.subr.bf16.mxu1 %v16294_v53  ;;  %v16351_v53 = vld [vmem:[%s21679_s30 + $0x398] ss:$28 sps:$4 sm:$0xff]  }
 0x61e   :  { %5612 = vmatpush1.bf16.msra.mxu0 %v16289_v18  ;;  %v16354_v18 = vld [vmem:[%s21679_s30 + $0x20c] ss:$28 sps:$4 sm:$0xff]  }
 0x61f   :  { %5776 = vmatpush1.bf16.msra.mxu1 %v16292_v19  ;;  %5613 = vmatprep.subr.bf16.mxu0 %v16297_v3  ;;  %v16355_v19 = vld [vmem:[%s21679_s30 + $0x590] ss:$28 sps:$4 sm:$0xff]   ;;  %v16352_v3 = vld [vmem:[%s21679_s30 + $0x208] ss:$28 sps:$4 sm:$0xff]  }
 0x620   :  { %5777 = vmatprep.subr.bf16.mxu1 %v16300_v13  ;;  %v16356_v13 = vld [vmem:[%s21679_s30 + $0x3d0] ss:$28 sps:$4 sm:$0xff]  }
 0x622   :  { %5614 = vmatpush1.bf16.msra.mxu0 %v16295_v37  ;;  %v16359_v37 = vld [vmem:[%s21679_s30 + $0x244] ss:$28 sps:$4 sm:$0xff]  }
 0x623   :  { %5778 = vmatpush1.bf16.msra.mxu1 %v16298_v34  ;;  %5624 = vmatprep.subr.bf16.mxu0 %v16303_v25  ;;  %v16360_v34 = vld [vmem:[%s21679_s30 + $0x5c8] ss:$28 sps:$4 sm:$0xff]   ;;  %v16357_v25 = vld [vmem:[%s21679_s30 + $0x240] ss:$28 sps:$4 sm:$0xff]  }
 0x624   :  { %5788 = vmatprep.subr.bf16.mxu1 %v16306_v43  ;;  %v16361_v43 = vld [vmem:[%s21679_s30 + $0x408] ss:$28 sps:$4 sm:$0xff]  }
 0x625   :  { %5616 = vmatmul.mubr.bf16.vlgmr.msra.gmra.mrb[28].mxu0 %v19305_v12 }
 0x626   :  { %5780 = vmatmul.mubr.bf16.vlgmr.msra.gmra.mrb[20].mxu1 %v19305_v12  ;;  %5625 = vmatpush1.bf16.msra.mxu0 %v16301_v52  ;;  %v16364_v52 = vld [vmem:[%s21679_s30 + $0x27c] ss:$28 sps:$4 sm:$0xff]  }
 0x627   :  { %5789 = vmatpush1.bf16.msra.mxu1 %v16304_v17  ;;  %5656 = vmatprep.mubr.bf16.mxu0 %v21561_v16  ;;  %v16365_v17 = vld [vmem:[%s21679_s30 + $0x600] ss:$28 sps:$4 sm:$0xff]  }
 0x628   :  { %5820 = vmatprep.mubr.bf16.mxu1 %v21561_v16  ;;  %5829 = vmatprep.subr.bf16.mxu0 %v16309_v26  ;;  %v16362_v26 = vld [vmem:[%s21679_s30 + $0x278] ss:$28 sps:$4 sm:$0xff]  }
 0x629   :  { %14673 = vmatprep.subr.bf16.mxu1 %v16310_v50  ;;  %v16366_v50 = vld [vmem:[%s21679_s30 + $0x440] ss:$28 sps:$4 sm:$0xff]  }
 0x631   :  { %13914 = vmatmul.mubr.msk.bf16.vlgmr.msra.gmra.mrb[28].mxu0 %vm1385_vm4, %v19325_v4 }
 0x632   :  { %13915 = vmatmul.mubr.msk.bf16.vlgmr.msra.gmra.mrb[20].mxu1 %vm1385_vm4, %v19325_v4  ;;  %5830 = vmatpush1.bf16.msra.mxu0 %v16307_v0  ;;  %v16370_v0 = vld [vmem:[%s21679_s30 + $0x638] ss:$28 sps:$4 sm:$0xff]  }
 0x633   :  { %14674 = vmatpush3.bf16.msra.mxu1 %v16311_v2  ;;  %5861 = vmatprep.mubr.bf16.mxu0 %v18888_v47  ;;  %v16367_v2 = vld [vmem:[%s21679_s30 + $0x2b0] ss:$28 sps:$4 sm:$0xff]  }
 0x634   :  { %6025 = vmatprep.mubr.bf16.mxu1 %v18888_v47  ;;  %5831 = vmatprep.subr.bf16.mxu0 %v16314_v7  ;;  %v16324_v47 = vld [vmem:[%s21679_s30 + $0xbc] ss:$28 sps:$4 sm:$0xff]  }
 0x635   :  { %14675 = vmatprep.subr.bf16.mxu1 %v16315_v9  ;;  %v16371_v7 = vld [vmem:[%s21679_s30 + $0x478] ss:$28 sps:$4 sm:$0xff]   ;;  %v16374_v9 = vld [vmem:[%s21679_s30 + $0x2ec] ss:$28 sps:$4 sm:$0xff]  }
 0x636   :  { %5832 = vmatpush1.bf16.msra.mxu0 %v16312_v8  ;;  %v16375_v8 = vld [vmem:[%s21679_s30 + $0x670] ss:$28 sps:$4 sm:$0xff]  }
 0x637   :  { %14676 = vmatpush3.bf16.msra.mxu1 %v16316_v20  ;;  %5833 = vmatprep.subr.bf16.mxu0 %v16319_v42  ;;  %v16372_v20 = vld [vmem:[%s21679_s30 + $0x2e8] ss:$28 sps:$4 sm:$0xff]   ;;  %v16376_v42 = vld [vmem:[%s21679_s30 + $0x4b0] ss:$28 sps:$4 sm:$0xff]  }
 0x638   :  { %14677 = vmatprep.subr.bf16.mxu1 %v16320_v44  ;;  %v16379_v44 = vld [vmem:[%s21679_s30 + $0x324] ss:$28 sps:$4 sm:$0xff]  }
 0x63a   :  { %5834 = vmatpush1.bf16.msra.mxu0 %v16317_v51  ;;  %v16380_v51 = vld [vmem:[%s21679_s30 + $0x6a8] ss:$28 sps:$4 sm:$0xff]  }
 0x63b   :  { %14678 = vmatpush3.bf16.msra.mxu1 %v16321_v10  ;;  %5835 = vmatprep.subr.bf16.mxu0 %v16324_v47  ;;  %v16377_v10 = vld [vmem:[%s21679_s30 + $0x320] ss:$28 sps:$4 sm:$0xff]   ;;  %v16381_v47 = vld [vmem:[%s21679_s30 + $0x4e8] ss:$28 sps:$4 sm:$0xff]  }
 0x63c   :  { %14679 = vmatprep.subr.bf16.mxu1 %v16325_v38  ;;  %v16384_v38 = vld [vmem:[%s21679_s30 + $0x35c] ss:$28 sps:$4 sm:$0xff]  }
 0x63e   :  { %5836 = vmatpush1.bf16.msra.mxu0 %v16322_v27  ;;  %v16385_v27 = vld [vmem:[%s21679_s30 + $0x6e0] ss:$28 sps:$4 sm:$0xff]  }
 0x63f   :  { %14680 = vmatpush3.bf16.msra.mxu1 %v16326_v30  ;;  %5837 = vmatprep.subr.bf16.mxu0 %v16329_v22  ;;  %v16382_v30 = vld [vmem:[%s21679_s30 + $0x358] ss:$28 sps:$4 sm:$0xff]   ;;  %v16386_v22 = vld [vmem:[%s21679_s30 + $0x520] ss:$28 sps:$4 sm:$0xff]  }
 0x640   :  { %14681 = vmatprep.subr.bf16.mxu1 %v16330_v57  ;;  %v16389_v57 = vld [vmem:[%s21679_s30 + $0x394] ss:$28 sps:$4 sm:$0xff]  }
 0x642   :  { %5838 = vmatpush1.bf16.msra.mxu0 %v16327_v56  ;;  %v16390_v56 = vld [vmem:[%s21679_s30 + $0x8d8] ss:$28 sps:$4 sm:$0xff]  }
 0x643   :  { %14682 = vmatpush3.bf16.msra.mxu1 %v16331_v29  ;;  %5839 = vmatprep.subr.bf16.mxu0 %v16334_v32  ;;  %v16387_v29 = vld [vmem:[%s21679_s30 + $0x390] ss:$28 sps:$4 sm:$0xff]   ;;  %v16391_v32 = vld [vmem:[%s21679_s30 + $0x718] ss:$28 sps:$4 sm:$0xff]  }
 0x644   :  { %14683 = vmatprep.subr.bf16.mxu1 %v16335_v23  ;;  %v16394_v23 = vld [vmem:[%s21679_s30 + $0x3cc] ss:$28 sps:$4 sm:$0xff]  }
 0x646   :  { %5840 = vmatpush1.bf16.msra.mxu0 %v16332_v21  ;;  %v16395_v21 = vld [vmem:[%s21679_s30 + $0x910] ss:$28 sps:$4 sm:$0xff]  }
 0x647   :  { %14684 = vmatpush3.bf16.msra.mxu1 %v16336_v39  ;;  %5841 = vmatprep.subr.bf16.mxu0 %v16339_v45  ;;  %v16392_v39 = vld [vmem:[%s21679_s30 + $0x3c8] ss:$28 sps:$4 sm:$0xff]   ;;  %v16396_v45 = vld [vmem:[%s21679_s30 + $0x750] ss:$28 sps:$4 sm:$0xff]  }
 0x648   :  { %14685 = vmatprep.subr.bf16.mxu1 %v16340_v49  ;;  %v16400_v49 = vld [vmem:[%s21679_s30 + $0x948] ss:$28 sps:$4 sm:$0xff]  }
 0x64a   :  { %5842 = vmatpush1.bf16.msra.mxu0 %v16337_v5  ;;  %v16401_v5 = vld [vmem:[%s21679_s30 + $0x788] ss:$28 sps:$4 sm:$0xff]  }
 0x64b   :  { %14686 = vmatpush3.bf16.msra.mxu1 %v16341_v46  ;;  %5843 = vmatprep.subr.bf16.mxu0 %v16344_v54  ;;  %v16404_v46 = vld [vmem:[%s21679_s30 + $0x43c] ss:$28 sps:$4 sm:$0xff]  }
 0x64c   :  { %14687 = vmatprep.subr.bf16.mxu1 %v16345_v61  ;;  %v16405_v54 = vld [vmem:[%s21679_s30 + $0x980] ss:$28 sps:$4 sm:$0xff]   ;;  %v16402_v61 = vld [vmem:[%s21679_s30 + $0x438] ss:$28 sps:$4 sm:$0xff]  }
 0x64e   :  { %5844 = vmatpush1.bf16.msra.mxu0 %v16342_v1  ;;  %v16406_v1 = vld [vmem:[%s21679_s30 + $0x7c0] ss:$28 sps:$4 sm:$0xff]  }
 0x64f   :  { %14688 = vmatpush3.bf16.msra.mxu1 %v16346_v58  ;;  %5845 = vmatprep.subr.bf16.mxu0 %v16349_v59  ;;  %v16409_v58 = vld [vmem:[%s21679_s30 + $0x474] ss:$28 sps:$4 sm:$0xff]  }
 0x650   :  { %14695 = vmatprep.subr.bf16.mxu1 %v16350_v40  ;;  %v16410_v59 = vld [vmem:[%s21679_s30 + $0x9b8] ss:$28 sps:$4 sm:$0xff]   ;;  %v16407_v40 = vld [vmem:[%s21679_s30 + $0x470] ss:$28 sps:$4 sm:$0xff]  }
 0x652   :  { %6026 = vmatmul.mubr.bf16.vlgmr.msra.gmra.mrb[24].mxu1 %v18896_v63  ;;  %5846 = vmatpush1.bf16.msra.mxu0 %v16347_v11  ;;  %v16411_v11 = vld [vmem:[%s21679_s30 + $0x7f8] ss:$28 sps:$4 sm:$0xff]  }
 0x653   :  { %14696 = vmatpush3.bf16.msra.mxu1 %v16351_v53  ;;  %6065 = vmatprep.mubr.bf16.mxu1 %v18908_v15  ;;  %v16414_v53 = vld [vmem:[%s21679_s30 + $0x4ac] ss:$28 sps:$4 sm:$0xff]  }
 0x654   :  { %5847 = vmatprep.subr.bf16.mxu0 %v16354_v18  ;;  %14697 = vmatprep.subr.bf16.mxu1 %v16355_v19  ;;  %v16415_v18 = vld [vmem:[%s21679_s30 + $0x9f0] ss:$28 sps:$4 sm:$0xff]   ;;  %v16412_v19 = vld [vmem:[%s21679_s30 + $0x4a8] ss:$28 sps:$4 sm:$0xff]  }
 0x656   :  { %5848 = vmatpush1.bf16.msra.mxu0 %v16352_v3  ;;  %v16416_v3 = vld [vmem:[%s21679_s30 + $0x830] ss:$28 sps:$4 sm:$0xff]  }
 0x657   :  { %14698 = vmatpush3.bf16.msra.mxu1 %v16356_v13  ;;  %5849 = vmatprep.subr.bf16.mxu0 %v16359_v37  ;;  %v16419_v13 = vld [vmem:[%s21679_s30 + $0x4e4] ss:$28 sps:$4 sm:$0xff]  }
 0x658   :  { %14699 = vmatprep.subr.bf16.mxu1 %v16360_v34  ;;  %v16420_v37 = vld [vmem:[%s21679_s30 + $0xa28] ss:$28 sps:$4 sm:$0xff]   ;;  %v16417_v34 = vld [vmem:[%s21679_s30 + $0x4e0] ss:$28 sps:$4 sm:$0xff]  }
 0x65a   :  { %5850 = vmatpush1.bf16.msra.mxu0 %v16357_v25  ;;  %v16421_v25 = vld [vmem:[%s21679_s30 + $0x868] ss:$28 sps:$4 sm:$0xff]  }
 0x65b   :  { %14700 = vmatpush3.bf16.msra.mxu1 %v16361_v43  ;;  %5851 = vmatprep.subr.bf16.mxu0 %v16364_v52  ;;  %v16424_v43 = vld [vmem:[%s21679_s30 + $0x51c] ss:$28 sps:$4 sm:$0xff]  }
 0x65c   :  { %14701 = vmatprep.subr.bf16.mxu1 %v16365_v17  ;;  %v16425_v52 = vld [vmem:[%s21679_s30 + $0xa60] ss:$28 sps:$4 sm:$0xff]   ;;  %v16422_v17 = vld [vmem:[%s21679_s30 + $0x518] ss:$28 sps:$4 sm:$0xff]  }
 0x65e   :  { %5852 = vmatpush1.bf16.msra.mxu0 %v16362_v26  ;;  %v16426_v26 = vld [vmem:[%s21679_s30 + $0x8a0] ss:$28 sps:$4 sm:$0xff]  }
 0x65f   :  { %14702 = vmatpush3.bf16.msra.mxu1 %v16366_v50  ;;  %5853 = vmatprep.subr.bf16.mxu0 %v16369_v48  ;;  %v16429_v50 = vld [vmem:[%s21679_s30 + $0x554] ss:$28 sps:$4 sm:$0xff]   ;;  %v6394_v48 = vld [vmem:[%s21684_s8 + $0x80] sm:$0xff] }
 0x660   :  { %14703 = vmatprep.subr.bf16.mxu1 %v16370_v0  ;;  %v6395_v0 = vld [vmem:[%s21684_s8 + $0x88] sm:$0xff] }
 0x662   :  { %5854 = vmatpush1.bf16.msra.mxu0 %v16367_v2  ;;  %v16427_v2 = vld [vmem:[%s21679_s30 + $0x550] ss:$28 sps:$4 sm:$0xff]  }
 0x663   :  { %14704 = vmatpush3.bf16.msra.mxu1 %v16371_v7  ;;  %5855 = vmatprep.subr.bf16.mxu0 %v16374_v9  ;;  %v16432_v7 = vld [vmem:[%s21679_s30 + $0x58c] ss:$28 sps:$4 sm:$0xff]   ;;  %v16433_v9 = vld [vmem:[%s21679_s30 + $0xa98] ss:$28 sps:$4 sm:$0xff]  }
 0x664   :  { %14705 = vmatprep.subr.bf16.mxu1 %v16375_v8  ;;  %v19637_v8 = vpack.c.bf16 %v6395_v0, %v6394_v48  ;;  %v6389_v48 = vld [vmem:[%s21684_s8 + $0x58] sm:$0xff]  ;;  %v6406_v0 = vld [vmem:[%s21684_s8 + $0xe0] sm:$0xff] }
 0x666   :  { %5856 = vmatpush1.bf16.msra.mxu0 %v16372_v20  ;;  %v16430_v20 = vld [vmem:[%s21679_s30 + $0x588] ss:$28 sps:$4 sm:$0xff]  }
 0x667   :  { %14706 = vmatpush3.bf16.msra.mxu1 %v16376_v42  ;;  %5857 = vmatprep.subr.bf16.mxu0 %v16379_v44  ;;  %v16436_v42 = vld [vmem:[%s21679_s30 + $0x5c4] ss:$28 sps:$4 sm:$0xff]  }
 0x668   :  { %14707 = vmatprep.subr.bf16.mxu1 %v16380_v51  ;;  %v6378_v44 = vld [vmem:[%s21684_s8] sm:$0xff]  ;;  %v6379_v51 = vld [vmem:[%s21684_s8 + $0x8] sm:$0xff] }
 0x66a   :  { %5858 = vmatpush1.bf16.msra.mxu0 %v16377_v10  ;;  %v6396_v10 = vld [vmem:[%s21684_s8 + $0x90] sm:$0xff] }
 0x66b   :  { %14708 = vmatpush3.bf16.msra.mxu1 %v16381_v47  ;;  %5859 = vmatprep.subr.bf16.mxu0 %v16384_v38  ;;  %v6397_v47 = vld [vmem:[%s21684_s8 + $0x98] sm:$0xff] }
 0x66c   :  { %14709 = vmatprep.subr.bf16.mxu1 %v16385_v27  ;;  %v16434_v38 = vld [vmem:[%s21679_s30 + $0x5c0] ss:$28 sps:$4 sm:$0xff]  }
 0x66d   :  { %v16439_v27 = vld [vmem:[%s21679_s30 + $0x5fc] ss:$28 sps:$4 sm:$0xff]  }
 0x66e   :  { %5860 = vmatpush1.bf16.msra.mxu0 %v16382_v30  ;;  %v19667_v30 = vpack.c.bf16 %v6379_v51, %v6378_v44  ;;  %v6390_v44 = vld [vmem:[%s21684_s8 + $0x60] sm:$0xff]  ;;  %v6391_v51 = vld [vmem:[%s21684_s8 + $0x68] sm:$0xff] }
 0x66f   :  { %14710 = vmatpush3.bf16.msra.mxu1 %v16386_v22  ;;  %5870 = vmatprep.subr.bf16.mxu0 %v16389_v57  ;;  %v19669_v22 = vpack.c.bf16 %v6397_v47, %v6396_v10  ;;  %v6380_v57 = vld [vmem:[%s21684_s8 + $0x10] sm:$0xff]  ;;  %v6409_v47 = vld [vmem:[%s21684_s8 + $0xf8] sm:$0xff] }
 0x670   :  { %14717 = vmatprep.subr.bf16.mxu1 %v16390_v56  ;;  %v6381_v56 = vld [vmem:[%s21684_s8 + $0x18] sm:$0xff]  ;;  %v6408_v10 = vld [vmem:[%s21684_s8 + $0xf0] sm:$0xff] }
 0x671   :  { %5862 = vmatmul.mubr.bf16.vlgmr.msra.gmra.mrb[32].mxu0 %v18896_v63  ;;  %v16399_v63 = vld [vmem:[%s21679_s30 + $0x404] ss:$28 sps:$4 sm:$0xff]  }
 0x672   :  { %6066 = vmatmul.mubr.bf16.vlgmr.msra.gmra.mrb[28].mxu1 %v19103_v35  ;;  %5871 = vmatpush1.bf16.msra.mxu0 %v16387_v29  ;;  %v6398_v29 = vld [vmem:[%s21684_s8 + $0xa0] sm:$0xff] }
 0x673   :  { %5902 = vmatprep.mubr.bf16.mxu0 %v18908_v15  ;;  %14718 = vmatpush3.bf16.msra.mxu1 %v16391_v32  ;;  %v16397_v15 = vld [vmem:[%s21679_s30 + $0x400] ss:$28 sps:$4 sm:$0xff]   ;;  %v6399_v32 = vld [vmem:[%s21684_s8 + $0xa8] sm:$0xff] }
 0x674   :  { %6105 = vmatprep.mubr.bf16.mxu1 %v19108_v55  ;;  %5872 = vmatprep.subr.bf16.mxu0 %v16394_v23  ;;  %v16437_v23 = vld [vmem:[%s21679_s30 + $0x5f8] ss:$28 sps:$4 sm:$0xff]  }
 0x675   :  { %14719 = vmatprep.subr.bf16.mxu1 %v16395_v21  ;;  %v16442_v21 = vld [vmem:[%s21679_s30 + $0x634] ss:$28 sps:$4 sm:$0xff]  }
 0x676   :  { %5873 = vmatpush1.bf16.msra.mxu0 %v16392_v39  ;;  %v19692_v39 = vpack.c.bf16 %v6381_v56, %v6380_v57  ;;  %v19812_v57 = vpack.c.bf16 %v6391_v51, %v6390_v44  ;;  %v19815_v56 = vpack.c.bf16 %v6409_v47, %v6408_v10  ;;  %v16491_v44 = vld [vmem:[%s21679_s30 + $0x9e8] ss:$28 sps:$4 sm:$0xff]   ;;  %v16494_v10 = vld [vmem:[%s21679_s30 + $0xa20] ss:$28 sps:$4 sm:$0xff]  }
 0x677   :  { %14720 = vmatpush3.bf16.msra.mxu1 %v16396_v45  ;;  %5874 = vmatprep.subr.bf16.mxu0 %v16399_v63  ;;  %v19695_v45 = vpack.c.bf16 %v6399_v32, %v6398_v29  ;;  %v6382_v63 = vld [vmem:[%s21684_s8 + $0x20] sm:$0xff]  ;;  %v6392_v29 = vld [vmem:[%s21684_s8 + $0x70] sm:$0xff]  ;;  %v6393_v32 = vld [vmem:[%s21684_s8 + $0x78] sm:$0xff] }
 0x678   :  { %14721 = vmatprep.subr.bf16.mxu1 %v16400_v49  ;;  %v6383_v49 = vld [vmem:[%s21684_s8 + $0x28] sm:$0xff]  ;;  %v16496_v51 = vld [vmem:[%s21679_s30 + $0xa24] ss:$28 sps:$4 sm:$0xff]   ;;  %v16499_v47 = vld [vmem:[%s21679_s30 + $0xa5c] ss:$28 sps:$4 sm:$0xff]  }
 0x67a   :  { %5875 = vmatpush1.bf16.msra.mxu0 %v16397_v15  ;;  %v6400_v15 = vld [vmem:[%s21684_s8 + $0xb0] sm:$0xff] }
 0x67b   :  { %14722 = vmatpush3.bf16.msra.mxu1 %v16401_v5  ;;  %5876 = vmatprep.subr.bf16.mxu0 %v16404_v46  ;;  %v6401_v5 = vld [vmem:[%s21684_s8 + $0xb8] sm:$0xff]  ;;  %v16440_v46 = vld [vmem:[%s21679_s30 + $0x630] ss:$28 sps:$4 sm:$0xff]  }
 0x67c   :  { %14723 = vmatprep.subr.bf16.mxu1 %v16405_v54  ;;  %v16445_v54 = vld [vmem:[%s21679_s30 + $0x66c] ss:$28 sps:$4 sm:$0xff]  }
 0x67e   :  { %5877 = vmatpush1.bf16.msra.mxu0 %v16402_v61  ;;  %v19716_v61 = vpack.c.bf16 %v6383_v49, %v6382_v63  ;;  %v16455_v63 = vld [vmem:[%s21679_s30 + $0x748] ss:$28 sps:$4 sm:$0xff]   ;;  %v19838_v49 = vpack.c.bf16 %v6393_v32, %v6392_v29  ;;  %v16500_v29 = vld [vmem:[%s21679_s30 + $0xa90] ss:$28 sps:$4 sm:$0xff]   ;;  %v21685_v32 = vmov 0.0|0.0  }
 0x67f   :  { %14724 = vmatpush3.bf16.msra.mxu1 %v16406_v1  ;;  %5878 = vmatprep.subr.bf16.mxu0 %v16409_v58  ;;  %v19719_v1 = vpack.c.bf16 %v6401_v5, %v6400_v15  ;;  %v6384_v58 = vld [vmem:[%s21684_s8 + $0x30] sm:$0xff]  ;;  %v16463_v5 = vld [vmem:[%s21679_s30 + $0x7bc] ss:$28 sps:$4 sm:$0xff]  }
 0x680   :  { %14725 = vmatprep.subr.bf16.mxu1 %v16410_v59  ;;  %v6385_v59 = vld [vmem:[%s21684_s8 + $0x38] sm:$0xff] }
 0x682   :  { %5879 = vmatpush1.bf16.msra.mxu0 %v16407_v40  ;;  %v6402_v40 = vld [vmem:[%s21684_s8 + $0xc0] sm:$0xff] }
 0x683   :  { %14726 = vmatpush3.bf16.msra.mxu1 %v16411_v11  ;;  %5880 = vmatprep.subr.bf16.mxu0 %v16414_v53  ;;  %v6403_v11 = vld [vmem:[%s21684_s8 + $0xc8] sm:$0xff] }
 0x684   :  { %14727 = vmatprep.subr.bf16.mxu1 %v16415_v18  ;;  %v16443_v53 = vld [vmem:[%s21679_s30 + $0x668] ss:$28 sps:$4 sm:$0xff]  }
 0x685   :  { %v16448_v18 = vld [vmem:[%s21679_s30 + $0x6a4] ss:$28 sps:$4 sm:$0xff]  }
 0x686   :  { %5881 = vmatpush1.bf16.msra.mxu0 %v16412_v19  ;;  %v19740_v19 = vpack.c.bf16 %v6385_v59, %v6384_v58  ;;  %v16464_v58 = vld [vmem:[%s21679_s30 + $0x7f0] ss:$28 sps:$4 sm:$0xff]  }
 0x687   :  { %14728 = vmatpush3.bf16.msra.mxu1 %v16416_v3  ;;  %5882 = vmatprep.subr.bf16.mxu0 %v16419_v13  ;;  %v19743_v3 = vpack.c.bf16 %v6403_v11, %v6402_v40  ;;  %v6386_v13 = vld [vmem:[%s21684_s8 + $0x40] sm:$0xff]  ;;  %v16469_v59 = vld [vmem:[%s21679_s30 + $0x82c] ss:$28 sps:$4 sm:$0xff]  }
 0x688   :  { %14729 = vmatprep.subr.bf16.mxu1 %v16420_v37  ;;  %v6387_v37 = vld [vmem:[%s21684_s8 + $0x48] sm:$0xff]  ;;  %v16472_v11 = vld [vmem:[%s21679_s30 + $0x864] ss:$28 sps:$4 sm:$0xff]  }
 0x689   :  { %v16467_v40 = vld [vmem:[%s21679_s30 + $0x828] ss:$28 sps:$4 sm:$0xff]  }
 0x68a   :  { %5883 = vmatpush1.bf16.msra.mxu0 %v16417_v34  ;;  %v6404_v34 = vld [vmem:[%s21684_s8 + $0xd0] sm:$0xff] }
 0x68b   :  { %14730 = vmatpush3.bf16.msra.mxu1 %v16421_v25  ;;  %5884 = vmatprep.subr.bf16.mxu0 %v16424_v43  ;;  %v6405_v25 = vld [vmem:[%s21684_s8 + $0xd8] sm:$0xff] }
 0x68c   :  { %14731 = vmatprep.subr.bf16.mxu1 %v16425_v52  ;;  %v16446_v43 = vld [vmem:[%s21679_s30 + $0x6a0] ss:$28 sps:$4 sm:$0xff]  }
 0x68d   :  { %v16451_v52 = vld [vmem:[%s21679_s30 + $0x6dc] ss:$28 sps:$4 sm:$0xff]  }
 0x68e   :  { %5885 = vmatpush1.bf16.msra.mxu0 %v16422_v17  ;;  %v19764_v17 = vpack.c.bf16 %v6387_v37, %v6386_v13  ;;  %v16473_v13 = vld [vmem:[%s21679_s30 + $0x898] ss:$28 sps:$4 sm:$0xff]  }
 0x68f   :  { %14732 = vmatpush3.bf16.msra.mxu1 %v16426_v26  ;;  %5886 = vmatprep.subr.bf16.mxu0 %v16429_v50  ;;  %v19767_v26 = vpack.c.bf16 %v6405_v25, %v6404_v34  ;;  %v6388_v50 = vld [vmem:[%s21684_s8 + $0x50] sm:$0xff]  ;;  %v16481_v25 = vld [vmem:[%s21679_s30 + $0x90c] ss:$28 sps:$4 sm:$0xff]  }
 0x690   :  { %15173 = vmatprep.subr.bf16.mxu1 %v21649_v33  ;;  %v16478_v37 = vld [vmem:[%s21679_s30 + $0x8d4] ss:$28 sps:$4 sm:$0xff]  }
 0x691   :  { %v16476_v34 = vld [vmem:[%s21679_s30 + $0x8d0] ss:$28 sps:$4 sm:$0xff]  }
 0x692   :  { %6106 = vmatmul.mubr.bf16.vlgmr.msra.gmra.mrb[32].mxu1 %v19305_v12  ;;  %5887 = vmatpush1.bf16.msra.mxu0 %v16427_v2  ;;  %v6407_v2 = vld [vmem:[%s21684_s8 + $0xe8] sm:$0xff] }
 0x693   :  { %5888 = vmatprep.subr.bf16.mxu0 %v16432_v7  ;;  %15174 = vmatpush3.bf16.msra.mxu1 %v16433_v9  ;;  %v16449_v7 = vld [vmem:[%s21679_s30 + $0x6d8] ss:$28 sps:$4 sm:$0xff]  }
 0x694   :  { %15175 = vmatprep.mubr.msk.bf16.mxu1 %vm17328_vm2, %v21649_v33  ;;  %15410 = vmatprep.subr.bf16.mxu1 %v19637_v8  ;;  %v16454_v9 = vld [vmem:[%s21679_s30 + $0x714] ss:$28 sps:$4 sm:$0xff]  }
 0x696   :  { %5889 = vmatpush1.bf16.msra.mxu0 %v16430_v20  ;;  %v19788_v20 = vpack.c.bf16 %v6389_v48, %v6388_v50  ;;  %v16482_v50 = vld [vmem:[%s21679_s30 + $0x940] ss:$28 sps:$4 sm:$0xff]  }
 0x697   :  { %5890 = vmatprep.subr.bf16.mxu0 %v16436_v42  ;;  %v19791_v42 = vpack.c.bf16 %v6407_v2, %v6406_v0  ;;  %v16487_v48 = vld [vmem:[%s21679_s30 + $0x97c] ss:$28 sps:$4 sm:$0xff]   ;;  %v16490_v2 = vld [vmem:[%s21679_s30 + $0x9b4] ss:$28 sps:$4 sm:$0xff]  }
 0x698   :  { %v16485_v0 = vld [vmem:[%s21679_s30 + $0x978] ss:$28 sps:$4 sm:$0xff]  }
 0x69a   :  { %15176 = vmatmul.mubr.msk.bf16.vlgmr.msra.gmra.mrb[36].mxu1 %vm1385_vm4, %v19325_v4  ;;  %5891 = vmatpush1.bf16.msra.mxu0 %v16434_v38  ;;  %v16452_v38 = vld [vmem:[%s21679_s30 + $0x710] ss:$28 sps:$4 sm:$0xff]  }
 0x69b   :  { %5892 = vmatprep.subr.bf16.mxu0 %v16439_v27  ;;  %15412 = vmatpush3.bf16.msra.mxu1 %v19667_v30  ;;  %v16457_v27 = vld [vmem:[%s21679_s30 + $0x74c] ss:$28 sps:$4 sm:$0xff]  }
 0x69c   :  { %15414 = vmatprep.subr.bf16.mxu1 %v19669_v22 }
 0x69e   :  { %5893 = vmatpush1.bf16.msra.mxu0 %v16437_v23  ;;  %v6426_v23 = vld [vmem:[%s21684_s8 + $0x180] sm:$0xff] }
 0x69f   :  { %5894 = vmatprep.subr.bf16.mxu0 %v16442_v21  ;;  %15416 = vmatpush3.bf16.msra.mxu1 %v19692_v39  ;;  %v6427_v21 = vld [vmem:[%s21684_s8 + $0x188] sm:$0xff] }
 0x6a0   :  { %15418 = vmatprep.subr.bf16.mxu1 %v19695_v45  ;;  %v19841_v15 = vpack.c.bf16 %v6427_v21, %v6426_v23  ;;  %v6474_v23 = vld [vmem:[%s21684_s8 + $0x300] sm:$0xff]  ;;  %v6475_v21 = vld [vmem:[%s21684_s8 + $0x308] sm:$0xff] }
 0x6a2   :  { %5895 = vmatpush1.bf16.msra.mxu0 %v16440_v46  ;;  %v16461_v46 = vld [vmem:[%s21679_s30 + $0x7b8] ss:$28 sps:$4 sm:$0xff]  }
 0x6a3   :  { %5896 = vmatprep.subr.bf16.mxu0 %v16445_v54  ;;  %15420 = vmatpush3.bf16.msra.mxu1 %v19716_v61  ;;  %v16466_v54 = vld [vmem:[%s21679_s30 + $0x7f4] ss:$28 sps:$4 sm:$0xff]  }
 0x6a4   :  { %15422 = vmatprep.subr.bf16.mxu1 %v19719_v1 }
 0x6a6   :  { %5897 = vmatpush1.bf16.msra.mxu0 %v16443_v53  ;;  %v16470_v53 = vld [vmem:[%s21679_s30 + $0x860] ss:$28 sps:$4 sm:$0xff]  }
 0x6a7   :  { %5898 = vmatprep.subr.bf16.mxu0 %v16448_v18  ;;  %15424 = vmatpush3.bf16.msra.mxu1 %v19740_v19  ;;  %v16475_v18 = vld [vmem:[%s21679_s30 + $0x89c] ss:$28 sps:$4 sm:$0xff]  }
 0x6a8   :  { %15426 = vmatprep.subr.bf16.mxu1 %v19743_v3 }
 0x6aa   :  { %5899 = vmatpush1.bf16.msra.mxu0 %v16446_v43  ;;  %v16479_v43 = vld [vmem:[%s21679_s30 + $0x908] ss:$28 sps:$4 sm:$0xff]  }
 0x6ab   :  { %5900 = vmatprep.subr.bf16.mxu0 %v16451_v52  ;;  %15428 = vmatpush3.bf16.msra.mxu1 %v19764_v17  ;;  %v16484_v52 = vld [vmem:[%s21679_s30 + $0x944] ss:$28 sps:$4 sm:$0xff]  }
 0x6ac   :  { %15430 = vmatprep.subr.bf16.mxu1 %v19767_v26 }
 0x6ae   :  { %5901 = vmatpush1.bf16.msra.mxu0 %v16449_v7  ;;  %v16488_v7 = vld [vmem:[%s21679_s30 + $0x9b0] ss:$28 sps:$4 sm:$0xff]  }
 0x6af   :  { %5911 = vmatprep.subr.bf16.mxu0 %v16454_v9  ;;  %15432 = vmatpush3.bf16.msra.mxu1 %v19788_v20  ;;  %v16493_v9 = vld [vmem:[%s21679_s30 + $0x9ec] ss:$28 sps:$4 sm:$0xff]  }
 0x6b0   :  { %15434 = vmatprep.subr.bf16.mxu1 %v19791_v42 }
 0x6b1   :  { %5903 = vmatmul.mubr.bf16.vlgmr.msra.gmra.mrb[32].mxu0 %v19103_v35  ;;  %v16460_v35 = vld [vmem:[%s21679_s30 + $0x784] ss:$28 sps:$4 sm:$0xff]  }
 0x6b2   :  { %5912 = vmatpush1.bf16.msra.mxu0 %v16452_v38  ;;  %5943 = vmatprep.mubr.bf16.mxu0 %v19108_v55  ;;  %v16458_v55 = vld [vmem:[%s21679_s30 + $0x780] ss:$28 sps:$4 sm:$0xff]   ;;  %v16497_v38 = vld [vmem:[%s21679_s30 + $0xa58] ss:$28 sps:$4 sm:$0xff]  }
 0x6b3   :  { %5913 = vmatprep.subr.bf16.mxu0 %v16457_v27  ;;  %15436 = vmatpush3.bf16.msra.mxu1 %v19812_v57  ;;  %v16502_v27 = vld [vmem:[%s21679_s30 + $0xa94] ss:$28 sps:$4 sm:$0xff]  }
 0x6b4   :  { %15438 = vmatprep.subr.bf16.mxu1 %v19815_v56 }
 0x6b6   :  { %5914 = vmatpush1.bf16.msra.mxu0 %v16455_v63  ;;  %v19941_v63 = vpack.c.bf16 %v6475_v21, %v6474_v23 }
 0x6b7   :  { %5915 = vmatprep.subr.bf16.mxu0 %v16460_v35  ;;  %15440 = vmatpush3.bf16.msra.mxu1 %v19838_v49  ;;  %v6476_v35 = vld [vmem:[%s21684_s8 + $0x310] sm:$0xff] }
 0x6b8   :  { %15442 = vmatprep.subr.bf16.mxu1 %v19841_v15  ;;  %21686 = vst [vmem:[#allocation15_spill] sm:$0xff] %v19941_v63 }
 0x6ba   :  { %5916 = vmatpush1.bf16.msra.mxu0 %v16458_v55  ;;  %v19954_v55 = vld [vmem:[%s21687_s1] sm:$0x7f] }
 0x6bb   :  { %5917 = vmatprep.subr.bf16.mxu0 %v16463_v5 }
 0x6be   :  { %5918 = vmatpush1.bf16.msra.mxu0 %v16461_v46  ;;  %v3702_v46 = vrot.slane %v19954_v55, %v21662_v24 }
 0x6bf   :  { %5919 = vmatprep.subr.bf16.mxu0 %v16466_v54  ;;  %v3706_v54 = vrot.slane %v19954_v55, %v21663_v60 }
 0x6c2   :  { %5920 = vmatpush1.bf16.msra.mxu0 %v16464_v58  ;;  %v3714_v58 = vrot.slane %v19954_v55, %v21665_v62 }
 0x6c3   :  { %5921 = vmatprep.subr.bf16.mxu0 %v16469_v59 }
 0x6c6   :  { %5922 = vmatpush1.bf16.msra.mxu0 %v16467_v40 }
 0x6c7   :  { %5923 = vmatprep.subr.bf16.mxu0 %v16472_v11 }
 0x6ca   :  { %5924 = vmatpush1.bf16.msra.mxu0 %v16470_v53 }
 0x6cb   :  { %5925 = vmatprep.subr.bf16.mxu0 %v16475_v18 }
 0x6ce   :  { %5926 = vmatpush1.bf16.msra.mxu0 %v16473_v13 }
 0x6cf   :  { %5927 = vmatprep.subr.bf16.mxu0 %v16478_v37 }
 0x6d2   :  { %5928 = vmatpush1.bf16.msra.mxu0 %v16476_v34 }
 0x6d3   :  { %5929 = vmatprep.subr.bf16.mxu0 %v16481_v25 }
 0x6d6   :  { %5930 = vmatpush1.bf16.msra.mxu0 %v16479_v43 }
 0x6d7   :  { %5931 = vmatprep.subr.bf16.mxu0 %v16484_v52 }
 0x6da   :  { %5932 = vmatpush1.bf16.msra.mxu0 %v16482_v50 }
 0x6db   :  { %5933 = vmatprep.subr.bf16.mxu0 %v16487_v48 }
 0x6de   :  { %5934 = vmatpush1.bf16.msra.mxu0 %v16485_v0 }
 0x6df   :  { %5935 = vmatprep.subr.bf16.mxu0 %v16490_v2 }
 0x6e2   :  { %5936 = vmatpush1.bf16.msra.mxu0 %v16488_v7 }
 0x6e3   :  { %5937 = vmatprep.subr.bf16.mxu0 %v16493_v9 }
 0x6e6   :  { %5938 = vmatpush1.bf16.msra.mxu0 %v16491_v44 }
 0x6e7   :  { %5939 = vmatprep.subr.bf16.mxu0 %v16496_v51 }
 0x6ea   :  { %5940 = vmatpush1.bf16.msra.mxu0 %v16494_v10 }
 0x6eb   :  { %5941 = vmatprep.subr.bf16.mxu0 %v16499_v47 }
 0x6ee   :  { %5942 = vmatpush1.bf16.msra.mxu0 %v16497_v38 }
 0x6ef   :  { %5952 = vmatprep.subr.bf16.mxu0 %v16502_v27 }
 0x6f1   :  { %5944 = vmatmul.mubr.bf16.vlgmr.msra.gmra.mrb[32].mxu0 %v19305_v12  ;;  %v6477_v12 = vld [vmem:[%s21684_s8 + $0x318] sm:$0xff] }
 0x6f2   :  { %5953 = vmatpush1.bf16.msra.mxu0 %v16500_v29  ;;  %5984 = vmatprep.mubr.bf16.mxu0 %v21561_v16  ;;  %v19957_v5 = vpack.c.bf16 %v6477_v12, %v6476_v35 }
 0x6f3   :  { %15505 = vmatprep.subr.bf16.mxu0 %v21685_v32 }
 0x6f4   :  { %21688 = vst [vmem:[#allocation16_spill] sm:$0xff] %v19957_v5 }
 0x6fd   :  { %13916 = vmatmul.mubr.msk.bf16.vlgmr.msra.gmra.mrb[32].mxu0 %vm1385_vm4, %v19325_v4  ;;  %v3710_v4 = vrot.slane %v19954_v55, %v21664_v41 }
 0x6fe   :  { %15507 = vmatpush3.bf16.msra.mxu0 %v19941_v63  ;;  %15187 = vmatprep.mubr.msk.f32.mxu0 %vm17328_vm2, %v21649_v33  ;;  %v6451_v63 = vld [vmem:[%s21684_s8 + $0x248] sm:$0xff] }
 0x6ff   :  { %15508 = vmatprep.subr.bf16.mxu0 %v21685_v32 }
 0x702   :  { %15510 = vmatpush3.bf16.msra.mxu0 %v19957_v5  ;;  %v6450_v5 = vld [vmem:[%s21684_s8 + $0x240] sm:$0xff] }
 0x704   :  { %v5658_v59 = vpop.f32.mrb[28].mxu0 }
 0x705   :  { %v15741_v40 = vadd.f32 %v5658_v59, %v3702_v46  ;;  %v5822_v11 = vpop.f32.mrb[20].mxu1  ;;  %v5660_v53 = vpop.f32.mrb[29].mxu0 }
 0x706   :  { %v15743_v18 = vadd.f32 %v5822_v11, %v3710_v4  ;;  %v15742_v13 = vadd.f32 %v5660_v53, %v3706_v54  ;;  %v5824_v37 = vpop.f32.mrb[21].mxu1  ;;  %v5662_v34 = vpop.f32.mrb[30].mxu0 }
 0x707   :  { %v15744_v25 = vadd.f32 %v5824_v37, %v3714_v58  ;;  %v5826_v43 = vpop.f32.mrb[22].mxu1  ;;  %v5663_v52 = vpop.f32.mrb[31].mxu0 }
 0x708   :  { %v6160_v50 = vcombine.low %v15741_v40, %v15742_v13  ;;  %v5827_v48 = vpop.f32.mrb[23].mxu1 }
 0x709   :  { %v6161_v0 = vcombine.low %v15743_v18, %v15744_v25 }
 0x70a   :  { %v6168_v2 = vrot.slane %v6160_v50, %v18177_v14 }
 0x70b   :  { %v6175_v7 = vrot.slane %v6161_v0, %v18177_v14 }
 0x70d   :  { %v19973_v9 = vcombine.low %v6168_v2, %v6175_v7  ;;  %v19975_v44 = vcombine.high %v6168_v2, %v6175_v7  ;;  %v13918_v51 = vcombine.low %v6175_v7, %v6175_v7  ;;  %v13920_v10 = vcombine.high %v6175_v7, %v6175_v7 }
 0x70f   :  { %21689 = vst [vmem:[#allocation17_spill] sm:$0xff] %v19973_v9  ;;  %21690 = vst [vmem:[#allocation18_spill] sm:$0xff] %v19975_v44  ;;  %v6206_v47 = vrot.slane %v19973_v9, %v18177_v14  ;;  %v19980_v38 = vrot.slane %v13918_v51, %v18177_v14  ;;  %v6239_v27 = vrot.slane %v19975_v44, %v18177_v14 }
 0x710   :  { %v19985_v29 = vrot.slane %v13920_v10, %v18177_v14 }
 0x711   :  { %v6214_v23 = vcombine.high %v6206_v47, %v6206_v47  ;;  %v6247_v21 = vcombine.high %v6239_v27, %v6239_v27  ;;  %v6279_v35 = vsel %vm1159_vm0, %v6206_v47, 0.0  ;;  %v6329_v12 = vsel %vm1159_vm0, %v6239_v27, 0.0 }
 0x712   :  { %v6280_v46 = vrot.slane %v6279_v35, 4  ;;  %v6330_v4 = vrot.slane %v6329_v12, 4  ;;  %v6215_v54 = vcombine.high %v19980_v38, %v19980_v38  ;;  %v6248_v58 = vcombine.high %v19985_v29, %v19985_v29 }
 0x713   :  { %v6286_v59 = vsel %vm1159_vm0, %v6214_v23, 0.0  ;;  %v6336_v40 = vsel %vm1159_vm0, %v6247_v21, 0.0 }
 0x714   :  { %v6287_v11 = vrot.slane %v6286_v59, 4  ;;  %v6337_v53 = vrot.slane %v6336_v40, 4  ;;  %v6281_v18 = vadd.f32 %v6280_v46, %v6279_v35  ;;  %v6331_v13 = vadd.f32 %v6330_v4, %v6329_v12 }
 0x715   :  { %v6300_v37 = vsel %vm1159_vm0, %v6215_v54, 0.0  ;;  %v6350_v34 = vsel %vm1159_vm0, %v6248_v58, 0.0 }
 0x716   :  { %v6288_v25 = vadd.f32 %v6287_v11, %v6286_v59  ;;  %v6338_v43 = vadd.f32 %v6337_v53, %v6336_v40  ;;  %v6282_v52 = vrot.slane %v6281_v18, 2  ;;  %v6332_v50 = vrot.slane %v6331_v13, 2  ;;  %v6410_v59 = vld [vmem:[%s21684_s8 + $0x100] sm:$0xff]  ;;  %v6411_v40 = vld [vmem:[%s21684_s8 + $0x108] sm:$0xff] }
 0x717   :  { %v6301_v48 = vrot.slane %v6300_v37, 4  ;;  %v6351_v0 = vrot.slane %v6350_v34, 4 }
 0x718   :  { %v6289_v2 = vrot.slane %v6288_v25, 2  ;;  %v6339_v7 = vrot.slane %v6338_v43, 2  ;;  %v6283_v51 = vadd.f32 %v6282_v52, %v6281_v18  ;;  %v6333_v10 = vadd.f32 %v6332_v50, %v6331_v13 }
 0x719   :  { %v6302_v47 = vadd.f32 %v6301_v48, %v6300_v37  ;;  %v6352_v27 = vadd.f32 %v6351_v0, %v6350_v34  ;;  %v6428_v37 = vld [vmem:[%s21684_s8 + $0x190] sm:$0xff]  ;;  %v6429_v34 = vld [vmem:[%s21684_s8 + $0x198] sm:$0xff]  ;;  %v20009_v52 = vpack.c.bf16 %v6411_v40, %v6410_v59 }
 0x71a   :  { %v6290_v23 = vadd.f32 %v6289_v2, %v6288_v25  ;;  %v6340_v21 = vadd.f32 %v6339_v7, %v6338_v43  ;;  %v6284_v35 = vrot.slane %v6283_v51, 1  ;;  %v6334_v12 = vrot.slane %v6333_v10, 1  ;;  %v6412_v7 = vld [vmem:[%s21684_s8 + $0x110] sm:$0xff]  ;;  %v6433_v40 = vld [vmem:[%s21684_s8 + $0x1b8] sm:$0xff] }
 0x71b   :  { %v6303_v46 = vrot.slane %v6302_v47, 2  ;;  %v6353_v4 = vrot.slane %v6352_v27, 2  ;;  %v20012_v2 = vpack.c.bf16 %v6429_v34, %v6428_v37  ;;  %v6432_v59 = vld [vmem:[%s21684_s8 + $0x1b0] sm:$0xff] }
 0x71c   :  { %v6291_v54 = vrot.slane %v6290_v23, 1  ;;  %v6341_v58 = vrot.slane %v6340_v21, 1  ;;  %v6285_v11 = vadd.f32 %v6284_v35, %v6283_v51  ;;  %v6335_v53 = vadd.f32 %v6334_v12, %v6333_v10  ;;  %v6413_v51 = vld [vmem:[%s21684_s8 + $0x118] sm:$0xff] }
 0x71d   :  { %v6304_v18 = vadd.f32 %v6303_v46, %v6302_v47  ;;  %v6354_v13 = vadd.f32 %v6353_v4, %v6352_v27  ;;  %v20029_v12 = vpack.c.bf16 %v6413_v51, %v6412_v7  ;;  %v6414_v4 = vld [vmem:[%s21684_s8 + $0x120] sm:$0xff] }
 0x71e   :  { %v6292_v25 = vadd.f32 %v6291_v54, %v6290_v23  ;;  %v6342_v43 = vadd.f32 %v6341_v58, %v6340_v21  ;;  %v6492_v10 = vsel %vm1371_vm1, %v6335_v53, %v6285_v11  ;;  %v6430_v23 = vld [vmem:[%s21684_s8 + $0x1a0] sm:$0xff]  ;;  %v6431_v21 = vld [vmem:[%s21684_s8 + $0x1a8] sm:$0xff]  ;;  %v6293_v53 = vsel %vm1159_vm0, %v19980_v38, 0.0  ;;  %v6417_v38 = vld [vmem:[%s21684_s8 + $0x138] sm:$0xff] }
 0x71f   :  { %v6305_v50 = vrot.slane %v6304_v18, 1  ;;  %v6355_v48 = vrot.slane %v6354_v13, 1  ;;  %v20032_v46 = vpack.c.bf16 %v6431_v21, %v6430_v23  ;;  %v6415_v54 = vld [vmem:[%s21684_s8 + $0x128] sm:$0xff]  ;;  %v6436_v23 = vld [vmem:[%s21684_s8 + $0x1d0] sm:$0xff]  ;;  %v6437_v21 = vld [vmem:[%s21684_s8 + $0x1d8] sm:$0xff] }
 0x720   :  { %v6493_v0 = vsel %vm1371_vm1, %v6342_v43, %v6292_v25  ;;  %v20053_v34 = vpack.c.bf16 %v6415_v54, %v6414_v4  ;;  %v20056_v43 = vpack.c.bf16 %v6433_v40, %v6432_v59  ;;  %v6420_v59 = vld [vmem:[%s21684_s8 + $0x150] sm:$0xff]  ;;  %v6421_v40 = vld [vmem:[%s21684_s8 + $0x158] sm:$0xff] }
 0x721   :  { %6572 = vmatprep.mubr.f32.mxu1 %v6493_v0  ;;  %v6306_v47 = vadd.f32 %v6305_v50, %v6304_v18  ;;  %v6356_v27 = vadd.f32 %v6355_v48, %v6354_v13  ;;  %v6343_v18 = vsel %vm1159_vm0, %v19985_v29, 0.0  ;;  %v6416_v50 = vld [vmem:[%s21684_s8 + $0x130] sm:$0xff]  ;;  %v6434_v29 = vld [vmem:[%s21684_s8 + $0x1c0] sm:$0xff]  ;;  %v6435_v48 = vld [vmem:[%s21684_s8 + $0x1c8] sm:$0xff]  ;;  %v6294_v0 = vrot.slane %v6293_v53, 4 }
 0x722   :  { %6573 = vmatmul.mubr.f32.vlgmr.msra.gmra.mrb[40].mxu1 %v6492_v10  ;;  %v6344_v7 = vrot.slane %v6343_v18, 4  ;;  %v20071_v51 = vpack.c.bf16 %v6417_v38, %v6416_v50  ;;  %v20074_v10 = vpack.c.bf16 %v6435_v48, %v6434_v29  ;;  %v6422_v38 = vld [vmem:[%s21684_s8 + $0x160] sm:$0xff]  ;;  %v6423_v29 = vld [vmem:[%s21684_s8 + $0x168] sm:$0xff]  ;;  %v6440_v48 = vld [vmem:[%s21684_s8 + $0x1f0] sm:$0xff] }
 0x723   :  { %15444 = vmatpush3.bf16.msra.mxu1 %v20009_v52  ;;  %v6495_v35 = vsel %vm1371_vm1, %v6356_v27, %v6306_v47  ;;  %v6418_v47 = vld [vmem:[%s21684_s8 + $0x140] sm:$0xff]  ;;  %v6419_v27 = vld [vmem:[%s21684_s8 + $0x148] sm:$0xff] }
 0x724   :  { %6642 = vmatprep.mubr.f32.mxu1 %v6495_v35  ;;  %15446 = vmatprep.subr.bf16.mxu1 %v20012_v2  ;;  %v6295_v35 = vadd.f32 %v6294_v0, %v6293_v53  ;;  %v6345_v4 = vadd.f32 %v6344_v7, %v6343_v18  ;;  %v20089_v54 = vpack.c.bf16 %v6419_v27, %v6418_v47  ;;  %v6439_v53 = vld [vmem:[%s21684_s8 + $0x1e8] sm:$0xff]  ;;  %v6441_v0 = vld [vmem:[%s21684_s8 + $0x1f8] sm:$0xff] }
 0x725   :  { %v14689_v58 = vpop.f32.mrb[24].mxu1  ;;  %v20125_v27 = vpack.c.bf16 %v6423_v29, %v6422_v38  ;;  %v6443_v38 = vld [vmem:[%s21684_s8 + $0x208] sm:$0xff] }
 0x726   :  { %v14690_v11 = vpop.f32.mrb[25].mxu1  ;;  %v6296_v18 = vrot.slane %v6295_v35, 2 }
 0x727   :  { %v20050_v13 = vadd.f32 %v14690_v11, %v14689_v58  ;;  %v14692_v37 = vpop.f32.mrb[26].mxu1  ;;  %15448 = vmatpush3.bf16.msra.mxu1 %v20029_v12  ;;  %v20092_v58 = vpack.c.bf16 %v6437_v21, %v6436_v23  ;;  %v6438_v11 = vld [vmem:[%s21684_s8 + $0x1e0] sm:$0xff]  ;;  %v20128_v23 = vpack.c.bf16 %v6441_v0, %v6440_v48  ;;  %v6424_v21 = vld [vmem:[%s21684_s8 + $0x170] sm:$0xff] }
 0x728   :  { %v14693_v25 = vpop.f32.mrb[27].mxu1  ;;  %15450 = vmatprep.subr.bf16.mxu1 %v20032_v46  ;;  %v6346_v37 = vrot.slane %v6345_v4, 2  ;;  %v20110_v50 = vpack.c.bf16 %v6439_v53, %v6438_v11  ;;  %v6297_v7 = vadd.f32 %v6296_v18, %v6295_v35  ;;  %v6458_v35 = vld [vmem:[%s21684_s8 + $0x280] sm:$0xff] }
 0x729   :  { %v20107_v25 = vpack.c.bf16 %v6421_v40, %v6420_v59  ;;  %v6425_v59 = vld [vmem:[%s21684_s8 + $0x178] sm:$0xff] }
 0x72a   :  { %v6347_v47 = vadd.f32 %v6346_v37, %v6345_v4  ;;  %v6298_v40 = vrot.slane %v6297_v7, 1  ;;  %v6459_v4 = vld [vmem:[%s21684_s8 + $0x288] sm:$0xff]  ;;  %v20143_v53 = vpack.c.bf16 %v6425_v59, %v6424_v21  ;;  %v6442_v37 = vld [vmem:[%s21684_s8 + $0x200] sm:$0xff]  ;;  %v3726_v59 = vrot.slane %v19954_v55, %v18236_v6 }
 0x72b   :  { %15452 = vmatpush3.bf16.msra.mxu1 %v20053_v34  ;;  %v20146_v18 = vpack.c.bf16 %v6459_v4, %v6458_v35  ;;  %v20155_v0 = vpack.c.bf16 %v6443_v38, %v6442_v37  ;;  %v6460_v37 = vld [vmem:[%s21684_s8 + $0x290] sm:$0xff]  ;;  %v6461_v38 = vld [vmem:[%s21684_s8 + $0x298] sm:$0xff] }
 0x72c   :  { %15454 = vmatprep.subr.bf16.mxu1 %v20056_v43  ;;  %v6348_v11 = vrot.slane %v6347_v47, 1  ;;  %v6299_v29 = vadd.f32 %v6298_v40, %v6297_v7  ;;  %v6028_v16 = vadd.f32 %v20050_v13, %v3726_v59  ;;  %v6445_v13 = vld [vmem:[%s21684_s8 + $0x218] sm:$0xff]  ;;  %v6463_v59 = vld [vmem:[%s21684_s8 + $0x2a8] sm:$0xff] }
 0x72d   :  { %21691 = vst [vmem:[#allocation19_spill] sm:$0xff] %v20155_v0 }
 0x72e   :  { %v6349_v48 = vadd.f32 %v6348_v11, %v6347_v47 }
 0x72f   :  { %15456 = vmatpush3.bf16.msra.mxu1 %v20071_v51 }
 0x730   :  { %15458 = vmatprep.subr.bf16.mxu1 %v20074_v10  ;;  %v6494_v21 = vsel %vm1371_vm1, %v6349_v48, %v6299_v29  ;;  %v20169_v29 = vpack.c.bf16 %v6461_v38, %v6460_v37  ;;  %v6444_v48 = vld [vmem:[%s21684_s8 + $0x210] sm:$0xff] }
 0x732   :  { %21692 = vst [vmem:[#allocation20_spill] sm:$0xff] %v20169_v29 }
 0x733   :  { %15460 = vmatpush3.bf16.msra.mxu1 %v20089_v54 }
 0x734   :  { %15462 = vmatprep.subr.bf16.mxu1 %v20092_v58 }
 0x737   :  { %15464 = vmatpush3.bf16.msra.mxu1 %v20107_v25 }
 0x738   :  { %15466 = vmatprep.subr.bf16.mxu1 %v20110_v50 }
 0x73b   :  { %15468 = vmatpush3.bf16.msra.mxu1 %v20125_v27 }
 0x73c   :  { %15470 = vmatprep.subr.bf16.mxu1 %v20128_v23 }
 0x73f   :  { %15472 = vmatpush3.bf16.msra.mxu1 %v20143_v53 }
 0x740   :  { %15474 = vmatprep.subr.bf16.mxu1 %v20146_v18 }
 0x742   :  { %6643 = vmatmul.mubr.f32.vlgmr.msra.gmra.mrb[42].mxu1 %v6494_v21  ;;  %v20177_v21 = vpack.c.bf16 %v6445_v13, %v6444_v48  ;;  %v6448_v48 = vld [vmem:[%s21684_s8 + $0x230] sm:$0xff]  ;;  %v6449_v13 = vld [vmem:[%s21684_s8 + $0x238] sm:$0xff] }
 0x743   :  { %15476 = vmatpush3.bf16.msra.mxu1 %v20155_v0 }
 0x744   :  { %21693 = vst [vmem:[#allocation26_spill] sm:$0xff] %v20177_v21  ;;  %15478 = vmatprep.subr.bf16.mxu1 %v20169_v29 }
 0x745   :  { %v14711_v35 = vpop.f32.mrb[28].mxu1 }
 0x746   :  { %v14712_v4 = vpop.f32.mrb[29].mxu1 }
 0x747   :  { %v14713_v7 = vadd.f32 %v14712_v4, %v14711_v35  ;;  %v14714_v47 = vpop.f32.mrb[30].mxu1  ;;  %v6446_v35 = vld [vmem:[%s21684_s8 + $0x220] sm:$0xff]  ;;  %15480 = vmatpush3.bf16.msra.mxu1 %v20177_v21 }
 0x748   :  { %v14715_v40 = vpop.f32.mrb[31].mxu1  ;;  %v6464_v47 = vld [vmem:[%s21684_s8 + $0x2b0] sm:$0xff] }
 0x749   :  { %v6068_v11 = vadd.f32 %v14713_v7, %v6028_v16  ;;  %v6462_v16 = vld [vmem:[%s21684_s8 + $0x2a0] sm:$0xff]  ;;  %v6447_v7 = vld [vmem:[%s21684_s8 + $0x228] sm:$0xff]  ;;  %v6465_v40 = vld [vmem:[%s21684_s8 + $0x2b8] sm:$0xff] }
 0x74a   :  { %v20189_v4 = vpack.c.bf16 %v6463_v59, %v6462_v16  ;;  %v20201_v37 = vpack.c.bf16 %v6447_v7, %v6446_v35  ;;  %v20204_v38 = vpack.c.bf16 %v6465_v40, %v6464_v47  ;;  %v6466_v16 = vld [vmem:[%s21684_s8 + $0x2c0] sm:$0xff]  ;;  %v6467_v59 = vld [vmem:[%s21684_s8 + $0x2c8] sm:$0xff]  ;;  %v20219_v7 = vpack.c.bf16 %v6449_v13, %v6448_v48  ;;  %v6468_v48 = vld [vmem:[%s21684_s8 + $0x2d0] sm:$0xff] }
 0x74b   :  { %v20222_v40 = vpack.c.bf16 %v6467_v59, %v6466_v16  ;;  %v6469_v13 = vld [vmem:[%s21684_s8 + $0x2d8] sm:$0xff] }
 0x74c   :  { %21694 = vst [vmem:[#allocation27_spill] sm:$0xff] %v20189_v4  ;;  %21695 = vst [vmem:[#allocation29_spill] sm:$0xff] %v20201_v37  ;;  %15482 = vmatprep.subr.bf16.mxu1 %v20189_v4 }
 0x74d   :  { %21696 = vst [vmem:[#allocation30_spill] sm:$0xff] %v20204_v38  ;;  %15484 = vmatpush3.bf16.msra.mxu1 %v20201_v37  ;;  %21697 = vst [vmem:[#allocation31_spill] sm:$0xff] %v20219_v7  ;;  %v20240_v37 = vpack.c.bf16 %v6469_v13, %v6468_v48 }
 0x74e   :  { %15486 = vmatprep.subr.bf16.mxu1 %v20204_v38  ;;  %21698 = vst [vmem:[#allocation32_spill] sm:$0xff] %v20222_v40  ;;  %v20237_v38 = vpack.c.bf16 %v6451_v63, %v6450_v5  ;;  %v6471_v63 = vld [vmem:[%s21684_s8 + $0x2e8] sm:$0xff] }
 0x74f   :  { %21700 = vst [vmem:[#allocation34_spill] sm:$0xff] %v20240_v37 }
 0x750   :  { %21699 = vst [vmem:[#allocation33_spill] sm:$0xff] %v20237_v38 }
 0x751   :  { %15488 = vmatpush3.bf16.msra.mxu1 %v20219_v7 }
 0x752   :  { %15490 = vmatprep.subr.bf16.mxu1 %v20222_v40  ;;  %v6455_v40 = vld [vmem:[%s21684_s8 + $0x268] sm:$0xff] }
 0x755   :  { %15492 = vmatpush3.bf16.msra.mxu1 %v20237_v38  ;;  %v6457_v38 = vld [vmem:[%s21684_s8 + $0x278] sm:$0xff] }
 0x756   :  { %15494 = vmatprep.subr.bf16.mxu1 %v20240_v37  ;;  %v6456_v37 = vld [vmem:[%s21684_s8 + $0x270] sm:$0xff] }
 0x765   :  { %v14733_v35 = vpop.f32.mrb[32].mxu1 }
 0x766   :  { %v14734_v47 = vpop.f32.mrb[33].mxu1 }
 0x767   :  { %v14735_v4 = vadd.f32 %v14734_v47, %v14733_v35  ;;  %v14736_v21 = vpop.f32.mrb[34].mxu1  ;;  %v6453_v35 = vld [vmem:[%s21684_s8 + $0x258] sm:$0xff] }
 0x768   :  { %v14737_v16 = vpop.f32.mrb[35].mxu1  ;;  %v6452_v21 = vld [vmem:[%s21684_s8 + $0x250] sm:$0xff] }
 0x769   :  { %v6108_v59 = vadd.f32 %v14735_v4, %v6068_v11  ;;  %v6470_v11 = vld [vmem:[%s21684_s8 + $0x2e0] sm:$0xff]  ;;  %v20255_v4 = vpack.c.bf16 %v6453_v35, %v6452_v21  ;;  %v6472_v21 = vld [vmem:[%s21684_s8 + $0x2f0] sm:$0xff] }
 0x76a   :  { %v20258_v13 = vpack.c.bf16 %v6471_v63, %v6470_v11  ;;  %v6454_v16 = vld [vmem:[%s21684_s8 + $0x260] sm:$0xff] }
 0x76b   :  { %21701 = vst [vmem:[#allocation35_spill] sm:$0xff] %v20255_v4  ;;  %15496 = vmatpush3.bf16.msra.mxu1 %v20255_v4  ;;  %v20274_v63 = vpack.c.bf16 %v6455_v40, %v6454_v16  ;;  %v20288_v16 = vpack.c.bf16 %v6457_v38, %v6456_v37 }
 0x76c   :  { %21702 = vst [vmem:[#allocation36_spill] sm:$0xff] %v20258_v13  ;;  %15498 = vmatprep.subr.bf16.mxu1 %v20258_v13 }
 0x76d   :  { %v6147_v5 = vpop.f32.mrb[36].mxu1  ;;  %21703 = vst [vmem:[#allocation37_spill] sm:$0xff] %v20274_v63  ;;  %21705 = vst [vmem:[#allocation14_spill] sm:$0xff] %v20288_v16 }
 0x76e   :  { %v6148_v47 = vadd.f32 %v6147_v5, %v6108_v59  ;;  %v15177_v48 = vpop.f32.mrb[37].mxu1  ;;  %v6473_v59 = vld [vmem:[%s21684_s8 + $0x2f8] sm:$0xff] }
 0x76f   :  { %v6150_v7 = vpop.f32.mrb[38].mxu1  ;;  %15500 = vmatpush3.bf16.msra.mxu1 %v20274_v63 }
 0x770   :  { %v6192_v35 = vrot.slane %v6148_v47, %v18177_v14  ;;  %v15178_v11 = vpop.f32.mrb[39].mxu1  ;;  %v20277_v7 = vpack.c.bf16 %v6473_v59, %v6472_v21 }
 0x772   :  { %v13919_v5 = vcombine.low %v6192_v35, %v6192_v35  ;;  %v13921_v48 = vcombine.high %v6192_v35, %v6192_v35  ;;  %21704 = vst [vmem:[#allocation13_spill] sm:$0xff] %v20277_v7  ;;  %15502 = vmatprep.subr.bf16.mxu1 %v20277_v7 }
 0x773   :  { %15504 = vmatpush3.bf16.msra.mxu1 %v20288_v16 }
 0x774   :  { %v6230_v47 = vrot.slane %v13919_v5, %v18177_v14  ;;  %v6263_v40 = vrot.slane %v13921_v48, %v18177_v14 }
 0x776   :  { %v6322_v21 = vsel %vm6321_vm7, %v6230_v47, 0.0  ;;  %v6371_v59 = vsel %vm6321_vm7, %v6263_v40, 0.0  ;;  %v3722_v40 = vrot.slane %v19954_v55, %v18369_v36 }
 0x777   :  { %v6323_v11 = vrot.slane %v6322_v21, 4  ;;  %v6372_v13 = vrot.slane %v6371_v59, 4 }
 0x779   :  { %v6324_v4 = vadd.f32 %v6323_v11, %v6322_v21  ;;  %v6373_v29 = vadd.f32 %v6372_v13, %v6371_v59  ;;  %v3718_v13 = vrot.slane %v19954_v55, %v18365_v28 }
 0x77b   :  { %v6325_v0 = vrot.slane %v6324_v4, 2  ;;  %v6374_v5 = vrot.slane %v6373_v29, 2 }
 0x77d   :  { %v6326_v44 = vadd.f32 %v6325_v0, %v6324_v4  ;;  %v6375_v48 = vadd.f32 %v6374_v5, %v6373_v29 }
 0x77f   :  { %v6327_v9 = vrot.slane %v6326_v44, 1  ;;  %v6376_v63 = vrot.slane %v6375_v48, 1 }
 0x781   :  { %v6328_v37 = vadd.f32 %v6327_v9, %v6326_v44  ;;  %v6377_v38 = vadd.f32 %v6376_v63, %v6375_v48 }
 0x783   :  { %v6498_v47 = vsel %vm1371_vm1, %v6377_v38, %v6328_v37 }
 0x784   :  { %15188 = vmatmul.mubr.msk.f32.vlgmr.msra.gmra.mrb[36].mxu0 %vm6505_vm8, %v6498_v47 }
 0x785   :  { %6865 = vmatprep.mubr.f32.mxu0 %v21649_v33 }
 0x7d0   :  { %v5986_v21 = vpop.f32.mrb[32].mxu0 }
 0x7d1   :  { %v15745_v0 = vadd.f32 %v5986_v21, %v3718_v13  ;;  %v5988_v29 = vpop.f32.mrb[33].mxu0 }
 0x7d2   :  { %v15746_v4 = vadd.f32 %v5988_v29, %v3722_v40  ;;  %v5990_v59 = vpop.f32.mrb[34].mxu0 }
 0x7d3   :  { %v5991_v9 = vpop.f32.mrb[35].mxu0 }
 0x7d4   :  { %v6178_v44 = vcombine.low %v15745_v0, %v15746_v4 }
 0x7d6   :  { %v6185_v63 = vrot.slane %v6178_v44, %v18177_v14 }
 0x7d8   :  { %v20302_v11 = vcombine.low %v6185_v63, %v6192_v35  ;;  %v20304_v5 = vcombine.high %v6185_v63, %v6192_v35 }
 0x7da   :  { %21706 = vst [vmem:[#allocation40_spill] sm:$0xff] %v20302_v11  ;;  %21707 = vst [vmem:[#allocation41_spill] sm:$0xff] %v20304_v5  ;;  %v6223_v48 = vrot.slane %v20302_v11, %v18177_v14  ;;  %v6256_v37 = vrot.slane %v20304_v5, %v18177_v14 }
 0x7dc   :  { %v6231_v55 = vcombine.high %v6223_v48, %v6223_v48  ;;  %v6264_v38 = vcombine.high %v6256_v37, %v6256_v37  ;;  %v6307_v47 = vsel %vm1159_vm0, %v6223_v48, 0.0  ;;  %v6357_v13 = vsel %vm1159_vm0, %v6256_v37, 0.0 }
 0x7dd   :  { %v6308_v40 = vrot.slane %v6307_v47, 4  ;;  %v6358_v21 = vrot.slane %v6357_v13, 4 }
 0x7de   :  { %v6314_v0 = vsel %vm1159_vm0, %v6231_v55, 0.0  ;;  %v6364_v29 = vsel %vm1159_vm0, %v6264_v38, 0.0 }
 0x7df   :  { %v6309_v35 = vadd.f32 %v6308_v40, %v6307_v47  ;;  %v6359_v4 = vadd.f32 %v6358_v21, %v6357_v13  ;;  %v6315_v59 = vrot.slane %v6314_v0, 4  ;;  %v6365_v9 = vrot.slane %v6364_v29, 4 }
 0x7e1   :  { %v6316_v44 = vadd.f32 %v6315_v59, %v6314_v0  ;;  %v6366_v63 = vadd.f32 %v6365_v9, %v6364_v29  ;;  %v6310_v16 = vrot.slane %v6309_v35, 2  ;;  %v6360_v7 = vrot.slane %v6359_v4, 2 }
 0x7e3   :  { %v6317_v5 = vrot.slane %v6316_v44, 2  ;;  %v6367_v11 = vrot.slane %v6366_v63, 2  ;;  %v6311_v14 = vadd.f32 %v6310_v16, %v6309_v35  ;;  %v6361_v48 = vadd.f32 %v6360_v7, %v6359_v4 }
 0x7e5   :  { %v6318_v6 = vadd.f32 %v6317_v5, %v6316_v44  ;;  %v6368_v37 = vadd.f32 %v6367_v11, %v6366_v63  ;;  %v6312_v36 = vrot.slane %v6311_v14, 1  ;;  %v6362_v28 = vrot.slane %v6361_v48, 1 }
 0x7e7   :  { %v6319_v62 = vrot.slane %v6318_v6, 1  ;;  %v6369_v55 = vrot.slane %v6368_v37, 1  ;;  %v6313_v41 = vadd.f32 %v6312_v36, %v6311_v14  ;;  %v6363_v38 = vadd.f32 %v6362_v28, %v6361_v48  ;;  %v20320_v14 = vld [vmem:[%s21506_s10 + $0x8] sm:$0xff]  ;;  %v20330_v28 = vld [vmem:[%s21506_s10 + $0x18] sm:$0xff]  ;;  %v20337_v36 = vld [vmem:[%s21506_s10 + $0x10] sm:$0xff] }
 0x7e8   :  { %6801 = vmatprep.subr.mxu0 %v20320_v14  ;;  %6872 = vmatprep.subr.mxu1 %v20330_v28 }
 0x7e9   :  { %v6320_v47 = vadd.f32 %v6319_v62, %v6318_v6  ;;  %v6370_v13 = vadd.f32 %v6369_v55, %v6368_v37  ;;  %v6496_v21 = vsel %vm1371_vm1, %v6363_v38, %v6313_v41  ;;  %v20325_v6 = vld [vmem:[%s21506_s10] sm:$0xff]  ;;  %v20344_v41 = vld [vmem:[%s21506_s10 + $0x28] sm:$0xff]  ;;  %v20356_v38 = vld [vmem:[%s21506_s10 + $0x30] sm:$0xff] }
 0x7ea   :  { %6802 = vmatpush1.msra.mxu0 %v20325_v6  ;;  %v20351_v55 = vld [vmem:[%s21506_s10 + $0x20] sm:$0xff]  ;;  %s17332_s10 = smov [#allocation8]  }
 0x7eb   :  { %v6497_v40 = vsel %vm1371_vm1, %v6370_v13, %v6320_v47  ;;  %6943 = vmatprep.subr.mxu0 %v20344_v41  ;;  %s13420_s13 = sshll.u32 %s17332_s10, 4  ;;  %s13421_s13 = int_to_ptr.vmem [resolvable:$true] %s13420_s13 }
 0x7ec   :  { %6712 = vmatprep.mubr.f32.mxu1 %v6497_v40  ;;  %p17296_p11 = scmp.lt.s32.totalorder %s13421_s13, %s13421_s13 }
 0x7ed   :  { %6713 = vmatmul.mubr.f32.vlgmr.msra.gmra.mrb[44].mxu1 %v6496_v21 }
 0x7ee   :  { %6936 = vmatprep.mubr.f32.mxu1 %v21649_v33  ;;  %6873 = vmatpush1.msra.mxu1 %v20337_v36 }
 0x7ef   :  { %15190 = vmatprep.subr.mxu1 %v21649_v33 }
 0x7f5   :  { %v14773_v16 = vpop.f32.mrb[40].mxu1 }
 0x7f6   :  { %v14774_v7 = vpop.f32.mrb[41].mxu1 }
 0x7f7   :  { %v14775_v5 = vadd.f32 %v14774_v7, %v14773_v16  ;;  %v21710_v16 = vld [vmem:[#allocation38_spill] sm:$0xff] }
 0x815   :  { %v14808_v11 = vpop.f32.mrb[42].mxu1 }
 0x816   :  { %v14809_v0 = vpop.f32.mrb[43].mxu1 }
 0x817   :  { %v14810_v29 = vadd.f32 %v14809_v0, %v14808_v11 }
 0x819   :  { %v6645_v35 = vadd.f32 %v14810_v29, %v14775_v5  ;;  %v21711_v5 = vld [vmem:[#allocation39_spill] sm:$0xff] }
 0x857   :  { %v6784_v62 = vpop.f32.mrb[36].mxu0 }
 0x858   :  { %v15189_v4 = vpop.f32.mrb[37].mxu0 }
 0x8c0   :  { %v14843_v59 = vpop.f32.mrb[44].mxu1 }
 0x8c1   :  { %v14844_v9 = vpop.f32.mrb[45].mxu1 }
 0x8c2   :  { %v14845_v44 = vadd.f32 %v14844_v9, %v14843_v59  ;;  %v21713_v59 = vld [vmem:[#allocation25_spill] sm:$0xff] }
 0x8c4   :  { %v6715_v63 = vadd.f32 %v14845_v44, %v6645_v35  ;;  %v21712_v35 = vld [vmem:[#allocation28_spill] sm:$0xff] }
 0x8c6   :  { %v6785_v48 = vadd.f32 %v6784_v62, %v6715_v63 }
 0x8c8   :  { %v6789_v37 = vmul.f32 0.005, %v6785_v48 }
 0x8ca   :  { %13923 = vmatmul.mubr.msk.f32.vlgmr.msra.gmra.mrb[38].mxu0 %vm6797_vm9, %v6789_v37  ;;  %13924 = vmatmul.mubr.msk.f32.vlgmr.msra.gmra.mrb[46].mxu1 %vm6797_vm9, %v6789_v37 }
 0x8cb   :  { %6944 = vmatpush1.msra.mxu0 %v20351_v55  ;;  %7007 = vmatprep.mubr.f32.mxu0 %v21649_v33 }
 0x8cc   :  { %15191 = vmatpush3.msra.mxu1 %v20356_v38  ;;  %15192 = vmatprep.mubr.msk.f32.mxu1 %vm17328_vm2, %v21649_v33 }
 0x8cd   :  { %15512 = vmatprep.subr.bf16.mxu0 %v19637_v8  ;;  %15544 = vmatprep.subr.bf16.mxu1 %v19841_v15 }
 0x8ce   :  { %13925 = vmatmul.mubr.msk.f32.vlgmr.msra.gmra.mrb[40].mxu0 %vm6797_vm9, %v6789_v37  ;;  %15193 = vmatmul.mubr.msk.f32.vlgmr.msra.gmra.mrb[48].mxu1 %vm6797_vm9, %v6789_v37 }
 0x8cf   :  { %15514 = vmatpush3.bf16.msra.mxu0 %v19667_v30  ;;  %15546 = vmatpush3.bf16.msra.mxu1 %v20009_v52 }
 0x8d0   :  { %15516 = vmatprep.subr.bf16.mxu0 %v19669_v22  ;;  %15548 = vmatprep.subr.bf16.mxu1 %v20012_v2 }
 0x8d3   :  { %15518 = vmatpush3.bf16.msra.mxu0 %v19692_v39  ;;  %15550 = vmatpush3.bf16.msra.mxu1 %v20029_v12 }
 0x8d4   :  { %15520 = vmatprep.subr.bf16.mxu0 %v19695_v45  ;;  %15552 = vmatprep.subr.bf16.mxu1 %v20032_v46 }
 0x8d7   :  { %15522 = vmatpush3.bf16.msra.mxu0 %v19716_v61  ;;  %15554 = vmatpush3.bf16.msra.mxu1 %v20053_v34 }
 0x8d8   :  { %15524 = vmatprep.subr.bf16.mxu0 %v19719_v1  ;;  %15556 = vmatprep.subr.bf16.mxu1 %v20056_v43 }
 0x8db   :  { %15526 = vmatpush3.bf16.msra.mxu0 %v19740_v19  ;;  %15558 = vmatpush3.bf16.msra.mxu1 %v20071_v51 }
 0x8dc   :  { %15528 = vmatprep.subr.bf16.mxu0 %v19743_v3  ;;  %15560 = vmatprep.subr.bf16.mxu1 %v20074_v10 }
 0x8df   :  { %15530 = vmatpush3.bf16.msra.mxu0 %v19764_v17  ;;  %15562 = vmatpush3.bf16.msra.mxu1 %v20089_v54 }
 0x8e0   :  { %15532 = vmatprep.subr.bf16.mxu0 %v19767_v26  ;;  %15564 = vmatprep.subr.bf16.mxu1 %v20092_v58 }
 0x8e3   :  { %15534 = vmatpush3.bf16.msra.mxu0 %v19788_v20  ;;  %15566 = vmatpush3.bf16.msra.mxu1 %v20107_v25  ;;  %v21708_v25 = vld [vmem:[#allocation22_spill] sm:$0xff] }
 0x8e4   :  { %15536 = vmatprep.subr.bf16.mxu0 %v19791_v42  ;;  %15568 = vmatprep.subr.bf16.mxu1 %v20110_v50 }
 0x8e7   :  { %15538 = vmatpush3.bf16.msra.mxu0 %v19812_v57  ;;  %15570 = vmatpush3.bf16.msra.mxu1 %v20125_v27  ;;  %v21709_v27 = vld [vmem:[#allocation24_spill] sm:$0xff] }
 0x8e8   :  { %15540 = vmatprep.subr.bf16.mxu0 %v19815_v56  ;;  %15572 = vmatprep.subr.bf16.mxu1 %v20128_v23 }
 0x8eb   :  { %15542 = vmatpush3.bf16.msra.mxu0 %v19838_v49  ;;  %15574 = vmatpush3.bf16.msra.mxu1 %v20143_v53 }
 0x8ec   :  { %15576 = vmatprep.subr.bf16.mxu0 %v20146_v18  ;;  %15607 = vmatprep.subr.bf16.mxu1 %v21685_v32 }
 0x99d   :  { %v6867_v8 = vpop.f32.mrb[38].mxu0  ;;  %v6938_v30 = vpop.f32.mrb[46].mxu1 }
 0x99e   :  { %v6869_v22 = vpop.f32.mrb[39].mxu0  ;;  %v6940_v39 = vpop.f32.mrb[47].mxu1 }
 0x99f   :  { %v7091_v45 = vcombine.low %v6867_v8, %v6869_v22  ;;  %v7092_v61 = vcombine.low %v6938_v30, %v6940_v39 }
 0x9a1   :  { %v7100_v1 = vrot.slane %v7091_v45, %v18485_v31  ;;  %v7107_v19 = vrot.slane %v7092_v61, %v18485_v31  ;;  %v7009_v3 = vpop.f32.mrb[40].mxu0  ;;  %v7080_v17 = vpop.f32.mrb[48].mxu1 }
 0x9a2   :  { %v7011_v26 = vpop.f32.mrb[41].mxu0  ;;  %v15194_v20 = vpop.f32.mrb[49].mxu1  ;;  %v7121_v49 = vrot.slane %v7080_v17, %v18485_v31 }
 0x9a3   :  { %v7122_v42 = vcombine.low %v7100_v1, %v7107_v19  ;;  %v7123_v57 = vcombine.high %v7100_v1, %v7107_v19  ;;  %v7093_v56 = vcombine.low %v7009_v3, %v7011_v26  ;;  %v21714_v19 = vld [vmem:[#allocation17_spill] sm:$0xff]  ;;  %v21715_v20 = vld [vmem:[#allocation18_spill] sm:$0xff] }
 0x9a5   :  { %v7114_v15 = vrot.slane %v7093_v56, %v18485_v31  ;;  %v7132_v12 = vrot.slane %v7122_v42, %v18485_v31  ;;  %v7139_v46 = vrot.slane %v7123_v57, %v18485_v31 }
 0x9a7   :  { %v7124_v52 = vcombine.low %v7114_v15, %v7121_v49  ;;  %v7125_v2 = vcombine.high %v7114_v15, %v7121_v49 }
 0x9a9   :  { %v7146_v34 = vrot.slane %v7124_v52, %v18485_v31  ;;  %v7153_v43 = vrot.slane %v7125_v2, %v18485_v31  ;;  %v21716_v52 = vld [vmem:[#allocation40_spill] sm:$0xff] }
 0x9ab   :  { %v7154_v51 = vcombine.low %v7132_v12, %v7146_v34  ;;  %v7155_v10 = vcombine.low %v7139_v46, %v7153_v43  ;;  %v21717_v34 = vld [vmem:[#allocation41_spill] sm:$0xff] }
 0x9ad   :  { %v7159_v54 = vrot.slane %v7154_v51, %v21662_v24  ;;  %v7163_v58 = vrot.slane %v7154_v51, %v21663_v60  ;;  %v7167_v50 = vrot.slane %v7154_v51, %v21708_v25  ;;  %v7171_v23 = vrot.slane %v7154_v51, %v21709_v27 }
 0x9ae   :  { %v7187_v53 = vrot.slane %v7155_v10, %v21662_v24  ;;  %v7191_v18 = vrot.slane %v7155_v10, %v21663_v60  ;;  %v7195_v47 = vrot.slane %v7155_v10, %v21708_v25  ;;  %v7199_v13 = vrot.slane %v7155_v10, %v21709_v27 }
 0x9af   :  { %v7212_v40 = vcombine.low %v7159_v54, %v7163_v58  ;;  %v7213_v21 = vcombine.low %v7167_v50, %v7171_v23  ;;  %v7175_v7 = vrot.slane %v7154_v51, %v21710_v16  ;;  %v7179_v11 = vrot.slane %v7154_v51, %v21711_v5 }
 0x9b0   :  { %v7245_v0 = vcombine.low %v7187_v53, %v7191_v18  ;;  %v7246_v29 = vcombine.low %v7195_v47, %v7199_v13  ;;  %v7183_v62 = vrot.slane %v7154_v51, %v21712_v35  ;;  %v7203_v4 = vrot.slane %v7155_v10, %v21710_v16 }
 0x9b1   :  { %v7220_v9 = vrot.slane %v7212_v40, %v21713_v59  ;;  %v7227_v44 = vrot.slane %v7213_v21, %v21713_v59  ;;  %v7207_v63 = vrot.slane %v7155_v10, %v21711_v5  ;;  %v7211_v48 = vrot.slane %v7155_v10, %v21712_v35 }
 0x9b2   :  { %v7253_v37 = vrot.slane %v7245_v0, %v21713_v59  ;;  %v7260_v8 = vrot.slane %v7246_v29, %v21713_v59  ;;  %v7229_v30 = vcombine.low %v7175_v7, %v7179_v11  ;;  %v7243_v1 = vrot.slane %v7183_v62, %v21713_v59 }
 0x9b3   :  { %v7228_v22 = vcombine.low %v7220_v9, %v7227_v44  ;;  %v7262_v39 = vcombine.low %v7203_v4, %v7207_v63  ;;  %v7276_v26 = vrot.slane %v7211_v48, %v21713_v59 }
 0x9b4   :  { %v7261_v45 = vcombine.low %v7253_v37, %v7260_v8  ;;  %v7236_v61 = vrot.slane %v7229_v30, %v21713_v59 }
 0x9b5   :  { %v20430_v3 = vsub.f32 %v21714_v19, %v7228_v22  ;;  %v7269_v17 = vrot.slane %v7262_v39, %v21713_v59 }
 0x9b6   :  { %v20435_v42 = vsub.f32 %v21715_v20, %v7261_v45  ;;  %v7244_v57 = vcombine.low %v7236_v61, %v7243_v1 }
 0x9b7   :  { %v7286_v56 = vmul.f32 %v20430_v3, %v20430_v3  ;;  %v7277_v49 = vcombine.low %v7269_v17, %v7276_v26 }
 0x9b8   :  { %v7288_v15 = vmul.f32 %v20435_v42, %v20435_v42  ;;  %v20442_v2 = vsub.f32 %v21716_v52, %v7244_v57 }
 0x9b9   :  { %v7301_v12 = vrot.slane %v7286_v56, %v21713_v59  ;;  %v7294_v46 = vcombine.high %v7286_v56, %v7286_v56  ;;  %v20446_v43 = vsub.f32 %v21717_v34, %v7277_v49 }
 0x9ba   :  { %v7334_v51 = vrot.slane %v7288_v15, %v21713_v59  ;;  %v7327_v10 = vcombine.high %v7288_v15, %v7288_v15  ;;  %v20451_v54 = vmul.f32 %v20442_v2, %v20442_v2 }
 0x9bb   :  { %v7309_v58 = vcombine.high %v7301_v12, %v7301_v12  ;;  %v7374_v50 = vsel %vm1159_vm0, %v7301_v12, 0.0  ;;  %v7308_v23 = vrot.slane %v7294_v46, %v21713_v59  ;;  %v20457_v53 = vmul.f32 %v20446_v43, %v20446_v43 }
 0x9bc   :  { %v7342_v18 = vcombine.high %v7334_v51, %v7334_v51  ;;  %v7375_v47 = vrot.slane %v7374_v50, 4  ;;  %v7423_v13 = vsel %vm1159_vm0, %v7334_v51, 0.0  ;;  %v7341_v40 = vrot.slane %v7327_v10, %v21713_v59 }
 0x9bd   :  { %v7381_v21 = vsel %vm1159_vm0, %v7309_v58, 0.0  ;;  %v7424_v7 = vrot.slane %v7423_v13, 4  ;;  %v7310_v11 = vcombine.high %v7308_v23, %v7308_v23  ;;  %v20464_v0 = vrot.slane %v20451_v54, %v21713_v59 }
 0x9be   :  { %v7382_v29 = vrot.slane %v7381_v21, 4  ;;  %v7430_v62 = vsel %vm1159_vm0, %v7342_v18, 0.0  ;;  %v7376_v4 = vadd.f32 %v7375_v47, %v7374_v50  ;;  %v7343_v9 = vcombine.high %v7341_v40, %v7341_v40 }
 0x9bf   :  { %v7431_v44 = vrot.slane %v7430_v62, 4  ;;  %v7425_v63 = vadd.f32 %v7424_v7, %v7423_v13  ;;  %v7395_v48 = vsel %vm1159_vm0, %v7310_v11, 0.0  ;;  %v7326_v37 = vcombine.high %v20464_v0, %v20464_v0 }
 0x9c0   :  { %v7383_v8 = vadd.f32 %v7382_v29, %v7381_v21  ;;  %v7377_v30 = vrot.slane %v7376_v4, 2  ;;  %v7396_v22 = vrot.slane %v7395_v48, 4  ;;  %v7444_v39 = vsel %vm1159_vm0, %v7343_v9, 0.0 }
 0x9c1   :  { %v7432_v45 = vadd.f32 %v7431_v44, %v7430_v62  ;;  %v7426_v61 = vrot.slane %v7425_v63, 2  ;;  %v7445_v1 = vrot.slane %v7444_v39, 4  ;;  %v20473_v19 = vrot.slane %v20457_v53, %v21713_v59 }
 0x9c2   :  { %v7384_v17 = vrot.slane %v7383_v8, 2  ;;  %v7378_v26 = vadd.f32 %v7377_v30, %v7376_v4  ;;  %v7397_v20 = vadd.f32 %v7396_v22, %v7395_v48  ;;  %v7409_v57 = vsel %vm1159_vm0, %v7326_v37, 0.0 }
 0x9c3   :  { %v7433_v56 = vrot.slane %v7432_v45, 2  ;;  %v7427_v49 = vadd.f32 %v7426_v61, %v7425_v63  ;;  %v7446_v15 = vadd.f32 %v7445_v1, %v7444_v39  ;;  %v7359_v52 = vcombine.high %v20473_v19, %v20473_v19 }
 0x9c4   :  { %v7385_v12 = vadd.f32 %v7384_v17, %v7383_v8  ;;  %v7379_v46 = vrot.slane %v7378_v26, 1  ;;  %v7398_v34 = vrot.slane %v7397_v20, 2  ;;  %v7410_v51 = vrot.slane %v7409_v57, 4 }
 0x9c5   :  { %v7434_v10 = vadd.f32 %v7433_v56, %v7432_v45  ;;  %v7428_v58 = vrot.slane %v7427_v49, 1  ;;  %v7447_v50 = vrot.slane %v7446_v15, 2  ;;  %v7458_v18 = vsel %vm1159_vm0, %v7359_v52, 0.0 }
 0x9c6   :  { %v7386_v47 = vrot.slane %v7385_v12, 1  ;;  %v7380_v13 = vadd.f32 %v7379_v46, %v7378_v26  ;;  %v7399_v21 = vadd.f32 %v7398_v34, %v7397_v20  ;;  %v7411_v7 = vadd.f32 %v7410_v51, %v7409_v57 }
 0x9c7   :  { %v7435_v11 = vrot.slane %v7434_v10, 1  ;;  %v7429_v29 = vadd.f32 %v7428_v58, %v7427_v49  ;;  %v7448_v62 = vadd.f32 %v7447_v50, %v7446_v15  ;;  %v7459_v4 = vrot.slane %v7458_v18, 4 }
 0x9c8   :  { %v7387_v9 = vadd.f32 %v7386_v47, %v7385_v12  ;;  %v7400_v44 = vrot.slane %v7399_v21, 1  ;;  %v7412_v63 = vrot.slane %v7411_v7, 2  ;;  %v7388_v48 = vsel %vm1159_vm0, %v7308_v23, 0.0 }
 0x9c9   :  { %v7436_v37 = vadd.f32 %v7435_v11, %v7434_v10  ;;  %v7486_v8 = vsel %vm1371_vm1, %v7429_v29, %v7380_v13  ;;  %v7449_v30 = vrot.slane %v7448_v62, 1  ;;  %v7460_v22 = vadd.f32 %v7459_v4, %v7458_v18 }
 0x9ca   :  { %v7401_v39 = vadd.f32 %v7400_v44, %v7399_v21  ;;  %v7413_v45 = vadd.f32 %v7412_v63, %v7411_v7  ;;  %v7389_v61 = vrot.slane %v7388_v48, 4  ;;  %v7437_v1 = vsel %vm1159_vm0, %v7341_v40, 0.0  ;;  %v21718_v40 = vld [vmem:[#allocation19_spill] sm:$0xff]  ;;  %v21720_v44 = vld [vmem:[#allocation26_spill] sm:$0xff] }
 0x9cb   :  { %v7487_v17 = vsel %vm1371_vm1, %v7436_v37, %v7387_v9  ;;  %v7450_v26 = vadd.f32 %v7449_v30, %v7448_v62  ;;  %v7461_v20 = vrot.slane %v7460_v22, 2  ;;  %v7438_v57 = vrot.slane %v7437_v1, 4  ;;  %v21721_v37 = vld [vmem:[#allocation27_spill] sm:$0xff] }
 0x9cc   :  { %7565 = vmatprep.mubr.f32.mxu0 %v7487_v17  ;;  %v7414_v56 = vrot.slane %v7413_v45, 1  ;;  %v7390_v49 = vadd.f32 %v7389_v61, %v7388_v48  ;;  %v7311_v23 = vcombine.high %v20451_v54, %v20451_v54  ;;  %v7344_v15 = vcombine.high %v20457_v53, %v20457_v53  ;;  %v21719_v54 = vld [vmem:[#allocation20_spill] sm:$0xff] }
 0x9cd   :  { %7566 = vmatmul.mubr.f32.vlgmr.msra.gmra.mrb[42].mxu0 %v7486_v8  ;;  %v7489_v52 = vsel %vm1371_vm1, %v7450_v26, %v7401_v39  ;;  %v7462_v12 = vadd.f32 %v7461_v20, %v7460_v22  ;;  %v7439_v46 = vadd.f32 %v7438_v57, %v7437_v1  ;;  %v7402_v53 = vsel %vm1159_vm0, %v20464_v0, 0.0  ;;  %v21722_v1 = vld [vmem:[#allocation29_spill] sm:$0xff]  ;;  %v21723_v57 = vld [vmem:[#allocation30_spill] sm:$0xff] }
 0x9ce   :  { %15578 = vmatpush3.bf16.msra.mxu0 %v21718_v40  ;;  %7635 = vmatprep.mubr.f32.mxu1 %v7489_v52  ;;  %v7391_v34 = vrot.slane %v7390_v49, 2  ;;  %v7325_v51 = vrot.slane %v7311_v23, %v21713_v59  ;;  %v7358_v10 = vrot.slane %v7344_v15, %v21713_v59  ;;  %v7415_v58 = vadd.f32 %v7414_v56, %v7413_v45  ;;  %v21724_v23 = vld [vmem:[#allocation15_spill] sm:$0xff] }
 0x9cf   :  { %v7463_v50 = vrot.slane %v7462_v12, 1  ;;  %v7440_v18 = vrot.slane %v7439_v46, 2  ;;  %15580 = vmatprep.subr.bf16.mxu0 %v21719_v54  ;;  %v7451_v7 = vsel %vm1159_vm0, %v20473_v19, 0.0  ;;  %v7403_v22 = vrot.slane %v7402_v53, 4  ;;  %v21729_v54 = vld [vmem:[#allocation34_spill] sm:$0xff] }
 0x9d0   :  { %v7392_v47 = vadd.f32 %v7391_v34, %v7390_v49  ;;  %v7416_v13 = vsel %vm6321_vm7, %v7325_v51, 0.0  ;;  %v7465_v21 = vsel %vm6321_vm7, %v7358_v10, 0.0  ;;  %v7452_v39 = vrot.slane %v7451_v7, 4  ;;  %v21726_v34 = vld [vmem:[#allocation32_spill] sm:$0xff] }
 0x9d1   :  { %v7464_v11 = vadd.f32 %v7463_v50, %v7462_v12  ;;  %v7441_v29 = vadd.f32 %v7440_v18, %v7439_v46  ;;  %v7417_v62 = vrot.slane %v7416_v13, 4  ;;  %v7466_v4 = vrot.slane %v7465_v21, 4  ;;  %v21725_v12 = vld [vmem:[#allocation31_spill] sm:$0xff]  ;;  %v21728_v50 = vld [vmem:[#allocation33_spill] sm:$0xff] }
 0x9d2   :  { %v7393_v9 = vrot.slane %v7392_v47, 1  ;;  %15582 = vmatpush3.bf16.msra.mxu0 %v21720_v44  ;;  %v7404_v56 = vadd.f32 %v7403_v22, %v7402_v53  ;;  %v7453_v49 = vadd.f32 %v7452_v39, %v7451_v7  ;;  %v21732_v7 = vld [vmem:[#allocation37_spill] sm:$0xff]  ;;  %v16530_v22 = vld [vmem:[#allocation2 + $0x88] ss:$16 sps:$4 sm:$0xff]  }
 0x9d3   :  { %v7491_v63 = vsel %vm1371_vm1, %v7464_v11, %v7415_v58  ;;  %v7442_v48 = vrot.slane %v7441_v29, 1  ;;  %15584 = vmatprep.subr.bf16.mxu0 %v21721_v37  ;;  %v7418_v0 = vadd.f32 %v7417_v62, %v7416_v13  ;;  %v7467_v8 = vadd.f32 %v7466_v4, %v7465_v21  ;;  %v21727_v58 = vld [vmem:[#allocation16_spill] sm:$0xff]  ;;  %v21733_v11 = vld [vmem:[#allocation13_spill] sm:$0xff]  ;;  %v21734_v4 = vld [vmem:[#allocation14_spill] sm:$0xff] }
 0x9d4   :  { %7705 = vmatprep.mubr.f32.mxu0 %v7491_v63  ;;  %v7394_v30 = vadd.f32 %v7393_v9, %v7392_v47  ;;  %v7405_v51 = vrot.slane %v7404_v56, 2  ;;  %v7454_v10 = vrot.slane %v7453_v49, 2  ;;  %v21730_v47 = vld [vmem:[#allocation35_spill] sm:$0xff]  ;;  %v21731_v13 = vld [vmem:[#allocation36_spill] sm:$0xff] }
 0x9d5   :  { %v7443_v45 = vadd.f32 %v7442_v48, %v7441_v29  ;;  %v7419_v19 = vrot.slane %v7418_v0, 2  ;;  %v7468_v61 = vrot.slane %v7467_v8, 2  ;;  %v16506_v9 = vld [vmem:[#allocation2 + $0x8] ss:$16 sps:$4 sm:$0xff]   ;;  %v16508_v44 = vld [vmem:[#allocation2 + $0xc] ss:$16 sps:$4 sm:$0xff]  }
 0x9d6   :  { %15586 = vmatpush3.bf16.msra.mxu0 %v21722_v1  ;;  %v7455_v53 = vadd.f32 %v7454_v10, %v7453_v49  ;;  %v16514_v63 = vld [vmem:[#allocation2 + $0x2c] ss:$16 sps:$4 sm:$0xff]   ;;  %v16518_v37 = vld [vmem:[#allocation2 + $0x48] ss:$16 sps:$4 sm:$0xff]  }
 0x9d7   :  { %v7488_v17 = vsel %vm1371_vm1, %v7443_v45, %v7394_v30  ;;  %v7420_v26 = vadd.f32 %v7419_v19, %v7418_v0  ;;  %v7469_v20 = vadd.f32 %v7468_v61, %v7467_v8  ;;  %15588 = vmatprep.subr.bf16.mxu0 %v21723_v57  ;;  %v16520_v48 = vld [vmem:[#allocation2 + $0x4c] ss:$16 sps:$4 sm:$0xff]   ;;  %v16524_v8 = vld [vmem:[#allocation2 + $0x68] ss:$16 sps:$4 sm:$0xff]  }
 0x9d8   :  { %7636 = vmatmul.mubr.f32.vlgmr.msra.gmra.mrb[50].mxu1 %v7488_v17  ;;  %v16526_v0 = vld [vmem:[#allocation2 + $0x6c] ss:$16 sps:$4 sm:$0xff]   ;;  %v16536_v45 = vld [vmem:[#allocation2 + $0xa8] ss:$16 sps:$4 sm:$0xff]  }
 0x9d9   :  { %15609 = vmatpush3.bf16.msra.mxu1 %v21724_v23  ;;  %15203 = vmatprep.mubr.msk.f32.mxu1 %vm17328_vm2, %v21649_v33  ;;  %v7421_v15 = vrot.slane %v7420_v26, 1  ;;  %v7470_v52 = vrot.slane %v7469_v20, 1  ;;  %v16532_v30 = vld [vmem:[#allocation2 + $0x8c] ss:$16 sps:$4 sm:$0xff]  }
 0x9da   :  { %15610 = vmatprep.subr.bf16.mxu1 %v21685_v32  ;;  %15590 = vmatpush3.bf16.msra.mxu0 %v21725_v12  ;;  %v7406_v32 = vadd.f32 %v7405_v51, %v7404_v56  ;;  %v16538_v39 = vld [vmem:[#allocation2 + $0xac] ss:$16 sps:$4 sm:$0xff]   ;;  %v13928_v51 = vld [vmem:[%s21507_s11] ss:$0 sm:$0xff]  ;;  %s17291_s11 = scalar_lea.vmem %s13421_s13, 64 }
 0x9db   :  { %v7422_v46 = vadd.f32 %v7421_v15, %v7420_v26  ;;  %v7471_v40 = vadd.f32 %v7470_v52, %v7469_v20  ;;  %15592 = vmatprep.subr.bf16.mxu0 %v21726_v34  ;;  %p17292_p10 = scmp.ne.s32.totalorder %s13421_s13, %s17291_s11  ;;  %p17297_p12 = scmp.lt.s32.totalorder %s17291_s11, %s17291_s11 }
 0x9dc   :  { %v7407_v21 = vrot.slane %v7406_v32, 1 }
 0x9dd   :  { %15612 = vmatpush3.bf16.msra.mxu1 %v21727_v58  ;;  %v7492_v18 = vsel %vm1371_vm1, %v7471_v40, %v7422_v46  ;;  %p17298_p13 = por %p17297_p12, %p17296_p11 }
 0x9de   :  { %15594 = vmatpush3.bf16.msra.mxu0 %v21728_v50  ;;  %7795 = vmatprep.subr.mxu1 %v20320_v14  ;;  %v7456_v14 = vrot.slane %v7455_v53, 1  ;;  %v7408_v29 = vadd.f32 %v7407_v21, %v7406_v32  ;;  %v16505_v50 = vld [vmem:[#allocation2 + $0x4] ss:$16 sps:$4 sm:$0xff]   ;;  %v16533_v21 = vld [vmem:[#allocation2 + $0xa0] ss:$16 sps:$4 sm:$0xff]  }
 0x9df   :  { %15596 = vmatprep.subr.bf16.mxu0 %v21729_v54  ;;  %v16515_v54 = vld [vmem:[#allocation2 + $0x40] ss:$16 sps:$4 sm:$0xff]   ;;  %v16523_v32 = vld [vmem:[#allocation2 + $0x64] ss:$16 sps:$4 sm:$0xff]   ;;  %p17299_p0 = pnand %p17298_p13, %p17292_p10 }
 0x9e0   :  { %15204 = vmatmul.mubr.msk.f32.vlgmr.msra.gmra.mrb[52].mxu1 %vm6505_vm8, %v7492_v18  ;;  %v7457_v62 = vadd.f32 %v7456_v14, %v7455_v53  ;;  %v16511_v18 = vld [vmem:[#allocation2 + $0x24] ss:$16 sps:$4 sm:$0xff]   ;;  %v16521_v53 = vld [vmem:[#allocation2 + $0x60] ss:$16 sps:$4 sm:$0xff]  }
 0x9e1   :  { %7796 = vmatpush1.msra.mxu1 %v20325_v6  ;;  %7859 = vmatprep.mubr.f32.mxu1 %v21649_v33  ;;  %v16539_v14 = vld [vmem:[#allocation2 + $0xc0] ss:$16 sps:$4 sm:$0xff]  }
 0x9e2   :  { %15598 = vmatpush3.bf16.msra.mxu0 %v21730_v47  ;;  %7866 = vmatprep.subr.mxu1 %v20330_v28  ;;  %v7490_v6 = vsel %vm1371_vm1, %v7457_v62, %v7408_v29  ;;  %v16512_v28 = vld [vmem:[#allocation2 + $0x28] ss:$16 sps:$4 sm:$0xff]   ;;  %v16527_v47 = vld [vmem:[#allocation2 + $0x80] ss:$16 sps:$4 sm:$0xff]   ;;  %v16544_v29 = vld [vmem:[#allocation2 + $0xcc] ss:$16 sps:$4 sm:$0xff]  }
 0x9e3   :  { %15600 = vmatprep.subr.bf16.mxu0 %v21731_v13  ;;  %v16535_v13 = vld [vmem:[#allocation2 + $0xa4] ss:$16 sps:$4 sm:$0xff]   ;;  %v16545_v62 = vld [vmem:[#allocation2 + $0xe0] ss:$16 sps:$4 sm:$0xff]  }
 0x9e6   :  { %15602 = vmatpush3.bf16.msra.mxu0 %v21732_v7  ;;  %v16541_v7 = vld [vmem:[#allocation2 + $0xc4] ss:$16 sps:$4 sm:$0xff]  }
 0x9e7   :  { %15604 = vmatprep.subr.bf16.mxu0 %v21733_v11  ;;  %v16542_v11 = vld [vmem:[#allocation2 + $0xc8] ss:$16 sps:$4 sm:$0xff]  }
 0x9ea   :  { %15606 = vmatpush3.bf16.msra.mxu0 %v21734_v4  ;;  %v16547_v4 = vld [vmem:[#allocation2 + $0xe4] ss:$16 sps:$4 sm:$0xff]  }
 0x9eb   :  { %9795 = vmatprep.subr.bf16.mxu0 %v16508_v44  ;;  %v16553_v44 = vld [vmem:[#allocation2 + $0x104] ss:$16 sps:$4 sm:$0xff]  }
 0x9ed   :  { %7706 = vmatmul.mubr.f32.vlgmr.msra.gmra.mrb[44].mxu0 %v7490_v6  ;;  %v16548_v6 = vld [vmem:[#allocation2 + $0xe8] ss:$16 sps:$4 sm:$0xff]  }
 0x9ee   :  { %9796 = vmatpush1.bf16.msra.mxu0 %v16506_v9  ;;  %v16550_v9 = vld [vmem:[#allocation2 + $0xec] ss:$16 sps:$4 sm:$0xff]  }
 0x9ef   :  { %9797 = vmatprep.subr.bf16.mxu0 %v16514_v63  ;;  %v16556_v63 = vld [vmem:[#allocation2 + $0x10c] ss:$16 sps:$4 sm:$0xff]  }
 0x9f2   :  { %9798 = vmatpush1.bf16.msra.mxu0 %v16512_v28  ;;  %v16551_v28 = vld [vmem:[#allocation2 + $0x100] ss:$16 sps:$4 sm:$0xff]  }
 0x9f3   :  { %9799 = vmatprep.subr.bf16.mxu0 %v16520_v48  ;;  %v16554_v48 = vld [vmem:[#allocation2 + $0x108] ss:$16 sps:$4 sm:$0xff]  }
 0x9f6   :  { %9800 = vmatpush1.bf16.msra.mxu0 %v16518_v37  ;;  %v16557_v37 = vld [vmem:[#allocation2 + $0x120] ss:$16 sps:$4 sm:$0xff]  }
 0x9f7   :  { %9801 = vmatprep.subr.bf16.mxu0 %v16526_v0  ;;  %v16559_v0 = vld [vmem:[#allocation2 + $0x124] ss:$16 sps:$4 sm:$0xff]  }
 0x9fa   :  { %9802 = vmatpush1.bf16.msra.mxu0 %v16524_v8  ;;  %v16560_v8 = vld [vmem:[#allocation2 + $0x128] ss:$16 sps:$4 sm:$0xff]  }
 0x9fb   :  { %9803 = vmatprep.subr.bf16.mxu0 %v16532_v30  ;;  %v16562_v30 = vld [vmem:[#allocation2 + $0x12c] ss:$16 sps:$4 sm:$0xff]  }
 0x9fe   :  { %9804 = vmatpush1.bf16.msra.mxu0 %v16530_v22  ;;  %v16565_v22 = vld [vmem:[#allocation2 + $0x144] ss:$16 sps:$4 sm:$0xff]  }
 0x9ff   :  { %9805 = vmatprep.subr.bf16.mxu0 %v16538_v39  ;;  %v16568_v39 = vld [vmem:[#allocation2 + $0x14c] ss:$16 sps:$4 sm:$0xff]  }
 0xa02   :  { %9806 = vmatpush1.bf16.msra.mxu0 %v16536_v45  ;;  %v16563_v45 = vld [vmem:[#allocation2 + $0x140] ss:$16 sps:$4 sm:$0xff]  }
 0xa03   :  { %9807 = vmatprep.subr.bf16.mxu0 %v16544_v29 }
 0xa06   :  { %9808 = vmatpush1.bf16.msra.mxu0 %v16542_v11 }
 0xa07   :  { %9809 = vmatprep.subr.bf16.mxu0 %v16550_v9 }
 0xa0a   :  { %9810 = vmatpush1.bf16.msra.mxu0 %v16548_v6 }
 0xa0b   :  { %9811 = vmatprep.subr.bf16.mxu0 %v16556_v63 }
 0xa0e   :  { %9812 = vmatpush1.bf16.msra.mxu0 %v16554_v48 }
 0xa0f   :  { %9813 = vmatprep.subr.bf16.mxu0 %v16562_v30 }
 0xa12   :  { %9814 = vmatpush1.bf16.msra.mxu0 %v16560_v8 }
 0xa13   :  { %9815 = vmatprep.subr.bf16.mxu0 %v16568_v39 }
 0xaa0   :  { %v14885_v19 = vpop.f32.mrb[42].mxu0 }
 0xaa1   :  { %v14886_v61 = vpop.f32.mrb[43].mxu0 }
 0xaa2   :  { %v14887_v1 = vadd.f32 %v14886_v61, %v14885_v19  ;;  %v16566_v19 = vld [vmem:[#allocation2 + $0x148] ss:$16 sps:$4 sm:$0xff]   ;;  %v16571_v61 = vld [vmem:[#allocation2 + $0x164] ss:$16 sps:$4 sm:$0xff]  }
 0xaa3   :  { %9816 = vmatpush1.bf16.msra.mxu0 %v16566_v19 }
 0xaab   :  { %v14920_v17 = vpop.f32.mrb[50].mxu1 }
 0xaac   :  { %v14921_v26 = vpop.f32.mrb[51].mxu1 }
 0xaad   :  { %v14922_v20 = vadd.f32 %v14921_v26, %v14920_v17  ;;  %v16569_v17 = vld [vmem:[#allocation2 + $0x160] ss:$16 sps:$4 sm:$0xff]   ;;  %v16572_v26 = vld [vmem:[#allocation2 + $0x168] ss:$16 sps:$4 sm:$0xff]  }
 0xaaf   :  { %v7638_v57 = vadd.f32 %v14922_v20, %v14887_v1  ;;  %v16574_v1 = vld [vmem:[#allocation2 + $0x16c] ss:$16 sps:$4 sm:$0xff]   ;;  %v16577_v20 = vld [vmem:[#allocation2 + $0x184] ss:$16 sps:$4 sm:$0xff]  }
 0xab0   :  { %9817 = vmatprep.subr.bf16.mxu0 %v16574_v1 }
 0xab1   :  { %9818 = vmatpush1.bf16.msra.mxu0 %v16572_v26 }
 0xab3   :  { %v7777_v56 = vpop.f32.mrb[52].mxu1 }
 0xab4   :  { %v15205_v49 = vpop.f32.mrb[53].mxu1 }
 0xab5   :  { %v16578_v49 = vld [vmem:[#allocation2 + $0x188] ss:$16 sps:$4 sm:$0xff]  }
 0xac0   :  { %v14955_v23 = vpop.f32.mrb[44].mxu0 }
 0xac1   :  { %v14956_v15 = vpop.f32.mrb[45].mxu0 }
 0xac2   :  { %v14957_v52 = vadd.f32 %v14956_v15, %v14955_v23  ;;  %v16583_v23 = vld [vmem:[#allocation2 + $0x1a4] ss:$16 sps:$4 sm:$0xff]   ;;  %v16586_v15 = vld [vmem:[#allocation2 + $0x1ac] ss:$16 sps:$4 sm:$0xff]  }
 0xac4   :  { %v7708_v12 = vadd.f32 %v14957_v52, %v7638_v57  ;;  %v16580_v57 = vld [vmem:[#allocation2 + $0x18c] ss:$16 sps:$4 sm:$0xff]   ;;  %v16581_v52 = vld [vmem:[#allocation2 + $0x1a0] ss:$16 sps:$4 sm:$0xff]  }
 0xac5   :  { %9819 = vmatprep.subr.bf16.mxu0 %v16580_v57 }
 0xac6   :  { %v7778_v46 = vadd.f32 %v7777_v56, %v7708_v12  ;;  %v16575_v56 = vld [vmem:[#allocation2 + $0x180] ss:$16 sps:$4 sm:$0xff]   ;;  %9820 = vmatpush1.bf16.msra.mxu0 %v16578_v49  ;;  %v16584_v12 = vld [vmem:[#allocation2 + $0x1a8] ss:$16 sps:$4 sm:$0xff]  }
 0xac7   :  { %9821 = vmatprep.subr.bf16.mxu0 %v16586_v15 }
 0xac8   :  { %v7781_v40 = vmul.f32 0.005, %v7778_v46  ;;  %v16589_v46 = vld [vmem:[#allocation2 + $0x1c4] ss:$16 sps:$4 sm:$0xff]  }
 0xaca   :  { %v7782_v34 = vadd.f32 1e-05, %v7781_v40  ;;  %v16592_v40 = vld [vmem:[#allocation2 + $0x1cc] ss:$16 sps:$4 sm:$0xff]   ;;  %9822 = vmatpush1.bf16.msra.mxu0 %v16584_v12 }
 0xacb   :  { %9823 = vmatprep.subr.bf16.mxu0 %v16592_v40 }
 0xacc   :  { %17221 = vrsqrt.f32 %v7782_v34  ;;  %v16587_v34 = vld [vmem:[#allocation2 + $0x1c0] ss:$16 sps:$4 sm:$0xff]  }
 0xad6   :  { %v17222_v10 = vpop.eup %17221 }
 0xad7   :  { %v7791_v58 = vmul.f32 %v17222_v10, %v13928_v51  ;;  %v16590_v51 = vld [vmem:[#allocation2 + $0x1c8] ss:$16 sps:$4 sm:$0xff]   ;;  %v16595_v10 = vld [vmem:[#allocation2 + $0x1e4] ss:$16 sps:$4 sm:$0xff]  }
 0xad8   :  { %9824 = vmatpush1.bf16.msra.mxu0 %v16590_v51 }
 0xad9   :  { %13929 = vmatmul.mubr.msk.f32.vlgmr.msra.gmra.mrb[54].mxu1 %vm6797_vm9, %v7791_v58 }
 0xada   :  { %7867 = vmatpush1.msra.mxu1 %v20337_v36  ;;  %7930 = vmatprep.mubr.f32.mxu1 %v21649_v33  ;;  %v16503_v36 = vld [vmem:[#allocation2] ss:$16 sps:$4 sm:$0xff]  }
 0xadb   :  { %7937 = vmatprep.subr.mxu1 %v20344_v41  ;;  %v16509_v41 = vld [vmem:[#allocation2 + $0x20] ss:$16 sps:$4 sm:$0xff]  }
 0xadd   :  { %13930 = vmatmul.mubr.msk.f32.vlgmr.msra.gmra.mrb[56].mxu1 %vm6797_vm9, %v7791_v58 }
 0xade   :  { %7938 = vmatpush1.msra.mxu1 %v20351_v55  ;;  %8001 = vmatprep.mubr.f32.mxu1 %v21649_v33  ;;  %v16517_v55 = vld [vmem:[#allocation2 + $0x44] ss:$16 sps:$4 sm:$0xff]  }
 0xadf   :  { %15206 = vmatprep.subr.mxu1 %v21649_v33 }
 0xae1   :  { %13931 = vmatmul.mubr.msk.f32.vlgmr.msra.gmra.mrb[58].mxu1 %vm6797_vm9, %v7791_v58 }
 0xae2   :  { %15207 = vmatpush3.msra.mxu1 %v20356_v38  ;;  %15208 = vmatprep.mubr.msk.f32.mxu1 %vm17328_vm2, %v21649_v33  ;;  %v16529_v38 = vld [vmem:[#allocation2 + $0x84] ss:$16 sps:$4 sm:$0xff]  }
 0xae3   :  { %9631 = vmatprep.subr.bf16.mxu1 %v16505_v50  ;;  %v16593_v50 = vld [vmem:[#allocation2 + $0x1e0] ss:$16 sps:$4 sm:$0xff]  }
 0xae5   :  { %15209 = vmatmul.mubr.msk.f32.vlgmr.msra.gmra.mrb[60].mxu1 %vm6797_vm9, %v7791_v58  ;;  %v16598_v58 = vld [vmem:[#allocation2 + $0x1ec] ss:$16 sps:$4 sm:$0xff]  }
 0xae6   :  { %9632 = vmatpush1.bf16.msra.mxu1 %v16503_v36  ;;  %v16596_v36 = vld [vmem:[#allocation2 + $0x1e8] ss:$16 sps:$4 sm:$0xff]   ;;  %9825 = vmatprep.subr.bf16.mxu0 %v16598_v58 }
 0xae7   :  { %9633 = vmatprep.subr.bf16.mxu1 %v16511_v18  ;;  %v16601_v18 = vld [vmem:[#allocation2 + $0x204] ss:$16 sps:$4 sm:$0xff]   ;;  %9826 = vmatpush1.bf16.msra.mxu0 %v16596_v36 }
 0xaea   :  { %9634 = vmatpush1.bf16.msra.mxu1 %v16509_v41  ;;  %v16604_v41 = vld [vmem:[#allocation2 + $0x20c] ss:$16 sps:$4 sm:$0xff]  }
 0xaeb   :  { %9635 = vmatprep.subr.bf16.mxu1 %v16517_v55  ;;  %9836 = vmatprep.subr.bf16.mxu0 %v16604_v41 }
 0xaee   :  { %9636 = vmatpush1.bf16.msra.mxu1 %v16515_v54 }
 0xaef   :  { %9637 = vmatprep.subr.bf16.mxu1 %v16523_v32 }
 0xaf2   :  { %9638 = vmatpush1.bf16.msra.mxu1 %v16521_v53 }
 0xaf3   :  { %9639 = vmatprep.subr.bf16.mxu1 %v16529_v38 }
 0xaf6   :  { %9640 = vmatpush1.bf16.msra.mxu1 %v16527_v47 }
 0xaf7   :  { %9641 = vmatprep.subr.bf16.mxu1 %v16535_v13 }
 0xafa   :  { %9642 = vmatpush1.bf16.msra.mxu1 %v16533_v21 }
 0xafb   :  { %9643 = vmatprep.subr.bf16.mxu1 %v16541_v7  ;;  %v8280_v7 = vld [vmem:[%s21508_s12] sm:$0x7f] }
 0xafc   :  { %v8285_v6 = vrot.slane %v8280_v7, %v21662_v24  ;;  %v8289_v9 = vrot.slane %v8280_v7, %v21663_v60  ;;  %v8297_v48 = vrot.slane %v8280_v7, %v21709_v27  ;;  %v8309_v15 = vrot.slane %v8280_v7, %v21712_v35 }
 0xafe   :  { %9644 = vmatpush1.bf16.msra.mxu1 %v16539_v14 }
 0xaff   :  { %9645 = vmatprep.subr.bf16.mxu1 %v16547_v4 }
 0xb02   :  { %9646 = vmatpush1.bf16.msra.mxu1 %v16545_v62 }
 0xb03   :  { %9647 = vmatprep.subr.bf16.mxu1 %v16553_v44  ;;  %v8293_v44 = vrot.slane %v8280_v7, %v21708_v25 }
 0xb05   :  { %v8311_v19 = vcombine.low %v8293_v44, %v8297_v48 }
 0xb06   :  { %9648 = vmatpush1.bf16.msra.mxu1 %v16551_v28 }
 0xb07   :  { %9649 = vmatprep.subr.bf16.mxu1 %v16559_v0  ;;  %v8305_v0 = vrot.slane %v8280_v7, %v21711_v5 }
 0xb0a   :  { %9650 = vmatpush1.bf16.msra.mxu1 %v16557_v37  ;;  %v8301_v37 = vrot.slane %v8280_v7, %v21710_v16 }
 0xb0b   :  { %9651 = vmatprep.subr.bf16.mxu1 %v16565_v22 }
 0xb0e   :  { %9652 = vmatpush1.bf16.msra.mxu1 %v16563_v45  ;;  %v8310_v45 = vcombine.low %v8285_v6, %v8289_v9 }
 0xb0f   :  { %9653 = vmatprep.subr.bf16.mxu1 %v16571_v61  ;;  %v8327_v61 = vcombine.low %v8301_v37, %v8305_v0 }
 0xb10   :  { %v8318_v49 = vrot.slane %v8310_v45, %v21713_v59 }
 0xb12   :  { %9654 = vmatpush1.bf16.msra.mxu1 %v16569_v17 }
 0xb13   :  { %9655 = vmatprep.subr.bf16.mxu1 %v16577_v20 }
 0xb16   :  { %9656 = vmatpush1.bf16.msra.mxu1 %v16575_v56 }
 0xb17   :  { %9657 = vmatprep.subr.bf16.mxu1 %v16583_v23  ;;  %v8325_v23 = vrot.slane %v8311_v19, %v21713_v59 }
 0xb19   :  { %v8326_v6 = vcombine.low %v8318_v49, %v8325_v23 }
 0xb1a   :  { %9658 = vmatpush1.bf16.msra.mxu1 %v16581_v52  ;;  %v8334_v52 = vrot.slane %v8327_v61, %v21713_v59 }
 0xb1b   :  { %9659 = vmatprep.subr.bf16.mxu1 %v16589_v46 }
 0xb1e   :  { %9660 = vmatpush1.bf16.msra.mxu1 %v16587_v34 }
 0xb1f   :  { %9661 = vmatprep.subr.bf16.mxu1 %v16595_v10 }
 0xb22   :  { %9662 = vmatpush1.bf16.msra.mxu1 %v16593_v50 }
 0xb23   :  { %9672 = vmatprep.subr.bf16.mxu1 %v16601_v18 }
 0xbac   :  { %v7861_v55 = vpop.f32.mrb[54].mxu1 }
 0xbad   :  { %v7863_v54 = vpop.f32.mrb[55].mxu1 }
 0xbae   :  { %v8085_v32 = vcombine.low %v7861_v55, %v7863_v54 }
 0xbb0   :  { %v7932_v53 = vpop.f32.mrb[56].mxu1  ;;  %v8094_v13 = vrot.slane %v8085_v32, %v18485_v31 }
 0xbb1   :  { %v7934_v38 = vpop.f32.mrb[57].mxu1 }
 0xbb2   :  { %v8086_v47 = vcombine.low %v7932_v53, %v7934_v38 }
 0xbb4   :  { %v8101_v21 = vrot.slane %v8086_v47, %v18485_v31  ;;  %v8003_v14 = vpop.f32.mrb[58].mxu1 }
 0xbb5   :  { %v8005_v11 = vpop.f32.mrb[59].mxu1 }
 0xbb6   :  { %v8116_v29 = vcombine.low %v8094_v13, %v8101_v21  ;;  %v8117_v62 = vcombine.high %v8094_v13, %v8101_v21  ;;  %v8087_v4 = vcombine.low %v8003_v14, %v8005_v11 }
 0xbb8   :  { %v8108_v63 = vrot.slane %v8087_v4, %v18485_v31  ;;  %v8074_v28 = vpop.f32.mrb[60].mxu1  ;;  %v8126_v1 = vrot.slane %v8116_v29, %v18485_v31  ;;  %v8133_v17 = vrot.slane %v8117_v62, %v18485_v31  ;;  %v8341_v62 = vrot.slane %v8309_v15, %v21713_v59 }
 0xbb9   :  { %v8115_v8 = vrot.slane %v8074_v28, %v18485_v31  ;;  %v15210_v30 = vpop.f32.mrb[61].mxu1 }
 0xbba   :  { %v8342_v0 = vcombine.low %v8334_v52, %v8341_v62  ;;  %v16599_v52 = vld [vmem:[#allocation2 + $0x200] ss:$16 sps:$4 sm:$0xff]   ;;  %v16637_v62 = vld [vmem:[#allocation2 + $0x2c4] ss:$16 sps:$4 sm:$0xff]  }
 0xbbb   :  { %v8118_v22 = vcombine.low %v8108_v63, %v8115_v8  ;;  %v8119_v39 = vcombine.high %v8108_v63, %v8115_v8 }
 0xbbd   :  { %v8140_v26 = vrot.slane %v8118_v22, %v18485_v31  ;;  %v8147_v20 = vrot.slane %v8119_v39, %v18485_v31 }
 0xbbf   :  { %v8148_v57 = vcombine.low %v8126_v1, %v8140_v26  ;;  %v8149_v56 = vcombine.low %v8133_v17, %v8147_v20 }
 0xbc1   :  { %v8153_v12 = vrot.slane %v8148_v57, %v21662_v24  ;;  %v8157_v46 = vrot.slane %v8148_v57, %v21663_v60  ;;  %v8161_v40 = vrot.slane %v8148_v57, %v21708_v25  ;;  %v8165_v34 = vrot.slane %v8148_v57, %v21709_v27 }
 0xbc2   :  { %v8181_v51 = vrot.slane %v8149_v56, %v21662_v24  ;;  %v8185_v10 = vrot.slane %v8149_v56, %v21663_v60  ;;  %v8189_v58 = vrot.slane %v8149_v56, %v21708_v25  ;;  %v8193_v50 = vrot.slane %v8149_v56, %v21709_v27 }
 0xbc3   :  { %v8206_v36 = vcombine.low %v8153_v12, %v8157_v46  ;;  %v8207_v18 = vcombine.low %v8161_v40, %v8165_v34  ;;  %v8169_v41 = vrot.slane %v8148_v57, %v21710_v16  ;;  %v8173_v55 = vrot.slane %v8148_v57, %v21711_v5  ;;  %v16602_v12 = vld [vmem:[#allocation2 + $0x208] ss:$16 sps:$4 sm:$0xff]   ;;  %v16607_v40 = vld [vmem:[#allocation2 + $0x224] ss:$16 sps:$4 sm:$0xff]   ;;  %v16610_v34 = vld [vmem:[#allocation2 + $0x22c] ss:$16 sps:$4 sm:$0xff]  }
 0xbc4   :  { %v8239_v54 = vcombine.low %v8181_v51, %v8185_v10  ;;  %v8240_v32 = vcombine.low %v8189_v58, %v8193_v50  ;;  %v8177_v53 = vrot.slane %v8148_v57, %v21712_v35  ;;  %v8197_v38 = vrot.slane %v8149_v56, %v21710_v16  ;;  %v16605_v10 = vld [vmem:[#allocation2 + $0x220] ss:$16 sps:$4 sm:$0xff]   ;;  %v16608_v58 = vld [vmem:[#allocation2 + $0x228] ss:$16 sps:$4 sm:$0xff]   ;;  %v16613_v50 = vld [vmem:[#allocation2 + $0x244] ss:$16 sps:$4 sm:$0xff]  }
 0xbc5   :  { %v8214_v47 = vrot.slane %v8206_v36, %v21713_v59  ;;  %v8221_v13 = vrot.slane %v8207_v18, %v21713_v59  ;;  %v8201_v21 = vrot.slane %v8149_v56, %v21711_v5  ;;  %v8205_v14 = vrot.slane %v8149_v56, %v21712_v35  ;;  %v16616_v36 = vld [vmem:[#allocation2 + $0x24c] ss:$16 sps:$4 sm:$0xff]   ;;  %v16611_v18 = vld [vmem:[#allocation2 + $0x240] ss:$16 sps:$4 sm:$0xff]  }
 0xbc6   :  { %v8247_v7 = vrot.slane %v8239_v54, %v21713_v59  ;;  %v8254_v11 = vrot.slane %v8240_v32, %v21713_v59  ;;  %v8223_v29 = vcombine.low %v8169_v41, %v8173_v55  ;;  %v8237_v63 = vrot.slane %v8177_v53, %v21713_v59  ;;  %v16614_v41 = vld [vmem:[#allocation2 + $0x248] ss:$16 sps:$4 sm:$0xff]   ;;  %v16619_v55 = vld [vmem:[#allocation2 + $0x264] ss:$16 sps:$4 sm:$0xff]   ;;  %v16622_v54 = vld [vmem:[#allocation2 + $0x26c] ss:$16 sps:$4 sm:$0xff]  }
 0xbc7   :  { %v8222_v4 = vcombine.low %v8214_v47, %v8221_v13  ;;  %v8256_v9 = vcombine.low %v8197_v38, %v8201_v21  ;;  %v8270_v35 = vrot.slane %v8205_v14, %v21713_v59  ;;  %v16617_v32 = vld [vmem:[#allocation2 + $0x260] ss:$16 sps:$4 sm:$0xff]   ;;  %v16620_v53 = vld [vmem:[#allocation2 + $0x268] ss:$16 sps:$4 sm:$0xff]   ;;  %v16625_v38 = vld [vmem:[#allocation2 + $0x284] ss:$16 sps:$4 sm:$0xff]  }
 0xbc8   :  { %v8255_v44 = vcombine.low %v8247_v7, %v8254_v11  ;;  %v8230_v16 = vrot.slane %v8223_v29, %v21713_v59  ;;  %v16628_v47 = vld [vmem:[#allocation2 + $0x28c] ss:$16 sps:$4 sm:$0xff]   ;;  %v16623_v13 = vld [vmem:[#allocation2 + $0x280] ss:$16 sps:$4 sm:$0xff]   ;;  %v16626_v21 = vld [vmem:[#allocation2 + $0x288] ss:$16 sps:$4 sm:$0xff]  }
 0xbc9   :  { %v8276_v28 = vmul.f32 %v8222_v4, %v20430_v3  ;;  %v8263_v5 = vrot.slane %v8256_v9, %v21713_v59  ;;  %v16631_v14 = vld [vmem:[#allocation2 + $0x2a4] ss:$16 sps:$4 sm:$0xff]   ;;  %v16634_v7 = vld [vmem:[#allocation2 + $0x2ac] ss:$16 sps:$4 sm:$0xff]   ;;  %v16629_v11 = vld [vmem:[#allocation2 + $0x2a0] ss:$16 sps:$4 sm:$0xff]  }
 0xbca   :  { %v8278_v48 = vmul.f32 %v8255_v44, %v20435_v42  ;;  %v8238_v37 = vcombine.low %v8230_v16, %v8237_v63  ;;  %v16632_v29 = vld [vmem:[#allocation2 + $0x2a8] ss:$16 sps:$4 sm:$0xff]   ;;  %v16640_v4 = vld [vmem:[#allocation2 + $0x2cc] ss:$16 sps:$4 sm:$0xff]   ;;  %v16643_v44 = vld [vmem:[#allocation2 + $0x2e4] ss:$16 sps:$4 sm:$0xff]  }
 0xbcb   :  { %v8345_v8 = vadd.f32 %v8326_v6, %v8276_v28  ;;  %v8271_v30 = vcombine.low %v8263_v5, %v8270_v35  ;;  %v16638_v9 = vld [vmem:[#allocation2 + $0x2c8] ss:$16 sps:$4 sm:$0xff]   ;;  %v16646_v16 = vld [vmem:[#allocation2 + $0x2ec] ss:$16 sps:$4 sm:$0xff]   ;;  %v16641_v63 = vld [vmem:[#allocation2 + $0x2e0] ss:$16 sps:$4 sm:$0xff]  }
 0xbcc   :  { %v8347_v22 = vadd.f32 %v8326_v6, %v8278_v48  ;;  %v8277_v39 = vmul.f32 %v8238_v37, %v20442_v2  ;;  %v16635_v6 = vld [vmem:[#allocation2 + $0x2c0] ss:$16 sps:$4 sm:$0xff]   ;;  %v16644_v28 = vld [vmem:[#allocation2 + $0x2e8] ss:$16 sps:$4 sm:$0xff]   ;;  %v16649_v5 = vld [vmem:[#allocation2 + $0x304] ss:$16 sps:$4 sm:$0xff]  }
 0xbcd   :  { %v8349_v45 = vmax.f32 %v8345_v8, 0.0  ;;  %v8279_v19 = vmul.f32 %v8271_v30, %v20446_v43  ;;  %v16652_v35 = vld [vmem:[#allocation2 + $0x30c] ss:$16 sps:$4 sm:$0xff]   ;;  %v16647_v48 = vld [vmem:[#allocation2 + $0x300] ss:$16 sps:$4 sm:$0xff]  }
 0xbce   :  { %v8351_v61 = vmax.f32 %v8347_v22, 0.0  ;;  %v8346_v1 = vadd.f32 %v8342_v0, %v8277_v39  ;;  %v16650_v37 = vld [vmem:[#allocation2 + $0x308] ss:$16 sps:$4 sm:$0xff]   ;;  %v16658_v8 = vld [vmem:[#allocation2 + $0x32c] ss:$16 sps:$4 sm:$0xff]  }
 0xbcf   :  { %v8348_v17 = vadd.f32 %v8342_v0, %v8279_v19  ;;  %v16655_v0 = vld [vmem:[#allocation2 + $0x324] ss:$16 sps:$4 sm:$0xff]   ;;  %v16653_v30 = vld [vmem:[#allocation2 + $0x320] ss:$16 sps:$4 sm:$0xff]   ;;  %v16656_v22 = vld [vmem:[#allocation2 + $0x328] ss:$16 sps:$4 sm:$0xff]  }
 0xbd0   :  { %v8357_v3 = vcombine.low %v8349_v45, %v8351_v61  ;;  %v8358_v26 = vcombine.high %v8349_v45, %v8351_v61  ;;  %v8350_v20 = vmax.f32 %v8346_v1, 0.0  ;;  %v16661_v39 = vld [vmem:[#allocation2 + $0x344] ss:$16 sps:$4 sm:$0xff]   ;;  %v16664_v45 = vld [vmem:[#allocation2 + $0x34c] ss:$16 sps:$4 sm:$0xff]  }
 0xbd1   :  { %v8352_v57 = vmax.f32 %v8348_v17, 0.0  ;;  %v16659_v19 = vld [vmem:[#allocation2 + $0x340] ss:$16 sps:$4 sm:$0xff]   ;;  %v16662_v61 = vld [vmem:[#allocation2 + $0x348] ss:$16 sps:$4 sm:$0xff]  }
 0xbd2   :  { %v8365_v56 = vrot.slane %v8357_v3, %v21713_v59  ;;  %v20591_v42 = vrot.slane %v8358_v26, %v21713_v59  ;;  %v16667_v1 = vld [vmem:[#allocation2 + $0x364] ss:$16 sps:$4 sm:$0xff]   ;;  %v16670_v17 = vld [vmem:[#allocation2 + $0x36c] ss:$16 sps:$4 sm:$0xff]   ;;  %v16665_v3 = vld [vmem:[#allocation2 + $0x360] ss:$16 sps:$4 sm:$0xff]  }
 0xbd3   :  { %v20593_v49 = vcombine.low %v8350_v20, %v8352_v57  ;;  %v20595_v23 = vcombine.high %v8350_v20, %v8352_v57  ;;  %v16668_v26 = vld [vmem:[#allocation2 + $0x368] ss:$16 sps:$4 sm:$0xff]   ;;  %v16673_v20 = vld [vmem:[#allocation2 + $0x384] ss:$16 sps:$4 sm:$0xff]   ;;  %v16676_v57 = vld [vmem:[#allocation2 + $0x38c] ss:$16 sps:$4 sm:$0xff]  }
 0xbd4   :  { %v8373_v2 = vcombine.high %v8365_v56, %v8365_v56  ;;  %v8374_v43 = vcombine.high %v20591_v42, %v20591_v42  ;;  %v8399_v46 = vpack.c.bf16 %v8365_v56, %v8365_v56  ;;  %v16671_v56 = vld [vmem:[#allocation2 + $0x380] ss:$16 sps:$4 sm:$0xff]  }
 0xbd6   :  { %v8400_v15 = vpack.c.bf16 %v8373_v2, %v8373_v2  ;;  %v8402_v51 = vpack.c.bf16 %v8374_v43, %v8374_v43  ;;  %v16674_v2 = vld [vmem:[#allocation2 + $0x388] ss:$16 sps:$4 sm:$0xff]   ;;  %v16679_v43 = vld [vmem:[#allocation2 + $0x3a4] ss:$16 sps:$4 sm:$0xff]  }
 0xbd8   :  { %9663 = vmatprep.mubr.bf16.mxu1 %v8400_v15  ;;  %9827 = vmatprep.mubr.bf16.mxu0 %v8400_v15  ;;  %v16682_v15 = vld [vmem:[#allocation2 + $0x3ac] ss:$16 sps:$4 sm:$0xff]  }
 0xbd9   :  { %9664 = vmatmul.mubr.bf16.vlgmr.msra.gmra.mrb[64].mxu1 %v8399_v46  ;;  %9828 = vmatmul.mubr.bf16.vlgmr.msra.gmra.mrb[48].mxu0 %v8399_v46  ;;  %v16685_v46 = vld [vmem:[#allocation2 + $0x3c4] ss:$16 sps:$4 sm:$0xff]  }
 0xbda   :  { %9673 = vmatpush1.bf16.msra.mxu1 %v16599_v52  ;;  %9837 = vmatpush1.bf16.msra.mxu0 %v16602_v12  ;;  %v16677_v52 = vld [vmem:[#allocation2 + $0x3a0] ss:$16 sps:$4 sm:$0xff]   ;;  %v16680_v12 = vld [vmem:[#allocation2 + $0x3a8] ss:$16 sps:$4 sm:$0xff]  }
 0xbdb   :  { %9704 = vmatprep.mubr.bf16.mxu1 %v8402_v51  ;;  %9868 = vmatprep.mubr.bf16.mxu0 %v8402_v51  ;;  %v16686_v51 = vld [vmem:[#allocation2 + $0x3c8] ss:$16 sps:$4 sm:$0xff]  }
 0xbdc   :  { %9674 = vmatprep.subr.bf16.mxu1 %v16607_v40  ;;  %9838 = vmatprep.subr.bf16.mxu0 %v16610_v34  ;;  %v16688_v40 = vld [vmem:[#allocation2 + $0x3cc] ss:$16 sps:$4 sm:$0xff]   ;;  %v16683_v34 = vld [vmem:[#allocation2 + $0x3c0] ss:$16 sps:$4 sm:$0xff]  }
 0xbde   :  { %9675 = vmatpush1.bf16.msra.mxu1 %v16605_v10  ;;  %9839 = vmatpush1.bf16.msra.mxu0 %v16608_v58  ;;  %v16691_v10 = vld [vmem:[#allocation2 + $0x3e4] ss:$16 sps:$4 sm:$0xff]   ;;  %v16694_v58 = vld [vmem:[#allocation2 + $0x3ec] ss:$16 sps:$4 sm:$0xff]  }
 0xbdf   :  { %9676 = vmatprep.subr.bf16.mxu1 %v16613_v50  ;;  %9840 = vmatprep.subr.bf16.mxu0 %v16616_v36  ;;  %v20601_v50 = vrot.slane %v20593_v49, %v21713_v59  ;;  %v16689_v36 = vld [vmem:[#allocation2 + $0x3e0] ss:$16 sps:$4 sm:$0xff]   ;;  %v16698_v49 = vld [vmem:[#allocation2 + $0x408] ss:$16 sps:$4 sm:$0xff]  }
 0xbe2   :  { %9677 = vmatpush1.bf16.msra.mxu1 %v16611_v18  ;;  %9841 = vmatpush1.bf16.msra.mxu0 %v16614_v41  ;;  %v16692_v18 = vld [vmem:[#allocation2 + $0x3e8] ss:$16 sps:$4 sm:$0xff]   ;;  %v16697_v41 = vld [vmem:[#allocation2 + $0x404] ss:$16 sps:$4 sm:$0xff]  }
 0xbe3   :  { %9678 = vmatprep.subr.bf16.mxu1 %v16619_v55  ;;  %9842 = vmatprep.subr.bf16.mxu0 %v16622_v54  ;;  %v16700_v55 = vld [vmem:[#allocation2 + $0x40c] ss:$16 sps:$4 sm:$0xff]   ;;  %v8391_v54 = vcombine.high %v20601_v50, %v20601_v50 }
 0xbe6   :  { %9679 = vmatpush1.bf16.msra.mxu1 %v16617_v32  ;;  %9843 = vmatpush1.bf16.msra.mxu0 %v16620_v53  ;;  %v16695_v32 = vld [vmem:[#allocation2 + $0x400] ss:$16 sps:$4 sm:$0xff]   ;;  %v8401_v53 = vpack.c.bf16 %v20591_v42, %v20591_v42 }
 0xbe7   :  { %9680 = vmatprep.subr.bf16.mxu1 %v16625_v38  ;;  %9844 = vmatprep.subr.bf16.mxu0 %v16628_v47  ;;  %v8404_v38 = vpack.c.bf16 %v8391_v54, %v8391_v54  ;;  %v16703_v47 = vld [vmem:[#allocation2 + $0x424] ss:$16 sps:$4 sm:$0xff]   ;;  %v16707_v42 = vld [vmem:[#allocation2 + $0x440] ss:$16 sps:$4 sm:$0xff]  }
 0xbe8   :  { %v16773_v54 = vld [vmem:[#allocation2 + $0x5a0] ss:$16 sps:$4 sm:$0xff]  }
 0xbea   :  { %9681 = vmatpush1.bf16.msra.mxu1 %v16623_v13  ;;  %9845 = vmatpush1.bf16.msra.mxu0 %v16626_v21  ;;  %v16706_v13 = vld [vmem:[#allocation2 + $0x42c] ss:$16 sps:$4 sm:$0xff]   ;;  %v16701_v21 = vld [vmem:[#allocation2 + $0x420] ss:$16 sps:$4 sm:$0xff]  }
 0xbeb   :  { %9682 = vmatprep.subr.bf16.mxu1 %v16631_v14  ;;  %9846 = vmatprep.subr.bf16.mxu0 %v16634_v7  ;;  %v16704_v14 = vld [vmem:[#allocation2 + $0x428] ss:$16 sps:$4 sm:$0xff]   ;;  %v16709_v7 = vld [vmem:[#allocation2 + $0x444] ss:$16 sps:$4 sm:$0xff]  }
 0xbee   :  { %9683 = vmatpush1.bf16.msra.mxu1 %v16629_v11  ;;  %9847 = vmatpush1.bf16.msra.mxu0 %v16632_v29  ;;  %v16712_v11 = vld [vmem:[#allocation2 + $0x44c] ss:$16 sps:$4 sm:$0xff]   ;;  %v16710_v29 = vld [vmem:[#allocation2 + $0x448] ss:$16 sps:$4 sm:$0xff]  }
 0xbef   :  { %9684 = vmatprep.subr.bf16.mxu1 %v16637_v62  ;;  %9848 = vmatprep.subr.bf16.mxu0 %v16640_v4  ;;  %v16715_v62 = vld [vmem:[#allocation2 + $0x464] ss:$16 sps:$4 sm:$0xff]   ;;  %v16718_v4 = vld [vmem:[#allocation2 + $0x46c] ss:$16 sps:$4 sm:$0xff]  }
 0xbf2   :  { %9685 = vmatpush1.bf16.msra.mxu1 %v16635_v6  ;;  %9849 = vmatpush1.bf16.msra.mxu0 %v16638_v9  ;;  %v16713_v6 = vld [vmem:[#allocation2 + $0x460] ss:$16 sps:$4 sm:$0xff]   ;;  %v16716_v9 = vld [vmem:[#allocation2 + $0x468] ss:$16 sps:$4 sm:$0xff]  }
 0xbf3   :  { %9686 = vmatprep.subr.bf16.mxu1 %v16643_v44  ;;  %9850 = vmatprep.subr.bf16.mxu0 %v16646_v16  ;;  %v16721_v44 = vld [vmem:[#allocation2 + $0x484] ss:$16 sps:$4 sm:$0xff]   ;;  %v16724_v16 = vld [vmem:[#allocation2 + $0x48c] ss:$16 sps:$4 sm:$0xff]  }
 0xbf6   :  { %9687 = vmatpush1.bf16.msra.mxu1 %v16641_v63  ;;  %9851 = vmatpush1.bf16.msra.mxu0 %v16644_v28  ;;  %v16719_v63 = vld [vmem:[#allocation2 + $0x480] ss:$16 sps:$4 sm:$0xff]   ;;  %v16722_v28 = vld [vmem:[#allocation2 + $0x488] ss:$16 sps:$4 sm:$0xff]  }
 0xbf7   :  { %9688 = vmatprep.subr.bf16.mxu1 %v16649_v5  ;;  %9852 = vmatprep.subr.bf16.mxu0 %v16652_v35  ;;  %v16727_v5 = vld [vmem:[#allocation2 + $0x4a4] ss:$16 sps:$4 sm:$0xff]   ;;  %v16730_v35 = vld [vmem:[#allocation2 + $0x4ac] ss:$16 sps:$4 sm:$0xff]  }
 0xbfa   :  { %9689 = vmatpush1.bf16.msra.mxu1 %v16647_v48  ;;  %9853 = vmatpush1.bf16.msra.mxu0 %v16650_v37  ;;  %v16725_v48 = vld [vmem:[#allocation2 + $0x4a0] ss:$16 sps:$4 sm:$0xff]   ;;  %v16728_v37 = vld [vmem:[#allocation2 + $0x4a8] ss:$16 sps:$4 sm:$0xff]  }
 0xbfb   :  { %9690 = vmatprep.subr.bf16.mxu1 %v16655_v0  ;;  %9854 = vmatprep.subr.bf16.mxu0 %v16658_v8  ;;  %v16733_v0 = vld [vmem:[#allocation2 + $0x4c4] ss:$16 sps:$4 sm:$0xff]   ;;  %v16736_v8 = vld [vmem:[#allocation2 + $0x4cc] ss:$16 sps:$4 sm:$0xff]  }
 0xbfe   :  { %9691 = vmatpush1.bf16.msra.mxu1 %v16653_v30  ;;  %9855 = vmatpush1.bf16.msra.mxu0 %v16656_v22  ;;  %v16731_v30 = vld [vmem:[#allocation2 + $0x4c0] ss:$16 sps:$4 sm:$0xff]   ;;  %v16734_v22 = vld [vmem:[#allocation2 + $0x4c8] ss:$16 sps:$4 sm:$0xff]  }
 0xbff   :  { %9692 = vmatprep.subr.bf16.mxu1 %v16661_v39  ;;  %9856 = vmatprep.subr.bf16.mxu0 %v16664_v45  ;;  %v16739_v39 = vld [vmem:[#allocation2 + $0x4e4] ss:$16 sps:$4 sm:$0xff]   ;;  %v16742_v45 = vld [vmem:[#allocation2 + $0x4ec] ss:$16 sps:$4 sm:$0xff]  }
 0xc02   :  { %9693 = vmatpush1.bf16.msra.mxu1 %v16659_v19  ;;  %9857 = vmatpush1.bf16.msra.mxu0 %v16662_v61  ;;  %v16737_v19 = vld [vmem:[#allocation2 + $0x4e0] ss:$16 sps:$4 sm:$0xff]   ;;  %v16740_v61 = vld [vmem:[#allocation2 + $0x4e8] ss:$16 sps:$4 sm:$0xff]  }
 0xc03   :  { %9694 = vmatprep.subr.bf16.mxu1 %v16667_v1  ;;  %9858 = vmatprep.subr.bf16.mxu0 %v16670_v17  ;;  %v16745_v1 = vld [vmem:[#allocation2 + $0x504] ss:$16 sps:$4 sm:$0xff]   ;;  %v16748_v17 = vld [vmem:[#allocation2 + $0x50c] ss:$16 sps:$4 sm:$0xff]  }
 0xc06   :  { %9695 = vmatpush1.bf16.msra.mxu1 %v16665_v3  ;;  %9859 = vmatpush1.bf16.msra.mxu0 %v16668_v26  ;;  %v16743_v3 = vld [vmem:[#allocation2 + $0x500] ss:$16 sps:$4 sm:$0xff]   ;;  %v16746_v26 = vld [vmem:[#allocation2 + $0x508] ss:$16 sps:$4 sm:$0xff]  }
 0xc07   :  { %9696 = vmatprep.subr.bf16.mxu1 %v16673_v20  ;;  %9860 = vmatprep.subr.bf16.mxu0 %v16676_v57  ;;  %v16751_v20 = vld [vmem:[#allocation2 + $0x524] ss:$16 sps:$4 sm:$0xff]   ;;  %v16754_v57 = vld [vmem:[#allocation2 + $0x52c] ss:$16 sps:$4 sm:$0xff]  }
 0xc0a   :  { %9697 = vmatpush1.bf16.msra.mxu1 %v16671_v56  ;;  %9861 = vmatpush1.bf16.msra.mxu0 %v16674_v2  ;;  %v16749_v56 = vld [vmem:[#allocation2 + $0x520] ss:$16 sps:$4 sm:$0xff]   ;;  %v16752_v2 = vld [vmem:[#allocation2 + $0x528] ss:$16 sps:$4 sm:$0xff]  }
 0xc0b   :  { %9698 = vmatprep.subr.bf16.mxu1 %v16679_v43  ;;  %9862 = vmatprep.subr.bf16.mxu0 %v16682_v15  ;;  %v16757_v43 = vld [vmem:[#allocation2 + $0x544] ss:$16 sps:$4 sm:$0xff]   ;;  %v16760_v15 = vld [vmem:[#allocation2 + $0x54c] ss:$16 sps:$4 sm:$0xff]  }
 0xc0e   :  { %9699 = vmatpush1.bf16.msra.mxu1 %v16677_v52  ;;  %9863 = vmatpush1.bf16.msra.mxu0 %v16680_v12  ;;  %v16755_v52 = vld [vmem:[#allocation2 + $0x540] ss:$16 sps:$4 sm:$0xff]   ;;  %v16758_v12 = vld [vmem:[#allocation2 + $0x548] ss:$16 sps:$4 sm:$0xff]  }
 0xc0f   :  { %9700 = vmatprep.subr.bf16.mxu1 %v16685_v46  ;;  %9864 = vmatprep.subr.bf16.mxu0 %v16688_v40  ;;  %v16763_v46 = vld [vmem:[#allocation2 + $0x564] ss:$16 sps:$4 sm:$0xff]   ;;  %v16766_v40 = vld [vmem:[#allocation2 + $0x56c] ss:$16 sps:$4 sm:$0xff]  }
 0xc12   :  { %9701 = vmatpush1.bf16.msra.mxu1 %v16683_v34  ;;  %9865 = vmatpush1.bf16.msra.mxu0 %v16686_v51  ;;  %v16761_v34 = vld [vmem:[#allocation2 + $0x560] ss:$16 sps:$4 sm:$0xff]   ;;  %v16764_v51 = vld [vmem:[#allocation2 + $0x568] ss:$16 sps:$4 sm:$0xff]  }
 0xc13   :  { %9702 = vmatprep.subr.bf16.mxu1 %v16691_v10  ;;  %9866 = vmatprep.subr.bf16.mxu0 %v16694_v58  ;;  %v16769_v10 = vld [vmem:[#allocation2 + $0x584] ss:$16 sps:$4 sm:$0xff]   ;;  %v16772_v58 = vld [vmem:[#allocation2 + $0x58c] ss:$16 sps:$4 sm:$0xff]  }
 0xc16   :  { %9703 = vmatpush1.bf16.msra.mxu1 %v16689_v36  ;;  %9867 = vmatpush1.bf16.msra.mxu0 %v16692_v18  ;;  %v16767_v36 = vld [vmem:[#allocation2 + $0x580] ss:$16 sps:$4 sm:$0xff]   ;;  %v16770_v18 = vld [vmem:[#allocation2 + $0x588] ss:$16 sps:$4 sm:$0xff]  }
 0xc17   :  { %9713 = vmatprep.subr.bf16.mxu1 %v16697_v41  ;;  %9877 = vmatprep.subr.bf16.mxu0 %v16700_v55  ;;  %v16775_v41 = vld [vmem:[#allocation2 + $0x5a4] ss:$16 sps:$4 sm:$0xff]   ;;  %v16778_v55 = vld [vmem:[#allocation2 + $0x5ac] ss:$16 sps:$4 sm:$0xff]  }
 0xc19   :  { %9705 = vmatmul.mubr.bf16.vlgmr.msra.gmra.mrb[64].mxu1 %v8401_v53  ;;  %9869 = vmatmul.mubr.bf16.vlgmr.msra.gmra.mrb[48].mxu0 %v8401_v53  ;;  %v16781_v53 = vld [vmem:[#allocation2 + $0x5c4] ss:$16 sps:$4 sm:$0xff]  }
 0xc1a   :  { %9714 = vmatpush1.bf16.msra.mxu1 %v16695_v32  ;;  %9745 = vmatprep.mubr.bf16.mxu1 %v8404_v38  ;;  %v16776_v32 = vld [vmem:[#allocation2 + $0x5a8] ss:$16 sps:$4 sm:$0xff]  }
 0xc1b   :  { %9878 = vmatpush1.bf16.msra.mxu0 %v16698_v49  ;;  %9909 = vmatprep.mubr.bf16.mxu0 %v8404_v38  ;;  %v16784_v49 = vld [vmem:[#allocation2 + $0x5cc] ss:$16 sps:$4 sm:$0xff]   ;;  %v16779_v38 = vld [vmem:[#allocation2 + $0x5c0] ss:$16 sps:$4 sm:$0xff]  }
 0xc1c   :  { %9715 = vmatprep.subr.bf16.mxu1 %v16703_v47  ;;  %9879 = vmatprep.subr.bf16.mxu0 %v16706_v13  ;;  %v16782_v47 = vld [vmem:[#allocation2 + $0x5c8] ss:$16 sps:$4 sm:$0xff]   ;;  %v16787_v13 = vld [vmem:[#allocation2 + $0x5e4] ss:$16 sps:$4 sm:$0xff]  }
 0xc1e   :  { %9716 = vmatpush1.bf16.msra.mxu1 %v16701_v21  ;;  %v16790_v21 = vld [vmem:[#allocation2 + $0x5ec] ss:$16 sps:$4 sm:$0xff]  }
 0xc1f   :  { %9880 = vmatpush1.bf16.msra.mxu0 %v16704_v14  ;;  %9717 = vmatprep.subr.bf16.mxu1 %v16709_v7  ;;  %v16785_v14 = vld [vmem:[#allocation2 + $0x5e0] ss:$16 sps:$4 sm:$0xff]   ;;  %v16788_v7 = vld [vmem:[#allocation2 + $0x5e8] ss:$16 sps:$4 sm:$0xff]  }
 0xc20   :  { %9881 = vmatprep.subr.bf16.mxu0 %v16712_v11  ;;  %v16793_v11 = vld [vmem:[#allocation2 + $0x604] ss:$16 sps:$4 sm:$0xff]  }
 0xc22   :  { %9718 = vmatpush1.bf16.msra.mxu1 %v16707_v42  ;;  %v16796_v42 = vld [vmem:[#allocation2 + $0x60c] ss:$16 sps:$4 sm:$0xff]  }
 0xc23   :  { %9882 = vmatpush1.bf16.msra.mxu0 %v16710_v29  ;;  %9719 = vmatprep.subr.bf16.mxu1 %v16715_v62  ;;  %v16791_v29 = vld [vmem:[#allocation2 + $0x600] ss:$16 sps:$4 sm:$0xff]   ;;  %v8403_v62 = vpack.c.bf16 %v20601_v50, %v20601_v50  ;;  %v10130_v50 = vld [vmem:[%s21511_s15 + $0x188] sm:$0xff] }
 0xc24   :  { %9883 = vmatprep.subr.bf16.mxu0 %v16718_v4  ;;  %v16794_v4 = vld [vmem:[#allocation2 + $0x608] ss:$16 sps:$4 sm:$0xff]  }
 0xc26   :  { %9720 = vmatpush1.bf16.msra.mxu1 %v16713_v6  ;;  %v16799_v6 = vld [vmem:[#allocation2 + $0x624] ss:$16 sps:$4 sm:$0xff]  }
 0xc27   :  { %9884 = vmatpush1.bf16.msra.mxu0 %v16716_v9  ;;  %9721 = vmatprep.subr.bf16.mxu1 %v16721_v44  ;;  %v16802_v9 = vld [vmem:[#allocation2 + $0x62c] ss:$16 sps:$4 sm:$0xff]   ;;  %v10097_v44 = vld [vmem:[%s21511_s15 + $0x80] sm:$0xff] }
 0xc28   :  { %9885 = vmatprep.subr.bf16.mxu0 %v16724_v16  ;;  %v10098_v16 = vld [vmem:[%s21511_s15 + $0x88] sm:$0xff] }
 0xc2a   :  { %9722 = vmatpush1.bf16.msra.mxu1 %v16719_v63  ;;  %v10129_v63 = vld [vmem:[%s21511_s15 + $0x180] sm:$0xff] }
 0xc2b   :  { %9886 = vmatpush1.bf16.msra.mxu0 %v16722_v28  ;;  %9723 = vmatprep.subr.bf16.mxu1 %v16727_v5  ;;  %v16797_v28 = vld [vmem:[#allocation2 + $0x620] ss:$16 sps:$4 sm:$0xff]   ;;  %v16800_v5 = vld [vmem:[#allocation2 + $0x628] ss:$16 sps:$4 sm:$0xff]  }
 0xc2c   :  { %9887 = vmatprep.subr.bf16.mxu0 %v16730_v35  ;;  %v20621_v35 = vpack.c.bf16 %v10098_v16, %v10097_v44  ;;  %v10138_v44 = vld [vmem:[%s21511_s15 + $0x1c8] sm:$0xff]  ;;  %v10089_v16 = vld [vmem:[%s21511_s15 + $0x40] sm:$0xff] }
 0xc2e   :  { %9724 = vmatpush1.bf16.msra.mxu1 %v16725_v48  ;;  %v21735_v48 = vmov 0  }
 0xc2f   :  { %9888 = vmatpush1.bf16.msra.mxu0 %v16728_v37  ;;  %9725 = vmatprep.subr.bf16.mxu1 %v16733_v0  ;;  %v20624_v37 = vpack.c.bf16 %v10130_v50, %v10129_v63  ;;  %v8390_v0 = vrot.slane %v20595_v23, %v21713_v59  ;;  %v10114_v23 = vld [vmem:[%s21511_s15 + $0x108] sm:$0xff] }
 0xc30   :  { %9889 = vmatprep.subr.bf16.mxu0 %v16736_v8  ;;  %v10081_v8 = vld [vmem:[%s21511_s15] sm:$0xff]  ;;  %v10090_v63 = vld [vmem:[%s21511_s15 + $0x48] sm:$0xff] }
 0xc32   :  { %9726 = vmatpush1.bf16.msra.mxu1 %v16731_v30  ;;  %v10082_v30 = vld [vmem:[%s21511_s15 + $0x8] sm:$0xff] }
 0xc33   :  { %9890 = vmatpush1.bf16.msra.mxu0 %v16734_v22  ;;  %9727 = vmatprep.subr.bf16.mxu1 %v16739_v39  ;;  %v10113_v22 = vld [vmem:[%s21511_s15 + $0x100] sm:$0xff]  ;;  %v20643_v39 = vpack.c.bf16 %v10082_v30, %v10081_v8  ;;  %v10139_v8 = vld [vmem:[%s21511_s15 + $0x1d0] sm:$0xff]  ;;  %v10140_v30 = vld [vmem:[%s21511_s15 + $0x1d8] sm:$0xff] }
 0xc34   :  { %9891 = vmatprep.subr.bf16.mxu0 %v16742_v45  ;;  %v8405_v45 = vpack.c.bf16 %v8390_v0, %v8390_v0  ;;  %v10108_v0 = vld [vmem:[%s21511_s15 + $0xd8] sm:$0xff] }
 0xc36   :  { %9728 = vmatpush1.bf16.msra.mxu1 %v16737_v19  ;;  %v20645_v19 = vpack.c.bf16 %v10114_v23, %v10113_v22  ;;  %v20798_v22 = vpack.c.bf16 %v10090_v63, %v10089_v16  ;;  %v10128_v16 = vld [vmem:[%s21511_s15 + $0x178] sm:$0xff] }
 0xc37   :  { %9892 = vmatpush1.bf16.msra.mxu0 %v16740_v61  ;;  %9729 = vmatprep.subr.bf16.mxu1 %v16745_v1  ;;  %v10099_v61 = vld [vmem:[%s21511_s15 + $0x90] sm:$0xff]  ;;  %v10100_v1 = vld [vmem:[%s21511_s15 + $0x98] sm:$0xff] }
 0xc38   :  { %9893 = vmatprep.subr.bf16.mxu0 %v16748_v17  ;;  %v10131_v17 = vld [vmem:[%s21511_s15 + $0x190] sm:$0xff] }
 0xc3a   :  { %9730 = vmatpush1.bf16.msra.mxu1 %v16743_v3  ;;  %v20660_v3 = vpack.c.bf16 %v10100_v1, %v10099_v61  ;;  %v10091_v61 = vld [vmem:[%s21511_s15 + $0x50] sm:$0xff]  ;;  %v10092_v1 = vld [vmem:[%s21511_s15 + $0x58] sm:$0xff] }
 0xc3b   :  { %9894 = vmatpush1.bf16.msra.mxu0 %v16746_v26  ;;  %9731 = vmatprep.subr.bf16.mxu1 %v16751_v20  ;;  %v10132_v26 = vld [vmem:[%s21511_s15 + $0x198] sm:$0xff]  ;;  %v10083_v20 = vld [vmem:[%s21511_s15 + $0x10] sm:$0xff] }
 0xc3c   :  { %9895 = vmatprep.subr.bf16.mxu0 %v16754_v57  ;;  %v10084_v57 = vld [vmem:[%s21511_s15 + $0x18] sm:$0xff] }
 0xc3e   :  { %9732 = vmatpush1.bf16.msra.mxu1 %v16749_v56  ;;  %v20671_v56 = vpack.c.bf16 %v10132_v26, %v10131_v17  ;;  %v10123_v17 = vld [vmem:[%s21511_s15 + $0x150] sm:$0xff]  ;;  %v20816_v26 = vpack.c.bf16 %v10140_v30, %v10139_v8 }
 0xc3f   :  { %9896 = vmatpush1.bf16.msra.mxu0 %v16752_v2  ;;  %9733 = vmatprep.subr.bf16.mxu1 %v16757_v43  ;;  %v20673_v2 = vpack.c.bf16 %v10084_v57, %v10083_v20  ;;  %v10115_v43 = vld [vmem:[%s21511_s15 + $0x110] sm:$0xff]  ;;  %v10124_v20 = vld [vmem:[%s21511_s15 + $0x158] sm:$0xff]  ;;  %v10109_v57 = vld [vmem:[%s21511_s15 + $0xe0] sm:$0xff] }
 0xc40   :  { %9897 = vmatprep.subr.bf16.mxu0 %v16760_v15  ;;  %v10116_v15 = vld [vmem:[%s21511_s15 + $0x118] sm:$0xff] }
 0xc42   :  { %9734 = vmatpush1.bf16.msra.mxu1 %v16755_v52  ;;  %v10101_v52 = vld [vmem:[%s21511_s15 + $0xa0] sm:$0xff] }
 0xc43   :  { %9898 = vmatpush1.bf16.msra.mxu0 %v16758_v12  ;;  %9735 = vmatprep.subr.bf16.mxu1 %v16763_v46  ;;  %v20685_v12 = vpack.c.bf16 %v10116_v15, %v10115_v43  ;;  %v10102_v46 = vld [vmem:[%s21511_s15 + $0xa8] sm:$0xff]  ;;  %v10141_v15 = vld [vmem:[%s21511_s15 + $0x1e0] sm:$0xff] }
 0xc44   :  { %9899 = vmatprep.subr.bf16.mxu0 %v16766_v40  ;;  %v10133_v40 = vld [vmem:[%s21511_s15 + $0x1a0] sm:$0xff]  ;;  %v10110_v43 = vld [vmem:[%s21511_s15 + $0xe8] sm:$0xff] }
 0xc46   :  { %9736 = vmatpush1.bf16.msra.mxu1 %v16761_v34  ;;  %v10134_v34 = vld [vmem:[%s21511_s15 + $0x1a8] sm:$0xff] }
 0xc47   :  { %9900 = vmatpush1.bf16.msra.mxu0 %v16764_v51  ;;  %9737 = vmatprep.subr.bf16.mxu1 %v16769_v10  ;;  %v20698_v51 = vpack.c.bf16 %v10102_v46, %v10101_v52  ;;  %v20700_v10 = vpack.c.bf16 %v10134_v34, %v10133_v40  ;;  %v10142_v52 = vld [vmem:[%s21511_s15 + $0x1e8] sm:$0xff]  ;;  %v20834_v46 = vpack.c.bf16 %v10092_v1, %v10091_v61 }
 0xc48   :  { %9901 = vmatprep.subr.bf16.mxu0 %v16772_v58  ;;  %v10085_v58 = vld [vmem:[%s21511_s15 + $0x20] sm:$0xff]  ;;  %v20838_v40 = vpack.c.bf16 %v10124_v20, %v10123_v17  ;;  %v20840_v34 = vpack.c.bf16 %v10110_v43, %v10109_v57 }
 0xc4a   :  { %9738 = vmatpush1.bf16.msra.mxu1 %v16767_v36  ;;  %v10086_v36 = vld [vmem:[%s21511_s15 + $0x28] sm:$0xff] }
 0xc4b   :  { %9902 = vmatpush1.bf16.msra.mxu0 %v16770_v18  ;;  %9739 = vmatprep.subr.bf16.mxu1 %v16775_v41  ;;  %v10117_v18 = vld [vmem:[%s21511_s15 + $0x120] sm:$0xff]  ;;  %v20712_v41 = vpack.c.bf16 %v10086_v36, %v10085_v58  ;;  %v10094_v36 = vld [vmem:[%s21511_s15 + $0x68] sm:$0xff] }
 0xc4c   :  { %9903 = vmatprep.subr.bf16.mxu0 %v16778_v55  ;;  %v10118_v55 = vld [vmem:[%s21511_s15 + $0x128] sm:$0xff]  ;;  %v10093_v58 = vld [vmem:[%s21511_s15 + $0x60] sm:$0xff] }
 0xc4e   :  { %9740 = vmatpush1.bf16.msra.mxu1 %v16773_v54  ;;  %v10103_v54 = vld [vmem:[%s21511_s15 + $0xb0] sm:$0xff] }
 0xc4f   :  { %9904 = vmatpush1.bf16.msra.mxu0 %v16776_v32  ;;  %9741 = vmatprep.subr.bf16.mxu1 %v16781_v53  ;;  %v10104_v32 = vld [vmem:[%s21511_s15 + $0xb8] sm:$0xff]  ;;  %v20725_v53 = vpack.c.bf16 %v10118_v55, %v10117_v18  ;;  %v10125_v18 = vld [vmem:[%s21511_s15 + $0x160] sm:$0xff]  ;;  %v20852_v55 = vpack.c.bf16 %v10142_v52, %v10141_v15 }
 0xc50   :  { %9905 = vmatprep.subr.bf16.mxu0 %v16784_v49  ;;  %v20727_v49 = vpack.c.bf16 %v10104_v32, %v10103_v54  ;;  %v10126_v54 = vld [vmem:[%s21511_s15 + $0x168] sm:$0xff]  ;;  %v10111_v32 = vld [vmem:[%s21511_s15 + $0xf0] sm:$0xff] }
 0xc51   :  { %21736 = vst [vmem:[#allocation38_spill] sm:$0xff] %v20852_v55 }
 0xc52   :  { %9742 = vmatpush1.bf16.msra.mxu1 %v16779_v38  ;;  %v10135_v38 = vld [vmem:[%s21511_s15 + $0x1b0] sm:$0xff] }
 0xc53   :  { %9906 = vmatpush1.bf16.msra.mxu0 %v16782_v47  ;;  %9743 = vmatprep.subr.bf16.mxu1 %v16787_v13  ;;  %v10136_v47 = vld [vmem:[%s21511_s15 + $0x1b8] sm:$0xff]  ;;  %v10087_v13 = vld [vmem:[%s21511_s15 + $0x30] sm:$0xff] }
 0xc54   :  { %9907 = vmatprep.subr.bf16.mxu0 %v16790_v21  ;;  %v20738_v21 = vpack.c.bf16 %v10136_v47, %v10135_v38  ;;  %v10112_v38 = vld [vmem:[%s21511_s15 + $0xf8] sm:$0xff]  ;;  %v10143_v47 = vld [vmem:[%s21511_s15 + $0x1f0] sm:$0xff] }
 0xc56   :  { %9744 = vmatpush1.bf16.msra.mxu1 %v16785_v14  ;;  %v10088_v14 = vld [vmem:[%s21511_s15 + $0x38] sm:$0xff] }
 0xc57   :  { %9908 = vmatpush1.bf16.msra.mxu0 %v16788_v7  ;;  %9754 = vmatprep.subr.bf16.mxu1 %v16793_v11  ;;  %v10119_v7 = vld [vmem:[%s21511_s15 + $0x130] sm:$0xff]  ;;  %v10120_v11 = vld [vmem:[%s21511_s15 + $0x138] sm:$0xff] }
 0xc58   :  { %9918 = vmatprep.subr.bf16.mxu0 %v16796_v42  ;;  %v20750_v42 = vpack.c.bf16 %v10088_v14, %v10087_v13  ;;  %v10144_v13 = vld [vmem:[%s21511_s15 + $0x1f8] sm:$0xff]  ;;  %v20870_v14 = vpack.c.bf16 %v10094_v36, %v10093_v58 }
 0xc59   :  { %9746 = vmatmul.mubr.bf16.vlgmr.msra.gmra.mrb[64].mxu1 %v8403_v62 }
 0xc5a   :  { %9910 = vmatmul.mubr.bf16.vlgmr.msra.gmra.mrb[48].mxu0 %v8403_v62  ;;  %9755 = vmatpush1.bf16.msra.mxu1 %v16791_v29  ;;  %v10105_v29 = vld [vmem:[%s21511_s15 + $0xc0] sm:$0xff]  ;;  %v10106_v62 = vld [vmem:[%s21511_s15 + $0xc8] sm:$0xff] }
 0xc5b   :  { %9919 = vmatpush1.bf16.msra.mxu0 %v16794_v4  ;;  %9756 = vmatprep.subr.bf16.mxu1 %v16799_v6  ;;  %v10137_v4 = vld [vmem:[%s21511_s15 + $0x1c0] sm:$0xff]  ;;  %v20763_v6 = vpack.c.bf16 %v10120_v11, %v10119_v7  ;;  %v20874_v7 = vpack.c.bf16 %v10126_v54, %v10125_v18  ;;  %v20876_v11 = vpack.c.bf16 %v10112_v38, %v10111_v32 }
 0xc5c   :  { %9920 = vmatprep.subr.bf16.mxu0 %v16802_v9  ;;  %9786 = vmatprep.mubr.bf16.mxu1 %v21735_v48  ;;  %v20765_v9 = vpack.c.bf16 %v10106_v62, %v10105_v29  ;;  %v20777_v50 = vpack.c.bf16 %v10138_v44, %v10137_v4  ;;  %v10095_v29 = vld [vmem:[%s21511_s15 + $0x70] sm:$0xff]  ;;  %v10096_v62 = vld [vmem:[%s21511_s15 + $0x78] sm:$0xff]  ;;  %v20885_v4 = vpack.c.bf16 %v10144_v13, %v10143_v47 }
 0xc5d   :  { %9950 = vmatprep.mubr.bf16.mxu0 %v21735_v48  ;;  %v10107_v48 = vld [vmem:[%s21511_s15 + $0xd0] sm:$0xff]  ;;  %21737 = vst [vmem:[#allocation39_spill] sm:$0xff] %v20874_v7  ;;  %v20894_v63 = vpack.c.bf16 %v10096_v62, %v10095_v29 }
 0xc5e   :  { %9757 = vmatpush1.bf16.msra.mxu1 %v16797_v28  ;;  %v10121_v28 = vld [vmem:[%s21511_s15 + $0x140] sm:$0xff]  ;;  %21738 = vst [vmem:[#allocation28_spill] sm:$0xff] %v20885_v4  ;;  %v10127_v44 = vld [vmem:[%s21511_s15 + $0x170] sm:$0xff] }
 0xc5f   :  { %9921 = vmatpush1.bf16.msra.mxu0 %v16800_v5  ;;  %15614 = vmatprep.subr.bf16.mxu1 %v20621_v35  ;;  %v10122_v5 = vld [vmem:[%s21511_s15 + $0x148] sm:$0xff] }
 0xc60   :  { %15646 = vmatprep.subr.bf16.mxu0 %v20624_v37  ;;  %v20802_v23 = vpack.c.bf16 %v10122_v5, %v10121_v28  ;;  %v20898_v28 = vpack.c.bf16 %v10128_v16, %v10127_v44  ;;  %v8606_v5 = vld [vmem:[%s21510_s14] sm:$0xf] }
 0xc61   :  { %v8615_v8 = vrot.slane %v8606_v5, %v21663_v60  ;;  %v8623_v30 = vrot.slane %v8606_v5, %v21709_v27 }
 0xc62   :  { %21739 = vst [vmem:[#allocation17_spill] sm:$0xff] %v20898_v28 }
 0xc65   :  { %14133 = vmatmul.mubr.msk.bf16.vlgmr.msra.gmra.mrb[64].mxu1 %vm6505_vm8, %v8405_v45 }
 0xc66   :  { %14134 = vmatmul.mubr.msk.bf16.vlgmr.msra.gmra.mrb[48].mxu0 %vm6505_vm8, %v8405_v45  ;;  %15616 = vmatpush3.bf16.msra.mxu1 %v20643_v39  ;;  %v20804_v45 = vpack.c.bf16 %v10108_v0, %v10107_v48  ;;  %v8611_v48 = vrot.slane %v8606_v5, %v21662_v24  ;;  %v8619_v0 = vrot.slane %v8606_v5, %v21708_v25 }
 0xc67   :  { %15648 = vmatpush3.bf16.msra.mxu0 %v20645_v19  ;;  %15618 = vmatprep.subr.bf16.mxu1 %v20660_v3 }
 0xc68   :  { %15650 = vmatprep.subr.bf16.mxu0 %v20671_v56 }
 0xc6a   :  { %15620 = vmatpush3.bf16.msra.mxu1 %v20673_v2 }
 0xc6b   :  { %15652 = vmatpush3.bf16.msra.mxu0 %v20685_v12  ;;  %15622 = vmatprep.subr.bf16.mxu1 %v20698_v51 }
 0xc6c   :  { %15654 = vmatprep.subr.bf16.mxu0 %v20700_v10 }
 0xc6e   :  { %15624 = vmatpush3.bf16.msra.mxu1 %v20712_v41 }
 0xc6f   :  { %15656 = vmatpush3.bf16.msra.mxu0 %v20725_v53  ;;  %15626 = vmatprep.subr.bf16.mxu1 %v20727_v49 }
 0xc70   :  { %15658 = vmatprep.subr.bf16.mxu0 %v20738_v21 }
 0xc72   :  { %15628 = vmatpush3.bf16.msra.mxu1 %v20750_v42 }
 0xc73   :  { %15660 = vmatpush3.bf16.msra.mxu0 %v20763_v6  ;;  %15630 = vmatprep.subr.bf16.mxu1 %v20765_v9 }
 0xc74   :  { %15662 = vmatprep.subr.bf16.mxu0 %v20777_v50 }
 0xc76   :  { %15632 = vmatpush3.bf16.msra.mxu1 %v20798_v22 }
 0xc77   :  { %15664 = vmatpush3.bf16.msra.mxu0 %v20802_v23  ;;  %15634 = vmatprep.subr.bf16.mxu1 %v20804_v45 }
 0xc78   :  { %15666 = vmatprep.subr.bf16.mxu0 %v20816_v26 }
 0xc7a   :  { %15636 = vmatpush3.bf16.msra.mxu1 %v20834_v46 }
 0xc7b   :  { %15668 = vmatpush3.bf16.msra.mxu0 %v20838_v40  ;;  %15638 = vmatprep.subr.bf16.mxu1 %v20840_v34 }
 0xc7c   :  { %15670 = vmatprep.subr.bf16.mxu0 %v20852_v55 }
 0xc7e   :  { %15640 = vmatpush3.bf16.msra.mxu1 %v20870_v14 }
 0xc7f   :  { %15672 = vmatpush3.bf16.msra.mxu0 %v20874_v7  ;;  %15642 = vmatprep.subr.bf16.mxu1 %v20876_v11 }
 0xc80   :  { %15674 = vmatprep.subr.bf16.mxu0 %v20885_v4 }
 0xc82   :  { %15644 = vmatpush3.bf16.msra.mxu1 %v20894_v63 }
 0xc83   :  { %15676 = vmatpush3.bf16.msra.mxu0 %v20898_v28 }
 0xc84   :  { %15678 = vmatprep.subr.bf16.mxu0 %v20621_v35 }
 0xd38   :  { %v9788_v61 = vpop.f32.mrb[64].mxu1 }
 0xd39   :  { %v15747_v1 = vadd.f32 %v9788_v61, %v8611_v48  ;;  %v9952_v17 = vpop.f32.mrb[48].mxu0  ;;  %v9790_v20 = vpop.f32.mrb[65].mxu1 }
 0xd3a   :  { %v15749_v57 = vadd.f32 %v9952_v17, %v8619_v0  ;;  %v15748_v43 = vadd.f32 %v9790_v20, %v8615_v8  ;;  %v9954_v15 = vpop.f32.mrb[49].mxu0  ;;  %v9792_v35 = vpop.f32.mrb[66].mxu1 }
 0xd3b   :  { %v15750_v52 = vadd.f32 %v9954_v15, %v8623_v30  ;;  %v9956_v58 = vpop.f32.mrb[50].mxu0  ;;  %v9793_v36 = vpop.f32.mrb[67].mxu1 }
 0xd3c   :  { %v9963_v18 = vcombine.low %v15747_v1, %v15748_v43  ;;  %v9957_v54 = vpop.f32.mrb[51].mxu0 }
 0xd3d   :  { %v9964_v32 = vcombine.low %v15749_v57, %v15750_v52 }
 0xd3e   :  { %v9971_v38 = vrot.slane %v9963_v18, %v21713_v59 }
 0xd3f   :  { %v9978_v47 = vrot.slane %v9964_v32, %v21713_v59 }
 0xd41   :  { %v20913_v13 = vcombine.low %v9971_v38, %v9978_v47  ;;  %v20915_v29 = vcombine.high %v9971_v38, %v9978_v47  ;;  %v14135_v62 = vcombine.low %v9978_v47, %v9978_v47  ;;  %v14136_v44 = vcombine.high %v9978_v47, %v9978_v47 }
 0xd43   :  { %21740 = vst [vmem:[#allocation18_spill] sm:$0xff] %v20913_v13  ;;  %21741 = vst [vmem:[#allocation40_spill] sm:$0xff] %v20915_v29  ;;  %v9990_v16 = vrot.slane %v20913_v13, %v21713_v59  ;;  %v9997_v5 = vrot.slane %v14135_v62, %v21713_v59  ;;  %v10007_v48 = vrot.slane %v20915_v29, %v21713_v59 }
 0xd44   :  { %v10014_v0 = vrot.slane %v14136_v44, %v21713_v59 }
 0xd45   :  { %v9998_v8 = vcombine.high %v9990_v16, %v9990_v16  ;;  %v10015_v30 = vcombine.high %v10007_v48, %v10007_v48  ;;  %v9999_v61 = vcombine.high %v9997_v5, %v9997_v5  ;;  %v10025_v17 = vsel %vm1159_vm0, %v9990_v16, 0.0 }
 0xd46   :  { %v10016_v1 = vcombine.high %v10014_v0, %v10014_v0  ;;  %v10053_v20 = vsel %vm1159_vm0, %v10007_v48, 0.0  ;;  %v10039_v57 = vsel %vm1159_vm0, %v9997_v5, 0.0  ;;  %v10067_v43 = vsel %vm1159_vm0, %v10014_v0, 0.0 }
 0xd47   :  { %v10032_v15 = vsel %vm1159_vm0, %v9998_v8, 0.0  ;;  %v10060_v35 = vsel %vm1159_vm0, %v10015_v30, 0.0  ;;  %v10046_v52 = vsel %vm1159_vm0, %v9999_v61, 0.0  ;;  %v10026_v38 = vrot.slane %v10025_v17, 4 }
 0xd48   :  { %v10074_v58 = vsel %vm1159_vm0, %v10016_v1, 0.0  ;;  %v10033_v36 = vrot.slane %v10032_v15, 4  ;;  %v10061_v18 = vrot.slane %v10060_v35, 4  ;;  %v10047_v54 = vrot.slane %v10046_v52, 4 }
 0xd49   :  { %v10075_v32 = vrot.slane %v10074_v58, 4  ;;  %v10054_v47 = vrot.slane %v10053_v20, 4  ;;  %v10040_v62 = vrot.slane %v10039_v57, 4  ;;  %v10068_v44 = vrot.slane %v10067_v43, 4 }
 0xd4a   :  { %v10034_v16 = vadd.f32 %v10033_v36, %v10032_v15  ;;  %v10062_v5 = vadd.f32 %v10061_v18, %v10060_v35  ;;  %v10048_v48 = vadd.f32 %v10047_v54, %v10046_v52  ;;  %v10027_v29 = vadd.f32 %v10026_v38, %v10025_v17 }
 0xd4b   :  { %v10076_v0 = vadd.f32 %v10075_v32, %v10074_v58  ;;  %v10055_v8 = vadd.f32 %v10054_v47, %v10053_v20  ;;  %v10041_v13 = vadd.f32 %v10040_v62, %v10039_v57  ;;  %v10069_v30 = vadd.f32 %v10068_v44, %v10067_v43 }
 0xd4c   :  { %v10035_v59 = vrot.slane %v10034_v16, 2  ;;  %v10063_v61 = vrot.slane %v10062_v5, 2  ;;  %v10049_v27 = vrot.slane %v10048_v48, 2  ;;  %v10028_v25 = vrot.slane %v10027_v29, 2 }
 0xd4d   :  { %v10077_v1 = vrot.slane %v10076_v0, 2  ;;  %v10056_v60 = vrot.slane %v10055_v8, 2  ;;  %v10042_v24 = vrot.slane %v10041_v13, 2  ;;  %v10070_v31 = vrot.slane %v10069_v30, 2 }
 0xd4e   :  { %v10036_v28 = vadd.f32 %v10035_v59, %v10034_v16  ;;  %v10064_v4 = vadd.f32 %v10063_v61, %v10062_v5  ;;  %v10050_v7 = vadd.f32 %v10049_v27, %v10048_v48  ;;  %v10029_v15 = vadd.f32 %v10028_v25, %v10027_v29  ;;  %v21749_v48 = vld [vmem:[#allocation22_spill] sm:$0xff] }
 0xd4f   :  { %v10078_v55 = vadd.f32 %v10077_v1, %v10076_v0  ;;  %v10057_v35 = vadd.f32 %v10056_v60, %v10055_v8  ;;  %v10043_v52 = vadd.f32 %v10042_v24, %v10041_v13  ;;  %v10071_v58 = vadd.f32 %v10070_v31, %v10069_v30  ;;  %v21748_v13 = vld [vmem:[#allocation23_spill] sm:$0xff]  ;;  %v21750_v8 = vld [vmem:[#allocation24_spill] sm:$0xff] }
 0xd50   :  { %v10037_v17 = vrot.slane %v10036_v28, 1  ;;  %v10065_v20 = vrot.slane %v10064_v4, 1  ;;  %v10051_v57 = vrot.slane %v10050_v7, 1  ;;  %v10030_v36 = vrot.slane %v10029_v15, 1 }
 0xd51   :  { %v10079_v43 = vrot.slane %v10078_v55, 1  ;;  %v10058_v18 = vrot.slane %v10057_v35, 1  ;;  %v10044_v54 = vrot.slane %v10043_v52, 1  ;;  %v10072_v32 = vrot.slane %v10071_v58, 1 }
 0xd52   :  { %v10038_v38 = vadd.f32 %v10037_v17, %v10036_v28  ;;  %v10066_v47 = vadd.f32 %v10065_v20, %v10064_v4  ;;  %v10052_v62 = vadd.f32 %v10051_v57, %v10050_v7  ;;  %v10031_v59 = vadd.f32 %v10030_v36, %v10029_v15  ;;  %v21751_v57 = vld [vmem:[#allocation25_spill] sm:$0xff] }
 0xd53   :  { %v10080_v44 = vadd.f32 %v10079_v43, %v10078_v55  ;;  %v10059_v16 = vadd.f32 %v10058_v18, %v10057_v35  ;;  %v10045_v27 = vadd.f32 %v10044_v54, %v10043_v52  ;;  %v10073_v5 = vadd.f32 %v10072_v32, %v10071_v58 }
 0xd54   :  { %v10154_v60 = vsel %vm1371_vm1, %v10066_v47, %v10038_v38  ;;  %v21752_v47 = vld [vmem:[#allocation18_spill] sm:$0xff] }
 0xd55   :  { %v10156_v31 = vsel %vm1371_vm1, %v10080_v44, %v10052_v62  ;;  %10225 = vmatprep.mubr.f32.mxu1 %v10154_v60  ;;  %v10153_v24 = vsel %vm1371_vm1, %v10059_v16, %v10031_v59  ;;  %v10155_v25 = vsel %vm1371_vm1, %v10073_v5, %v10045_v27  ;;  %v21753_v44 = vld [vmem:[#allocation40_spill] sm:$0xff] }
 0xd56   :  { %10295 = vmatprep.mubr.f32.mxu0 %v10156_v31  ;;  %10226 = vmatmul.mubr.f32.vlgmr.msra.gmra.mrb[62].mxu1 %v10153_v24 }
 0xd57   :  { %10296 = vmatmul.mubr.f32.vlgmr.msra.gmra.mrb[46].mxu0 %v10155_v25  ;;  %10374 = vmatprep.mubr.f32.mxu1 %v21649_v33 }
 0xd58   :  { %15680 = vmatpush3.bf16.msra.mxu0 %v20643_v39  ;;  %v10304_v39 = vld [vmem:[%s21512_s16 + $0x8] sm:$0xff] }
 0xd59   :  { %15682 = vmatprep.subr.bf16.mxu0 %v20660_v3  ;;  %v20957_v3 = vld [vmem:[%s21512_s16] sm:$0xff]  ;;  %10310 = vmatprep.subr.mxu1 %v10304_v39 }
 0xd5a   :  { %10311 = vmatpush1.msra.mxu1 %v20957_v3 }
 0xd5c   :  { %15684 = vmatpush3.bf16.msra.mxu0 %v20673_v2  ;;  %v10306_v2 = vld [vmem:[%s21512_s16 + $0x18] sm:$0xff] }
 0xd5d   :  { %15686 = vmatprep.subr.bf16.mxu0 %v20698_v51  ;;  %10381 = vmatprep.subr.mxu1 %v10306_v2 }
 0xd60   :  { %15688 = vmatpush3.bf16.msra.mxu0 %v20712_v41 }
 0xd61   :  { %15690 = vmatprep.subr.bf16.mxu0 %v20727_v49 }
 0xd64   :  { %15692 = vmatpush3.bf16.msra.mxu0 %v20750_v42 }
 0xd65   :  { %15694 = vmatprep.subr.bf16.mxu0 %v20765_v9 }
 0xd68   :  { %15696 = vmatpush3.bf16.msra.mxu0 %v20798_v22 }
 0xd69   :  { %15698 = vmatprep.subr.bf16.mxu0 %v20804_v45 }
 0xd6c   :  { %15700 = vmatpush3.bf16.msra.mxu0 %v20834_v46 }
 0xd6d   :  { %15702 = vmatprep.subr.bf16.mxu0 %v20840_v34  ;;  %v20966_v34 = vld [vmem:[%s21512_s16 + $0x10] sm:$0xff] }
 0xd70   :  { %15704 = vmatpush3.bf16.msra.mxu0 %v20870_v14 }
 0xd71   :  { %15706 = vmatprep.subr.bf16.mxu0 %v20876_v11 }
 0xd74   :  { %15708 = vmatpush3.bf16.msra.mxu0 %v20894_v63  ;;  %v21747_v63 = vld [vmem:[#allocation21_spill] sm:$0xff] }
 0xd75   :  { %10830 = vmatprep.subr.mxu0 %v10304_v39 }
 0xe29   :  { %v14997_v51 = vpop.f32.mrb[62].mxu1 }
 0xe2a   :  { %v15032_v41 = vpop.f32.mrb[46].mxu0  ;;  %v14998_v49 = vpop.f32.mrb[63].mxu1 }
 0xe2b   :  { %v15033_v42 = vpop.f32.mrb[47].mxu0  ;;  %v14999_v9 = vadd.f32 %v14998_v49, %v14997_v51 }
 0xe2c   :  { %v15034_v22 = vadd.f32 %v15033_v42, %v15032_v41 }
 0xe2e   :  { %v10298_v45 = vadd.f32 %v15034_v22, %v14999_v9 }
 0xe30   :  { %v10302_v46 = vmul.f32 0.0078125, %v10298_v45 }
 0xe32   :  { %14137 = vmatmul.mubr.msk.f32.vlgmr.msra.gmra.mrb[68].mxu1 %vm6797_vm9, %v10302_v46 }
 0xe33   :  { %10382 = vmatpush1.msra.mxu1 %v20966_v34  ;;  %10445 = vmatprep.mubr.f32.mxu1 %v21649_v33 }
 0xe34   :  { %15710 = vmatprep.subr.bf16.mxu1 %v20624_v37  ;;  %v21742_v37 = vld [vmem:[#allocation38_spill] sm:$0xff] }
 0xe36   :  { %14138 = vmatmul.mubr.msk.f32.vlgmr.msra.gmra.mrb[70].mxu1 %vm6797_vm9, %v10302_v46 }
 0xe37   :  { %15712 = vmatpush3.bf16.msra.mxu1 %v20645_v19  ;;  %v21743_v19 = vld [vmem:[#allocation39_spill] sm:$0xff] }
 0xe38   :  { %15714 = vmatprep.subr.bf16.mxu1 %v20671_v56  ;;  %v21744_v56 = vld [vmem:[#allocation28_spill] sm:$0xff] }
 0xe3b   :  { %15716 = vmatpush3.bf16.msra.mxu1 %v20685_v12  ;;  %v21745_v12 = vld [vmem:[#allocation17_spill] sm:$0xff] }
 0xe3c   :  { %15718 = vmatprep.subr.bf16.mxu1 %v20700_v10 }
 0xe3f   :  { %15720 = vmatpush3.bf16.msra.mxu1 %v20725_v53 }
 0xe40   :  { %15722 = vmatprep.subr.bf16.mxu1 %v20738_v21 }
 0xe43   :  { %15724 = vmatpush3.bf16.msra.mxu1 %v20763_v6 }
 0xe44   :  { %15726 = vmatprep.subr.bf16.mxu1 %v20777_v50 }
 0xe47   :  { %15728 = vmatpush3.bf16.msra.mxu1 %v20802_v23  ;;  %v21746_v23 = vld [vmem:[#allocation12_spill] sm:$0xff] }
 0xe48   :  { %15730 = vmatprep.subr.bf16.mxu1 %v20816_v26 }
 0xe4b   :  { %15732 = vmatpush3.bf16.msra.mxu1 %v20838_v40 }
 0xe4c   :  { %15734 = vmatprep.subr.bf16.mxu1 %v21742_v37 }
 0xe4f   :  { %15736 = vmatpush3.bf16.msra.mxu1 %v21743_v19 }
 0xe50   :  { %15738 = vmatprep.subr.bf16.mxu1 %v21744_v56 }
 0xe53   :  { %15740 = vmatpush3.bf16.msra.mxu1 %v21745_v12 }
 0xe54   :  { %10901 = vmatprep.subr.mxu1 %v10306_v2 }
 0xf05   :  { %v10376_v10 = vpop.f32.mrb[68].mxu1 }
 0xf06   :  { %v10378_v53 = vpop.f32.mrb[69].mxu1 }
 0xf07   :  { %v10456_v21 = vcombine.low %v10376_v10, %v10378_v53 }
 0xf09   :  { %v10447_v6 = vpop.f32.mrb[70].mxu1  ;;  %v10464_v14 = vrot.slane %v10456_v21, %v21746_v23 }
 0xf0a   :  { %v10449_v50 = vpop.f32.mrb[71].mxu1 }
 0xf0b   :  { %v10457_v55 = vcombine.low %v10447_v6, %v10449_v50 }
 0xf0d   :  { %v10471_v26 = vrot.slane %v10457_v55, %v21746_v23 }
 0xf0f   :  { %v10472_v40 = vcombine.low %v10464_v14, %v10471_v26  ;;  %v10473_v7 = vcombine.high %v10464_v14, %v10471_v26 }
 0xf11   :  { %v10480_v11 = vrot.slane %v10472_v40, %v21746_v23  ;;  %v10487_v4 = vrot.slane %v10473_v7, %v21746_v23 }
 0xf13   :  { %v10491_v28 = vrot.slane %v10480_v11, %v21747_v63  ;;  %v10495_v29 = vrot.slane %v10480_v11, %v21748_v13  ;;  %v10499_v0 = vrot.slane %v10480_v11, %v21749_v48  ;;  %v10503_v30 = vrot.slane %v10480_v11, %v21750_v8 }
 0xf14   :  { %v10507_v61 = vrot.slane %v10487_v4, %v21747_v63  ;;  %v10511_v1 = vrot.slane %v10487_v4, %v21748_v13  ;;  %v10515_v15 = vrot.slane %v10487_v4, %v21749_v48  ;;  %v10519_v35 = vrot.slane %v10487_v4, %v21750_v8 }
 0xf15   :  { %v10520_v52 = vcombine.low %v10491_v28, %v10495_v29  ;;  %v10521_v58 = vcombine.low %v10499_v0, %v10503_v30 }
 0xf16   :  { %v10537_v17 = vcombine.low %v10507_v61, %v10511_v1  ;;  %v10538_v20 = vcombine.low %v10515_v15, %v10519_v35 }
 0xf17   :  { %v10528_v43 = vrot.slane %v10520_v52, %v21751_v57  ;;  %v10535_v36 = vrot.slane %v10521_v58, %v21751_v57 }
 0xf18   :  { %v10545_v18 = vrot.slane %v10537_v17, %v21751_v57  ;;  %v10552_v54 = vrot.slane %v10538_v20, %v21751_v57 }
 0xf19   :  { %v10536_v32 = vcombine.low %v10528_v43, %v10535_v36 }
 0xf1a   :  { %v10553_v38 = vcombine.low %v10545_v18, %v10552_v54 }
 0xf1b   :  { %v21005_v62 = vsub.f32 %v21752_v47, %v10536_v32 }
 0xf1c   :  { %v21008_v59 = vsub.f32 %v21753_v44, %v10553_v38 }
 0xf1d   :  { %v10558_v16 = vmul.f32 %v21005_v62, %v21005_v62 }
 0xf1e   :  { %v10559_v27 = vmul.f32 %v21008_v59, %v21008_v59 }
 0xf1f   :  { %v10569_v5 = vrot.slane %v10558_v16, %v21751_v57  ;;  %v10562_v60 = vcombine.high %v10558_v16, %v10558_v16 }
 0xf20   :  { %v10586_v31 = vrot.slane %v10559_v27, %v21751_v57  ;;  %v10579_v24 = vcombine.high %v10559_v27, %v10559_v27 }
 0xf21   :  { %v10577_v25 = vcombine.high %v10569_v5, %v10569_v5  ;;  %v10604_v39 = vsel %vm1159_vm0, %v10569_v5, 0.0  ;;  %v10576_v2 = vrot.slane %v10562_v60, %v21751_v57 }
 0xf22   :  { %v10594_v51 = vcombine.high %v10586_v31, %v10586_v31  ;;  %v10605_v41 = vrot.slane %v10604_v39, 4  ;;  %v10632_v49 = vsel %vm1159_vm0, %v10586_v31, 0.0  ;;  %v10593_v42 = vrot.slane %v10579_v24, %v21751_v57 }
 0xf23   :  { %v10611_v9 = vsel %vm1159_vm0, %v10577_v25, 0.0  ;;  %v10633_v22 = vrot.slane %v10632_v49, 4  ;;  %v10578_v45 = vcombine.high %v10576_v2, %v10576_v2  ;;  %v10618_v46 = vsel %vm1159_vm0, %v10576_v2, 0.0 }
 0xf24   :  { %v10612_v37 = vrot.slane %v10611_v9, 4  ;;  %v10639_v19 = vsel %vm1159_vm0, %v10594_v51, 0.0  ;;  %v10606_v56 = vadd.f32 %v10605_v41, %v10604_v39  ;;  %v10595_v12 = vcombine.high %v10593_v42, %v10593_v42 }
 0xf25   :  { %v10640_v10 = vrot.slane %v10639_v19, 4  ;;  %v10634_v53 = vadd.f32 %v10633_v22, %v10632_v49  ;;  %v10625_v21 = vsel %vm1159_vm0, %v10578_v45, 0.0  ;;  %v10619_v6 = vrot.slane %v10618_v46, 4 }
 0xf26   :  { %v10613_v50 = vadd.f32 %v10612_v37, %v10611_v9  ;;  %v10607_v55 = vrot.slane %v10606_v56, 2  ;;  %v10626_v14 = vrot.slane %v10625_v21, 4  ;;  %v10653_v26 = vsel %vm1159_vm0, %v10595_v12, 0.0  ;;  %v16808_v12 = vld [vmem:[%s21515_s19 + $0xc] ss:$16 sps:$4 sm:$0xff]  }
 0xf27   :  { %v10641_v40 = vadd.f32 %v10640_v10, %v10639_v19  ;;  %v10635_v7 = vrot.slane %v10634_v53, 2  ;;  %v10654_v11 = vrot.slane %v10653_v26, 4  ;;  %v10620_v4 = vadd.f32 %v10619_v6, %v10618_v46 }
 0xf28   :  { %v10614_v28 = vrot.slane %v10613_v50, 2  ;;  %v10608_v29 = vadd.f32 %v10607_v55, %v10606_v56  ;;  %v10627_v0 = vadd.f32 %v10626_v14, %v10625_v21  ;;  %v10646_v30 = vsel %vm1159_vm0, %v10593_v42, 0.0  ;;  %v16805_v56 = vld [vmem:[%s21515_s19 + $0x4] ss:$16 sps:$4 sm:$0xff]  }
 0xf29   :  { %v10642_v61 = vrot.slane %v10641_v40, 2  ;;  %v10636_v1 = vadd.f32 %v10635_v7, %v10634_v53  ;;  %v10655_v15 = vadd.f32 %v10654_v11, %v10653_v26  ;;  %v10621_v35 = vrot.slane %v10620_v4, 2  ;;  %v16806_v7 = vld [vmem:[%s21515_s19 + $0x8] ss:$16 sps:$4 sm:$0xff]  }
 0xf2a   :  { %v10615_v52 = vadd.f32 %v10614_v28, %v10613_v50  ;;  %v10609_v58 = vrot.slane %v10608_v29, 1  ;;  %v10628_v17 = vrot.slane %v10627_v0, 2  ;;  %v10647_v20 = vrot.slane %v10646_v30, 4  ;;  %v16814_v28 = vld [vmem:[%s21515_s19 + $0x2c] ss:$16 sps:$4 sm:$0xff]  }
 0xf2b   :  { %v10643_v43 = vadd.f32 %v10642_v61, %v10641_v40  ;;  %v10637_v36 = vrot.slane %v10636_v1, 1  ;;  %v10656_v18 = vrot.slane %v10655_v15, 2  ;;  %v10622_v54 = vadd.f32 %v10621_v35, %v10620_v4  ;;  %v16803_v40 = vld [vmem:[%s21515_s19] ss:$16 sps:$4 sm:$0xff]   ;;  %v16811_v4 = vld [vmem:[%s21515_s19 + $0x24] ss:$16 sps:$4 sm:$0xff]  }
 0xf2c   :  { %v10616_v32 = vrot.slane %v10615_v52, 1  ;;  %v10629_v38 = vadd.f32 %v10628_v17, %v10627_v0  ;;  %v10648_v47 = vadd.f32 %v10647_v20, %v10646_v30  ;;  %v10610_v16 = vadd.f32 %v10609_v58, %v10608_v29  ;;  %v16809_v29 = vld [vmem:[%s21515_s19 + $0x20] ss:$16 sps:$4 sm:$0xff]   ;;  %v16812_v0 = vld [vmem:[%s21515_s19 + $0x28] ss:$16 sps:$4 sm:$0xff]  }
 0xf2d   :  { %v10644_v44 = vrot.slane %v10643_v43, 1  ;;  %v10638_v27 = vadd.f32 %v10637_v36, %v10636_v1  ;;  %v10657_v5 = vadd.f32 %v10656_v18, %v10655_v15  ;;  %v10623_v24 = vrot.slane %v10622_v54, 1  ;;  %v16817_v30 = vld [vmem:[%s21515_s19 + $0x44] ss:$16 sps:$4 sm:$0xff]   ;;  %v16820_v61 = vld [vmem:[%s21515_s19 + $0x4c] ss:$16 sps:$4 sm:$0xff]  }
 0xf2e   :  { %v10617_v60 = vadd.f32 %v10616_v32, %v10615_v52  ;;  %v10630_v31 = vrot.slane %v10629_v38, 1  ;;  %v10649_v25 = vrot.slane %v10648_v47, 2  ;;  %v16815_v1 = vld [vmem:[%s21515_s19 + $0x40] ss:$16 sps:$4 sm:$0xff]   ;;  %v16818_v15 = vld [vmem:[%s21515_s19 + $0x48] ss:$16 sps:$4 sm:$0xff]  }
 0xf2f   :  { %v10645_v39 = vadd.f32 %v10644_v44, %v10643_v43  ;;  %v10658_v2 = vrot.slane %v10657_v5, 1  ;;  %v10668_v9 = vsel %vm1371_vm1, %v10638_v27, %v10610_v16  ;;  %v10624_v22 = vadd.f32 %v10623_v24, %v10622_v54  ;;  %v16823_v35 = vld [vmem:[%s21515_s19 + $0x64] ss:$16 sps:$4 sm:$0xff]   ;;  %v16826_v52 = vld [vmem:[%s21515_s19 + $0x6c] ss:$16 sps:$4 sm:$0xff]  }
 0xf30   :  { %v10631_v51 = vadd.f32 %v10630_v31, %v10629_v38  ;;  %v10650_v41 = vadd.f32 %v10649_v25, %v10648_v47  ;;  %v16821_v58 = vld [vmem:[%s21515_s19 + $0x60] ss:$16 sps:$4 sm:$0xff]   ;;  %v16824_v17 = vld [vmem:[%s21515_s19 + $0x68] ss:$16 sps:$4 sm:$0xff]   ;;  %v16829_v20 = vld [vmem:[%s21515_s19 + $0x84] ss:$16 sps:$4 sm:$0xff]  }
 0xf31   :  { %v10669_v49 = vsel %vm1371_vm1, %v10645_v39, %v10617_v60  ;;  %v10659_v42 = vadd.f32 %v10658_v2, %v10657_v5  ;;  %v16832_v43 = vld [vmem:[%s21515_s19 + $0x8c] ss:$16 sps:$4 sm:$0xff]   ;;  %v16827_v36 = vld [vmem:[%s21515_s19 + $0x80] ss:$16 sps:$4 sm:$0xff]   ;;  %v16830_v18 = vld [vmem:[%s21515_s19 + $0x88] ss:$16 sps:$4 sm:$0xff]  }
 0xf32   :  { %10740 = vmatprep.mubr.f32.mxu0 %v10669_v49  ;;  %v10651_v45 = vrot.slane %v10650_v41, 1  ;;  %v16835_v54 = vld [vmem:[%s21515_s19 + $0xa4] ss:$16 sps:$4 sm:$0xff]   ;;  %v16838_v32 = vld [vmem:[%s21515_s19 + $0xac] ss:$16 sps:$4 sm:$0xff]  }
 0xf33   :  { %10741 = vmatmul.mubr.f32.vlgmr.msra.gmra.mrb[52].mxu0 %v10668_v9  ;;  %v10671_v46 = vsel %vm1371_vm1, %v10659_v42, %v10631_v51  ;;  %v16833_v38 = vld [vmem:[%s21515_s19 + $0xa0] ss:$16 sps:$4 sm:$0xff]   ;;  %v16836_v47 = vld [vmem:[%s21515_s19 + $0xa8] ss:$16 sps:$4 sm:$0xff]   ;;  %v16841_v44 = vld [vmem:[%s21515_s19 + $0xc4] ss:$16 sps:$4 sm:$0xff]  }
 0xf34   :  { %10810 = vmatprep.mubr.f32.mxu1 %v10671_v46  ;;  %v10652_v37 = vadd.f32 %v10651_v45, %v10650_v41  ;;  %10831 = vmatpush1.msra.mxu0 %v20957_v3  ;;  %v16844_v16 = vld [vmem:[%s21515_s19 + $0xcc] ss:$16 sps:$4 sm:$0xff]   ;;  %v16839_v27 = vld [vmem:[%s21515_s19 + $0xc0] ss:$16 sps:$4 sm:$0xff]   ;;  %v16842_v5 = vld [vmem:[%s21515_s19 + $0xc8] ss:$16 sps:$4 sm:$0xff]  }
 0xf35   :  { %10894 = vmatprep.mubr.f32.mxu0 %v21649_v33  ;;  %11936 = vmatprep.subr.bf16.mxu0 %v16805_v56  ;;  %v16847_v60 = vld [vmem:[%s21515_s19 + $0xe4] ss:$16 sps:$4 sm:$0xff]   ;;  %v16850_v31 = vld [vmem:[%s21515_s19 + $0xec] ss:$16 sps:$4 sm:$0xff]   ;;  %v16845_v24 = vld [vmem:[%s21515_s19 + $0xe0] ss:$16 sps:$4 sm:$0xff]  }
 0xf36   :  { %v10670_v19 = vsel %vm1371_vm1, %v10652_v37, %v10624_v22  ;;  %v16848_v25 = vld [vmem:[%s21515_s19 + $0xe8] ss:$16 sps:$4 sm:$0xff]   ;;  %v16851_v39 = vld [vmem:[%s21515_s19 + $0x100] ss:$16 sps:$4 sm:$0xff]   ;;  %v16853_v2 = vld [vmem:[%s21515_s19 + $0x104] ss:$16 sps:$4 sm:$0xff]  }
 0xf37   :  { %10811 = vmatmul.mubr.f32.vlgmr.msra.gmra.mrb[72].mxu1 %v10670_v19  ;;  %v16854_v51 = vld [vmem:[%s21515_s19 + $0x108] ss:$16 sps:$4 sm:$0xff]   ;;  %v16856_v41 = vld [vmem:[%s21515_s19 + $0x10c] ss:$16 sps:$4 sm:$0xff]   ;;  %v16857_v49 = vld [vmem:[%s21515_s19 + $0x120] ss:$16 sps:$4 sm:$0xff]  }
 0xf38   :  { %10902 = vmatpush1.msra.mxu1 %v20966_v34  ;;  %10965 = vmatprep.mubr.f32.mxu1 %v21649_v33  ;;  %v14139_v33 = vld [vmem:[%s21513_s17] ss:$0 sm:$0xff]  ;;  %v16859_v42 = vld [vmem:[%s21515_s19 + $0x124] ss:$16 sps:$4 sm:$0xff]   ;;  %v16860_v9 = vld [vmem:[%s21515_s19 + $0x128] ss:$16 sps:$4 sm:$0xff]  }
 0xf39   :  { %12018 = vmatprep.subr.bf16.mxu1 %v16808_v12  ;;  %v16862_v22 = vld [vmem:[%s21515_s19 + $0x12c] ss:$16 sps:$4 sm:$0xff]   ;;  %v16865_v45 = vld [vmem:[%s21515_s19 + $0x144] ss:$16 sps:$4 sm:$0xff]   ;;  %v16863_v37 = vld [vmem:[%s21515_s19 + $0x140] ss:$16 sps:$4 sm:$0xff]  }
 0xf3a   :  { %v16868_v46 = vld [vmem:[%s21515_s19 + $0x14c] ss:$16 sps:$4 sm:$0xff]   ;;  %v16866_v19 = vld [vmem:[%s21515_s19 + $0x148] ss:$16 sps:$4 sm:$0xff]   ;;  %v16871_v56 = vld [vmem:[%s21515_s19 + $0x164] ss:$16 sps:$4 sm:$0xff]  }
 0xf3b   :  { %v16874_v12 = vld [vmem:[%s21515_s19 + $0x16c] ss:$16 sps:$4 sm:$0xff]  }
0x1006   :  { %v15067_v3 = vpop.f32.mrb[52].mxu0 }
0x1007   :  { %v15068_v10 = vpop.f32.mrb[53].mxu0 }
0x1008   :  { %v15069_v53 = vadd.f32 %v15068_v10, %v15067_v3  ;;  %v16869_v3 = vld [vmem:[%s21515_s19 + $0x160] ss:$16 sps:$4 sm:$0xff]   ;;  %v16872_v10 = vld [vmem:[%s21515_s19 + $0x168] ss:$16 sps:$4 sm:$0xff]  }
0x100a   :  { %v15102_v21 = vpop.f32.mrb[72].mxu1 }
0x100b   :  { %v15103_v6 = vpop.f32.mrb[73].mxu1 }
0x100c   :  { %v15104_v50 = vadd.f32 %v15103_v6, %v15102_v21  ;;  %v16880_v21 = vld [vmem:[%s21515_s19 + $0x18c] ss:$16 sps:$4 sm:$0xff]   ;;  %v16875_v6 = vld [vmem:[%s21515_s19 + $0x180] ss:$16 sps:$4 sm:$0xff]  }
0x100e   :  { %v10813_v55 = vadd.f32 %v15104_v50, %v15069_v53  ;;  %v16877_v53 = vld [vmem:[%s21515_s19 + $0x184] ss:$16 sps:$4 sm:$0xff]   ;;  %v16878_v50 = vld [vmem:[%s21515_s19 + $0x188] ss:$16 sps:$4 sm:$0xff]  }
0x1010   :  { %v10816_v34 = vmul.f32 0.0078125, %v10813_v55  ;;  %v16883_v55 = vld [vmem:[%s21515_s19 + $0x1a4] ss:$16 sps:$4 sm:$0xff]  }
0x1012   :  { %v10817_v14 = vadd.f32 1e-05, %v10816_v34  ;;  %v16886_v34 = vld [vmem:[%s21515_s19 + $0x1ac] ss:$16 sps:$4 sm:$0xff]  }
0x1014   :  { %17223 = vrsqrt.f32 %v10817_v14  ;;  %v16881_v14 = vld [vmem:[%s21515_s19 + $0x1a0] ss:$16 sps:$4 sm:$0xff]  }
0x101e   :  { %v17224_v26 = vpop.eup %17223 }
0x101f   :  { %v10826_v11 = vmul.f32 %v17224_v26, %v14139_v33  ;;  %v16884_v33 = vld [vmem:[%s21515_s19 + $0x1a8] ss:$16 sps:$4 sm:$0xff]   ;;  %v16889_v26 = vld [vmem:[%s21515_s19 + $0x1c4] ss:$16 sps:$4 sm:$0xff]  }
0x1021   :  { %14140 = vmatmul.mubr.msk.f32.vlgmr.msra.gmra.mrb[54].mxu0 %vm6797_vm9, %v10826_v11  ;;  %14141 = vmatmul.mubr.msk.f32.vlgmr.msra.gmra.mrb[74].mxu1 %vm6797_vm9, %v10826_v11  ;;  %v16890_v11 = vld [vmem:[%s21515_s19 + $0x1c8] ss:$16 sps:$4 sm:$0xff]  }
0x1022   :  { %11937 = vmatpush1.bf16.msra.mxu0 %v16803_v40  ;;  %12019 = vmatpush1.bf16.msra.mxu1 %v16806_v7  ;;  %v16892_v40 = vld [vmem:[%s21515_s19 + $0x1cc] ss:$16 sps:$4 sm:$0xff]   ;;  %v16887_v7 = vld [vmem:[%s21515_s19 + $0x1c0] ss:$16 sps:$4 sm:$0xff]  }
0x1023   :  { %11938 = vmatprep.subr.bf16.mxu0 %v16811_v4  ;;  %12020 = vmatprep.subr.bf16.mxu1 %v16814_v28  ;;  %v16895_v4 = vld [vmem:[%s21515_s19 + $0x1e4] ss:$16 sps:$4 sm:$0xff]   ;;  %v16898_v28 = vld [vmem:[%s21515_s19 + $0x1ec] ss:$16 sps:$4 sm:$0xff]  }
0x1026   :  { %11939 = vmatpush1.bf16.msra.mxu0 %v16809_v29  ;;  %12021 = vmatpush1.bf16.msra.mxu1 %v16812_v0  ;;  %v16893_v29 = vld [vmem:[%s21515_s19 + $0x1e0] ss:$16 sps:$4 sm:$0xff]   ;;  %v16896_v0 = vld [vmem:[%s21515_s19 + $0x1e8] ss:$16 sps:$4 sm:$0xff]  }
0x1027   :  { %11940 = vmatprep.subr.bf16.mxu0 %v16817_v30  ;;  %12022 = vmatprep.subr.bf16.mxu1 %v16820_v61  ;;  %v16901_v30 = vld [vmem:[%s21515_s19 + $0x204] ss:$16 sps:$4 sm:$0xff]   ;;  %v16904_v61 = vld [vmem:[%s21515_s19 + $0x20c] ss:$16 sps:$4 sm:$0xff]  }
0x102a   :  { %11941 = vmatpush1.bf16.msra.mxu0 %v16815_v1  ;;  %12023 = vmatpush1.bf16.msra.mxu1 %v16818_v15 }
0x102b   :  { %11942 = vmatprep.subr.bf16.mxu0 %v16823_v35  ;;  %12024 = vmatprep.subr.bf16.mxu1 %v16826_v52  ;;  %v11078_v35 = vld [vmem:[%s21514_s18] sm:$0xf] }
0x102e   :  { %11943 = vmatpush1.bf16.msra.mxu0 %v16821_v58  ;;  %12025 = vmatpush1.bf16.msra.mxu1 %v16824_v17 }
0x102f   :  { %11944 = vmatprep.subr.bf16.mxu0 %v16829_v20  ;;  %12026 = vmatprep.subr.bf16.mxu1 %v16832_v43  ;;  %v11083_v43 = vrot.slane %v11078_v35, %v21747_v63 }
0x1032   :  { %11945 = vmatpush1.bf16.msra.mxu0 %v16827_v36  ;;  %12027 = vmatpush1.bf16.msra.mxu1 %v16830_v18  ;;  %v11087_v36 = vrot.slane %v11078_v35, %v21748_v13 }
0x1033   :  { %11946 = vmatprep.subr.bf16.mxu0 %v16835_v54  ;;  %12028 = vmatprep.subr.bf16.mxu1 %v16838_v32  ;;  %v11091_v32 = vrot.slane %v11078_v35, %v21749_v48 }
0x1036   :  { %11947 = vmatpush1.bf16.msra.mxu0 %v16833_v38  ;;  %12029 = vmatpush1.bf16.msra.mxu1 %v16836_v47  ;;  %v11095_v38 = vrot.slane %v11078_v35, %v21750_v8  ;;  %v16916_v35 = vld [vmem:[%s21515_s19 + $0x24c] ss:$16 sps:$4 sm:$0xff]  }
0x1037   :  { %11948 = vmatprep.subr.bf16.mxu0 %v16841_v44  ;;  %12030 = vmatprep.subr.bf16.mxu1 %v16844_v16 }
0x103a   :  { %11949 = vmatpush1.bf16.msra.mxu0 %v16839_v27  ;;  %12031 = vmatpush1.bf16.msra.mxu1 %v16842_v5  ;;  %v11096_v5 = vcombine.low %v11083_v43, %v11087_v36  ;;  %v16917_v43 = vld [vmem:[%s21515_s19 + $0x260] ss:$16 sps:$4 sm:$0xff]   ;;  %v16920_v36 = vld [vmem:[%s21515_s19 + $0x268] ss:$16 sps:$4 sm:$0xff]  }
0x103b   :  { %11950 = vmatprep.subr.bf16.mxu0 %v16847_v60  ;;  %12032 = vmatprep.subr.bf16.mxu1 %v16850_v31  ;;  %v11097_v60 = vcombine.low %v11091_v32, %v11095_v38  ;;  %v16923_v32 = vld [vmem:[%s21515_s19 + $0x280] ss:$16 sps:$4 sm:$0xff]   ;;  %v16926_v38 = vld [vmem:[%s21515_s19 + $0x288] ss:$16 sps:$4 sm:$0xff]  }
0x103e   :  { %11951 = vmatpush1.bf16.msra.mxu0 %v16845_v24  ;;  %12033 = vmatpush1.bf16.msra.mxu1 %v16848_v25 }
0x103f   :  { %11952 = vmatprep.subr.bf16.mxu0 %v16853_v2  ;;  %12034 = vmatprep.subr.bf16.mxu1 %v16856_v41 }
0x1042   :  { %11953 = vmatpush1.bf16.msra.mxu0 %v16851_v39  ;;  %12035 = vmatpush1.bf16.msra.mxu1 %v16854_v51 }
0x1043   :  { %11954 = vmatprep.subr.bf16.mxu0 %v16859_v42  ;;  %12036 = vmatprep.subr.bf16.mxu1 %v16862_v22  ;;  %v11111_v22 = vrot.slane %v11097_v60, %v21751_v57  ;;  %v16940_v60 = vld [vmem:[%s21515_s19 + $0x2cc] ss:$16 sps:$4 sm:$0xff]  }
0x1046   :  { %11955 = vmatpush1.bf16.msra.mxu0 %v16857_v49  ;;  %12037 = vmatpush1.bf16.msra.mxu1 %v16860_v9  ;;  %v11104_v9 = vrot.slane %v11096_v5, %v21751_v57  ;;  %v16937_v5 = vld [vmem:[%s21515_s19 + $0x2c4] ss:$16 sps:$4 sm:$0xff]  }
0x1047   :  { %11956 = vmatprep.subr.bf16.mxu0 %v16865_v45  ;;  %12038 = vmatprep.subr.bf16.mxu1 %v16868_v46 }
0x104a   :  { %11957 = vmatpush1.bf16.msra.mxu0 %v16863_v37  ;;  %12039 = vmatpush1.bf16.msra.mxu1 %v16866_v19 }
0x104b   :  { %11958 = vmatprep.subr.bf16.mxu0 %v16871_v56  ;;  %12040 = vmatprep.subr.bf16.mxu1 %v16874_v12 }
0x104e   :  { %11959 = vmatpush1.bf16.msra.mxu0 %v16869_v3  ;;  %12041 = vmatpush1.bf16.msra.mxu1 %v16872_v10  ;;  %v11112_v10 = vcombine.low %v11104_v9, %v11111_v22  ;;  %v16955_v9 = vld [vmem:[%s21515_s19 + $0x324] ss:$16 sps:$4 sm:$0xff]   ;;  %v16958_v22 = vld [vmem:[%s21515_s19 + $0x32c] ss:$16 sps:$4 sm:$0xff]  }
0x104f   :  { %11960 = vmatprep.subr.bf16.mxu0 %v16877_v53  ;;  %12042 = vmatprep.subr.bf16.mxu1 %v16880_v21 }
0x1052   :  { %11961 = vmatpush1.bf16.msra.mxu0 %v16875_v6  ;;  %12043 = vmatpush1.bf16.msra.mxu1 %v16878_v50 }
0x1053   :  { %11962 = vmatprep.subr.bf16.mxu0 %v16883_v55  ;;  %12044 = vmatprep.subr.bf16.mxu1 %v16886_v34 }
0x1056   :  { %11963 = vmatpush1.bf16.msra.mxu0 %v16881_v14  ;;  %12045 = vmatpush1.bf16.msra.mxu1 %v16884_v33 }
0x1057   :  { %11964 = vmatprep.subr.bf16.mxu0 %v16889_v26  ;;  %12046 = vmatprep.subr.bf16.mxu1 %v16892_v40 }
0x105a   :  { %11965 = vmatpush1.bf16.msra.mxu0 %v16887_v7  ;;  %12047 = vmatpush1.bf16.msra.mxu1 %v16890_v11 }
0x105b   :  { %11966 = vmatprep.subr.bf16.mxu0 %v16895_v4  ;;  %12048 = vmatprep.subr.bf16.mxu1 %v16898_v28 }
0x105e   :  { %11967 = vmatpush1.bf16.msra.mxu0 %v16893_v29  ;;  %12049 = vmatpush1.bf16.msra.mxu1 %v16896_v0  ;;  %v16910_v0 = vld [vmem:[%s21515_s19 + $0x22c] ss:$16 sps:$4 sm:$0xff]  }
0x105f   :  { %11977 = vmatprep.subr.bf16.mxu0 %v16901_v30  ;;  %12059 = vmatprep.subr.bf16.mxu1 %v16904_v61  ;;  %v16905_v61 = vld [vmem:[%s21515_s19 + $0x220] ss:$16 sps:$4 sm:$0xff]  }
0x10f4   :  { %v10896_v1 = vpop.f32.mrb[54].mxu0  ;;  %v10967_v15 = vpop.f32.mrb[74].mxu1 }
0x10f5   :  { %v10898_v52 = vpop.f32.mrb[55].mxu0  ;;  %v10969_v58 = vpop.f32.mrb[75].mxu1 }
0x10f6   :  { %v10976_v17 = vcombine.low %v10896_v1, %v10898_v52  ;;  %v10977_v20 = vcombine.low %v10967_v15, %v10969_v58  ;;  %v16908_v1 = vld [vmem:[%s21515_s19 + $0x228] ss:$16 sps:$4 sm:$0xff]   ;;  %v16913_v15 = vld [vmem:[%s21515_s19 + $0x244] ss:$16 sps:$4 sm:$0xff]   ;;  %v16911_v52 = vld [vmem:[%s21515_s19 + $0x240] ss:$16 sps:$4 sm:$0xff]  }
0x10f7   :  { %v16914_v58 = vld [vmem:[%s21515_s19 + $0x248] ss:$16 sps:$4 sm:$0xff]  }
0x10f8   :  { %v10984_v18 = vrot.slane %v10976_v17, %v21746_v23  ;;  %v10991_v54 = vrot.slane %v10977_v20, %v21746_v23  ;;  %v16919_v17 = vld [vmem:[%s21515_s19 + $0x264] ss:$16 sps:$4 sm:$0xff]   ;;  %v16922_v20 = vld [vmem:[%s21515_s19 + $0x26c] ss:$16 sps:$4 sm:$0xff]  }
0x10fa   :  { %v10992_v47 = vcombine.low %v10984_v18, %v10991_v54  ;;  %v10993_v44 = vcombine.high %v10984_v18, %v10991_v54  ;;  %v16925_v18 = vld [vmem:[%s21515_s19 + $0x284] ss:$16 sps:$4 sm:$0xff]   ;;  %v16928_v54 = vld [vmem:[%s21515_s19 + $0x28c] ss:$16 sps:$4 sm:$0xff]  }
0x10fc   :  { %v11000_v16 = vrot.slane %v10992_v47, %v21746_v23  ;;  %v11007_v27 = vrot.slane %v10993_v44, %v21746_v23  ;;  %v16931_v47 = vld [vmem:[%s21515_s19 + $0x2a4] ss:$16 sps:$4 sm:$0xff]   ;;  %v16934_v44 = vld [vmem:[%s21515_s19 + $0x2ac] ss:$16 sps:$4 sm:$0xff]  }
0x10fe   :  { %v11011_v31 = vrot.slane %v11000_v16, %v21747_v63  ;;  %v11015_v24 = vrot.slane %v11000_v16, %v21748_v13  ;;  %v11019_v25 = vrot.slane %v11000_v16, %v21749_v48  ;;  %v11023_v39 = vrot.slane %v11000_v16, %v21750_v8  ;;  %v16929_v16 = vld [vmem:[%s21515_s19 + $0x2a0] ss:$16 sps:$4 sm:$0xff]  }
0x10ff   :  { %v11027_v2 = vrot.slane %v11007_v27, %v21747_v63  ;;  %v11031_v51 = vrot.slane %v11007_v27, %v21748_v13  ;;  %v11035_v41 = vrot.slane %v11007_v27, %v21749_v48  ;;  %v11039_v49 = vrot.slane %v11007_v27, %v21750_v8  ;;  %v16932_v27 = vld [vmem:[%s21515_s19 + $0x2a8] ss:$16 sps:$4 sm:$0xff]  }
0x1100   :  { %v11040_v42 = vcombine.low %v11011_v31, %v11015_v24  ;;  %v11041_v23 = vcombine.low %v11019_v25, %v11023_v39  ;;  %v16935_v31 = vld [vmem:[%s21515_s19 + $0x2c0] ss:$16 sps:$4 sm:$0xff]   ;;  %v16938_v24 = vld [vmem:[%s21515_s19 + $0x2c8] ss:$16 sps:$4 sm:$0xff]   ;;  %v16943_v25 = vld [vmem:[%s21515_s19 + $0x2e4] ss:$16 sps:$4 sm:$0xff]  }
0x1101   :  { %v11057_v45 = vcombine.low %v11027_v2, %v11031_v51  ;;  %v11058_v46 = vcombine.low %v11035_v41, %v11039_v49  ;;  %v16946_v39 = vld [vmem:[%s21515_s19 + $0x2ec] ss:$16 sps:$4 sm:$0xff]   ;;  %v16941_v2 = vld [vmem:[%s21515_s19 + $0x2e0] ss:$16 sps:$4 sm:$0xff]   ;;  %v16944_v51 = vld [vmem:[%s21515_s19 + $0x2e8] ss:$16 sps:$4 sm:$0xff]  }
0x1102   :  { %v11048_v37 = vrot.slane %v11040_v42, %v21751_v57  ;;  %v11055_v19 = vrot.slane %v11041_v23, %v21751_v57  ;;  %v16949_v41 = vld [vmem:[%s21515_s19 + $0x304] ss:$16 sps:$4 sm:$0xff]   ;;  %v16952_v49 = vld [vmem:[%s21515_s19 + $0x30c] ss:$16 sps:$4 sm:$0xff]   ;;  %v16947_v42 = vld [vmem:[%s21515_s19 + $0x300] ss:$16 sps:$4 sm:$0xff]  }
0x1103   :  { %v11065_v56 = vrot.slane %v11057_v45, %v21751_v57  ;;  %v11072_v12 = vrot.slane %v11058_v46, %v21751_v57  ;;  %v16950_v23 = vld [vmem:[%s21515_s19 + $0x308] ss:$16 sps:$4 sm:$0xff]   ;;  %v16953_v45 = vld [vmem:[%s21515_s19 + $0x320] ss:$16 sps:$4 sm:$0xff]  }
0x1104   :  { %v11056_v3 = vcombine.low %v11048_v37, %v11055_v19  ;;  %v16956_v46 = vld [vmem:[%s21515_s19 + $0x328] ss:$16 sps:$4 sm:$0xff]   ;;  %v16961_v37 = vld [vmem:[%s21515_s19 + $0x344] ss:$16 sps:$4 sm:$0xff]   ;;  %v16964_v19 = vld [vmem:[%s21515_s19 + $0x34c] ss:$16 sps:$4 sm:$0xff]  }
0x1105   :  { %v11073_v53 = vcombine.low %v11065_v56, %v11072_v12  ;;  %v16959_v56 = vld [vmem:[%s21515_s19 + $0x340] ss:$16 sps:$4 sm:$0xff]   ;;  %v16962_v12 = vld [vmem:[%s21515_s19 + $0x348] ss:$16 sps:$4 sm:$0xff]  }
0x1106   :  { %v11076_v21 = vmul.f32 %v11056_v3, %v21005_v62  ;;  %v16899_v62 = vld [vmem:[%s21515_s19 + $0x200] ss:$16 sps:$4 sm:$0xff]   ;;  %v16967_v3 = vld [vmem:[%s21515_s19 + $0x364] ss:$16 sps:$4 sm:$0xff]  }
0x1107   :  { %v11077_v6 = vmul.f32 %v11073_v53, %v21008_v59  ;;  %v16902_v59 = vld [vmem:[%s21515_s19 + $0x208] ss:$16 sps:$4 sm:$0xff]   ;;  %v16965_v53 = vld [vmem:[%s21515_s19 + $0x360] ss:$16 sps:$4 sm:$0xff]  }
0x1108   :  { %v11114_v50 = vadd.f32 %v11112_v10, %v11076_v21  ;;  %v16968_v21 = vld [vmem:[%s21515_s19 + $0x368] ss:$16 sps:$4 sm:$0xff]  }
0x1109   :  { %v11115_v55 = vadd.f32 %v11112_v10, %v11077_v6  ;;  %v16970_v10 = vld [vmem:[%s21515_s19 + $0x36c] ss:$16 sps:$4 sm:$0xff]   ;;  %v16973_v6 = vld [vmem:[%s21515_s19 + $0x384] ss:$16 sps:$4 sm:$0xff]  }
0x110a   :  { %v11116_v34 = vmax.f32 %v11114_v50, 0.0  ;;  %v16976_v50 = vld [vmem:[%s21515_s19 + $0x38c] ss:$16 sps:$4 sm:$0xff]  }
0x110b   :  { %v11117_v14 = vmax.f32 %v11115_v55, 0.0  ;;  %v16971_v55 = vld [vmem:[%s21515_s19 + $0x380] ss:$16 sps:$4 sm:$0xff]  }
0x110d   :  { %v11120_v33 = vcombine.low %v11116_v34, %v11117_v14  ;;  %v11121_v26 = vcombine.high %v11116_v34, %v11117_v14  ;;  %v16974_v34 = vld [vmem:[%s21515_s19 + $0x388] ss:$16 sps:$4 sm:$0xff]   ;;  %v16979_v14 = vld [vmem:[%s21515_s19 + $0x3a4] ss:$16 sps:$4 sm:$0xff]  }
0x110f   :  { %v11128_v40 = vrot.slane %v11120_v33, %v21751_v57  ;;  %v21266_v7 = vrot.slane %v11121_v26, %v21751_v57  ;;  %v16907_v57 = vld [vmem:[%s21515_s19 + $0x224] ss:$16 sps:$4 sm:$0xff]   ;;  %v16982_v33 = vld [vmem:[%s21515_s19 + $0x3ac] ss:$16 sps:$4 sm:$0xff]   ;;  %v16977_v26 = vld [vmem:[%s21515_s19 + $0x3a0] ss:$16 sps:$4 sm:$0xff]  }
0x1111   :  { %v11136_v11 = vcombine.high %v11128_v40, %v11128_v40  ;;  %v11137_v4 = vcombine.high %v21266_v7, %v21266_v7  ;;  %v11142_v29 = vpack.c.bf16 %v11128_v40, %v11128_v40  ;;  %v16980_v40 = vld [vmem:[%s21515_s19 + $0x3a8] ss:$16 sps:$4 sm:$0xff]  }
0x1113   :  { %v11143_v28 = vpack.c.bf16 %v11136_v11, %v11136_v11  ;;  %v11145_v30 = vpack.c.bf16 %v11137_v4, %v11137_v4  ;;  %v16985_v11 = vld [vmem:[%s21515_s19 + $0x3c4] ss:$16 sps:$4 sm:$0xff]   ;;  %v16988_v4 = vld [vmem:[%s21515_s19 + $0x3cc] ss:$16 sps:$4 sm:$0xff]  }
0x1115   :  { %11968 = vmatprep.mubr.bf16.mxu0 %v11143_v28  ;;  %12050 = vmatprep.mubr.bf16.mxu1 %v11143_v28  ;;  %v16983_v28 = vld [vmem:[%s21515_s19 + $0x3c0] ss:$16 sps:$4 sm:$0xff]  }
0x1116   :  { %11969 = vmatmul.mubr.bf16.vlgmr.msra.gmra.mrb[56].mxu0 %v11142_v29  ;;  %12051 = vmatmul.mubr.bf16.vlgmr.msra.gmra.mrb[76].mxu1 %v11142_v29  ;;  %v16994_v29 = vld [vmem:[%s21515_s19 + $0x3ec] ss:$16 sps:$4 sm:$0xff]  }
0x1117   :  { %11978 = vmatpush1.bf16.msra.mxu0 %v16899_v62  ;;  %12060 = vmatpush1.bf16.msra.mxu1 %v16902_v59  ;;  %v16986_v62 = vld [vmem:[%s21515_s19 + $0x3c8] ss:$16 sps:$4 sm:$0xff]   ;;  %v16991_v59 = vld [vmem:[%s21515_s19 + $0x3e4] ss:$16 sps:$4 sm:$0xff]  }
0x1118   :  { %12009 = vmatprep.mubr.bf16.mxu0 %v11145_v30  ;;  %12091 = vmatprep.mubr.bf16.mxu1 %v11145_v30  ;;  %v16997_v30 = vld [vmem:[#allocation5 + $0x4] ss:$16 sps:$4 sm:$0xff]  }
0x1119   :  { %11979 = vmatprep.subr.bf16.mxu0 %v16907_v57  ;;  %12061 = vmatprep.subr.bf16.mxu1 %v16910_v0  ;;  %v16989_v57 = vld [vmem:[%s21515_s19 + $0x3e0] ss:$16 sps:$4 sm:$0xff]   ;;  %v16992_v0 = vld [vmem:[%s21515_s19 + $0x3e8] ss:$16 sps:$4 sm:$0xff]  }
0x111b   :  { %11980 = vmatpush1.bf16.msra.mxu0 %v16905_v61  ;;  %12062 = vmatpush1.bf16.msra.mxu1 %v16908_v1  ;;  %v17000_v61 = vld [vmem:[#allocation5 + $0xc] ss:$16 sps:$4 sm:$0xff]   ;;  %v16995_v1 = vld [vmem:[#allocation5] ss:$16 sps:$4 sm:$0xff]  }
0x111c   :  { %11981 = vmatprep.subr.bf16.mxu0 %v16913_v15  ;;  %12063 = vmatprep.subr.bf16.mxu1 %v16916_v35  ;;  %v16998_v15 = vld [vmem:[#allocation5 + $0x8] ss:$16 sps:$4 sm:$0xff]   ;;  %v11144_v35 = vpack.c.bf16 %v21266_v7, %v21266_v7  ;;  %v17015_v7 = vld [vmem:[#allocation5 + $0x64] ss:$16 sps:$4 sm:$0xff]  }
0x111f   :  { %11982 = vmatpush1.bf16.msra.mxu0 %v16911_v52  ;;  %12064 = vmatpush1.bf16.msra.mxu1 %v16914_v58  ;;  %v17003_v52 = vld [vmem:[#allocation5 + $0x24] ss:$16 sps:$4 sm:$0xff]   ;;  %v17006_v58 = vld [vmem:[#allocation5 + $0x2c] ss:$16 sps:$4 sm:$0xff]  }
0x1120   :  { %11983 = vmatprep.subr.bf16.mxu0 %v16919_v17  ;;  %12065 = vmatprep.subr.bf16.mxu1 %v16922_v20  ;;  %v17001_v17 = vld [vmem:[#allocation5 + $0x20] ss:$16 sps:$4 sm:$0xff]   ;;  %v17004_v20 = vld [vmem:[#allocation5 + $0x28] ss:$16 sps:$4 sm:$0xff]  }
0x1123   :  { %11984 = vmatpush1.bf16.msra.mxu0 %v16917_v43  ;;  %12066 = vmatpush1.bf16.msra.mxu1 %v16920_v36  ;;  %v17009_v43 = vld [vmem:[#allocation5 + $0x44] ss:$16 sps:$4 sm:$0xff]   ;;  %v17012_v36 = vld [vmem:[#allocation5 + $0x4c] ss:$16 sps:$4 sm:$0xff]  }
0x1124   :  { %11985 = vmatprep.subr.bf16.mxu0 %v16925_v18  ;;  %12067 = vmatprep.subr.bf16.mxu1 %v16928_v54  ;;  %v17007_v18 = vld [vmem:[#allocation5 + $0x40] ss:$16 sps:$4 sm:$0xff]   ;;  %v17010_v54 = vld [vmem:[#allocation5 + $0x48] ss:$16 sps:$4 sm:$0xff]  }
0x1127   :  { %11986 = vmatpush1.bf16.msra.mxu0 %v16923_v32  ;;  %12068 = vmatpush1.bf16.msra.mxu1 %v16926_v38  ;;  %v17018_v32 = vld [vmem:[#allocation5 + $0x6c] ss:$16 sps:$4 sm:$0xff]   ;;  %v17013_v38 = vld [vmem:[#allocation5 + $0x60] ss:$16 sps:$4 sm:$0xff]  }
0x1128   :  { %11987 = vmatprep.subr.bf16.mxu0 %v16931_v47  ;;  %12069 = vmatprep.subr.bf16.mxu1 %v16934_v44  ;;  %v17016_v47 = vld [vmem:[#allocation5 + $0x68] ss:$16 sps:$4 sm:$0xff]   ;;  %v17021_v44 = vld [vmem:[#allocation5 + $0x84] ss:$16 sps:$4 sm:$0xff]  }
0x112b   :  { %11988 = vmatpush1.bf16.msra.mxu0 %v16929_v16  ;;  %12070 = vmatpush1.bf16.msra.mxu1 %v16932_v27  ;;  %v17024_v16 = vld [vmem:[#allocation5 + $0x8c] ss:$16 sps:$4 sm:$0xff]   ;;  %v17019_v27 = vld [vmem:[#allocation5 + $0x80] ss:$16 sps:$4 sm:$0xff]  }
0x112c   :  { %11989 = vmatprep.subr.bf16.mxu0 %v16937_v5  ;;  %12071 = vmatprep.subr.bf16.mxu1 %v16940_v60  ;;  %v17022_v5 = vld [vmem:[#allocation5 + $0x88] ss:$16 sps:$4 sm:$0xff]   ;;  %v17027_v60 = vld [vmem:[#allocation5 + $0xa4] ss:$16 sps:$4 sm:$0xff]  }
0x112f   :  { %11990 = vmatpush1.bf16.msra.mxu0 %v16935_v31  ;;  %12072 = vmatpush1.bf16.msra.mxu1 %v16938_v24  ;;  %v17030_v31 = vld [vmem:[#allocation5 + $0xac] ss:$16 sps:$4 sm:$0xff]   ;;  %v17025_v24 = vld [vmem:[#allocation5 + $0xa0] ss:$16 sps:$4 sm:$0xff]  }
0x1130   :  { %11991 = vmatprep.subr.bf16.mxu0 %v16943_v25  ;;  %12073 = vmatprep.subr.bf16.mxu1 %v16946_v39  ;;  %v17028_v25 = vld [vmem:[#allocation5 + $0xa8] ss:$16 sps:$4 sm:$0xff]   ;;  %v17033_v39 = vld [vmem:[#allocation5 + $0xc4] ss:$16 sps:$4 sm:$0xff]  }
0x1133   :  { %11992 = vmatpush1.bf16.msra.mxu0 %v16941_v2  ;;  %12074 = vmatpush1.bf16.msra.mxu1 %v16944_v51  ;;  %v17036_v2 = vld [vmem:[#allocation5 + $0xcc] ss:$16 sps:$4 sm:$0xff]   ;;  %v17031_v51 = vld [vmem:[#allocation5 + $0xc0] ss:$16 sps:$4 sm:$0xff]  }
0x1134   :  { %11993 = vmatprep.subr.bf16.mxu0 %v16949_v41  ;;  %12075 = vmatprep.subr.bf16.mxu1 %v16952_v49  ;;  %v17034_v41 = vld [vmem:[#allocation5 + $0xc8] ss:$16 sps:$4 sm:$0xff]   ;;  %v17039_v49 = vld [vmem:[#allocation5 + $0xe4] ss:$16 sps:$4 sm:$0xff]  }
0x1137   :  { %11994 = vmatpush1.bf16.msra.mxu0 %v16947_v42  ;;  %12076 = vmatpush1.bf16.msra.mxu1 %v16950_v23  ;;  %v17042_v42 = vld [vmem:[#allocation5 + $0xec] ss:$16 sps:$4 sm:$0xff]   ;;  %v17037_v23 = vld [vmem:[#allocation5 + $0xe0] ss:$16 sps:$4 sm:$0xff]  }
0x1138   :  { %11995 = vmatprep.subr.bf16.mxu0 %v16955_v9  ;;  %12077 = vmatprep.subr.bf16.mxu1 %v16958_v22  ;;  %v17040_v9 = vld [vmem:[#allocation5 + $0xe8] ss:$16 sps:$4 sm:$0xff]   ;;  %v17045_v22 = vld [vmem:[#allocation5 + $0x104] ss:$16 sps:$4 sm:$0xff]  }
0x113b   :  { %11996 = vmatpush1.bf16.msra.mxu0 %v16953_v45  ;;  %12078 = vmatpush1.bf16.msra.mxu1 %v16956_v46  ;;  %v17048_v45 = vld [vmem:[#allocation5 + $0x10c] ss:$16 sps:$4 sm:$0xff]   ;;  %v17043_v46 = vld [vmem:[#allocation5 + $0x100] ss:$16 sps:$4 sm:$0xff]  }
0x113c   :  { %11997 = vmatprep.subr.bf16.mxu0 %v16961_v37  ;;  %12079 = vmatprep.subr.bf16.mxu1 %v16964_v19  ;;  %v17046_v37 = vld [vmem:[#allocation5 + $0x108] ss:$16 sps:$4 sm:$0xff]   ;;  %v17051_v19 = vld [vmem:[#allocation5 + $0x124] ss:$16 sps:$4 sm:$0xff]  }
0x113f   :  { %11998 = vmatpush1.bf16.msra.mxu0 %v16959_v56  ;;  %12080 = vmatpush1.bf16.msra.mxu1 %v16962_v12  ;;  %v17054_v56 = vld [vmem:[#allocation5 + $0x12c] ss:$16 sps:$4 sm:$0xff]   ;;  %v17049_v12 = vld [vmem:[#allocation5 + $0x120] ss:$16 sps:$4 sm:$0xff]  }
0x1140   :  { %11999 = vmatprep.subr.bf16.mxu0 %v16967_v3  ;;  %12081 = vmatprep.subr.bf16.mxu1 %v16970_v10  ;;  %v17052_v3 = vld [vmem:[#allocation5 + $0x128] ss:$16 sps:$4 sm:$0xff]   ;;  %v17057_v10 = vld [vmem:[#allocation5 + $0x144] ss:$16 sps:$4 sm:$0xff]  }
0x1143   :  { %12000 = vmatpush1.bf16.msra.mxu0 %v16965_v53  ;;  %12082 = vmatpush1.bf16.msra.mxu1 %v16968_v21  ;;  %v17060_v53 = vld [vmem:[#allocation5 + $0x14c] ss:$16 sps:$4 sm:$0xff]   ;;  %v17055_v21 = vld [vmem:[#allocation5 + $0x140] ss:$16 sps:$4 sm:$0xff]  }
0x1144   :  { %12001 = vmatprep.subr.bf16.mxu0 %v16973_v6  ;;  %12083 = vmatprep.subr.bf16.mxu1 %v16976_v50  ;;  %v17058_v6 = vld [vmem:[#allocation5 + $0x148] ss:$16 sps:$4 sm:$0xff]   ;;  %v17063_v50 = vld [vmem:[#allocation5 + $0x164] ss:$16 sps:$4 sm:$0xff]  }
0x1147   :  { %12002 = vmatpush1.bf16.msra.mxu0 %v16971_v55  ;;  %12084 = vmatpush1.bf16.msra.mxu1 %v16974_v34  ;;  %v17066_v55 = vld [vmem:[#allocation5 + $0x16c] ss:$16 sps:$4 sm:$0xff]   ;;  %v17061_v34 = vld [vmem:[#allocation5 + $0x160] ss:$16 sps:$4 sm:$0xff]  }
0x1148   :  { %12003 = vmatprep.subr.bf16.mxu0 %v16979_v14  ;;  %12085 = vmatprep.subr.bf16.mxu1 %v16982_v33  ;;  %v17064_v14 = vld [vmem:[#allocation5 + $0x168] ss:$16 sps:$4 sm:$0xff]   ;;  %v17069_v33 = vld [vmem:[#allocation5 + $0x184] ss:$16 sps:$4 sm:$0xff]  }
0x114b   :  { %12004 = vmatpush1.bf16.msra.mxu0 %v16977_v26  ;;  %12086 = vmatpush1.bf16.msra.mxu1 %v16980_v40  ;;  %v17072_v26 = vld [vmem:[#allocation5 + $0x18c] ss:$16 sps:$4 sm:$0xff]   ;;  %v17067_v40 = vld [vmem:[#allocation5 + $0x180] ss:$16 sps:$4 sm:$0xff]  }
0x114c   :  { %12005 = vmatprep.subr.bf16.mxu0 %v16985_v11  ;;  %12087 = vmatprep.subr.bf16.mxu1 %v16988_v4  ;;  %v17070_v11 = vld [vmem:[#allocation5 + $0x188] ss:$16 sps:$4 sm:$0xff]   ;;  %v17075_v4 = vld [vmem:[#allocation5 + $0x1a4] ss:$16 sps:$4 sm:$0xff]  }
0x114f   :  { %12006 = vmatpush1.bf16.msra.mxu0 %v16983_v28  ;;  %12088 = vmatpush1.bf16.msra.mxu1 %v16986_v62  ;;  %v17078_v28 = vld [vmem:[#allocation5 + $0x1ac] ss:$16 sps:$4 sm:$0xff]   ;;  %v17073_v62 = vld [vmem:[#allocation5 + $0x1a0] ss:$16 sps:$4 sm:$0xff]  }
0x1150   :  { %12007 = vmatprep.subr.bf16.mxu0 %v16991_v59  ;;  %12089 = vmatprep.subr.bf16.mxu1 %v16994_v29  ;;  %v17076_v59 = vld [vmem:[#allocation5 + $0x1a8] ss:$16 sps:$4 sm:$0xff]   ;;  %v17079_v29 = vld [vmem:[#allocation5 + $0x1c0] ss:$16 sps:$4 sm:$0xff]  }
0x1153   :  { %12008 = vmatpush1.bf16.msra.mxu0 %v16989_v57  ;;  %12090 = vmatpush1.bf16.msra.mxu1 %v16992_v0  ;;  %v17081_v57 = vld [vmem:[#allocation5 + $0x1c4] ss:$16 sps:$4 sm:$0xff]   ;;  %v17082_v0 = vld [vmem:[#allocation5 + $0x1c8] ss:$16 sps:$4 sm:$0xff]  }
0x1154   :  { %12898 = vmatprep.subr.bf16.mxu0 %v16997_v30  ;;  %12980 = vmatprep.subr.bf16.mxu1 %v17000_v61  ;;  %v17084_v30 = vld [vmem:[#allocation5 + $0x1cc] ss:$16 sps:$4 sm:$0xff]   ;;  %v17087_v61 = vld [vmem:[#allocation5 + $0x1e4] ss:$16 sps:$4 sm:$0xff]  }
0x1156   :  { %12010 = vmatmul.mubr.bf16.vlgmr.msra.gmra.mrb[56].mxu0 %v11144_v35  ;;  %12092 = vmatmul.mubr.bf16.vlgmr.msra.gmra.mrb[76].mxu1 %v11144_v35  ;;  %v17088_v35 = vld [vmem:[#allocation5 + $0x1e8] ss:$16 sps:$4 sm:$0xff]  }
0x1157   :  { %12899 = vmatpush1.bf16.msra.mxu0 %v16995_v1  ;;  %12981 = vmatpush1.bf16.msra.mxu1 %v16998_v15  ;;  %v17090_v1 = vld [vmem:[#allocation5 + $0x1ec] ss:$16 sps:$4 sm:$0xff]   ;;  %v17085_v15 = vld [vmem:[#allocation5 + $0x1e0] ss:$16 sps:$4 sm:$0xff]  }
0x1158   :  { %12900 = vmatprep.subr.bf16.mxu0 %v17003_v52  ;;  %12982 = vmatprep.subr.bf16.mxu1 %v17006_v58  ;;  %v17093_v52 = vld [vmem:[#allocation5 + $0x204] ss:$16 sps:$4 sm:$0xff]   ;;  %v17096_v58 = vld [vmem:[#allocation5 + $0x20c] ss:$16 sps:$4 sm:$0xff]  }
0x115b   :  { %12901 = vmatpush1.bf16.msra.mxu0 %v17001_v17  ;;  %12983 = vmatpush1.bf16.msra.mxu1 %v17004_v20  ;;  %v21461_v17 = vld [vmem:[%s21516_s20] sm:$0xf] }
0x115c   :  { %12902 = vmatprep.subr.bf16.mxu0 %v17009_v43  ;;  %12984 = vmatprep.subr.bf16.mxu1 %v17012_v36  ;;  %v11279_v20 = vrot.slane %v21461_v17, %v21747_v63  ;;  %v11283_v43 = vrot.slane %v21461_v17, %v21748_v13  ;;  %v11291_v36 = vrot.slane %v21461_v17, %v21750_v8 }
0x115f   :  { %12903 = vmatpush1.bf16.msra.mxu0 %v17007_v18  ;;  %12985 = vmatpush1.bf16.msra.mxu1 %v17010_v54 }
0x1160   :  { %12904 = vmatprep.subr.bf16.mxu0 %v17015_v7  ;;  %12986 = vmatprep.subr.bf16.mxu1 %v17018_v32 }
0x1163   :  { %12905 = vmatpush1.bf16.msra.mxu0 %v17013_v38  ;;  %12987 = vmatpush1.bf16.msra.mxu1 %v17016_v47 }
0x1164   :  { %12906 = vmatprep.subr.bf16.mxu0 %v17021_v44  ;;  %12988 = vmatprep.subr.bf16.mxu1 %v17024_v16 }
0x1167   :  { %12907 = vmatpush1.bf16.msra.mxu0 %v17019_v27  ;;  %12989 = vmatpush1.bf16.msra.mxu1 %v17022_v5 }
0x1168   :  { %12908 = vmatprep.subr.bf16.mxu0 %v17027_v60  ;;  %12990 = vmatprep.subr.bf16.mxu1 %v17030_v31 }
0x116b   :  { %12909 = vmatpush1.bf16.msra.mxu0 %v17025_v24  ;;  %12991 = vmatpush1.bf16.msra.mxu1 %v17028_v25 }
0x116c   :  { %12910 = vmatprep.subr.bf16.mxu0 %v17033_v39  ;;  %12992 = vmatprep.subr.bf16.mxu1 %v17036_v2  ;;  %v17091_v2 = vld [vmem:[#allocation5 + $0x200] ss:$16 sps:$4 sm:$0xff]  }
0x116f   :  { %12911 = vmatpush1.bf16.msra.mxu0 %v17031_v51  ;;  %12993 = vmatpush1.bf16.msra.mxu1 %v17034_v41  ;;  %v17094_v51 = vld [vmem:[#allocation5 + $0x208] ss:$16 sps:$4 sm:$0xff]  }
0x1170   :  { %12912 = vmatprep.subr.bf16.mxu0 %v17039_v49  ;;  %12994 = vmatprep.subr.bf16.mxu1 %v17042_v42  ;;  %v17099_v49 = vld [vmem:[#allocation5 + $0x224] ss:$16 sps:$4 sm:$0xff]   ;;  %v17102_v42 = vld [vmem:[#allocation5 + $0x22c] ss:$16 sps:$4 sm:$0xff]  }
0x1173   :  { %12913 = vmatpush1.bf16.msra.mxu0 %v17037_v23  ;;  %12995 = vmatpush1.bf16.msra.mxu1 %v17040_v9  ;;  %v17097_v9 = vld [vmem:[#allocation5 + $0x220] ss:$16 sps:$4 sm:$0xff]  }
0x1174   :  { %12914 = vmatprep.subr.bf16.mxu0 %v17045_v22  ;;  %12996 = vmatprep.subr.bf16.mxu1 %v17048_v45  ;;  %v17100_v22 = vld [vmem:[#allocation5 + $0x228] ss:$16 sps:$4 sm:$0xff]   ;;  %v17105_v45 = vld [vmem:[#allocation5 + $0x244] ss:$16 sps:$4 sm:$0xff]  }
0x1177   :  { %12915 = vmatpush1.bf16.msra.mxu0 %v17043_v46  ;;  %12997 = vmatpush1.bf16.msra.mxu1 %v17046_v37  ;;  %v17108_v46 = vld [vmem:[#allocation5 + $0x24c] ss:$16 sps:$4 sm:$0xff]   ;;  %v17103_v37 = vld [vmem:[#allocation5 + $0x240] ss:$16 sps:$4 sm:$0xff]  }
0x1178   :  { %12916 = vmatprep.subr.bf16.mxu0 %v17051_v19  ;;  %12998 = vmatprep.subr.bf16.mxu1 %v17054_v56  ;;  %v17106_v19 = vld [vmem:[#allocation5 + $0x248] ss:$16 sps:$4 sm:$0xff]   ;;  %v17111_v56 = vld [vmem:[#allocation5 + $0x264] ss:$16 sps:$4 sm:$0xff]  }
0x117b   :  { %12917 = vmatpush1.bf16.msra.mxu0 %v17049_v12  ;;  %12999 = vmatpush1.bf16.msra.mxu1 %v17052_v3  ;;  %v17114_v12 = vld [vmem:[#allocation5 + $0x26c] ss:$16 sps:$4 sm:$0xff]   ;;  %v17109_v3 = vld [vmem:[#allocation5 + $0x260] ss:$16 sps:$4 sm:$0xff]  }
0x117c   :  { %12918 = vmatprep.subr.bf16.mxu0 %v17057_v10  ;;  %13000 = vmatprep.subr.bf16.mxu1 %v17060_v53  ;;  %v17112_v10 = vld [vmem:[#allocation5 + $0x268] ss:$16 sps:$4 sm:$0xff]   ;;  %v17117_v53 = vld [vmem:[#allocation5 + $0x284] ss:$16 sps:$4 sm:$0xff]  }
0x117f   :  { %12919 = vmatpush1.bf16.msra.mxu0 %v17055_v21  ;;  %13001 = vmatpush1.bf16.msra.mxu1 %v17058_v6  ;;  %v17120_v21 = vld [vmem:[#allocation5 + $0x28c] ss:$16 sps:$4 sm:$0xff]   ;;  %v17115_v6 = vld [vmem:[#allocation5 + $0x280] ss:$16 sps:$4 sm:$0xff]  }
0x1180   :  { %12920 = vmatprep.subr.bf16.mxu0 %v17063_v50  ;;  %13002 = vmatprep.subr.bf16.mxu1 %v17066_v55  ;;  %v17118_v50 = vld [vmem:[#allocation5 + $0x288] ss:$16 sps:$4 sm:$0xff]   ;;  %v17123_v55 = vld [vmem:[#allocation5 + $0x2a4] ss:$16 sps:$4 sm:$0xff]  }
0x1183   :  { %12921 = vmatpush1.bf16.msra.mxu0 %v17061_v34  ;;  %13003 = vmatpush1.bf16.msra.mxu1 %v17064_v14  ;;  %v17126_v34 = vld [vmem:[#allocation5 + $0x2ac] ss:$16 sps:$4 sm:$0xff]   ;;  %v17121_v14 = vld [vmem:[#allocation5 + $0x2a0] ss:$16 sps:$4 sm:$0xff]  }
0x1184   :  { %12922 = vmatprep.subr.bf16.mxu0 %v17069_v33  ;;  %13004 = vmatprep.subr.bf16.mxu1 %v17072_v26  ;;  %v17124_v33 = vld [vmem:[#allocation5 + $0x2a8] ss:$16 sps:$4 sm:$0xff]   ;;  %v17129_v26 = vld [vmem:[#allocation5 + $0x2c4] ss:$16 sps:$4 sm:$0xff]  }
0x1187   :  { %12923 = vmatpush1.bf16.msra.mxu0 %v17067_v40  ;;  %13005 = vmatpush1.bf16.msra.mxu1 %v17070_v11  ;;  %v17132_v40 = vld [vmem:[#allocation5 + $0x2cc] ss:$16 sps:$4 sm:$0xff]   ;;  %v17127_v11 = vld [vmem:[#allocation5 + $0x2c0] ss:$16 sps:$4 sm:$0xff]  }
0x1188   :  { %12924 = vmatprep.subr.bf16.mxu0 %v17075_v4  ;;  %13006 = vmatprep.subr.bf16.mxu1 %v17078_v28  ;;  %v17130_v4 = vld [vmem:[#allocation5 + $0x2c8] ss:$16 sps:$4 sm:$0xff]   ;;  %v17135_v28 = vld [vmem:[#allocation5 + $0x2e4] ss:$16 sps:$4 sm:$0xff]  }
0x118b   :  { %12925 = vmatpush1.bf16.msra.mxu0 %v17073_v62  ;;  %13007 = vmatpush1.bf16.msra.mxu1 %v17076_v59  ;;  %v17138_v62 = vld [vmem:[#allocation5 + $0x2ec] ss:$16 sps:$4 sm:$0xff]   ;;  %v17133_v59 = vld [vmem:[#allocation5 + $0x2e0] ss:$16 sps:$4 sm:$0xff]  }
0x118c   :  { %12926 = vmatprep.subr.bf16.mxu0 %v17081_v57  ;;  %13008 = vmatprep.subr.bf16.mxu1 %v17084_v30  ;;  %v17141_v57 = vld [vmem:[#allocation5 + $0x304] ss:$16 sps:$4 sm:$0xff]   ;;  %v17139_v30 = vld [vmem:[#allocation5 + $0x300] ss:$16 sps:$4 sm:$0xff]  }
0x118f   :  { %12927 = vmatpush1.bf16.msra.mxu0 %v17079_v29  ;;  %13009 = vmatpush1.bf16.msra.mxu1 %v17082_v0  ;;  %v17136_v29 = vld [vmem:[#allocation5 + $0x2e8] ss:$16 sps:$4 sm:$0xff]   ;;  %v17144_v0 = vld [vmem:[#allocation5 + $0x30c] ss:$16 sps:$4 sm:$0xff]  }
0x1190   :  { %12928 = vmatprep.subr.bf16.mxu0 %v17087_v61  ;;  %13010 = vmatprep.subr.bf16.mxu1 %v17090_v1  ;;  %v17142_v61 = vld [vmem:[#allocation5 + $0x308] ss:$16 sps:$4 sm:$0xff]   ;;  %v17147_v1 = vld [vmem:[#allocation5 + $0x324] ss:$16 sps:$4 sm:$0xff]  }
0x1193   :  { %12929 = vmatpush1.bf16.msra.mxu0 %v17085_v15  ;;  %13011 = vmatpush1.bf16.msra.mxu1 %v17088_v35  ;;  %v17150_v15 = vld [vmem:[#allocation5 + $0x32c] ss:$16 sps:$4 sm:$0xff]   ;;  %v17145_v35 = vld [vmem:[#allocation5 + $0x320] ss:$16 sps:$4 sm:$0xff]  }
0x1194   :  { %12939 = vmatprep.subr.bf16.mxu0 %v17093_v52  ;;  %13021 = vmatprep.subr.bf16.mxu1 %v17096_v58  ;;  %v17148_v52 = vld [vmem:[#allocation5 + $0x328] ss:$16 sps:$4 sm:$0xff]   ;;  %v17153_v58 = vld [vmem:[#allocation5 + $0x344] ss:$16 sps:$4 sm:$0xff]  }
0x1229   :  { %v12011_v18 = vpop.f32.mrb[56].mxu0  ;;  %v21469_v54 = vpop.f32.mrb[76].mxu1 }
0x122a   :  { %v15751_v7 = vadd.f32 %v12011_v18, %v11279_v20  ;;  %v12013_v32 = vpop.f32.mrb[57].mxu0  ;;  %v12095_v38 = vpop.f32.mrb[77].mxu1  ;;  %v17156_v20 = vld [vmem:[#allocation5 + $0x34c] ss:$16 sps:$4 sm:$0xff]   ;;  %v17159_v18 = vld [vmem:[#allocation5 + $0x364] ss:$16 sps:$4 sm:$0xff]  }
0x122b   :  { %v15752_v47 = vadd.f32 %v12013_v32, %v11283_v43  ;;  %v15754_v44 = vadd.f32 %v12095_v38, %v11291_v36  ;;  %v12015_v16 = vpop.f32.mrb[58].mxu0  ;;  %v12097_v27 = vpop.f32.mrb[78].mxu1  ;;  %v17151_v43 = vld [vmem:[#allocation5 + $0x340] ss:$16 sps:$4 sm:$0xff]   ;;  %v17154_v36 = vld [vmem:[#allocation5 + $0x348] ss:$16 sps:$4 sm:$0xff]  }
0x122c   :  { %v12100_v5 = vmax.f32 %v15751_v7, 0.0  ;;  %v12016_v60 = vpop.f32.mrb[59].mxu0  ;;  %v12098_v31 = vpop.f32.mrb[79].mxu1  ;;  %v17162_v7 = vld [vmem:[#allocation5 + $0x36c] ss:$16 sps:$4 sm:$0xff]  }
0x122d   :  { %v12101_v24 = vmax.f32 %v15752_v47, 0.0  ;;  %v12103_v25 = vmax.f32 %v15754_v44, 0.0  ;;  %v17157_v32 = vld [vmem:[#allocation5 + $0x360] ss:$16 sps:$4 sm:$0xff]   ;;  %v17160_v38 = vld [vmem:[#allocation5 + $0x368] ss:$16 sps:$4 sm:$0xff]  }
0x122e   :  { %v12104_v41 = vpack.c.bf16 %v12100_v5, %v12100_v5  ;;  %v17165_v47 = vld [vmem:[#allocation5 + $0x384] ss:$16 sps:$4 sm:$0xff]   ;;  %v17168_v44 = vld [vmem:[#allocation5 + $0x38c] ss:$16 sps:$4 sm:$0xff]   ;;  %v17163_v16 = vld [vmem:[#allocation5 + $0x380] ss:$16 sps:$4 sm:$0xff]  }
0x122f   :  { %v12105_v39 = vpack.c.bf16 %v12101_v24, %v12101_v24  ;;  %v12107_v23 = vpack.c.bf16 %v12103_v25, %v12103_v25  ;;  %v17166_v27 = vld [vmem:[#allocation5 + $0x388] ss:$16 sps:$4 sm:$0xff]   ;;  %v17171_v5 = vld [vmem:[#allocation5 + $0x3a4] ss:$16 sps:$4 sm:$0xff]   ;;  %v17174_v60 = vld [vmem:[#allocation5 + $0x3ac] ss:$16 sps:$4 sm:$0xff]   ;;  %v11287_v25 = vrot.slane %v21461_v17, %v21749_v48 }
0x1230   :  { %v17169_v31 = vld [vmem:[#allocation5 + $0x3a0] ss:$16 sps:$4 sm:$0xff]   ;;  %v17172_v24 = vld [vmem:[#allocation5 + $0x3a8] ss:$16 sps:$4 sm:$0xff]  }
0x1231   :  { %12930 = vmatprep.mubr.bf16.mxu0 %v12105_v39  ;;  %13012 = vmatprep.mubr.bf16.mxu1 %v12105_v39  ;;  %v17177_v39 = vld [vmem:[#allocation5 + $0x3c4] ss:$16 sps:$4 sm:$0xff]  }
0x1232   :  { %12931 = vmatmul.mubr.bf16.vlgmr.msra.gmra.mrb[60].mxu0 %v12104_v41  ;;  %13013 = vmatmul.mubr.bf16.vlgmr.msra.gmra.mrb[80].mxu1 %v12104_v41  ;;  %v17178_v41 = vld [vmem:[#allocation5 + $0x3c8] ss:$16 sps:$4 sm:$0xff]   ;;  %v17187_v17 = vld [vmem:[#allocation7 + $0x40] sm:$0xff]  }
0x1233   :  { %12940 = vmatpush1.bf16.msra.mxu0 %v17091_v2  ;;  %13022 = vmatpush1.bf16.msra.mxu1 %v17094_v51  ;;  %v17180_v2 = vld [vmem:[#allocation5 + $0x3cc] ss:$16 sps:$4 sm:$0xff]   ;;  %v17175_v51 = vld [vmem:[#allocation5 + $0x3c0] ss:$16 sps:$4 sm:$0xff]  }
0x1234   :  { %12971 = vmatprep.mubr.bf16.mxu0 %v12107_v23  ;;  %13053 = vmatprep.mubr.bf16.mxu1 %v12107_v23  ;;  %v17186_v23 = vld [vmem:[#allocation5 + $0x3ec] ss:$16 sps:$4 sm:$0xff]  }
0x1235   :  { %12941 = vmatprep.subr.bf16.mxu0 %v17099_v49  ;;  %13023 = vmatprep.subr.bf16.mxu1 %v17102_v42  ;;  %v15753_v49 = vadd.f32 %v21469_v54, %v11287_v25  ;;  %v17183_v42 = vld [vmem:[#allocation5 + $0x3e4] ss:$16 sps:$4 sm:$0xff]   ;;  %v17191_v54 = vld [vmem:[#allocation7 + $0x48] sm:$0xff]  }
0x1237   :  { %12942 = vmatpush1.bf16.msra.mxu0 %v17097_v9  ;;  %13024 = vmatpush1.bf16.msra.mxu1 %v17100_v22  ;;  %v17181_v9 = vld [vmem:[#allocation5 + $0x3e0] ss:$16 sps:$4 sm:$0xff]   ;;  %v17184_v22 = vld [vmem:[#allocation5 + $0x3e8] ss:$16 sps:$4 sm:$0xff]  }
0x1238   :  { %12943 = vmatprep.subr.bf16.mxu0 %v17105_v45  ;;  %13025 = vmatprep.subr.bf16.mxu1 %v17108_v46  ;;  %v12102_v45 = vmax.f32 %v15753_v49, 0.0  ;;  %v17188_v46 = vld [vmem:[#allocation7 + $0xc0] sm:$0xff]  }
0x123b   :  { %12944 = vmatpush1.bf16.msra.mxu0 %v17103_v37  ;;  %13026 = vmatpush1.bf16.msra.mxu1 %v17106_v19  ;;  %v17189_v37 = vld [vmem:[#allocation7] sm:$0xff]  }
0x123c   :  { %12945 = vmatprep.subr.bf16.mxu0 %v17111_v56  ;;  %13027 = vmatprep.subr.bf16.mxu1 %v17114_v12  ;;  %v17190_v19 = vld [vmem:[#allocation7 + $0x80] sm:$0xff]   ;;  %v12106_v56 = vpack.c.bf16 %v12102_v45, %v12102_v45  ;;  %v17192_v12 = vld [vmem:[#allocation7 + $0xc8] sm:$0xff]  }
0x123f   :  { %12946 = vmatpush1.bf16.msra.mxu0 %v17109_v3  ;;  %13028 = vmatpush1.bf16.msra.mxu1 %v17112_v10  ;;  %v17193_v3 = vld [vmem:[#allocation7 + $0x8] sm:$0xff]  }
0x1240   :  { %12947 = vmatprep.subr.bf16.mxu0 %v17117_v53  ;;  %13029 = vmatprep.subr.bf16.mxu1 %v17120_v21  ;;  %v17194_v10 = vld [vmem:[#allocation7 + $0x88] sm:$0xff]   ;;  %v17195_v53 = vld [vmem:[#allocation7 + $0x50] sm:$0xff]  }
0x1241   :  { %v17196_v21 = vld [vmem:[#allocation7 + $0xd0] sm:$0xff]  }
0x1243   :  { %12948 = vmatpush1.bf16.msra.mxu0 %v17115_v6  ;;  %13030 = vmatpush1.bf16.msra.mxu1 %v17118_v50  ;;  %v17197_v6 = vld [vmem:[#allocation7 + $0x10] sm:$0xff]  }
0x1244   :  { %12949 = vmatprep.subr.bf16.mxu0 %v17123_v55  ;;  %13031 = vmatprep.subr.bf16.mxu1 %v17126_v34  ;;  %v17198_v50 = vld [vmem:[#allocation7 + $0x90] sm:$0xff]   ;;  %v17199_v55 = vld [vmem:[#allocation7 + $0x58] sm:$0xff]  }
0x1245   :  { %v17200_v34 = vld [vmem:[#allocation7 + $0xd8] sm:$0xff]  }
0x1247   :  { %12950 = vmatpush1.bf16.msra.mxu0 %v17121_v14  ;;  %13032 = vmatpush1.bf16.msra.mxu1 %v17124_v33  ;;  %v17201_v14 = vld [vmem:[#allocation7 + $0x18] sm:$0xff]  }
0x1248   :  { %12951 = vmatprep.subr.bf16.mxu0 %v17129_v26  ;;  %13033 = vmatprep.subr.bf16.mxu1 %v17132_v40  ;;  %v17202_v33 = vld [vmem:[#allocation7 + $0x98] sm:$0xff]   ;;  %v17203_v26 = vld [vmem:[#allocation7 + $0x60] sm:$0xff]  }
0x1249   :  { %v17204_v40 = vld [vmem:[#allocation7 + $0xe0] sm:$0xff]  }
0x124b   :  { %12952 = vmatpush1.bf16.msra.mxu0 %v17127_v11  ;;  %13034 = vmatpush1.bf16.msra.mxu1 %v17130_v4  ;;  %v17205_v11 = vld [vmem:[#allocation7 + $0x20] sm:$0xff]  }
0x124c   :  { %12953 = vmatprep.subr.bf16.mxu0 %v17135_v28  ;;  %13035 = vmatprep.subr.bf16.mxu1 %v17138_v62  ;;  %v17206_v4 = vld [vmem:[#allocation7 + $0xa0] sm:$0xff]   ;;  %v17207_v28 = vld [vmem:[#allocation7 + $0x68] sm:$0xff]  }
0x124d   :  { %v17208_v62 = vld [vmem:[#allocation7 + $0xe8] sm:$0xff]  }
0x124f   :  { %12954 = vmatpush1.bf16.msra.mxu0 %v17133_v59  ;;  %13036 = vmatpush1.bf16.msra.mxu1 %v17136_v29  ;;  %v17209_v59 = vld [vmem:[#allocation7 + $0x28] sm:$0xff]  }
0x1250   :  { %12955 = vmatprep.subr.bf16.mxu0 %v17141_v57  ;;  %13037 = vmatprep.subr.bf16.mxu1 %v17144_v0  ;;  %v17210_v29 = vld [vmem:[#allocation7 + $0xa8] sm:$0xff]   ;;  %v17211_v57 = vld [vmem:[#allocation7 + $0x70] sm:$0xff]  }
0x1251   :  { %v17212_v0 = vld [vmem:[#allocation7 + $0xf0] sm:$0xff]  }
0x1253   :  { %12956 = vmatpush1.bf16.msra.mxu0 %v17139_v30  ;;  %13038 = vmatpush1.bf16.msra.mxu1 %v17142_v61  ;;  %v17213_v30 = vld [vmem:[#allocation7 + $0x30] sm:$0xff]  }
0x1254   :  { %12957 = vmatprep.subr.bf16.mxu0 %v17147_v1  ;;  %13039 = vmatprep.subr.bf16.mxu1 %v17150_v15  ;;  %v17214_v61 = vld [vmem:[#allocation7 + $0xb0] sm:$0xff]   ;;  %v17215_v1 = vld [vmem:[#allocation7 + $0x78] sm:$0xff]  }
0x1255   :  { %v17216_v15 = vld [vmem:[#allocation7 + $0xf8] sm:$0xff]  }
0x1257   :  { %12958 = vmatpush1.bf16.msra.mxu0 %v17145_v35  ;;  %13040 = vmatpush1.bf16.msra.mxu1 %v17148_v52  ;;  %v17217_v35 = vld [vmem:[#allocation7 + $0x38] sm:$0xff]  }
0x1258   :  { %12959 = vmatprep.subr.bf16.mxu0 %v17153_v58  ;;  %13041 = vmatprep.subr.bf16.mxu1 %v17156_v20  ;;  %v17218_v52 = vld [vmem:[#allocation7 + $0xb8] sm:$0xff]   ;;  %v12236_v58 = vld [vmem:[%s21518_s22] sm:$0xf] }
0x1259   :  { %v12241_v20 = vrot.slane %v12236_v58, %v21747_v63 }
0x125b   :  { %12960 = vmatpush1.bf16.msra.mxu0 %v17151_v43  ;;  %13042 = vmatpush1.bf16.msra.mxu1 %v17154_v36  ;;  %v12249_v43 = vrot.slane %v12236_v58, %v21749_v48  ;;  %v12245_v36 = vrot.slane %v12236_v58, %v21748_v13 }
0x125c   :  { %12961 = vmatprep.subr.bf16.mxu0 %v17159_v18  ;;  %13043 = vmatprep.subr.bf16.mxu1 %v17162_v7  ;;  %v12253_v18 = vrot.slane %v12236_v58, %v21750_v8 }
0x125f   :  { %12962 = vmatpush1.bf16.msra.mxu0 %v17157_v32  ;;  %13044 = vmatpush1.bf16.msra.mxu1 %v17160_v38 }
0x1260   :  { %12963 = vmatprep.subr.bf16.mxu0 %v17165_v47  ;;  %13045 = vmatprep.subr.bf16.mxu1 %v17168_v44 }
0x1263   :  { %12964 = vmatpush1.bf16.msra.mxu0 %v17163_v16  ;;  %13046 = vmatpush1.bf16.msra.mxu1 %v17166_v27 }
0x1264   :  { %12965 = vmatprep.subr.bf16.mxu0 %v17171_v5  ;;  %13047 = vmatprep.subr.bf16.mxu1 %v17174_v60 }
0x1267   :  { %12966 = vmatpush1.bf16.msra.mxu0 %v17169_v31  ;;  %13048 = vmatpush1.bf16.msra.mxu1 %v17172_v24 }
0x1268   :  { %12967 = vmatprep.subr.bf16.mxu0 %v17177_v39  ;;  %13049 = vmatprep.subr.bf16.mxu1 %v17180_v2 }
0x126b   :  { %12968 = vmatpush1.bf16.msra.mxu0 %v17175_v51  ;;  %13050 = vmatpush1.bf16.msra.mxu1 %v17178_v41 }
0x126c   :  { %12969 = vmatprep.subr.bf16.mxu0 %v17183_v42  ;;  %13051 = vmatprep.subr.bf16.mxu1 %v17186_v23  ;;  %v14398_v23 = vld [vmem:[%s21520_s24] ss:$0 sm:$0xff] }
0x126f   :  { %12970 = vmatpush1.bf16.msra.mxu0 %v17181_v9  ;;  %13052 = vmatpush1.bf16.msra.mxu1 %v17184_v22 }
0x1270   :  { %15105 = vmatprep.subr.bf16.mxu0 %v17187_v17  ;;  %15127 = vmatprep.subr.bf16.mxu1 %v17188_v46 }
0x1272   :  { %12972 = vmatmul.mubr.bf16.vlgmr.msra.gmra.mrb[60].mxu0 %v12106_v56  ;;  %13054 = vmatmul.mubr.bf16.vlgmr.msra.gmra.mrb[80].mxu1 %v12106_v56 }
0x1273   :  { %15106 = vmatpush3.bf16.msra.mxu0 %v17189_v37  ;;  %15128 = vmatpush3.bf16.msra.mxu1 %v17190_v19 }
0x1274   :  { %15107 = vmatprep.subr.bf16.mxu0 %v17191_v54  ;;  %15129 = vmatprep.subr.bf16.mxu1 %v17192_v12 }
0x1277   :  { %15108 = vmatpush3.bf16.msra.mxu0 %v17193_v3  ;;  %15130 = vmatpush3.bf16.msra.mxu1 %v17194_v10 }
0x1278   :  { %15109 = vmatprep.subr.bf16.mxu0 %v17195_v53  ;;  %15131 = vmatprep.subr.bf16.mxu1 %v17196_v21 }
0x127b   :  { %15110 = vmatpush3.bf16.msra.mxu0 %v17197_v6  ;;  %15132 = vmatpush3.bf16.msra.mxu1 %v17198_v50 }
0x127c   :  { %15111 = vmatprep.subr.bf16.mxu0 %v17199_v55  ;;  %15133 = vmatprep.subr.bf16.mxu1 %v17200_v34 }
0x127f   :  { %15112 = vmatpush3.bf16.msra.mxu0 %v17201_v14  ;;  %15134 = vmatpush3.bf16.msra.mxu1 %v17202_v33 }
0x1280   :  { %15113 = vmatprep.subr.bf16.mxu0 %v17203_v26  ;;  %15135 = vmatprep.subr.bf16.mxu1 %v17204_v40 }
0x1283   :  { %15114 = vmatpush3.bf16.msra.mxu0 %v17205_v11  ;;  %15136 = vmatpush3.bf16.msra.mxu1 %v17206_v4 }
0x1284   :  { %15115 = vmatprep.subr.bf16.mxu0 %v17207_v28  ;;  %15137 = vmatprep.subr.bf16.mxu1 %v17208_v62 }
0x1287   :  { %15116 = vmatpush3.bf16.msra.mxu0 %v17209_v59  ;;  %15138 = vmatpush3.bf16.msra.mxu1 %v17210_v29 }
0x1288   :  { %15117 = vmatprep.subr.bf16.mxu0 %v17211_v57  ;;  %15139 = vmatprep.subr.bf16.mxu1 %v17212_v0 }
0x128b   :  { %15118 = vmatpush3.bf16.msra.mxu0 %v17213_v30  ;;  %15140 = vmatpush3.bf16.msra.mxu1 %v17214_v61 }
0x128c   :  { %15119 = vmatprep.subr.bf16.mxu0 %v17215_v1  ;;  %15141 = vmatprep.subr.bf16.mxu1 %v17216_v15 }
0x128f   :  { %15120 = vmatpush3.bf16.msra.mxu0 %v17217_v35  ;;  %15142 = vmatpush3.bf16.msra.mxu1 %v17218_v52 }
0x1345   :  { %v12973_v7 = vpop.f32.mrb[60].mxu0  ;;  %v13055_v32 = vpop.f32.mrb[80].mxu1 }
0x1346   :  { %v15755_v38 = vadd.f32 %v12973_v7, %v12241_v20  ;;  %v15757_v47 = vadd.f32 %v13055_v32, %v12249_v43  ;;  %v12975_v44 = vpop.f32.mrb[61].mxu0  ;;  %v13057_v16 = vpop.f32.mrb[81].mxu1 }
0x1347   :  { %v15756_v27 = vadd.f32 %v12975_v44, %v12245_v36  ;;  %v15758_v5 = vadd.f32 %v13057_v16, %v12253_v18  ;;  %v12977_v60 = vpop.f32.mrb[62].mxu0  ;;  %v13059_v31 = vpop.f32.mrb[82].mxu1 }
0x1348   :  { %v13062_v24 = vmax.f32 %v15755_v38, 0.0  ;;  %v13064_v25 = vmax.f32 %v15757_v47, 0.0  ;;  %v12978_v39 = vpop.f32.mrb[63].mxu0  ;;  %v13060_v63 = vpop.f32.mrb[83].mxu1 }
0x1349   :  { %v13063_v2 = vmax.f32 %v15756_v27, 0.0  ;;  %v13065_v48 = vmax.f32 %v15758_v5, 0.0 }
0x134a   :  { %v13066_v41 = vpack.c.bf16 %v13062_v24, %v13062_v24  ;;  %v13068_v8 = vpack.c.bf16 %v13064_v25, %v13064_v25 }
0x134b   :  { %v13067_v51 = vpack.c.bf16 %v13063_v2, %v13063_v2  ;;  %v13069_v13 = vpack.c.bf16 %v13065_v48, %v13065_v48 }
0x134d   :  { %13365 = vmatprep.mubr.bf16.mxu0 %v13067_v51  ;;  %13405 = vmatprep.mubr.bf16.mxu1 %v13069_v13 }
0x134e   :  { %13366 = vmatmul.mubr.bf16.vlgmr.msra.gmra.mrb[64].mxu0 %v13066_v41  ;;  %13406 = vmatmul.mubr.bf16.vlgmr.msra.gmra.mrb[84].mxu1 %v13068_v8 }
0x1421   :  { %v15121_v49 = vpop.f32.mrb[64].mxu0  ;;  %v15143_v42 = vpop.f32.mrb[84].mxu1 }
0x1422   :  { %v15122_v9 = vpop.f32.mrb[65].mxu0  ;;  %v15144_v22 = vpop.f32.mrb[85].mxu1 }
0x1423   :  { %v15123_v45 = vadd.f32 %v15122_v9, %v15121_v49  ;;  %v15145_v17 = vadd.f32 %v15144_v22, %v15143_v42  ;;  %v15124_v46 = vpop.f32.mrb[66].mxu0  ;;  %v15146_v37 = vpop.f32.mrb[86].mxu1 }
0x1424   :  { %v15125_v19 = vpop.f32.mrb[67].mxu0  ;;  %v15147_v56 = vpop.f32.mrb[87].mxu1 }
0x1425   :  { %v13368_v54 = vadd.f32 %v15123_v45, %v14398_v23 }
0x1427   :  { %v13408_v12 = vadd.f32 %v15145_v17, %v13368_v54 }
0x1429   :  { %13413 = vst [vmem:[#allocation8] sm:$0xf] %v13408_v12 }
0x142a   :  { %17302 = shalt.err (!%p17299_p0)
}
0x142b   :  { %s17303_s9 = scalar_lea.hbm %s21521_s25, 64 }
0x142c   :  { %p17304_p1 = scmp.ne.s32.totalorder %s21521_s25, %s17303_s9  ;;  %p17307_p2 = scmp.lt.u32.totalorder %s17303_s9, %s21521_s25 }
0x142e   :  { %p17309_p3 = pnand %p17307_p2, %p17304_p1 }
0x1430   :  { %17312 = shalt.err (!%p17309_p3)
}
0x1431   :  { %13423 = dma.vmem_to_hbm [thread:$0]  %s13421_s13, 64, %s21521_s25, [#allocation4]  }
0x1432   :  { %17317 = dma.done.wait [#allocation4], 64  }
0x1433   :  { %17318 = vsyncadd [#allocation4], 4294967232 }
0x1434   :  { %13427 = vsyncpa [#allocation3], 1 }
0x1435   :  { %13428 = vsyncpa [#allocation6], 1 }
0x1436   :  { %13429 = vsyncpa [#allocation4], 1 }

</bundles_post_ra>
